<compile_context>
chip_gen: v7x
topology: tpu7x:2x2x1
jax: 0.10.0
libtpu: 0.0.40
codegen_flags: <defaults>
</compile_context>

<pallas_src>
import jax
import jax.numpy as jnp
import numpy as np
from jax import lax
from jax.experimental import pallas as pl
from jax.experimental.pallas import tpu as pltpu

# ---------------------------------------------------------------------------
# Static geometry (the module needs 3x32x32 inputs so conv3 sees a 5x5 map).
# ---------------------------------------------------------------------------
CPAD = 128                    # lane-dense padded channel width
KK = 5                        # all three convs are 5x5, stride 1, valid
C_IN = 3

H1 = W1 = 32                  # input spatial
HO1 = WO1 = 28                # conv1 output
HP1 = WP1 = 14                # after 2x2 pool
W2 = WP1                      # layer-2 input map width (14)
HO2 = WO2 = 10                # conv2 output
HP2 = WP2 = 5                 # after 2x2 pool (conv3 consumes the whole map)

K1 = KK * KK * C_IN           # 75  im2col depth of the 3-channel stem
M1 = HO1 * WO1                # 784 conv1 rows (r = h*28 + w)
M2 = HO2 * W2                 # 140 conv2 rows computed at full map width 14
PAD2 = 2 * W2                 # 28  tail rows so shifted conv2 reads stay in bounds
A1_ROWS = HP1 * WP1 + PAD2    # 224 pooled layer-1 map rows (r = h*14 + w) + pad


def _pool_select(wp, w):
    """0/1 matrices picking even / odd columns of a width-`w` conv row."""
    p_idx = lax.broadcasted_iota(jnp.int32, (wp, w), 0)
    w_idx = lax.broadcasted_iota(jnp.int32, (wp, w), 1)
    sel_e = (w_idx == 2 * p_idx).astype(jnp.float32)
    sel_o = (w_idx == 2 * p_idx + 1).astype(jnp.float32)
    return sel_e, sel_o


# ---------------------------------------------------------------------------
# Fully fused kernel: conv1+ReLU+pool -> conv2+ReLU+pool -> conv3+sigmoid.
# ---------------------------------------------------------------------------
def _cnn_kernel(xcol_ref, w1_ref, b1_ref, w2_ref, b2_ref, w3_ref, b3_ref,
                o_ref, y1_scr, a1_scr, y2_scr, p2_scr):
    # ---- conv1: one MXU matmul over im2col columns (K = 75 padded to 128) ----
    y1_scr[...] = jnp.dot(xcol_ref[...], w1_ref[...],
                          preferred_element_type=jnp.float32)

    # ---- bias + ReLU + 2x2 max-pool: 28x28 -> 14x14 (into VMEM a1_scr) ----
    sel_e1, sel_o1 = _pool_select(WP1, WO1)                  # (14, 28)
    b1 = b1_ref[...]
    # Tail rows of a1 feed only discarded conv2 columns but must stay finite.
    a1_scr[pl.ds(HP1 * WP1, PAD2), :] = jnp.zeros((PAD2, CPAD), jnp.float32)
    for ph in range(HP1):
        r0 = y1_scr[pl.ds((2 * ph) * WO1, WO1), :]           # conv row 2*ph
        r1 = y1_scr[pl.ds((2 * ph + 1) * WO1, WO1), :]       # conv row 2*ph+1
        v = jnp.maximum(r0, r1)                              # vertical 2x max
        pooled = jnp.maximum(                                # horizontal 2x max
            jnp.dot(sel_e1, v, preferred_element_type=jnp.float32),
            jnp.dot(sel_o1, v, preferred_element_type=jnp.float32))
        # bias + ReLU commute with max-pool: apply once on the pooled tile.
        a1_scr[pl.ds(ph * WP1, WP1), :] = jnp.maximum(pooled + b1, 0.0)

    # ---- conv2: 25 shifted matmuls on the resident map (K = 128, lane-dense) ----
    # Row convention r = h*14 + w, so tap (i, j) is a constant shift i*14 + j.
    y2_scr[...] = jnp.zeros((M2, CPAD), jnp.float32)
    for i in range(KK):
        for j in range(KK):
            xs = a1_scr[pl.ds(i * W2 + j, M2), :]            # (140, 128)
            y2_scr[...] += jnp.dot(xs, w2_ref[i * KK + j],
                                   preferred_element_type=jnp.float32)

    # ---- bias + ReLU + 2x2 max-pool: 10x10 -> 5x5 (rows are width-14) ----
    sel_e2, sel_o2 = _pool_select(WP2, W2)                   # (5, 14), cols 0..9
    b2 = b2_ref[...]
    for ph in range(HP2):
        r0 = y2_scr[pl.ds((2 * ph) * W2, W2), :]
        r1 = y2_scr[pl.ds((2 * ph + 1) * W2, W2), :]
        v = jnp.maximum(r0, r1)
        pooled = jnp.maximum(
            jnp.dot(sel_e2, v, preferred_element_type=jnp.float32),
            jnp.dot(sel_o2, v, preferred_element_type=jnp.float32))
        p2_scr[pl.ds(ph * WP2, WP2), :] = jnp.maximum(pooled + b2, 0.0)

    # ---- conv3 (5x5 over the whole 5x5 map) + bias + sigmoid: VPU reduction ----
    s = jnp.sum(p2_scr[...] * w3_ref[...], axis=1, keepdims=True)   # (25, 1)
    s = jnp.sum(s, axis=0, keepdims=True)                           # (1, 1)
    val = jax.nn.sigmoid(s + b3_ref[...])                           # (1, 128)
    o_ref[...] = jnp.broadcast_to(val, o_ref.shape)                 # lane-dense store


# ---------------------------------------------------------------------------
# pallas_call wrapper (grid over batch; weights resident in VMEM).
# ---------------------------------------------------------------------------
def _cnn_pallas(xcol, w1m, b1m, w2m, b2m, w3m, b3m):
    n = xcol.shape[0]
    return pl.pallas_call(
        _cnn_kernel,
        out_shape=jax.ShapeDtypeStruct((n, 8, CPAD), jnp.float32),
        grid=(n,),
        in_specs=[
            pl.BlockSpec((None, M1, CPAD), lambda b: (b, 0, 0)),      # im2col stem
            pl.BlockSpec((CPAD, CPAD), lambda b: (0, 0)),             # conv1 weight
            pl.BlockSpec((1, CPAD), lambda b: (0, 0)),                # conv1 bias
            pl.BlockSpec((KK * KK, CPAD, CPAD), lambda b: (0, 0, 0)),  # conv2 taps
            pl.BlockSpec((1, CPAD), lambda b: (0, 0)),                # conv2 bias
            pl.BlockSpec((KK * KK, CPAD), lambda b: (0, 0)),          # conv3 weight
            pl.BlockSpec((1, CPAD), lambda b: (0, 0)),                # conv3 bias
        ],
        out_specs=pl.BlockSpec((None, 8, CPAD), lambda b: (b, 0, 0)),
        scratch_shapes=[
            pltpu.VMEM((M1, CPAD), jnp.float32),        # conv1 rows (784, 128)
            pltpu.VMEM((A1_ROWS, CPAD), jnp.float32),   # pooled layer-1 map
            pltpu.VMEM((M2, CPAD), jnp.float32),        # conv2 rows (140, 128)
            pltpu.VMEM((HP2 * WP2, CPAD), jnp.float32),  # pooled layer-2 map
        ],
        compiler_params=pltpu.CompilerParams(dimension_semantics=("parallel",)),
    )(xcol, w1m, b1m, w2m, b2m, w3m, b3m)


# ---------------------------------------------------------------------------
# Parameter prep (done once, outside the forward) and the forward pass.
# ---------------------------------------------------------------------------
def prepare_params(params):
    w1, b1, w2, b2, w3, b3 = params

    # conv1 as an im2col matmul weight: (75, 6) in (i, j, c) column order.
    w1m = jnp.transpose(w1, (2, 3, 1, 0)).reshape(K1, w1.shape[0])
    w1m = jnp.pad(w1m, ((0, CPAD - K1), (0, CPAD - w1.shape[0]))).astype(jnp.float32)

    # conv2 as 25 taps of (Cin, Cout), channel axes padded to 128.
    w2m = jnp.transpose(w2, (2, 3, 1, 0)).reshape(KK * KK, w2.shape[1], w2.shape[0])
    w2m = jnp.pad(w2m, ((0, 0), (0, CPAD - w2.shape[1]),
                        (0, CPAD - w2.shape[0]))).astype(jnp.float32)

    # conv3 (single output channel) as a (25, Cin) contraction weight.
    w3m = jnp.transpose(w3[0], (1, 2, 0)).reshape(KK * KK, w3.shape[1])
    w3m = jnp.pad(w3m, ((0, 0), (0, CPAD - w3.shape[1]))).astype(jnp.float32)

    def bias_row(b):
        return jnp.pad(b, (0, CPAD - b.shape[0])).reshape(1, CPAD).astype(jnp.float32)

    b3m = jnp.full((1, CPAD), b3[0], jnp.float32)
    return (w1m, bias_row(b1), w2m, bias_row(b2), w3m, b3m)


@jax.jit
def cnn_forward(x, prepared):
    w1m, b1m, w2m, b2m, w3m, b3m = prepared
    n, c, h, w = x.shape
    assert (c, h, w) == (C_IN, H1, W1), "kernel is specialized for 3x32x32 inputs"
    # One-time entry glue: NCHW -> NHWC and im2col of the tiny 3-channel stem.
    # Column order = (i, j, c), matching w1m rows.
    x_nhwc = jnp.transpose(x, (0, 2, 3, 1)).astype(jnp.float32)
    cols = [x_nhwc[:, i:i + HO1, j:j + WO1, :] for i in range(KK) for j in range(KK)]
    xcol = jnp.concatenate(cols, axis=-1).reshape(n, M1, K1)
    xcol = jnp.pad(xcol, ((0, 0), (0, 0), (0, CPAD - K1)))            # (n, 784, 128)
    a = _cnn_pallas(xcol, w1m, b1m, w2m, b2m, w3m, b3m)               # (n, 8, 128)
    return a[:, 0, 0]                                                 # (n,)


# ---------------------------------------------------------------------------
# Init (PyTorch Conv2d default style) + pure-JAX reference + test harness.
# ---------------------------------------------------------------------------
def init_params(key):
    ks = jax.random.split(key, 6)

    def conv_init(kw_key, kb_key, cout, cin, k):
        fan_in = cin * k * k
        bound = 1.0 / np.sqrt(fan_in)
        w = jax.random.uniform(kw_key, (cout, cin, k, k), jnp.float32, -bound, bound)
        b = jax.random.uniform(kb_key, (cout,), jnp.float32, -bound, bound)
        return w, b

    w1, b1 = conv_init(ks[0], ks[1], 6, 3, 5)
    w2, b2 = conv_init(ks[2], ks[3], 16, 6, 5)
    w3, b3 = conv_init(ks[4], ks[5], 1, 16, 5)
    return (w1, b1, w2, b2, w3, b3)


def cnn_forward_ref(x, params):
    w1, b1, w2, b2, w3, b3 = params

    def conv(x, w, b):
        y = jax.lax.conv_general_dilated(
            x, w, window_strides=(1, 1), padding="VALID",
            dimension_numbers=("NCHW", "OIHW", "NCHW"))
        return y + b.reshape(1, -1, 1, 1)

    def pool(x):
        return jax.lax.reduce_window(
            x, -jnp.inf, jax.lax.max,
            window_dimensions=(1, 1, 2, 2), window_strides=(1, 1, 2, 2),
            padding="VALID")

    y = pool(jax.nn.relu(conv(x, w1, b1)))
    y = pool(jax.nn.relu(conv(y, w2, b2)))
    y = jax.nn.sigmoid(conv(y, w3, b3))
    return y.reshape(-1)


if __name__ == "__main__":
    key = jax.random.PRNGKey(0)
    k_x, k_p = jax.random.split(key)

    # NCHW input; 32x32 spatial so the final 5x5 conv consumes a 1x1 map.
    x = jax.random.normal(k_x, (2, 3, 32, 32), jnp.float32)
    params = init_params(k_p)
    prepared = prepare_params(params)

    out = jax.block_until_ready(cnn_forward(x, prepared))

    ref = jax.block_until_ready(cnn_forward_ref(x, params))
    np.testing.assert_allclose(np.asarray(out), np.asarray(ref),
                               rtol=1e-4, atol=1e-4)
    assert out.shape == (2,)

    print("KERNEL_OK")
</pallas_src>

<mosaic_0001>
module attributes {stable_mosaic.version = 11 : i64} {
  func.func @_cnn_kernel(%arg0: i32, %arg1: memref<1x784x128xf32, #tpu.memory_space<vmem>>, %arg2: memref<128x128xf32, #tpu.memory_space<vmem>>, %arg3: memref<1x128xf32, #tpu.memory_space<vmem>>, %arg4: memref<25x128x128xf32, #tpu.memory_space<vmem>>, %arg5: memref<1x128xf32, #tpu.memory_space<vmem>>, %arg6: memref<25x128xf32, #tpu.memory_space<vmem>>, %arg7: memref<1x128xf32, #tpu.memory_space<vmem>>, %arg8: memref<1x8x128xf32, #tpu.memory_space<vmem>>, %arg9: memref<784x128xf32, #tpu.memory_space<vmem>>, %arg10: memref<224x128xf32, #tpu.memory_space<vmem>>, %arg11: memref<140x128xf32, #tpu.memory_space<vmem>>, %arg12: memref<25x128xf32, #tpu.memory_space<vmem>>) attributes {dimension_semantics = [#tpu.dimension_semantics<parallel>], iteration_bounds = array<i64: 2>, scalar_prefetch = 0 : i64, scratch_operands = 4 : i64, tpu.core_type = #tpu.core_type<tc>, window_params = [{transform_indices = @transform_0, window_bounds = array<i64: 1, 784, 128>}, {pipeline_mode = #tpu.pipeline_mode<synchronous>, transform_indices = @transform_1, window_bounds = array<i64: 128, 128>}, {pipeline_mode = #tpu.pipeline_mode<synchronous>, transform_indices = @transform_2, window_bounds = array<i64: 1, 128>}, {pipeline_mode = #tpu.pipeline_mode<synchronous>, transform_indices = @transform_3, window_bounds = array<i64: 25, 128, 128>}, {pipeline_mode = #tpu.pipeline_mode<synchronous>, transform_indices = @transform_4, window_bounds = array<i64: 1, 128>}, {pipeline_mode = #tpu.pipeline_mode<synchronous>, transform_indices = @transform_5, window_bounds = array<i64: 25, 128>}, {pipeline_mode = #tpu.pipeline_mode<synchronous>, transform_indices = @transform_6, window_bounds = array<i64: 1, 128>}, {transform_indices = @transform_7, window_bounds = array<i64: 1, 8, 128>}]} {
    %c0 = arith.constant 0 : index
    %c0_0 = arith.constant 0 : index
    %c0_1 = arith.constant 0 : index
    %0 = vector.load %arg1[%c0, %c0_0, %c0_1] : memref<1x784x128xf32, #tpu.memory_space<vmem>>, vector<1x784x128xf32>
    %1 = vector.shape_cast %0 : vector<1x784x128xf32> to vector<784x128xf32>
    %c0_2 = arith.constant 0 : index
    %c0_3 = arith.constant 0 : index
    %2 = vector.load %arg2[%c0_2, %c0_3] : memref<128x128xf32, #tpu.memory_space<vmem>>, vector<128x128xf32>
    %cst = arith.constant dense<0.000000e+00> : vector<784x128xf32>
    %3 = tpu.matmul %1, %2, %cst {dimension_numbers = #tpu.dot_dimension_numbers<[1], [0], [0], [1], [0, 0, 1, 1], [], []>} : vector<784x128xf32>, vector<128x128xf32>, vector<784x128xf32> -> vector<784x128xf32>
    %c0_4 = arith.constant 0 : index
    %c0_5 = arith.constant 0 : index
    %4 = vector.load %arg9[%c0_4, %c0_5] : memref<784x128xf32, #tpu.memory_space<vmem>>, vector<784x128xf32>
    tpu.vector_store %arg9[%c0_4, %c0_5], %3 {strides = array<i32>} : memref<784x128xf32, #tpu.memory_space<vmem>>, vector<784x128xf32>,
    %5 = tpu.iota {dimensions = array<i32: 0>} : vector<14x28xi32>
    %6 = tpu.iota {dimensions = array<i32: 1>} : vector<14x28xi32>
    %c2_i32 = arith.constant 2 : i32
    %7 = vector.broadcast %c2_i32 : i32 to vector<14x28xi32>
    %8 = arith.muli %7, %5 : vector<14x28xi32>
    %9 = arith.cmpi eq, %6, %8 : vector<14x28xi32>
    %10 = arith.extui %9 : vector<14x28xi1> to vector<14x28xi32>
    %11 = arith.sitofp %10 : vector<14x28xi32> to vector<14x28xf32>
    %c2_i32_6 = arith.constant 2 : i32
    %12 = vector.broadcast %c2_i32_6 : i32 to vector<14x28xi32>
    %13 = arith.muli %12, %5 : vector<14x28xi32>
    %c1_i32 = arith.constant 1 : i32
    %14 = vector.broadcast %c1_i32 : i32 to vector<14x28xi32>
    %15 = arith.addi %13, %14 : vector<14x28xi32>
    %16 = arith.cmpi eq, %6, %15 : vector<14x28xi32>
    %17 = arith.extui %16 : vector<14x28xi1> to vector<14x28xi32>
    %18 = arith.sitofp %17 : vector<14x28xi32> to vector<14x28xf32>
    %c0_7 = arith.constant 0 : index
    %c0_8 = arith.constant 0 : index
    %19 = vector.load %arg3[%c0_7, %c0_8] : memref<1x128xf32, #tpu.memory_space<vmem>>, vector<1x128xf32>
    %cst_9 = arith.constant 0.000000e+00 : f32
    %20 = vector.broadcast %cst_9 : f32 to vector<28x128xf32>
    %c196 = arith.constant 196 : index
    %c0_10 = arith.constant 0 : index
    %21 = vector.load %arg10[%c196, %c0_10] : memref<224x128xf32, #tpu.memory_space<vmem>>, vector<28x128xf32>
    tpu.vector_store %arg10[%c196, %c0_10], %20 {strides = array<i32>} : memref<224x128xf32, #tpu.memory_space<vmem>>, vector<28x128xf32>,
    %c0_11 = arith.constant 0 : index
    %c0_12 = arith.constant 0 : index
    %22 = vector.load %arg9[%c0_11, %c0_12] : memref<784x128xf32, #tpu.memory_space<vmem>>, vector<28x128xf32>
    %c28 = arith.constant 28 : index
    %c0_13 = arith.constant 0 : index
    %23 = vector.load %arg9[%c28, %c0_13] : memref<784x128xf32, #tpu.memory_space<vmem>>, vector<28x128xf32>
    %24 = arith.maximumf %22, %23 : vector<28x128xf32>
    %cst_14 = arith.constant dense<0.000000e+00> : vector<14x128xf32>
    %25 = tpu.matmul %11, %24, %cst_14 {dimension_numbers = #tpu.dot_dimension_numbers<[1], [0], [0], [1], [0, 0, 1, 1], [], []>} : vector<14x28xf32>, vector<28x128xf32>, vector<14x128xf32> -> vector<14x128xf32>
    %cst_15 = arith.constant dense<0.000000e+00> : vector<14x128xf32>
    %26 = tpu.matmul %18, %24, %cst_15 {dimension_numbers = #tpu.dot_dimension_numbers<[1], [0], [0], [1], [0, 0, 1, 1], [], []>} : vector<14x28xf32>, vector<28x128xf32>, vector<14x128xf32> -> vector<14x128xf32>
    %27 = arith.maximumf %25, %26 : vector<14x128xf32>
    %28 = vector.broadcast %19 : vector<1x128xf32> to vector<14x128xf32>
    %29 = arith.addf %27, %28 : vector<14x128xf32>
    %cst_16 = arith.constant 0.000000e+00 : f32
    %30 = vector.broadcast %cst_16 : f32 to vector<14x128xf32>
    %31 = arith.maximumf %29, %30 : vector<14x128xf32>
    %c0_17 = arith.constant 0 : index
    %c0_18 = arith.constant 0 : index
    %32 = vector.load %arg10[%c0_17, %c0_18] : memref<224x128xf32, #tpu.memory_space<vmem>>, vector<14x128xf32>
    tpu.vector_store %arg10[%c0_17, %c0_18], %31 {strides = array<i32>} : memref<224x128xf32, #tpu.memory_space<vmem>>, vector<14x128xf32>,
    %c56 = arith.constant 56 : index
    %c0_19 = arith.constant 0 : index
    %33 = vector.load %arg9[%c56, %c0_19] : memref<784x128xf32, #tpu.memory_space<vmem>>, vector<28x128xf32>
    %c84 = arith.constant 84 : index
    %c0_20 = arith.constant 0 : index
    %34 = vector.load %arg9[%c84, %c0_20] : memref<784x128xf32, #tpu.memory_space<vmem>>, vector<28x128xf32>
    %35 = arith.maximumf %33, %34 : vector<28x128xf32>
    %cst_21 = arith.constant dense<0.000000e+00> : vector<14x128xf32>
    %36 = tpu.matmul %11, %35, %cst_21 {dimension_numbers = #tpu.dot_dimension_numbers<[1], [0], [0], [1], [0, 0, 1, 1], [], []>} : vector<14x28xf32>, vector<28x128xf32>, vector<14x128xf32> -> vector<14x128xf32>
    %cst_22 = arith.constant dense<0.000000e+00> : vector<14x128xf32>
    %37 = tpu.matmul %18, %35, %cst_22 {dimension_numbers = #tpu.dot_dimension_numbers<[1], [0], [0], [1], [0, 0, 1, 1], [], []>} : vector<14x28xf32>, vector<28x128xf32>, vector<14x128xf32> -> vector<14x128xf32>
    %38 = arith.maximumf %36, %37 : vector<14x128xf32>
    %39 = vector.broadcast %19 : vector<1x128xf32> to vector<14x128xf32>
    %40 = arith.addf %38, %39 : vector<14x128xf32>
    %cst_23 = arith.constant 0.000000e+00 : f32
    %41 = vector.broadcast %cst_23 : f32 to vector<14x128xf32>
    %42 = arith.maximumf %40, %41 : vector<14x128xf32>
    %c14 = arith.constant 14 : index
    %c0_24 = arith.constant 0 : index
    %43 = vector.load %arg10[%c14, %c0_24] : memref<224x128xf32, #tpu.memory_space<vmem>>, vector<14x128xf32>
    tpu.vector_store %arg10[%c14, %c0_24], %42 {strides = array<i32>} : memref<224x128xf32, #tpu.memory_space<vmem>>, vector<14x128xf32>,
    %c112 = arith.constant 112 : index
    %c0_25 = arith.constant 0 : index
    %44 = vector.load %arg9[%c112, %c0_25] : memref<784x128xf32, #tpu.memory_space<vmem>>, vector<28x128xf32>
    %c140 = arith.constant 140 : index
    %c0_26 = arith.constant 0 : index
    %45 = vector.load %arg9[%c140, %c0_26] : memref<784x128xf32, #tpu.memory_space<vmem>>, vector<28x128xf32>
    %46 = arith.maximumf %44, %45 : vector<28x128xf32>
    %cst_27 = arith.constant dense<0.000000e+00> : vector<14x128xf32>
    %47 = tpu.matmul %11, %46, %cst_27 {dimension_numbers = #tpu.dot_dimension_numbers<[1], [0], [0], [1], [0, 0, 1, 1], [], []>} : vector<14x28xf32>, vector<28x128xf32>, vector<14x128xf32> -> vector<14x128xf32>
    %cst_28 = arith.constant dense<0.000000e+00> : vector<14x128xf32>
    %48 = tpu.matmul %18, %46, %cst_28 {dimension_numbers = #tpu.dot_dimension_numbers<[1], [0], [0], [1], [0, 0, 1, 1], [], []>} : vector<14x28xf32>, vector<28x128xf32>, vector<14x128xf32> -> vector<14x128xf32>
    %49 = arith.maximumf %47, %48 : vector<14x128xf32>
    %50 = vector.broadcast %19 : vector<1x128xf32> to vector<14x128xf32>
    %51 = arith.addf %49, %50 : vector<14x128xf32>
    %cst_29 = arith.constant 0.000000e+00 : f32
    %52 = vector.broadcast %cst_29 : f32 to vector<14x128xf32>
    %53 = arith.maximumf %51, %52 : vector<14x128xf32>
    %c28_30 = arith.constant 28 : index
    %c0_31 = arith.constant 0 : index
    %54 = vector.load %arg10[%c28_30, %c0_31] : memref<224x128xf32, #tpu.memory_space<vmem>>, vector<14x128xf32>
    tpu.vector_store %arg10[%c28_30, %c0_31], %53 {strides = array<i32>} : memref<224x128xf32, #tpu.memory_space<vmem>>, vector<14x128xf32>,
    %c168 = arith.constant 168 : index
    %c0_32 = arith.constant 0 : index
    %55 = vector.load %arg9[%c168, %c0_32] : memref<784x128xf32, #tpu.memory_space<vmem>>, vector<28x128xf32>
    %c196_33 = arith.constant 196 : index
    %c0_34 = arith.constant 0 : index
    %56 = vector.load %arg9[%c196_33, %c0_34] : memref<784x128xf32, #tpu.memory_space<vmem>>, vector<28x128xf32>
    %57 = arith.maximumf %55, %56 : vector<28x128xf32>
    %cst_35 = arith.constant dense<0.000000e+00> : vector<14x128xf32>
    %58 = tpu.matmul %11, %57, %cst_35 {dimension_numbers = #tpu.dot_dimension_numbers<[1], [0], [0], [1], [0, 0, 1, 1], [], []>} : vector<14x28xf32>, vector<28x128xf32>, vector<14x128xf32> -> vector<14x128xf32>
    %cst_36 = arith.constant dense<0.000000e+00> : vector<14x128xf32>
    %59 = tpu.matmul %18, %57, %cst_36 {dimension_numbers = #tpu.dot_dimension_numbers<[1], [0], [0], [1], [0, 0, 1, 1], [], []>} : vector<14x28xf32>, vector<28x128xf32>, vector<14x128xf32> -> vector<14x128xf32>
    %60 = arith.maximumf %58, %59 : vector<14x128xf32>
    %61 = vector.broadcast %19 : vector<1x128xf32> to vector<14x128xf32>
    %62 = arith.addf %60, %61 : vector<14x128xf32>
    %cst_37 = arith.constant 0.000000e+00 : f32
    %63 = vector.broadcast %cst_37 : f32 to vector<14x128xf32>
    %64 = arith.maximumf %62, %63 : vector<14x128xf32>
    %c42 = arith.constant 42 : index
    %c0_38 = arith.constant 0 : index
    %65 = vector.load %arg10[%c42, %c0_38] : memref<224x128xf32, #tpu.memory_space<vmem>>, vector<14x128xf32>
    tpu.vector_store %arg10[%c42, %c0_38], %64 {strides = array<i32>} : memref<224x128xf32, #tpu.memory_space<vmem>>, vector<14x128xf32>,
    %c224 = arith.constant 224 : index
    %c0_39 = arith.constant 0 : index
    %66 = vector.load %arg9[%c224, %c0_39] : memref<784x128xf32, #tpu.memory_space<vmem>>, vector<28x128xf32>
    %c252 = arith.constant 252 : index
    %c0_40 = arith.constant 0 : index
    %67 = vector.load %arg9[%c252, %c0_40] : memref<784x128xf32, #tpu.memory_space<vmem>>, vector<28x128xf32>
    %68 = arith.maximumf %66, %67 : vector<28x128xf32>
    %cst_41 = arith.constant dense<0.000000e+00> : vector<14x128xf32>
    %69 = tpu.matmul %11, %68, %cst_41 {dimension_numbers = #tpu.dot_dimension_numbers<[1], [0], [0], [1], [0, 0, 1, 1], [], []>} : vector<14x28xf32>, vector<28x128xf32>, vector<14x128xf32> -> vector<14x128xf32>
    %cst_42 = arith.constant dense<0.000000e+00> : vector<14x128xf32>
    %70 = tpu.matmul %18, %68, %cst_42 {dimension_numbers = #tpu.dot_dimension_numbers<[1], [0], [0], [1], [0, 0, 1, 1], [], []>} : vector<14x28xf32>, vector<28x128xf32>, vector<14x128xf32> -> vector<14x128xf32>
    %71 = arith.maximumf %69, %70 : vector<14x128xf32>
    %72 = vector.broadcast %19 : vector<1x128xf32> to vector<14x128xf32>
    %73 = arith.addf %71, %72 : vector<14x128xf32>
    %cst_43 = arith.constant 0.000000e+00 : f32
    %74 = vector.broadcast %cst_43 : f32 to vector<14x128xf32>
    %75 = arith.maximumf %73, %74 : vector<14x128xf32>
    %c56_44 = arith.constant 56 : index
    %c0_45 = arith.constant 0 : index
    %76 = vector.load %arg10[%c56_44, %c0_45] : memref<224x128xf32, #tpu.memory_space<vmem>>, vector<14x128xf32>
    tpu.vector_store %arg10[%c56_44, %c0_45], %75 {strides = array<i32>} : memref<224x128xf32, #tpu.memory_space<vmem>>, vector<14x128xf32>,
    %c280 = arith.constant 280 : index
    %c0_46 = arith.constant 0 : index
    %77 = vector.load %arg9[%c280, %c0_46] : memref<784x128xf32, #tpu.memory_space<vmem>>, vector<28x128xf32>
    %c308 = arith.constant 308 : index
    %c0_47 = arith.constant 0 : index
    %78 = vector.load %arg9[%c308, %c0_47] : memref<784x128xf32, #tpu.memory_space<vmem>>, vector<28x128xf32>
    %79 = arith.maximumf %77, %78 : vector<28x128xf32>
    %cst_48 = arith.constant dense<0.000000e+00> : vector<14x128xf32>
    %80 = tpu.matmul %11, %79, %cst_48 {dimension_numbers = #tpu.dot_dimension_numbers<[1], [0], [0], [1], [0, 0, 1, 1], [], []>} : vector<14x28xf32>, vector<28x128xf32>, vector<14x128xf32> -> vector<14x128xf32>
    %cst_49 = arith.constant dense<0.000000e+00> : vector<14x128xf32>
    %81 = tpu.matmul %18, %79, %cst_49 {dimension_numbers = #tpu.dot_dimension_numbers<[1], [0], [0], [1], [0, 0, 1, 1], [], []>} : vector<14x28xf32>, vector<28x128xf32>, vector<14x128xf32> -> vector<14x128xf32>
    %82 = arith.maximumf %80, %81 : vector<14x128xf32>
    %83 = vector.broadcast %19 : vector<1x128xf32> to vector<14x128xf32>
    %84 = arith.addf %82, %83 : vector<14x128xf32>
    %cst_50 = arith.constant 0.000000e+00 : f32
    %85 = vector.broadcast %cst_50 : f32 to vector<14x128xf32>
    %86 = arith.maximumf %84, %85 : vector<14x128xf32>
    %c70 = arith.constant 70 : index
    %c0_51 = arith.constant 0 : index
    %87 = vector.load %arg10[%c70, %c0_51] : memref<224x128xf32, #tpu.memory_space<vmem>>, vector<14x128xf32>
    tpu.vector_store %arg10[%c70, %c0_51], %86 {strides = array<i32>} : memref<224x128xf32, #tpu.memory_space<vmem>>, vector<14x128xf32>,
    %c336 = arith.constant 336 : index
    %c0_52 = arith.constant 0 : index
    %88 = vector.load %arg9[%c336, %c0_52] : memref<784x128xf32, #tpu.memory_space<vmem>>, vector<28x128xf32>
    %c364 = arith.constant 364 : index
    %c0_53 = arith.constant 0 : index
    %89 = vector.load %arg9[%c364, %c0_53] : memref<784x128xf32, #tpu.memory_space<vmem>>, vector<28x128xf32>
    %90 = arith.maximumf %88, %89 : vector<28x128xf32>
    %cst_54 = arith.constant dense<0.000000e+00> : vector<14x128xf32>
    %91 = tpu.matmul %11, %90, %cst_54 {dimension_numbers = #tpu.dot_dimension_numbers<[1], [0], [0], [1], [0, 0, 1, 1], [], []>} : vector<14x28xf32>, vector<28x128xf32>, vector<14x128xf32> -> vector<14x128xf32>
    %cst_55 = arith.constant dense<0.000000e+00> : vector<14x128xf32>
    %92 = tpu.matmul %18, %90, %cst_55 {dimension_numbers = #tpu.dot_dimension_numbers<[1], [0], [0], [1], [0, 0, 1, 1], [], []>} : vector<14x28xf32>, vector<28x128xf32>, vector<14x128xf32> -> vector<14x128xf32>
    %93 = arith.maximumf %91, %92 : vector<14x128xf32>
    %94 = vector.broadcast %19 : vector<1x128xf32> to vector<14x128xf32>
    %95 = arith.addf %93, %94 : vector<14x128xf32>
    %cst_56 = arith.constant 0.000000e+00 : f32
    %96 = vector.broadcast %cst_56 : f32 to vector<14x128xf32>
    %97 = arith.maximumf %95, %96 : vector<14x128xf32>
    %c84_57 = arith.constant 84 : index
    %c0_58 = arith.constant 0 : index
    %98 = vector.load %arg10[%c84_57, %c0_58] : memref<224x128xf32, #tpu.memory_space<vmem>>, vector<14x128xf32>
    tpu.vector_store %arg10[%c84_57, %c0_58], %97 {strides = array<i32>} : memref<224x128xf32, #tpu.memory_space<vmem>>, vector<14x128xf32>,
    %c392 = arith.constant 392 : index
    %c0_59 = arith.constant 0 : index
    %99 = vector.load %arg9[%c392, %c0_59] : memref<784x128xf32, #tpu.memory_space<vmem>>, vector<28x128xf32>
    %c420 = arith.constant 420 : index
    %c0_60 = arith.constant 0 : index
    %100 = vector.load %arg9[%c420, %c0_60] : memref<784x128xf32, #tpu.memory_space<vmem>>, vector<28x128xf32>
    %101 = arith.maximumf %99, %100 : vector<28x128xf32>
    %cst_61 = arith.constant dense<0.000000e+00> : vector<14x128xf32>
    %102 = tpu.matmul %11, %101, %cst_61 {dimension_numbers = #tpu.dot_dimension_numbers<[1], [0], [0], [1], [0, 0, 1, 1], [], []>} : vector<14x28xf32>, vector<28x128xf32>, vector<14x128xf32> -> vector<14x128xf32>
    %cst_62 = arith.constant dense<0.000000e+00> : vector<14x128xf32>
    %103 = tpu.matmul %18, %101, %cst_62 {dimension_numbers = #tpu.dot_dimension_numbers<[1], [0], [0], [1], [0, 0, 1, 1], [], []>} : vector<14x28xf32>, vector<28x128xf32>, vector<14x128xf32> -> vector<14x128xf32>
    %104 = arith.maximumf %102, %103 : vector<14x128xf32>
    %105 = vector.broadcast %19 : vector<1x128xf32> to vector<14x128xf32>
    %106 = arith.addf %104, %105 : vector<14x128xf32>
    %cst_63 = arith.constant 0.000000e+00 : f32
    %107 = vector.broadcast %cst_63 : f32 to vector<14x128xf32>
    %108 = arith.maximumf %106, %107 : vector<14x128xf32>
    %c98 = arith.constant 98 : index
    %c0_64 = arith.constant 0 : index
    %109 = vector.load %arg10[%c98, %c0_64] : memref<224x128xf32, #tpu.memory_space<vmem>>, vector<14x128xf32>
    tpu.vector_store %arg10[%c98, %c0_64], %108 {strides = array<i32>} : memref<224x128xf32, #tpu.memory_space<vmem>>, vector<14x128xf32>,
    %c448 = arith.constant 448 : index
    %c0_65 = arith.constant 0 : index
    %110 = vector.load %arg9[%c448, %c0_65] : memref<784x128xf32, #tpu.memory_space<vmem>>, vector<28x128xf32>
    %c476 = arith.constant 476 : index
    %c0_66 = arith.constant 0 : index
    %111 = vector.load %arg9[%c476, %c0_66] : memref<784x128xf32, #tpu.memory_space<vmem>>, vector<28x128xf32>
    %112 = arith.maximumf %110, %111 : vector<28x128xf32>
    %cst_67 = arith.constant dense<0.000000e+00> : vector<14x128xf32>
    %113 = tpu.matmul %11, %112, %cst_67 {dimension_numbers = #tpu.dot_dimension_numbers<[1], [0], [0], [1], [0, 0, 1, 1], [], []>} : vector<14x28xf32>, vector<28x128xf32>, vector<14x128xf32> -> vector<14x128xf32>
    %cst_68 = arith.constant dense<0.000000e+00> : vector<14x128xf32>
    %114 = tpu.matmul %18, %112, %cst_68 {dimension_numbers = #tpu.dot_dimension_numbers<[1], [0], [0], [1], [0, 0, 1, 1], [], []>} : vector<14x28xf32>, vector<28x128xf32>, vector<14x128xf32> -> vector<14x128xf32>
    %115 = arith.maximumf %113, %114 : vector<14x128xf32>
    %116 = vector.broadcast %19 : vector<1x128xf32> to vector<14x128xf32>
    %117 = arith.addf %115, %116 : vector<14x128xf32>
    %cst_69 = arith.constant 0.000000e+00 : f32
    %118 = vector.broadcast %cst_69 : f32 to vector<14x128xf32>
    %119 = arith.maximumf %117, %118 : vector<14x128xf32>
    %c112_70 = arith.constant 112 : index
    %c0_71 = arith.constant 0 : index
    %120 = vector.load %arg10[%c112_70, %c0_71] : memref<224x128xf32, #tpu.memory_space<vmem>>, vector<14x128xf32>
    tpu.vector_store %arg10[%c112_70, %c0_71], %119 {strides = array<i32>} : memref<224x128xf32, #tpu.memory_space<vmem>>, vector<14x128xf32>,
    %c504 = arith.constant 504 : index
    %c0_72 = arith.constant 0 : index
    %121 = vector.load %arg9[%c504, %c0_72] : memref<784x128xf32, #tpu.memory_space<vmem>>, vector<28x128xf32>
    %c532 = arith.constant 532 : index
    %c0_73 = arith.constant 0 : index
    %122 = vector.load %arg9[%c532, %c0_73] : memref<784x128xf32, #tpu.memory_space<vmem>>, vector<28x128xf32>
    %123 = arith.maximumf %121, %122 : vector<28x128xf32>
    %cst_74 = arith.constant dense<0.000000e+00> : vector<14x128xf32>
    %124 = tpu.matmul %11, %123, %cst_74 {dimension_numbers = #tpu.dot_dimension_numbers<[1], [0], [0], [1], [0, 0, 1, 1], [], []>} : vector<14x28xf32>, vector<28x128xf32>, vector<14x128xf32> -> vector<14x128xf32>
    %cst_75 = arith.constant dense<0.000000e+00> : vector<14x128xf32>
    %125 = tpu.matmul %18, %123, %cst_75 {dimension_numbers = #tpu.dot_dimension_numbers<[1], [0], [0], [1], [0, 0, 1, 1], [], []>} : vector<14x28xf32>, vector<28x128xf32>, vector<14x128xf32> -> vector<14x128xf32>
    %126 = arith.maximumf %124, %125 : vector<14x128xf32>
    %127 = vector.broadcast %19 : vector<1x128xf32> to vector<14x128xf32>
    %128 = arith.addf %126, %127 : vector<14x128xf32>
    %cst_76 = arith.constant 0.000000e+00 : f32
    %129 = vector.broadcast %cst_76 : f32 to vector<14x128xf32>
    %130 = arith.maximumf %128, %129 : vector<14x128xf32>
    %c126 = arith.constant 126 : index
    %c0_77 = arith.constant 0 : index
    %131 = vector.load %arg10[%c126, %c0_77] : memref<224x128xf32, #tpu.memory_space<vmem>>, vector<14x128xf32>
    tpu.vector_store %arg10[%c126, %c0_77], %130 {strides = array<i32>} : memref<224x128xf32, #tpu.memory_space<vmem>>, vector<14x128xf32>,
    %c560 = arith.constant 560 : index
    %c0_78 = arith.constant 0 : index
    %132 = vector.load %arg9[%c560, %c0_78] : memref<784x128xf32, #tpu.memory_space<vmem>>, vector<28x128xf32>
    %c588 = arith.constant 588 : index
    %c0_79 = arith.constant 0 : index
    %133 = vector.load %arg9[%c588, %c0_79] : memref<784x128xf32, #tpu.memory_space<vmem>>, vector<28x128xf32>
    %134 = arith.maximumf %132, %133 : vector<28x128xf32>
    %cst_80 = arith.constant dense<0.000000e+00> : vector<14x128xf32>
    %135 = tpu.matmul %11, %134, %cst_80 {dimension_numbers = #tpu.dot_dimension_numbers<[1], [0], [0], [1], [0, 0, 1, 1], [], []>} : vector<14x28xf32>, vector<28x128xf32>, vector<14x128xf32> -> vector<14x128xf32>
    %cst_81 = arith.constant dense<0.000000e+00> : vector<14x128xf32>
    %136 = tpu.matmul %18, %134, %cst_81 {dimension_numbers = #tpu.dot_dimension_numbers<[1], [0], [0], [1], [0, 0, 1, 1], [], []>} : vector<14x28xf32>, vector<28x128xf32>, vector<14x128xf32> -> vector<14x128xf32>
    %137 = arith.maximumf %135, %136 : vector<14x128xf32>
    %138 = vector.broadcast %19 : vector<1x128xf32> to vector<14x128xf32>
    %139 = arith.addf %137, %138 : vector<14x128xf32>
    %cst_82 = arith.constant 0.000000e+00 : f32
    %140 = vector.broadcast %cst_82 : f32 to vector<14x128xf32>
    %141 = arith.maximumf %139, %140 : vector<14x128xf32>
    %c140_83 = arith.constant 140 : index
    %c0_84 = arith.constant 0 : index
    %142 = vector.load %arg10[%c140_83, %c0_84] : memref<224x128xf32, #tpu.memory_space<vmem>>, vector<14x128xf32>
    tpu.vector_store %arg10[%c140_83, %c0_84], %141 {strides = array<i32>} : memref<224x128xf32, #tpu.memory_space<vmem>>, vector<14x128xf32>,
    %c616 = arith.constant 616 : index
    %c0_85 = arith.constant 0 : index
    %143 = vector.load %arg9[%c616, %c0_85] : memref<784x128xf32, #tpu.memory_space<vmem>>, vector<28x128xf32>
    %c644 = arith.constant 644 : index
    %c0_86 = arith.constant 0 : index
    %144 = vector.load %arg9[%c644, %c0_86] : memref<784x128xf32, #tpu.memory_space<vmem>>, vector<28x128xf32>
    %145 = arith.maximumf %143, %144 : vector<28x128xf32>
    %cst_87 = arith.constant dense<0.000000e+00> : vector<14x128xf32>
    %146 = tpu.matmul %11, %145, %cst_87 {dimension_numbers = #tpu.dot_dimension_numbers<[1], [0], [0], [1], [0, 0, 1, 1], [], []>} : vector<14x28xf32>, vector<28x128xf32>, vector<14x128xf32> -> vector<14x128xf32>
    %cst_88 = arith.constant dense<0.000000e+00> : vector<14x128xf32>
    %147 = tpu.matmul %18, %145, %cst_88 {dimension_numbers = #tpu.dot_dimension_numbers<[1], [0], [0], [1], [0, 0, 1, 1], [], []>} : vector<14x28xf32>, vector<28x128xf32>, vector<14x128xf32> -> vector<14x128xf32>
    %148 = arith.maximumf %146, %147 : vector<14x128xf32>
    %149 = vector.broadcast %19 : vector<1x128xf32> to vector<14x128xf32>
    %150 = arith.addf %148, %149 : vector<14x128xf32>
    %cst_89 = arith.constant 0.000000e+00 : f32
    %151 = vector.broadcast %cst_89 : f32 to vector<14x128xf32>
    %152 = arith.maximumf %150, %151 : vector<14x128xf32>
    %c154 = arith.constant 154 : index
    %c0_90 = arith.constant 0 : index
    %153 = vector.load %arg10[%c154, %c0_90] : memref<224x128xf32, #tpu.memory_space<vmem>>, vector<14x128xf32>
    tpu.vector_store %arg10[%c154, %c0_90], %152 {strides = array<i32>} : memref<224x128xf32, #tpu.memory_space<vmem>>, vector<14x128xf32>,
    %c672 = arith.constant 672 : index
    %c0_91 = arith.constant 0 : index
    %154 = vector.load %arg9[%c672, %c0_91] : memref<784x128xf32, #tpu.memory_space<vmem>>, vector<28x128xf32>
    %c700 = arith.constant 700 : index
    %c0_92 = arith.constant 0 : index
    %155 = vector.load %arg9[%c700, %c0_92] : memref<784x128xf32, #tpu.memory_space<vmem>>, vector<28x128xf32>
    %156 = arith.maximumf %154, %155 : vector<28x128xf32>
    %cst_93 = arith.constant dense<0.000000e+00> : vector<14x128xf32>
    %157 = tpu.matmul %11, %156, %cst_93 {dimension_numbers = #tpu.dot_dimension_numbers<[1], [0], [0], [1], [0, 0, 1, 1], [], []>} : vector<14x28xf32>, vector<28x128xf32>, vector<14x128xf32> -> vector<14x128xf32>
    %cst_94 = arith.constant dense<0.000000e+00> : vector<14x128xf32>
    %158 = tpu.matmul %18, %156, %cst_94 {dimension_numbers = #tpu.dot_dimension_numbers<[1], [0], [0], [1], [0, 0, 1, 1], [], []>} : vector<14x28xf32>, vector<28x128xf32>, vector<14x128xf32> -> vector<14x128xf32>
    %159 = arith.maximumf %157, %158 : vector<14x128xf32>
    %160 = vector.broadcast %19 : vector<1x128xf32> to vector<14x128xf32>
    %161 = arith.addf %159, %160 : vector<14x128xf32>
    %cst_95 = arith.constant 0.000000e+00 : f32
    %162 = vector.broadcast %cst_95 : f32 to vector<14x128xf32>
    %163 = arith.maximumf %161, %162 : vector<14x128xf32>
    %c168_96 = arith.constant 168 : index
    %c0_97 = arith.constant 0 : index
    %164 = vector.load %arg10[%c168_96, %c0_97] : memref<224x128xf32, #tpu.memory_space<vmem>>, vector<14x128xf32>
    tpu.vector_store %arg10[%c168_96, %c0_97], %163 {strides = array<i32>} : memref<224x128xf32, #tpu.memory_space<vmem>>, vector<14x128xf32>,
    %c728 = arith.constant 728 : index
    %c0_98 = arith.constant 0 : index
    %165 = vector.load %arg9[%c728, %c0_98] : memref<784x128xf32, #tpu.memory_space<vmem>>, vector<28x128xf32>
    %c756 = arith.constant 756 : index
    %c0_99 = arith.constant 0 : index
    %166 = vector.load %arg9[%c756, %c0_99] : memref<784x128xf32, #tpu.memory_space<vmem>>, vector<28x128xf32>
    %167 = arith.maximumf %165, %166 : vector<28x128xf32>
    %cst_100 = arith.constant dense<0.000000e+00> : vector<14x128xf32>
    %168 = tpu.matmul %11, %167, %cst_100 {dimension_numbers = #tpu.dot_dimension_numbers<[1], [0], [0], [1], [0, 0, 1, 1], [], []>} : vector<14x28xf32>, vector<28x128xf32>, vector<14x128xf32> -> vector<14x128xf32>
    %cst_101 = arith.constant dense<0.000000e+00> : vector<14x128xf32>
    %169 = tpu.matmul %18, %167, %cst_101 {dimension_numbers = #tpu.dot_dimension_numbers<[1], [0], [0], [1], [0, 0, 1, 1], [], []>} : vector<14x28xf32>, vector<28x128xf32>, vector<14x128xf32> -> vector<14x128xf32>
    %170 = arith.maximumf %168, %169 : vector<14x128xf32>
    %171 = vector.broadcast %19 : vector<1x128xf32> to vector<14x128xf32>
    %172 = arith.addf %170, %171 : vector<14x128xf32>
    %cst_102 = arith.constant 0.000000e+00 : f32
    %173 = vector.broadcast %cst_102 : f32 to vector<14x128xf32>
    %174 = arith.maximumf %172, %173 : vector<14x128xf32>
    %c182 = arith.constant 182 : index
    %c0_103 = arith.constant 0 : index
    %175 = vector.load %arg10[%c182, %c0_103] : memref<224x128xf32, #tpu.memory_space<vmem>>, vector<14x128xf32>
    tpu.vector_store %arg10[%c182, %c0_103], %174 {strides = array<i32>} : memref<224x128xf32, #tpu.memory_space<vmem>>, vector<14x128xf32>,
    %cst_104 = arith.constant 0.000000e+00 : f32
    %176 = vector.broadcast %cst_104 : f32 to vector<140x128xf32>
    %c0_105 = arith.constant 0 : index
    %c0_106 = arith.constant 0 : index
    %177 = vector.load %arg11[%c0_105, %c0_106] : memref<140x128xf32, #tpu.memory_space<vmem>>, vector<140x128xf32>
    tpu.vector_store %arg11[%c0_105, %c0_106], %176 {strides = array<i32>} : memref<140x128xf32, #tpu.memory_space<vmem>>, vector<140x128xf32>,
    %c0_107 = arith.constant 0 : index
    %c0_108 = arith.constant 0 : index
    %178 = vector.load %arg10[%c0_107, %c0_108] : memref<224x128xf32, #tpu.memory_space<vmem>>, vector<140x128xf32>
    %c0_109 = arith.constant 0 : index
    %c0_110 = arith.constant 0 : index
    %179 = vector.load %arg11[%c0_109, %c0_110] : memref<140x128xf32, #tpu.memory_space<vmem>>, vector<140x128xf32>
    %c0_111 = arith.constant 0 : index
    %c0_112 = arith.constant 0 : index
    %c0_113 = arith.constant 0 : index
    %180 = vector.load %arg4[%c0_111, %c0_112, %c0_113] : memref<25x128x128xf32, #tpu.memory_space<vmem>>, vector<1x128x128xf32>
    %181 = vector.shape_cast %180 : vector<1x128x128xf32> to vector<128x128xf32>
    %cst_114 = arith.constant dense<0.000000e+00> : vector<140x128xf32>
    %182 = tpu.matmul %178, %181, %cst_114 {dimension_numbers = #tpu.dot_dimension_numbers<[1], [0], [0], [1], [0, 0, 1, 1], [], []>} : vector<140x128xf32>, vector<128x128xf32>, vector<140x128xf32> -> vector<140x128xf32>
    %183 = arith.addf %179, %182 : vector<140x128xf32>
    %c0_115 = arith.constant 0 : index
    %c0_116 = arith.constant 0 : index
    %184 = vector.load %arg11[%c0_115, %c0_116] : memref<140x128xf32, #tpu.memory_space<vmem>>, vector<140x128xf32>
    tpu.vector_store %arg11[%c0_115, %c0_116], %183 {strides = array<i32>} : memref<140x128xf32, #tpu.memory_space<vmem>>, vector<140x128xf32>,
    %c1 = arith.constant 1 : index
    %c0_117 = arith.constant 0 : index
    %185 = vector.load %arg10[%c1, %c0_117] : memref<224x128xf32, #tpu.memory_space<vmem>>, vector<140x128xf32>
    %c0_118 = arith.constant 0 : index
    %c0_119 = arith.constant 0 : index
    %186 = vector.load %arg11[%c0_118, %c0_119] : memref<140x128xf32, #tpu.memory_space<vmem>>, vector<140x128xf32>
    %c1_120 = arith.constant 1 : index
    %c0_121 = arith.constant 0 : index
    %c0_122 = arith.constant 0 : index
    %187 = vector.load %arg4[%c1_120, %c0_121, %c0_122] : memref<25x128x128xf32, #tpu.memory_space<vmem>>, vector<1x128x128xf32>
    %188 = vector.shape_cast %187 : vector<1x128x128xf32> to vector<128x128xf32>
    %cst_123 = arith.constant dense<0.000000e+00> : vector<140x128xf32>
    %189 = tpu.matmul %185, %188, %cst_123 {dimension_numbers = #tpu.dot_dimension_numbers<[1], [0], [0], [1], [0, 0, 1, 1], [], []>} : vector<140x128xf32>, vector<128x128xf32>, vector<140x128xf32> -> vector<140x128xf32>
    %190 = arith.addf %186, %189 : vector<140x128xf32>
    %c0_124 = arith.constant 0 : index
    %c0_125 = arith.constant 0 : index
    %191 = vector.load %arg11[%c0_124, %c0_125] : memref<140x128xf32, #tpu.memory_space<vmem>>, vector<140x128xf32>
    tpu.vector_store %arg11[%c0_124, %c0_125], %190 {strides = array<i32>} : memref<140x128xf32, #tpu.memory_space<vmem>>, vector<140x128xf32>,
    %c2 = arith.constant 2 : index
    %c0_126 = arith.constant 0 : index
    %192 = vector.load %arg10[%c2, %c0_126] : memref<224x128xf32, #tpu.memory_space<vmem>>, vector<140x128xf32>
    %c0_127 = arith.constant 0 : index
    %c0_128 = arith.constant 0 : index
    %193 = vector.load %arg11[%c0_127, %c0_128] : memref<140x128xf32, #tpu.memory_space<vmem>>, vector<140x128xf32>
    %c2_129 = arith.constant 2 : index
    %c0_130 = arith.constant 0 : index
    %c0_131 = arith.constant 0 : index
    %194 = vector.load %arg4[%c2_129, %c0_130, %c0_131] : memref<25x128x128xf32, #tpu.memory_space<vmem>>, vector<1x128x128xf32>
    %195 = vector.shape_cast %194 : vector<1x128x128xf32> to vector<128x128xf32>
    %cst_132 = arith.constant dense<0.000000e+00> : vector<140x128xf32>
    %196 = tpu.matmul %192, %195, %cst_132 {dimension_numbers = #tpu.dot_dimension_numbers<[1], [0], [0], [1], [0, 0, 1, 1], [], []>} : vector<140x128xf32>, vector<128x128xf32>, vector<140x128xf32> -> vector<140x128xf32>
    %197 = arith.addf %193, %196 : vector<140x128xf32>
    %c0_133 = arith.constant 0 : index
    %c0_134 = arith.constant 0 : index
    %198 = vector.load %arg11[%c0_133, %c0_134] : memref<140x128xf32, #tpu.memory_space<vmem>>, vector<140x128xf32>
    tpu.vector_store %arg11[%c0_133, %c0_134], %197 {strides = array<i32>} : memref<140x128xf32, #tpu.memory_space<vmem>>, vector<140x128xf32>,
    %c3 = arith.constant 3 : index
    %c0_135 = arith.constant 0 : index
    %199 = vector.load %arg10[%c3, %c0_135] : memref<224x128xf32, #tpu.memory_space<vmem>>, vector<140x128xf32>
    %c0_136 = arith.constant 0 : index
    %c0_137 = arith.constant 0 : index
    %200 = vector.load %arg11[%c0_136, %c0_137] : memref<140x128xf32, #tpu.memory_space<vmem>>, vector<140x128xf32>
    %c3_138 = arith.constant 3 : index
    %c0_139 = arith.constant 0 : index
    %c0_140 = arith.constant 0 : index
    %201 = vector.load %arg4[%c3_138, %c0_139, %c0_140] : memref<25x128x128xf32, #tpu.memory_space<vmem>>, vector<1x128x128xf32>
    %202 = vector.shape_cast %201 : vector<1x128x128xf32> to vector<128x128xf32>
    %cst_141 = arith.constant dense<0.000000e+00> : vector<140x128xf32>
    %203 = tpu.matmul %199, %202, %cst_141 {dimension_numbers = #tpu.dot_dimension_numbers<[1], [0], [0], [1], [0, 0, 1, 1], [], []>} : vector<140x128xf32>, vector<128x128xf32>, vector<140x128xf32> -> vector<140x128xf32>
    %204 = arith.addf %200, %203 : vector<140x128xf32>
    %c0_142 = arith.constant 0 : index
    %c0_143 = arith.constant 0 : index
    %205 = vector.load %arg11[%c0_142, %c0_143] : memref<140x128xf32, #tpu.memory_space<vmem>>, vector<140x128xf32>
    tpu.vector_store %arg11[%c0_142, %c0_143], %204 {strides = array<i32>} : memref<140x128xf32, #tpu.memory_space<vmem>>, vector<140x128xf32>,
    %c4 = arith.constant 4 : index
    %c0_144 = arith.constant 0 : index
    %206 = vector.load %arg10[%c4, %c0_144] : memref<224x128xf32, #tpu.memory_space<vmem>>, vector<140x128xf32>
    %c0_145 = arith.constant 0 : index
    %c0_146 = arith.constant 0 : index
    %207 = vector.load %arg11[%c0_145, %c0_146] : memref<140x128xf32, #tpu.memory_space<vmem>>, vector<140x128xf32>
    %c4_147 = arith.constant 4 : index
    %c0_148 = arith.constant 0 : index
    %c0_149 = arith.constant 0 : index
    %208 = vector.load %arg4[%c4_147, %c0_148, %c0_149] : memref<25x128x128xf32, #tpu.memory_space<vmem>>, vector<1x128x128xf32>
    %209 = vector.shape_cast %208 : vector<1x128x128xf32> to vector<128x128xf32>
    %cst_150 = arith.constant dense<0.000000e+00> : vector<140x128xf32>
    %210 = tpu.matmul %206, %209, %cst_150 {dimension_numbers = #tpu.dot_dimension_numbers<[1], [0], [0], [1], [0, 0, 1, 1], [], []>} : vector<140x128xf32>, vector<128x128xf32>, vector<140x128xf32> -> vector<140x128xf32>
    %211 = arith.addf %207, %210 : vector<140x128xf32>
    %c0_151 = arith.constant 0 : index
    %c0_152 = arith.constant 0 : index
    %212 = vector.load %arg11[%c0_151, %c0_152] : memref<140x128xf32, #tpu.memory_space<vmem>>, vector<140x128xf32>
    tpu.vector_store %arg11[%c0_151, %c0_152], %211 {strides = array<i32>} : memref<140x128xf32, #tpu.memory_space<vmem>>, vector<140x128xf32>,
    %c14_153 = arith.constant 14 : index
    %c0_154 = arith.constant 0 : index
    %213 = vector.load %arg10[%c14_153, %c0_154] : memref<224x128xf32, #tpu.memory_space<vmem>>, vector<140x128xf32>
    %c0_155 = arith.constant 0 : index
    %c0_156 = arith.constant 0 : index
    %214 = vector.load %arg11[%c0_155, %c0_156] : memref<140x128xf32, #tpu.memory_space<vmem>>, vector<140x128xf32>
    %c5 = arith.constant 5 : index
    %c0_157 = arith.constant 0 : index
    %c0_158 = arith.constant 0 : index
    %215 = vector.load %arg4[%c5, %c0_157, %c0_158] : memref<25x128x128xf32, #tpu.memory_space<vmem>>, vector<1x128x128xf32>
    %216 = vector.shape_cast %215 : vector<1x128x128xf32> to vector<128x128xf32>
    %cst_159 = arith.constant dense<0.000000e+00> : vector<140x128xf32>
    %217 = tpu.matmul %213, %216, %cst_159 {dimension_numbers = #tpu.dot_dimension_numbers<[1], [0], [0], [1], [0, 0, 1, 1], [], []>} : vector<140x128xf32>, vector<128x128xf32>, vector<140x128xf32> -> vector<140x128xf32>
    %218 = arith.addf %214, %217 : vector<140x128xf32>
    %c0_160 = arith.constant 0 : index
    %c0_161 = arith.constant 0 : index
    %219 = vector.load %arg11[%c0_160, %c0_161] : memref<140x128xf32, #tpu.memory_space<vmem>>, vector<140x128xf32>
    tpu.vector_store %arg11[%c0_160, %c0_161], %218 {strides = array<i32>} : memref<140x128xf32, #tpu.memory_space<vmem>>, vector<140x128xf32>,
    %c15 = arith.constant 15 : index
    %c0_162 = arith.constant 0 : index
    %220 = vector.load %arg10[%c15, %c0_162] : memref<224x128xf32, #tpu.memory_space<vmem>>, vector<140x128xf32>
    %c0_163 = arith.constant 0 : index
    %c0_164 = arith.constant 0 : index
    %221 = vector.load %arg11[%c0_163, %c0_164] : memref<140x128xf32, #tpu.memory_space<vmem>>, vector<140x128xf32>
    %c6 = arith.constant 6 : index
    %c0_165 = arith.constant 0 : index
    %c0_166 = arith.constant 0 : index
    %222 = vector.load %arg4[%c6, %c0_165, %c0_166] : memref<25x128x128xf32, #tpu.memory_space<vmem>>, vector<1x128x128xf32>
    %223 = vector.shape_cast %222 : vector<1x128x128xf32> to vector<128x128xf32>
    %cst_167 = arith.constant dense<0.000000e+00> : vector<140x128xf32>
    %224 = tpu.matmul %220, %223, %cst_167 {dimension_numbers = #tpu.dot_dimension_numbers<[1], [0], [0], [1], [0, 0, 1, 1], [], []>} : vector<140x128xf32>, vector<128x128xf32>, vector<140x128xf32> -> vector<140x128xf32>
    %225 = arith.addf %221, %224 : vector<140x128xf32>
    %c0_168 = arith.constant 0 : index
    %c0_169 = arith.constant 0 : index
    %226 = vector.load %arg11[%c0_168, %c0_169] : memref<140x128xf32, #tpu.memory_space<vmem>>, vector<140x128xf32>
    tpu.vector_store %arg11[%c0_168, %c0_169], %225 {strides = array<i32>} : memref<140x128xf32, #tpu.memory_space<vmem>>, vector<140x128xf32>,
    %c16 = arith.constant 16 : index
    %c0_170 = arith.constant 0 : index
    %227 = vector.load %arg10[%c16, %c0_170] : memref<224x128xf32, #tpu.memory_space<vmem>>, vector<140x128xf32>
    %c0_171 = arith.constant 0 : index
    %c0_172 = arith.constant 0 : index
    %228 = vector.load %arg11[%c0_171, %c0_172] : memref<140x128xf32, #tpu.memory_space<vmem>>, vector<140x128xf32>
    %c7 = arith.constant 7 : index
    %c0_173 = arith.constant 0 : index
    %c0_174 = arith.constant 0 : index
    %229 = vector.load %arg4[%c7, %c0_173, %c0_174] : memref<25x128x128xf32, #tpu.memory_space<vmem>>, vector<1x128x128xf32>
    %230 = vector.shape_cast %229 : vector<1x128x128xf32> to vector<128x128xf32>
    %cst_175 = arith.constant dense<0.000000e+00> : vector<140x128xf32>
    %231 = tpu.matmul %227, %230, %cst_175 {dimension_numbers = #tpu.dot_dimension_numbers<[1], [0], [0], [1], [0, 0, 1, 1], [], []>} : vector<140x128xf32>, vector<128x128xf32>, vector<140x128xf32> -> vector<140x128xf32>
    %232 = arith.addf %228, %231 : vector<140x128xf32>
    %c0_176 = arith.constant 0 : index
    %c0_177 = arith.constant 0 : index
    %233 = vector.load %arg11[%c0_176, %c0_177] : memref<140x128xf32, #tpu.memory_space<vmem>>, vector<140x128xf32>
    tpu.vector_store %arg11[%c0_176, %c0_177], %232 {strides = array<i32>} : memref<140x128xf32, #tpu.memory_space<vmem>>, vector<140x128xf32>,
    %c17 = arith.constant 17 : index
    %c0_178 = arith.constant 0 : index
    %234 = vector.load %arg10[%c17, %c0_178] : memref<224x128xf32, #tpu.memory_space<vmem>>, vector<140x128xf32>
    %c0_179 = arith.constant 0 : index
    %c0_180 = arith.constant 0 : index
    %235 = vector.load %arg11[%c0_179, %c0_180] : memref<140x128xf32, #tpu.memory_space<vmem>>, vector<140x128xf32>
    %c8 = arith.constant 8 : index
    %c0_181 = arith.constant 0 : index
    %c0_182 = arith.constant 0 : index
    %236 = vector.load %arg4[%c8, %c0_181, %c0_182] : memref<25x128x128xf32, #tpu.memory_space<vmem>>, vector<1x128x128xf32>
    %237 = vector.shape_cast %236 : vector<1x128x128xf32> to vector<128x128xf32>
    %cst_183 = arith.constant dense<0.000000e+00> : vector<140x128xf32>
    %238 = tpu.matmul %234, %237, %cst_183 {dimension_numbers = #tpu.dot_dimension_numbers<[1], [0], [0], [1], [0, 0, 1, 1], [], []>} : vector<140x128xf32>, vector<128x128xf32>, vector<140x128xf32> -> vector<140x128xf32>
    %239 = arith.addf %235, %238 : vector<140x128xf32>
    %c0_184 = arith.constant 0 : index
    %c0_185 = arith.constant 0 : index
    %240 = vector.load %arg11[%c0_184, %c0_185] : memref<140x128xf32, #tpu.memory_space<vmem>>, vector<140x128xf32>
    tpu.vector_store %arg11[%c0_184, %c0_185], %239 {strides = array<i32>} : memref<140x128xf32, #tpu.memory_space<vmem>>, vector<140x128xf32>,
    %c18 = arith.constant 18 : index
    %c0_186 = arith.constant 0 : index
    %241 = vector.load %arg10[%c18, %c0_186] : memref<224x128xf32, #tpu.memory_space<vmem>>, vector<140x128xf32>
    %c0_187 = arith.constant 0 : index
    %c0_188 = arith.constant 0 : index
    %242 = vector.load %arg11[%c0_187, %c0_188] : memref<140x128xf32, #tpu.memory_space<vmem>>, vector<140x128xf32>
    %c9 = arith.constant 9 : index
    %c0_189 = arith.constant 0 : index
    %c0_190 = arith.constant 0 : index
    %243 = vector.load %arg4[%c9, %c0_189, %c0_190] : memref<25x128x128xf32, #tpu.memory_space<vmem>>, vector<1x128x128xf32>
    %244 = vector.shape_cast %243 : vector<1x128x128xf32> to vector<128x128xf32>
    %cst_191 = arith.constant dense<0.000000e+00> : vector<140x128xf32>
    %245 = tpu.matmul %241, %244, %cst_191 {dimension_numbers = #tpu.dot_dimension_numbers<[1], [0], [0], [1], [0, 0, 1, 1], [], []>} : vector<140x128xf32>, vector<128x128xf32>, vector<140x128xf32> -> vector<140x128xf32>
    %246 = arith.addf %242, %245 : vector<140x128xf32>
    %c0_192 = arith.constant 0 : index
    %c0_193 = arith.constant 0 : index
    %247 = vector.load %arg11[%c0_192, %c0_193] : memref<140x128xf32, #tpu.memory_space<vmem>>, vector<140x128xf32>
    tpu.vector_store %arg11[%c0_192, %c0_193], %246 {strides = array<i32>} : memref<140x128xf32, #tpu.memory_space<vmem>>, vector<140x128xf32>,
    %c28_194 = arith.constant 28 : index
    %c0_195 = arith.constant 0 : index
    %248 = vector.load %arg10[%c28_194, %c0_195] : memref<224x128xf32, #tpu.memory_space<vmem>>, vector<140x128xf32>
    %c0_196 = arith.constant 0 : index
    %c0_197 = arith.constant 0 : index
    %249 = vector.load %arg11[%c0_196, %c0_197] : memref<140x128xf32, #tpu.memory_space<vmem>>, vector<140x128xf32>
    %c10 = arith.constant 10 : index
    %c0_198 = arith.constant 0 : index
    %c0_199 = arith.constant 0 : index
    %250 = vector.load %arg4[%c10, %c0_198, %c0_199] : memref<25x128x128xf32, #tpu.memory_space<vmem>>, vector<1x128x128xf32>
    %251 = vector.shape_cast %250 : vector<1x128x128xf32> to vector<128x128xf32>
    %cst_200 = arith.constant dense<0.000000e+00> : vector<140x128xf32>
    %252 = tpu.matmul %248, %251, %cst_200 {dimension_numbers = #tpu.dot_dimension_numbers<[1], [0], [0], [1], [0, 0, 1, 1], [], []>} : vector<140x128xf32>, vector<128x128xf32>, vector<140x128xf32> -> vector<140x128xf32>
    %253 = arith.addf %249, %252 : vector<140x128xf32>
    %c0_201 = arith.constant 0 : index
    %c0_202 = arith.constant 0 : index
    %254 = vector.load %arg11[%c0_201, %c0_202] : memref<140x128xf32, #tpu.memory_space<vmem>>, vector<140x128xf32>
    tpu.vector_store %arg11[%c0_201, %c0_202], %253 {strides = array<i32>} : memref<140x128xf32, #tpu.memory_space<vmem>>, vector<140x128xf32>,
    %c29 = arith.constant 29 : index
    %c0_203 = arith.constant 0 : index
    %255 = vector.load %arg10[%c29, %c0_203] : memref<224x128xf32, #tpu.memory_space<vmem>>, vector<140x128xf32>
    %c0_204 = arith.constant 0 : index
    %c0_205 = arith.constant 0 : index
    %256 = vector.load %arg11[%c0_204, %c0_205] : memref<140x128xf32, #tpu.memory_space<vmem>>, vector<140x128xf32>
    %c11 = arith.constant 11 : index
    %c0_206 = arith.constant 0 : index
    %c0_207 = arith.constant 0 : index
    %257 = vector.load %arg4[%c11, %c0_206, %c0_207] : memref<25x128x128xf32, #tpu.memory_space<vmem>>, vector<1x128x128xf32>
    %258 = vector.shape_cast %257 : vector<1x128x128xf32> to vector<128x128xf32>
    %cst_208 = arith.constant dense<0.000000e+00> : vector<140x128xf32>
    %259 = tpu.matmul %255, %258, %cst_208 {dimension_numbers = #tpu.dot_dimension_numbers<[1], [0], [0], [1], [0, 0, 1, 1], [], []>} : vector<140x128xf32>, vector<128x128xf32>, vector<140x128xf32> -> vector<140x128xf32>
    %260 = arith.addf %256, %259 : vector<140x128xf32>
    %c0_209 = arith.constant 0 : index
    %c0_210 = arith.constant 0 : index
    %261 = vector.load %arg11[%c0_209, %c0_210] : memref<140x128xf32, #tpu.memory_space<vmem>>, vector<140x128xf32>
    tpu.vector_store %arg11[%c0_209, %c0_210], %260 {strides = array<i32>} : memref<140x128xf32, #tpu.memory_space<vmem>>, vector<140x128xf32>,
    %c30 = arith.constant 30 : index
    %c0_211 = arith.constant 0 : index
    %262 = vector.load %arg10[%c30, %c0_211] : memref<224x128xf32, #tpu.memory_space<vmem>>, vector<140x128xf32>
    %c0_212 = arith.constant 0 : index
    %c0_213 = arith.constant 0 : index
    %263 = vector.load %arg11[%c0_212, %c0_213] : memref<140x128xf32, #tpu.memory_space<vmem>>, vector<140x128xf32>
    %c12 = arith.constant 12 : index
    %c0_214 = arith.constant 0 : index
    %c0_215 = arith.constant 0 : index
    %264 = vector.load %arg4[%c12, %c0_214, %c0_215] : memref<25x128x128xf32, #tpu.memory_space<vmem>>, vector<1x128x128xf32>
    %265 = vector.shape_cast %264 : vector<1x128x128xf32> to vector<128x128xf32>
    %cst_216 = arith.constant dense<0.000000e+00> : vector<140x128xf32>
    %266 = tpu.matmul %262, %265, %cst_216 {dimension_numbers = #tpu.dot_dimension_numbers<[1], [0], [0], [1], [0, 0, 1, 1], [], []>} : vector<140x128xf32>, vector<128x128xf32>, vector<140x128xf32> -> vector<140x128xf32>
    %267 = arith.addf %263, %266 : vector<140x128xf32>
    %c0_217 = arith.constant 0 : index
    %c0_218 = arith.constant 0 : index
    %268 = vector.load %arg11[%c0_217, %c0_218] : memref<140x128xf32, #tpu.memory_space<vmem>>, vector<140x128xf32>
    tpu.vector_store %arg11[%c0_217, %c0_218], %267 {strides = array<i32>} : memref<140x128xf32, #tpu.memory_space<vmem>>, vector<140x128xf32>,
    %c31 = arith.constant 31 : index
    %c0_219 = arith.constant 0 : index
    %269 = vector.load %arg10[%c31, %c0_219] : memref<224x128xf32, #tpu.memory_space<vmem>>, vector<140x128xf32>
    %c0_220 = arith.constant 0 : index
    %c0_221 = arith.constant 0 : index
    %270 = vector.load %arg11[%c0_220, %c0_221] : memref<140x128xf32, #tpu.memory_space<vmem>>, vector<140x128xf32>
    %c13 = arith.constant 13 : index
    %c0_222 = arith.constant 0 : index
    %c0_223 = arith.constant 0 : index
    %271 = vector.load %arg4[%c13, %c0_222, %c0_223] : memref<25x128x128xf32, #tpu.memory_space<vmem>>, vector<1x128x128xf32>
    %272 = vector.shape_cast %271 : vector<1x128x128xf32> to vector<128x128xf32>
    %cst_224 = arith.constant dense<0.000000e+00> : vector<140x128xf32>
    %273 = tpu.matmul %269, %272, %cst_224 {dimension_numbers = #tpu.dot_dimension_numbers<[1], [0], [0], [1], [0, 0, 1, 1], [], []>} : vector<140x128xf32>, vector<128x128xf32>, vector<140x128xf32> -> vector<140x128xf32>
    %274 = arith.addf %270, %273 : vector<140x128xf32>
    %c0_225 = arith.constant 0 : index
    %c0_226 = arith.constant 0 : index
    %275 = vector.load %arg11[%c0_225, %c0_226] : memref<140x128xf32, #tpu.memory_space<vmem>>, vector<140x128xf32>
    tpu.vector_store %arg11[%c0_225, %c0_226], %274 {strides = array<i32>} : memref<140x128xf32, #tpu.memory_space<vmem>>, vector<140x128xf32>,
    %c32 = arith.constant 32 : index
    %c0_227 = arith.constant 0 : index
    %276 = vector.load %arg10[%c32, %c0_227] : memref<224x128xf32, #tpu.memory_space<vmem>>, vector<140x128xf32>
    %c0_228 = arith.constant 0 : index
    %c0_229 = arith.constant 0 : index
    %277 = vector.load %arg11[%c0_228, %c0_229] : memref<140x128xf32, #tpu.memory_space<vmem>>, vector<140x128xf32>
    %c14_230 = arith.constant 14 : index
    %c0_231 = arith.constant 0 : index
    %c0_232 = arith.constant 0 : index
    %278 = vector.load %arg4[%c14_230, %c0_231, %c0_232] : memref<25x128x128xf32, #tpu.memory_space<vmem>>, vector<1x128x128xf32>
    %279 = vector.shape_cast %278 : vector<1x128x128xf32> to vector<128x128xf32>
    %cst_233 = arith.constant dense<0.000000e+00> : vector<140x128xf32>
    %280 = tpu.matmul %276, %279, %cst_233 {dimension_numbers = #tpu.dot_dimension_numbers<[1], [0], [0], [1], [0, 0, 1, 1], [], []>} : vector<140x128xf32>, vector<128x128xf32>, vector<140x128xf32> -> vector<140x128xf32>
    %281 = arith.addf %277, %280 : vector<140x128xf32>
    %c0_234 = arith.constant 0 : index
    %c0_235 = arith.constant 0 : index
    %282 = vector.load %arg11[%c0_234, %c0_235] : memref<140x128xf32, #tpu.memory_space<vmem>>, vector<140x128xf32>
    tpu.vector_store %arg11[%c0_234, %c0_235], %281 {strides = array<i32>} : memref<140x128xf32, #tpu.memory_space<vmem>>, vector<140x128xf32>,
    %c42_236 = arith.constant 42 : index
    %c0_237 = arith.constant 0 : index
    %283 = vector.load %arg10[%c42_236, %c0_237] : memref<224x128xf32, #tpu.memory_space<vmem>>, vector<140x128xf32>
    %c0_238 = arith.constant 0 : index
    %c0_239 = arith.constant 0 : index
    %284 = vector.load %arg11[%c0_238, %c0_239] : memref<140x128xf32, #tpu.memory_space<vmem>>, vector<140x128xf32>
    %c15_240 = arith.constant 15 : index
    %c0_241 = arith.constant 0 : index
    %c0_242 = arith.constant 0 : index
    %285 = vector.load %arg4[%c15_240, %c0_241, %c0_242] : memref<25x128x128xf32, #tpu.memory_space<vmem>>, vector<1x128x128xf32>
    %286 = vector.shape_cast %285 : vector<1x128x128xf32> to vector<128x128xf32>
    %cst_243 = arith.constant dense<0.000000e+00> : vector<140x128xf32>
    %287 = tpu.matmul %283, %286, %cst_243 {dimension_numbers = #tpu.dot_dimension_numbers<[1], [0], [0], [1], [0, 0, 1, 1], [], []>} : vector<140x128xf32>, vector<128x128xf32>, vector<140x128xf32> -> vector<140x128xf32>
    %288 = arith.addf %284, %287 : vector<140x128xf32>
    %c0_244 = arith.constant 0 : index
    %c0_245 = arith.constant 0 : index
    %289 = vector.load %arg11[%c0_244, %c0_245] : memref<140x128xf32, #tpu.memory_space<vmem>>, vector<140x128xf32>
    tpu.vector_store %arg11[%c0_244, %c0_245], %288 {strides = array<i32>} : memref<140x128xf32, #tpu.memory_space<vmem>>, vector<140x128xf32>,
    %c43 = arith.constant 43 : index
    %c0_246 = arith.constant 0 : index
    %290 = vector.load %arg10[%c43, %c0_246] : memref<224x128xf32, #tpu.memory_space<vmem>>, vector<140x128xf32>
    %c0_247 = arith.constant 0 : index
    %c0_248 = arith.constant 0 : index
    %291 = vector.load %arg11[%c0_247, %c0_248] : memref<140x128xf32, #tpu.memory_space<vmem>>, vector<140x128xf32>
    %c16_249 = arith.constant 16 : index
    %c0_250 = arith.constant 0 : index
    %c0_251 = arith.constant 0 : index
    %292 = vector.load %arg4[%c16_249, %c0_250, %c0_251] : memref<25x128x128xf32, #tpu.memory_space<vmem>>, vector<1x128x128xf32>
    %293 = vector.shape_cast %292 : vector<1x128x128xf32> to vector<128x128xf32>
    %cst_252 = arith.constant dense<0.000000e+00> : vector<140x128xf32>
    %294 = tpu.matmul %290, %293, %cst_252 {dimension_numbers = #tpu.dot_dimension_numbers<[1], [0], [0], [1], [0, 0, 1, 1], [], []>} : vector<140x128xf32>, vector<128x128xf32>, vector<140x128xf32> -> vector<140x128xf32>
    %295 = arith.addf %291, %294 : vector<140x128xf32>
    %c0_253 = arith.constant 0 : index
    %c0_254 = arith.constant 0 : index
    %296 = vector.load %arg11[%c0_253, %c0_254] : memref<140x128xf32, #tpu.memory_space<vmem>>, vector<140x128xf32>
    tpu.vector_store %arg11[%c0_253, %c0_254], %295 {strides = array<i32>} : memref<140x128xf32, #tpu.memory_space<vmem>>, vector<140x128xf32>,
    %c44 = arith.constant 44 : index
    %c0_255 = arith.constant 0 : index
    %297 = vector.load %arg10[%c44, %c0_255] : memref<224x128xf32, #tpu.memory_space<vmem>>, vector<140x128xf32>
    %c0_256 = arith.constant 0 : index
    %c0_257 = arith.constant 0 : index
    %298 = vector.load %arg11[%c0_256, %c0_257] : memref<140x128xf32, #tpu.memory_space<vmem>>, vector<140x128xf32>
    %c17_258 = arith.constant 17 : index
    %c0_259 = arith.constant 0 : index
    %c0_260 = arith.constant 0 : index
    %299 = vector.load %arg4[%c17_258, %c0_259, %c0_260] : memref<25x128x128xf32, #tpu.memory_space<vmem>>, vector<1x128x128xf32>
    %300 = vector.shape_cast %299 : vector<1x128x128xf32> to vector<128x128xf32>
    %cst_261 = arith.constant dense<0.000000e+00> : vector<140x128xf32>
    %301 = tpu.matmul %297, %300, %cst_261 {dimension_numbers = #tpu.dot_dimension_numbers<[1], [0], [0], [1], [0, 0, 1, 1], [], []>} : vector<140x128xf32>, vector<128x128xf32>, vector<140x128xf32> -> vector<140x128xf32>
    %302 = arith.addf %298, %301 : vector<140x128xf32>
    %c0_262 = arith.constant 0 : index
    %c0_263 = arith.constant 0 : index
    %303 = vector.load %arg11[%c0_262, %c0_263] : memref<140x128xf32, #tpu.memory_space<vmem>>, vector<140x128xf32>
    tpu.vector_store %arg11[%c0_262, %c0_263], %302 {strides = array<i32>} : memref<140x128xf32, #tpu.memory_space<vmem>>, vector<140x128xf32>,
    %c45 = arith.constant 45 : index
    %c0_264 = arith.constant 0 : index
    %304 = vector.load %arg10[%c45, %c0_264] : memref<224x128xf32, #tpu.memory_space<vmem>>, vector<140x128xf32>
    %c0_265 = arith.constant 0 : index
    %c0_266 = arith.constant 0 : index
    %305 = vector.load %arg11[%c0_265, %c0_266] : memref<140x128xf32, #tpu.memory_space<vmem>>, vector<140x128xf32>
    %c18_267 = arith.constant 18 : index
    %c0_268 = arith.constant 0 : index
    %c0_269 = arith.constant 0 : index
    %306 = vector.load %arg4[%c18_267, %c0_268, %c0_269] : memref<25x128x128xf32, #tpu.memory_space<vmem>>, vector<1x128x128xf32>
    %307 = vector.shape_cast %306 : vector<1x128x128xf32> to vector<128x128xf32>
    %cst_270 = arith.constant dense<0.000000e+00> : vector<140x128xf32>
    %308 = tpu.matmul %304, %307, %cst_270 {dimension_numbers = #tpu.dot_dimension_numbers<[1], [0], [0], [1], [0, 0, 1, 1], [], []>} : vector<140x128xf32>, vector<128x128xf32>, vector<140x128xf32> -> vector<140x128xf32>
    %309 = arith.addf %305, %308 : vector<140x128xf32>
    %c0_271 = arith.constant 0 : index
    %c0_272 = arith.constant 0 : index
    %310 = vector.load %arg11[%c0_271, %c0_272] : memref<140x128xf32, #tpu.memory_space<vmem>>, vector<140x128xf32>
    tpu.vector_store %arg11[%c0_271, %c0_272], %309 {strides = array<i32>} : memref<140x128xf32, #tpu.memory_space<vmem>>, vector<140x128xf32>,
    %c46 = arith.constant 46 : index
    %c0_273 = arith.constant 0 : index
    %311 = vector.load %arg10[%c46, %c0_273] : memref<224x128xf32, #tpu.memory_space<vmem>>, vector<140x128xf32>
    %c0_274 = arith.constant 0 : index
    %c0_275 = arith.constant 0 : index
    %312 = vector.load %arg11[%c0_274, %c0_275] : memref<140x128xf32, #tpu.memory_space<vmem>>, vector<140x128xf32>
    %c19 = arith.constant 19 : index
    %c0_276 = arith.constant 0 : index
    %c0_277 = arith.constant 0 : index
    %313 = vector.load %arg4[%c19, %c0_276, %c0_277] : memref<25x128x128xf32, #tpu.memory_space<vmem>>, vector<1x128x128xf32>
    %314 = vector.shape_cast %313 : vector<1x128x128xf32> to vector<128x128xf32>
    %cst_278 = arith.constant dense<0.000000e+00> : vector<140x128xf32>
    %315 = tpu.matmul %311, %314, %cst_278 {dimension_numbers = #tpu.dot_dimension_numbers<[1], [0], [0], [1], [0, 0, 1, 1], [], []>} : vector<140x128xf32>, vector<128x128xf32>, vector<140x128xf32> -> vector<140x128xf32>
    %316 = arith.addf %312, %315 : vector<140x128xf32>
    %c0_279 = arith.constant 0 : index
    %c0_280 = arith.constant 0 : index
    %317 = vector.load %arg11[%c0_279, %c0_280] : memref<140x128xf32, #tpu.memory_space<vmem>>, vector<140x128xf32>
    tpu.vector_store %arg11[%c0_279, %c0_280], %316 {strides = array<i32>} : memref<140x128xf32, #tpu.memory_space<vmem>>, vector<140x128xf32>,
    %c56_281 = arith.constant 56 : index
    %c0_282 = arith.constant 0 : index
    %318 = vector.load %arg10[%c56_281, %c0_282] : memref<224x128xf32, #tpu.memory_space<vmem>>, vector<140x128xf32>
    %c0_283 = arith.constant 0 : index
    %c0_284 = arith.constant 0 : index
    %319 = vector.load %arg11[%c0_283, %c0_284] : memref<140x128xf32, #tpu.memory_space<vmem>>, vector<140x128xf32>
    %c20 = arith.constant 20 : index
    %c0_285 = arith.constant 0 : index
    %c0_286 = arith.constant 0 : index
    %320 = vector.load %arg4[%c20, %c0_285, %c0_286] : memref<25x128x128xf32, #tpu.memory_space<vmem>>, vector<1x128x128xf32>
    %321 = vector.shape_cast %320 : vector<1x128x128xf32> to vector<128x128xf32>
    %cst_287 = arith.constant dense<0.000000e+00> : vector<140x128xf32>
    %322 = tpu.matmul %318, %321, %cst_287 {dimension_numbers = #tpu.dot_dimension_numbers<[1], [0], [0], [1], [0, 0, 1, 1], [], []>} : vector<140x128xf32>, vector<128x128xf32>, vector<140x128xf32> -> vector<140x128xf32>
    %323 = arith.addf %319, %322 : vector<140x128xf32>
    %c0_288 = arith.constant 0 : index
    %c0_289 = arith.constant 0 : index
    %324 = vector.load %arg11[%c0_288, %c0_289] : memref<140x128xf32, #tpu.memory_space<vmem>>, vector<140x128xf32>
    tpu.vector_store %arg11[%c0_288, %c0_289], %323 {strides = array<i32>} : memref<140x128xf32, #tpu.memory_space<vmem>>, vector<140x128xf32>,
    %c57 = arith.constant 57 : index
    %c0_290 = arith.constant 0 : index
    %325 = vector.load %arg10[%c57, %c0_290] : memref<224x128xf32, #tpu.memory_space<vmem>>, vector<140x128xf32>
    %c0_291 = arith.constant 0 : index
    %c0_292 = arith.constant 0 : index
    %326 = vector.load %arg11[%c0_291, %c0_292] : memref<140x128xf32, #tpu.memory_space<vmem>>, vector<140x128xf32>
    %c21 = arith.constant 21 : index
    %c0_293 = arith.constant 0 : index
    %c0_294 = arith.constant 0 : index
    %327 = vector.load %arg4[%c21, %c0_293, %c0_294] : memref<25x128x128xf32, #tpu.memory_space<vmem>>, vector<1x128x128xf32>
    %328 = vector.shape_cast %327 : vector<1x128x128xf32> to vector<128x128xf32>
    %cst_295 = arith.constant dense<0.000000e+00> : vector<140x128xf32>
    %329 = tpu.matmul %325, %328, %cst_295 {dimension_numbers = #tpu.dot_dimension_numbers<[1], [0], [0], [1], [0, 0, 1, 1], [], []>} : vector<140x128xf32>, vector<128x128xf32>, vector<140x128xf32> -> vector<140x128xf32>
    %330 = arith.addf %326, %329 : vector<140x128xf32>
    %c0_296 = arith.constant 0 : index
    %c0_297 = arith.constant 0 : index
    %331 = vector.load %arg11[%c0_296, %c0_297] : memref<140x128xf32, #tpu.memory_space<vmem>>, vector<140x128xf32>
    tpu.vector_store %arg11[%c0_296, %c0_297], %330 {strides = array<i32>} : memref<140x128xf32, #tpu.memory_space<vmem>>, vector<140x128xf32>,
    %c58 = arith.constant 58 : index
    %c0_298 = arith.constant 0 : index
    %332 = vector.load %arg10[%c58, %c0_298] : memref<224x128xf32, #tpu.memory_space<vmem>>, vector<140x128xf32>
    %c0_299 = arith.constant 0 : index
    %c0_300 = arith.constant 0 : index
    %333 = vector.load %arg11[%c0_299, %c0_300] : memref<140x128xf32, #tpu.memory_space<vmem>>, vector<140x128xf32>
    %c22 = arith.constant 22 : index
    %c0_301 = arith.constant 0 : index
    %c0_302 = arith.constant 0 : index
    %334 = vector.load %arg4[%c22, %c0_301, %c0_302] : memref<25x128x128xf32, #tpu.memory_space<vmem>>, vector<1x128x128xf32>
    %335 = vector.shape_cast %334 : vector<1x128x128xf32> to vector<128x128xf32>
    %cst_303 = arith.constant dense<0.000000e+00> : vector<140x128xf32>
    %336 = tpu.matmul %332, %335, %cst_303 {dimension_numbers = #tpu.dot_dimension_numbers<[1], [0], [0], [1], [0, 0, 1, 1], [], []>} : vector<140x128xf32>, vector<128x128xf32>, vector<140x128xf32> -> vector<140x128xf32>
    %337 = arith.addf %333, %336 : vector<140x128xf32>
    %c0_304 = arith.constant 0 : index
    %c0_305 = arith.constant 0 : index
    %338 = vector.load %arg11[%c0_304, %c0_305] : memref<140x128xf32, #tpu.memory_space<vmem>>, vector<140x128xf32>
    tpu.vector_store %arg11[%c0_304, %c0_305], %337 {strides = array<i32>} : memref<140x128xf32, #tpu.memory_space<vmem>>, vector<140x128xf32>,
    %c59 = arith.constant 59 : index
    %c0_306 = arith.constant 0 : index
    %339 = vector.load %arg10[%c59, %c0_306] : memref<224x128xf32, #tpu.memory_space<vmem>>, vector<140x128xf32>
    %c0_307 = arith.constant 0 : index
    %c0_308 = arith.constant 0 : index
    %340 = vector.load %arg11[%c0_307, %c0_308] : memref<140x128xf32, #tpu.memory_space<vmem>>, vector<140x128xf32>
    %c23 = arith.constant 23 : index
    %c0_309 = arith.constant 0 : index
    %c0_310 = arith.constant 0 : index
    %341 = vector.load %arg4[%c23, %c0_309, %c0_310] : memref<25x128x128xf32, #tpu.memory_space<vmem>>, vector<1x128x128xf32>
    %342 = vector.shape_cast %341 : vector<1x128x128xf32> to vector<128x128xf32>
    %cst_311 = arith.constant dense<0.000000e+00> : vector<140x128xf32>
    %343 = tpu.matmul %339, %342, %cst_311 {dimension_numbers = #tpu.dot_dimension_numbers<[1], [0], [0], [1], [0, 0, 1, 1], [], []>} : vector<140x128xf32>, vector<128x128xf32>, vector<140x128xf32> -> vector<140x128xf32>
    %344 = arith.addf %340, %343 : vector<140x128xf32>
    %c0_312 = arith.constant 0 : index
    %c0_313 = arith.constant 0 : index
    %345 = vector.load %arg11[%c0_312, %c0_313] : memref<140x128xf32, #tpu.memory_space<vmem>>, vector<140x128xf32>
    tpu.vector_store %arg11[%c0_312, %c0_313], %344 {strides = array<i32>} : memref<140x128xf32, #tpu.memory_space<vmem>>, vector<140x128xf32>,
    %c60 = arith.constant 60 : index
    %c0_314 = arith.constant 0 : index
    %346 = vector.load %arg10[%c60, %c0_314] : memref<224x128xf32, #tpu.memory_space<vmem>>, vector<140x128xf32>
    %c0_315 = arith.constant 0 : index
    %c0_316 = arith.constant 0 : index
    %347 = vector.load %arg11[%c0_315, %c0_316] : memref<140x128xf32, #tpu.memory_space<vmem>>, vector<140x128xf32>
    %c24 = arith.constant 24 : index
    %c0_317 = arith.constant 0 : index
    %c0_318 = arith.constant 0 : index
    %348 = vector.load %arg4[%c24, %c0_317, %c0_318] : memref<25x128x128xf32, #tpu.memory_space<vmem>>, vector<1x128x128xf32>
    %349 = vector.shape_cast %348 : vector<1x128x128xf32> to vector<128x128xf32>
    %cst_319 = arith.constant dense<0.000000e+00> : vector<140x128xf32>
    %350 = tpu.matmul %346, %349, %cst_319 {dimension_numbers = #tpu.dot_dimension_numbers<[1], [0], [0], [1], [0, 0, 1, 1], [], []>} : vector<140x128xf32>, vector<128x128xf32>, vector<140x128xf32> -> vector<140x128xf32>
    %351 = arith.addf %347, %350 : vector<140x128xf32>
    %c0_320 = arith.constant 0 : index
    %c0_321 = arith.constant 0 : index
    %352 = vector.load %arg11[%c0_320, %c0_321] : memref<140x128xf32, #tpu.memory_space<vmem>>, vector<140x128xf32>
    tpu.vector_store %arg11[%c0_320, %c0_321], %351 {strides = array<i32>} : memref<140x128xf32, #tpu.memory_space<vmem>>, vector<140x128xf32>,
    %353 = tpu.iota {dimensions = array<i32: 0>} : vector<5x14xi32>
    %354 = tpu.iota {dimensions = array<i32: 1>} : vector<5x14xi32>
    %c2_i32_322 = arith.constant 2 : i32
    %355 = vector.broadcast %c2_i32_322 : i32 to vector<5x14xi32>
    %356 = arith.muli %355, %353 : vector<5x14xi32>
    %357 = arith.cmpi eq, %354, %356 : vector<5x14xi32>
    %358 = arith.extui %357 : vector<5x14xi1> to vector<5x14xi32>
    %359 = arith.sitofp %358 : vector<5x14xi32> to vector<5x14xf32>
    %c2_i32_323 = arith.constant 2 : i32
    %360 = vector.broadcast %c2_i32_323 : i32 to vector<5x14xi32>
    %361 = arith.muli %360, %353 : vector<5x14xi32>
    %c1_i32_324 = arith.constant 1 : i32
    %362 = vector.broadcast %c1_i32_324 : i32 to vector<5x14xi32>
    %363 = arith.addi %361, %362 : vector<5x14xi32>
    %364 = arith.cmpi eq, %354, %363 : vector<5x14xi32>
    %365 = arith.extui %364 : vector<5x14xi1> to vector<5x14xi32>
    %366 = arith.sitofp %365 : vector<5x14xi32> to vector<5x14xf32>
    %c0_325 = arith.constant 0 : index
    %c0_326 = arith.constant 0 : index
    %367 = vector.load %arg5[%c0_325, %c0_326] : memref<1x128xf32, #tpu.memory_space<vmem>>, vector<1x128xf32>
    %c0_327 = arith.constant 0 : index
    %c0_328 = arith.constant 0 : index
    %368 = vector.load %arg11[%c0_327, %c0_328] : memref<140x128xf32, #tpu.memory_space<vmem>>, vector<14x128xf32>
    %c14_329 = arith.constant 14 : index
    %c0_330 = arith.constant 0 : index
    %369 = vector.load %arg11[%c14_329, %c0_330] : memref<140x128xf32, #tpu.memory_space<vmem>>, vector<14x128xf32>
    %370 = arith.maximumf %368, %369 : vector<14x128xf32>
    %cst_331 = arith.constant dense<0.000000e+00> : vector<5x128xf32>
    %371 = tpu.matmul %359, %370, %cst_331 {dimension_numbers = #tpu.dot_dimension_numbers<[1], [0], [0], [1], [0, 0, 1, 1], [], []>} : vector<5x14xf32>, vector<14x128xf32>, vector<5x128xf32> -> vector<5x128xf32>
    %cst_332 = arith.constant dense<0.000000e+00> : vector<5x128xf32>
    %372 = tpu.matmul %366, %370, %cst_332 {dimension_numbers = #tpu.dot_dimension_numbers<[1], [0], [0], [1], [0, 0, 1, 1], [], []>} : vector<5x14xf32>, vector<14x128xf32>, vector<5x128xf32> -> vector<5x128xf32>
    %373 = arith.maximumf %371, %372 : vector<5x128xf32>
    %374 = vector.broadcast %367 : vector<1x128xf32> to vector<5x128xf32>
    %375 = arith.addf %373, %374 : vector<5x128xf32>
    %cst_333 = arith.constant 0.000000e+00 : f32
    %376 = vector.broadcast %cst_333 : f32 to vector<5x128xf32>
    %377 = arith.maximumf %375, %376 : vector<5x128xf32>
    %c0_334 = arith.constant 0 : index
    %c0_335 = arith.constant 0 : index
    %378 = vector.load %arg12[%c0_334, %c0_335] : memref<25x128xf32, #tpu.memory_space<vmem>>, vector<5x128xf32>
    tpu.vector_store %arg12[%c0_334, %c0_335], %377 {strides = array<i32>} : memref<25x128xf32, #tpu.memory_space<vmem>>, vector<5x128xf32>,
    %c28_336 = arith.constant 28 : index
    %c0_337 = arith.constant 0 : index
    %379 = vector.load %arg11[%c28_336, %c0_337] : memref<140x128xf32, #tpu.memory_space<vmem>>, vector<14x128xf32>
    %c42_338 = arith.constant 42 : index
    %c0_339 = arith.constant 0 : index
    %380 = vector.load %arg11[%c42_338, %c0_339] : memref<140x128xf32, #tpu.memory_space<vmem>>, vector<14x128xf32>
    %381 = arith.maximumf %379, %380 : vector<14x128xf32>
    %cst_340 = arith.constant dense<0.000000e+00> : vector<5x128xf32>
    %382 = tpu.matmul %359, %381, %cst_340 {dimension_numbers = #tpu.dot_dimension_numbers<[1], [0], [0], [1], [0, 0, 1, 1], [], []>} : vector<5x14xf32>, vector<14x128xf32>, vector<5x128xf32> -> vector<5x128xf32>
    %cst_341 = arith.constant dense<0.000000e+00> : vector<5x128xf32>
    %383 = tpu.matmul %366, %381, %cst_341 {dimension_numbers = #tpu.dot_dimension_numbers<[1], [0], [0], [1], [0, 0, 1, 1], [], []>} : vector<5x14xf32>, vector<14x128xf32>, vector<5x128xf32> -> vector<5x128xf32>
    %384 = arith.maximumf %382, %383 : vector<5x128xf32>
    %385 = vector.broadcast %367 : vector<1x128xf32> to vector<5x128xf32>
    %386 = arith.addf %384, %385 : vector<5x128xf32>
    %cst_342 = arith.constant 0.000000e+00 : f32
    %387 = vector.broadcast %cst_342 : f32 to vector<5x128xf32>
    %388 = arith.maximumf %386, %387 : vector<5x128xf32>
    %c5_343 = arith.constant 5 : index
    %c0_344 = arith.constant 0 : index
    %389 = vector.load %arg12[%c5_343, %c0_344] : memref<25x128xf32, #tpu.memory_space<vmem>>, vector<5x128xf32>
    tpu.vector_store %arg12[%c5_343, %c0_344], %388 {strides = array<i32>} : memref<25x128xf32, #tpu.memory_space<vmem>>, vector<5x128xf32>,
    %c56_345 = arith.constant 56 : index
    %c0_346 = arith.constant 0 : index
    %390 = vector.load %arg11[%c56_345, %c0_346] : memref<140x128xf32, #tpu.memory_space<vmem>>, vector<14x128xf32>
    %c70_347 = arith.constant 70 : index
    %c0_348 = arith.constant 0 : index
    %391 = vector.load %arg11[%c70_347, %c0_348] : memref<140x128xf32, #tpu.memory_space<vmem>>, vector<14x128xf32>
    %392 = arith.maximumf %390, %391 : vector<14x128xf32>
    %cst_349 = arith.constant dense<0.000000e+00> : vector<5x128xf32>
    %393 = tpu.matmul %359, %392, %cst_349 {dimension_numbers = #tpu.dot_dimension_numbers<[1], [0], [0], [1], [0, 0, 1, 1], [], []>} : vector<5x14xf32>, vector<14x128xf32>, vector<5x128xf32> -> vector<5x128xf32>
    %cst_350 = arith.constant dense<0.000000e+00> : vector<5x128xf32>
    %394 = tpu.matmul %366, %392, %cst_350 {dimension_numbers = #tpu.dot_dimension_numbers<[1], [0], [0], [1], [0, 0, 1, 1], [], []>} : vector<5x14xf32>, vector<14x128xf32>, vector<5x128xf32> -> vector<5x128xf32>
    %395 = arith.maximumf %393, %394 : vector<5x128xf32>
    %396 = vector.broadcast %367 : vector<1x128xf32> to vector<5x128xf32>
    %397 = arith.addf %395, %396 : vector<5x128xf32>
    %cst_351 = arith.constant 0.000000e+00 : f32
    %398 = vector.broadcast %cst_351 : f32 to vector<5x128xf32>
    %399 = arith.maximumf %397, %398 : vector<5x128xf32>
    %c10_352 = arith.constant 10 : index
    %c0_353 = arith.constant 0 : index
    %400 = vector.load %arg12[%c10_352, %c0_353] : memref<25x128xf32, #tpu.memory_space<vmem>>, vector<5x128xf32>
    tpu.vector_store %arg12[%c10_352, %c0_353], %399 {strides = array<i32>} : memref<25x128xf32, #tpu.memory_space<vmem>>, vector<5x128xf32>,
    %c84_354 = arith.constant 84 : index
    %c0_355 = arith.constant 0 : index
    %401 = vector.load %arg11[%c84_354, %c0_355] : memref<140x128xf32, #tpu.memory_space<vmem>>, vector<14x128xf32>
    %c98_356 = arith.constant 98 : index
    %c0_357 = arith.constant 0 : index
    %402 = vector.load %arg11[%c98_356, %c0_357] : memref<140x128xf32, #tpu.memory_space<vmem>>, vector<14x128xf32>
    %403 = arith.maximumf %401, %402 : vector<14x128xf32>
    %cst_358 = arith.constant dense<0.000000e+00> : vector<5x128xf32>
    %404 = tpu.matmul %359, %403, %cst_358 {dimension_numbers = #tpu.dot_dimension_numbers<[1], [0], [0], [1], [0, 0, 1, 1], [], []>} : vector<5x14xf32>, vector<14x128xf32>, vector<5x128xf32> -> vector<5x128xf32>
    %cst_359 = arith.constant dense<0.000000e+00> : vector<5x128xf32>
    %405 = tpu.matmul %366, %403, %cst_359 {dimension_numbers = #tpu.dot_dimension_numbers<[1], [0], [0], [1], [0, 0, 1, 1], [], []>} : vector<5x14xf32>, vector<14x128xf32>, vector<5x128xf32> -> vector<5x128xf32>
    %406 = arith.maximumf %404, %405 : vector<5x128xf32>
    %407 = vector.broadcast %367 : vector<1x128xf32> to vector<5x128xf32>
    %408 = arith.addf %406, %407 : vector<5x128xf32>
    %cst_360 = arith.constant 0.000000e+00 : f32
    %409 = vector.broadcast %cst_360 : f32 to vector<5x128xf32>
    %410 = arith.maximumf %408, %409 : vector<5x128xf32>
    %c15_361 = arith.constant 15 : index
    %c0_362 = arith.constant 0 : index
    %411 = vector.load %arg12[%c15_361, %c0_362] : memref<25x128xf32, #tpu.memory_space<vmem>>, vector<5x128xf32>
    tpu.vector_store %arg12[%c15_361, %c0_362], %410 {strides = array<i32>} : memref<25x128xf32, #tpu.memory_space<vmem>>, vector<5x128xf32>,
    %c112_363 = arith.constant 112 : index
    %c0_364 = arith.constant 0 : index
    %412 = vector.load %arg11[%c112_363, %c0_364] : memref<140x128xf32, #tpu.memory_space<vmem>>, vector<14x128xf32>
    %c126_365 = arith.constant 126 : index
    %c0_366 = arith.constant 0 : index
    %413 = vector.load %arg11[%c126_365, %c0_366] : memref<140x128xf32, #tpu.memory_space<vmem>>, vector<14x128xf32>
    %414 = arith.maximumf %412, %413 : vector<14x128xf32>
    %cst_367 = arith.constant dense<0.000000e+00> : vector<5x128xf32>
    %415 = tpu.matmul %359, %414, %cst_367 {dimension_numbers = #tpu.dot_dimension_numbers<[1], [0], [0], [1], [0, 0, 1, 1], [], []>} : vector<5x14xf32>, vector<14x128xf32>, vector<5x128xf32> -> vector<5x128xf32>
    %cst_368 = arith.constant dense<0.000000e+00> : vector<5x128xf32>
    %416 = tpu.matmul %366, %414, %cst_368 {dimension_numbers = #tpu.dot_dimension_numbers<[1], [0], [0], [1], [0, 0, 1, 1], [], []>} : vector<5x14xf32>, vector<14x128xf32>, vector<5x128xf32> -> vector<5x128xf32>
    %417 = arith.maximumf %415, %416 : vector<5x128xf32>
    %418 = vector.broadcast %367 : vector<1x128xf32> to vector<5x128xf32>
    %419 = arith.addf %417, %418 : vector<5x128xf32>
    %cst_369 = arith.constant 0.000000e+00 : f32
    %420 = vector.broadcast %cst_369 : f32 to vector<5x128xf32>
    %421 = arith.maximumf %419, %420 : vector<5x128xf32>
    %c20_370 = arith.constant 20 : index
    %c0_371 = arith.constant 0 : index
    %422 = vector.load %arg12[%c20_370, %c0_371] : memref<25x128xf32, #tpu.memory_space<vmem>>, vector<5x128xf32>
    tpu.vector_store %arg12[%c20_370, %c0_371], %421 {strides = array<i32>} : memref<25x128xf32, #tpu.memory_space<vmem>>, vector<5x128xf32>,
    %c0_372 = arith.constant 0 : index
    %c0_373 = arith.constant 0 : index
    %423 = vector.load %arg12[%c0_372, %c0_373] : memref<25x128xf32, #tpu.memory_space<vmem>>, vector<25x128xf32>
    %c0_374 = arith.constant 0 : index
    %c0_375 = arith.constant 0 : index
    %424 = vector.load %arg6[%c0_374, %c0_375] : memref<25x128xf32, #tpu.memory_space<vmem>>, vector<25x128xf32>
    %425 = arith.mulf %423, %424 : vector<25x128xf32>
    %cst_376 = arith.constant dense<0.000000e+00> : vector<25xf32>
    %426 = vector.multi_reduction <add>, %425, %cst_376 [1] : vector<25x128xf32> to vector<25xf32>
    %427 = vector.shape_cast %426 : vector<25xf32> to vector<25x1xf32>
    %cst_377 = arith.constant dense<0.000000e+00> : vector<1xf32>
    %428 = vector.multi_reduction <add>, %427, %cst_377 [0] : vector<25x1xf32> to vector<1xf32>
    %429 = vector.shape_cast %428 : vector<1xf32> to vector<1x1xf32>
    %c0_378 = arith.constant 0 : index
    %c0_379 = arith.constant 0 : index
    %430 = vector.load %arg7[%c0_378, %c0_379] : memref<1x128xf32, #tpu.memory_space<vmem>>, vector<1x128xf32>
    %431 = vector.broadcast %429 : vector<1x1xf32> to vector<1x128xf32>
    %432 = arith.addf %431, %430 : vector<1x128xf32>
    %433 = arith.negf %432 : vector<1x128xf32>
    %434 = math.exp %433 : vector<1x128xf32>
    %cst_380 = arith.constant 1.000000e+00 : f32
    %435 = vector.broadcast %cst_380 : f32 to vector<1x128xf32>
    %436 = arith.addf %435, %434 : vector<1x128xf32>
    %437 = arith.divf %435, %436 : vector<1x128xf32>
    %438 = vector.shape_cast %437 : vector<1x128xf32> to vector<1x128xf32>
    %439 = vector.broadcast %438 : vector<1x128xf32> to vector<8x128xf32>
    %c0_381 = arith.constant 0 : index
    %c0_382 = arith.constant 0 : index
    %c0_383 = arith.constant 0 : index
    %440 = vector.load %arg8[%c0_381, %c0_382, %c0_383] : memref<1x8x128xf32, #tpu.memory_space<vmem>>, vector<1x8x128xf32>
    %441 = vector.shape_cast %440 : vector<1x8x128xf32> to vector<8x128xf32>
    %442 = vector.shape_cast %439 : vector<8x128xf32> to vector<1x8x128xf32>
    tpu.vector_store %arg8[%c0_381, %c0_382, %c0_383], %442 {strides = array<i32>} : memref<1x8x128xf32, #tpu.memory_space<vmem>>, vector<1x8x128xf32>,
    return
  }
  func.func @transform_0(%arg0: i32) -> (i32, i32, i32) {
    %c0_i32 = arith.constant 0 : i32
    %c0_i32_0 = arith.constant 0 : i32
    %c0_i32_1 = arith.constant 0 : i32
    return %arg0, %c0_i32, %c0_i32_0 : i32, i32, i32
  }
  func.func @transform_1(%arg0: i32) -> (i32, i32) {
    %c0_i32 = arith.constant 0 : i32
    %c0_i32_0 = arith.constant 0 : i32
    %c0_i32_1 = arith.constant 0 : i32
    return %c0_i32, %c0_i32_0 : i32, i32
  }
  func.func @transform_2(%arg0: i32) -> (i32, i32) {
    %c0_i32 = arith.constant 0 : i32
    %c0_i32_0 = arith.constant 0 : i32
    %c0_i32_1 = arith.constant 0 : i32
    return %c0_i32, %c0_i32_0 : i32, i32
  }
  func.func @transform_3(%arg0: i32) -> (i32, i32, i32) {
    %c0_i32 = arith.constant 0 : i32
    %c0_i32_0 = arith.constant 0 : i32
    %c0_i32_1 = arith.constant 0 : i32
    %c0_i32_2 = arith.constant 0 : i32
    return %c0_i32, %c0_i32_0, %c0_i32_1 : i32, i32, i32
  }
  func.func @transform_4(%arg0: i32) -> (i32, i32) {
    %c0_i32 = arith.constant 0 : i32
    %c0_i32_0 = arith.constant 0 : i32
    %c0_i32_1 = arith.constant 0 : i32
    return %c0_i32, %c0_i32_0 : i32, i32
  }
  func.func @transform_5(%arg0: i32) -> (i32, i32) {
    %c0_i32 = arith.constant 0 : i32
    %c0_i32_0 = arith.constant 0 : i32
    %c0_i32_1 = arith.constant 0 : i32
    return %c0_i32, %c0_i32_0 : i32, i32
  }
  func.func @transform_6(%arg0: i32) -> (i32, i32) {
    %c0_i32 = arith.constant 0 : i32
    %c0_i32_0 = arith.constant 0 : i32
    %c0_i32_1 = arith.constant 0 : i32
    return %c0_i32, %c0_i32_0 : i32, i32
  }
  func.func @transform_7(%arg0: i32) -> (i32, i32, i32) {
    %c0_i32 = arith.constant 0 : i32
    %c0_i32_0 = arith.constant 0 : i32
    %c0_i32_1 = arith.constant 0 : i32
    return %arg0, %c0_i32, %c0_i32_0 : i32, i32, i32
  }
}

</mosaic_0001>

<bundles_post_ra>
// kernel: cnn_forward.1
= control target key start
LH: loop header
LB: loop body
LE: loop exit
PB: predicated region body
PF: predicated region fallthrough
CT: control target
= control target key end

     0   :  { %s15934_s24 = smov 0   ;;  %s18218_s0 = inlined_call_operand.vmem [shape: f32[2,784,128], index: 0, kind: input, shape index: {}]   ;;  %s18219_s1 = inlined_call_operand.vmem [shape: f32[128,128], index: 1, kind: input, shape index: {}]   ;;  %s18220_s2 = inlined_call_operand.vmem [shape: f32[1,128], index: 2, kind: input, shape index: {}]   ;;  %s18221_s3 = inlined_call_operand.vmem [shape: f32[25,128,128], index: 3, kind: input, shape index: {}]   ;;  %s18222_s4 = inlined_call_operand.vmem [shape: f32[1,128], index: 4, kind: input, shape index: {}]   ;;  %s18223_s5 = inlined_call_operand.vmem [shape: f32[25,128], index: 5, kind: input, shape index: {}]   ;;  %s18224_s6 = inlined_call_operand.vmem [shape: f32[1,128], index: 6, kind: input, shape index: {}]   ;;  %s18225_s7 = inlined_call_operand.vmem [shape: f32[2,8,128], index: 7, kind: output, shape index: {}]  }
   0x1 LB: > { %s10507_s25 = sadd.s32 4294967295, %s15888_s24   ;;  %p10511_p0 = scmp.ge.s32.totalorder %s15888_s24, 1  ;;  %s15888_s24 = sphi %s15934_s24, %s17_s24  }
   0x2   : > { %p237_p1 = scmp.lt.s32.totalorder %s15888_s24, 3 }
   0x4   : > { %p238_p2 = pnand %p10511_p0, %p237_p1 }
   0x5   : > { %v375_v0 = vld [vmem:[%s18219_s1] sm:$0xff] (!%p238_p2)  ;;  %v376_v1 = vld [vmem:[%s18219_s1 + $0x8] sm:$0xff] (!%p238_p2)  ;;  %v377_v2 = vld [vmem:[%s18219_s1 + $0x10] sm:$0xff] (!%p238_p2)  ;;  %p268_p3 = scmp.lt.s32.totalorder (!%p238_p2), %s10507_s25, 1  ;;  %vm1082_vm1 = vcmask (!%p238_p2), 228352   ;;  %vm1089_vm2 = vcmask (!%p238_p2), 1043456  }
   0x6   : > { %241 = sbr.rel (%p238_p2) target bundleno = 2022 (0x7e6), region = 48  ;;  %v14205_v3 = vpack.c.bf16 (!%p238_p2), %v376_v1, %v375_v0  ;;  %v378_v4 = vld [vmem:[%s18219_s1 + $0x18] sm:$0xff] (!%p238_p2)  ;;  %v379_v6 = vld [vmem:[%s18219_s1 + $0x20] sm:$0xff] (!%p238_p2)  ;;  %v380_v7 = vld [vmem:[%s18219_s1 + $0x28] sm:$0xff] (!%p238_p2)  ;;  %vm15891_vm3 = vmmov (!%p238_p2), 1   ;;  %vm15893_vm8 = vmmov (!%p238_p2), 0  }
   0x7   : > { %v14209_v5 = vpack.c.bf16 (!%p238_p2), %v378_v4, %v377_v2  ;;  %v14213_v8 = vpack.c.bf16 (!%p238_p2), %v380_v7, %v379_v6  ;;  %v381_v9 = vld [vmem:[%s18219_s1 + $0x30] sm:$0xff] (!%p238_p2)  ;;  %v382_v10 = vld [vmem:[%s18219_s1 + $0x38] sm:$0xff] (!%p238_p2)  ;;  %v383_v13 = vld [vmem:[%s18219_s1 + $0x40] sm:$0xff] (!%p238_p2)  ;;  %vm9639_vm9 = vcmask (!%p238_p2), 1045504   ;;  %vm9636_vm11 = vcmask (!%p238_p2), 113664  }
   0x8   : > { %14206 = vmatprep.subr.bf16.mxu1 (!%p238_p2), %v14205_v3  ;;  %v14217_v12 = vpack.c.bf16 (!%p238_p2), %v382_v10, %v381_v9  ;;  %v384_v14 = vld [vmem:[%s18219_s1 + $0x48] sm:$0xff] (!%p238_p2)  ;;  %v385_v16 = vld [vmem:[%s18219_s1 + $0x50] sm:$0xff] (!%p238_p2)  ;;  %v386_v17 = vld [vmem:[%s18219_s1 + $0x58] sm:$0xff] (!%p238_p2)  ;;  %vm10425_vm12 = vcmask (!%p238_p2), 1040384  }
   0x9   : > { %14208 = vmatpush3.bf16.msra.mxu1 (!%p238_p2), %v14205_v3  ;;  %v14221_v15 = vpack.c.bf16 (!%p238_p2), %v384_v14, %v383_v13  ;;  %v14225_v18 = vpack.c.bf16 (!%p238_p2), %v386_v17, %v385_v16  ;;  %v387_v19 = vld [vmem:[%s18219_s1 + $0x60] sm:$0xff] (!%p238_p2)  ;;  %v388_v20 = vld [vmem:[%s18219_s1 + $0x68] sm:$0xff] (!%p238_p2)  ;;  %v389_v22 = vld [vmem:[%s18219_s1 + $0x70] sm:$0xff] (!%p238_p2) }
   0xa   : > { %14210 = vmatprep.subr.bf16.mxu1 (!%p238_p2), %v14209_v5  ;;  %v14229_v21 = vpack.c.bf16 (!%p238_p2), %v388_v20, %v387_v19  ;;  %v390_v23 = vld [vmem:[%s18219_s1 + $0x78] sm:$0xff] (!%p238_p2)  ;;  %v15890_v19 = vmov (!%p238_p2), 0.0   ;;  %vm16115_vm4 = vmpackc.low (!%p238_p2), %vm1089_vm2, %vm15891_vm3 }
   0xb   : > { %v14233_v24 = vpack.c.bf16 (!%p238_p2), %v390_v23, %v389_v22  ;;  %1067 = vst [vmem:[#allocation3 + $0xcc] sm:$0xff] (!%p238_p2), %v15890_v19  ;;  %1066 = vst [vmem:[#allocation3 + $0xc4] sm:$0xff] (!%p238_p2), %v15890_v19 }
   0xc   : > { %3529 = vst [vmem:[#allocation4 + $0x88] sm:$0xf] (!%p238_p2), %v15890_v19  ;;  %vm18119_vm10 = vmpackc.low (!%p238_p2), %vm9639_vm9, %vm15891_vm3 }
   0xd   : > { %s18231_s25 = smov (!%p268_p3, %s10507_s25), 1  ;;  %14212 = vmatpush3.bf16.msra.mxu1 %v14209_v5 }
   0xe   : > { %s15861_s15 = smul.u32 784, %s18231_s25  ;;  %14214 = vmatprep.subr.bf16.mxu1 %v14213_v8 }
  0x10   : > { %s15972_s22 = scalar_lea.vmem %s18218_s0, %s15861_s15  ;;  %s10513_s15 = sshll.u32 %s18231_s25, 3 }
  0x11   : > { %v277_v11 = vld [vmem:[%s15972_s22] sm:$0xff]  ;;  %14216 = vmatpush3.bf16.msra.mxu1 %v14213_v8  ;;  %v278_v25 = vld [vmem:[%s15972_s22 + $0x8] sm:$0xff]  ;;  %v279_v26 = vld [vmem:[%s15972_s22 + $0x10] sm:$0xff]  ;;  %s276_s18 = scalar_lea.vmem %s18225_s7, %s10513_s15 }
  0x12   : > { %12205 = vmatprep.mubr.f32.mxu1 %v277_v11  ;;  %14218 = vmatprep.subr.bf16.mxu1 %v14217_v12  ;;  %v280_v27 = vld [vmem:[%s15972_s22 + $0x18] sm:$0xff]  ;;  %v281_v28 = vld [vmem:[%s15972_s22 + $0x20] sm:$0xff]  ;;  %v282_v29 = vld [vmem:[%s15972_s22 + $0x28] sm:$0xff] }
  0x13   : > { %v283_v30 = vld [vmem:[%s15972_s22 + $0x30] sm:$0xff]  ;;  %v284_v31 = vld [vmem:[%s15972_s22 + $0x38] sm:$0xff]  ;;  %v285_v32 = vld [vmem:[%s15972_s22 + $0x40] sm:$0xff] }
  0x14   : > { %v286_v33 = vld [vmem:[%s15972_s22 + $0x48] sm:$0xff]  ;;  %v287_v34 = vld [vmem:[%s15972_s22 + $0x50] sm:$0xff]  ;;  %v288_v35 = vld [vmem:[%s15972_s22 + $0x58] sm:$0xff] }
  0x15   : > { %14220 = vmatpush3.bf16.msra.mxu1 %v14217_v12  ;;  %v289_v36 = vld [vmem:[%s15972_s22 + $0x60] sm:$0xff]  ;;  %v290_v37 = vld [vmem:[%s15972_s22 + $0x68] sm:$0xff]  ;;  %v291_v38 = vld [vmem:[%s15972_s22 + $0x70] sm:$0xff] }
  0x16   : > { %14222 = vmatprep.subr.bf16.mxu1 %v14221_v15  ;;  %v292_v39 = vld [vmem:[%s15972_s22 + $0x78] sm:$0xff]  ;;  %v293_v40 = vld [vmem:[%s15972_s22 + $0x80] sm:$0xff]  ;;  %v294_v41 = vld [vmem:[%s15972_s22 + $0x88] sm:$0xff] }
  0x17   : > { %v295_v42 = vld [vmem:[%s15972_s22 + $0x90] sm:$0xff]  ;;  %v296_v43 = vld [vmem:[%s15972_s22 + $0x98] sm:$0xff]  ;;  %v297_v44 = vld [vmem:[%s15972_s22 + $0xa0] sm:$0xff] }
  0x18   : > { %v298_v45 = vld [vmem:[%s15972_s22 + $0xa8] sm:$0xff]  ;;  %v299_v46 = vld [vmem:[%s15972_s22 + $0xb0] sm:$0xff]  ;;  %v300_v47 = vld [vmem:[%s15972_s22 + $0xb8] sm:$0xff] }
  0x19   : > { %14224 = vmatpush3.bf16.msra.mxu1 %v14221_v15  ;;  %v301_v48 = vld [vmem:[%s15972_s22 + $0xc0] sm:$0xff]  ;;  %v302_v49 = vld [vmem:[%s15972_s22 + $0xc8] sm:$0xff]  ;;  %v303_v50 = vld [vmem:[%s15972_s22 + $0xd0] sm:$0xff] }
  0x1a   : > { %14226 = vmatprep.subr.bf16.mxu1 %v14225_v18  ;;  %v304_v51 = vld [vmem:[%s15972_s22 + $0xd8] sm:$0xff]  ;;  %v305_v52 = vld [vmem:[%s15972_s22 + $0xe0] sm:$0xff]  ;;  %v306_v53 = vld [vmem:[%s15972_s22 + $0xe8] sm:$0xff] }
  0x1b   : > { %v307_v54 = vld [vmem:[%s15972_s22 + $0xf0] sm:$0xff]  ;;  %v308_v55 = vld [vmem:[%s15972_s22 + $0xf8] sm:$0xff]  ;;  %v309_v56 = vld [vmem:[%s15972_s22 + $0x100] sm:$0xff] }
  0x1c   : > { %v310_v57 = vld [vmem:[%s15972_s22 + $0x108] sm:$0xff]  ;;  %v311_v58 = vld [vmem:[%s15972_s22 + $0x110] sm:$0xff]  ;;  %v312_v59 = vld [vmem:[%s15972_s22 + $0x118] sm:$0xff] }
  0x1d   : > { %14228 = vmatpush3.bf16.msra.mxu1 %v14225_v18  ;;  %v313_v60 = vld [vmem:[%s15972_s22 + $0x120] sm:$0xff]  ;;  %v314_v61 = vld [vmem:[%s15972_s22 + $0x128] sm:$0xff]  ;;  %v315_v62 = vld [vmem:[%s15972_s22 + $0x130] sm:$0xff] }
  0x1e   : > { %14230 = vmatprep.subr.bf16.mxu1 %v14229_v21  ;;  %v316_v63 = vld [vmem:[%s15972_s22 + $0x138] sm:$0xff]  ;;  %v317_v0 = vld [vmem:[%s15972_s22 + $0x140] sm:$0xff]  ;;  %v318_v1 = vld [vmem:[%s15972_s22 + $0x148] sm:$0xff] }
  0x1f   : > { %v319_v2 = vld [vmem:[%s15972_s22 + $0x150] sm:$0xff]  ;;  %v320_v3 = vld [vmem:[%s15972_s22 + $0x158] sm:$0xff]  ;;  %v321_v4 = vld [vmem:[%s15972_s22 + $0x160] sm:$0xff] }
  0x20   : > { %v322_v5 = vld [vmem:[%s15972_s22 + $0x168] sm:$0xff]  ;;  %v323_v6 = vld [vmem:[%s15972_s22 + $0x170] sm:$0xff]  ;;  %v324_v7 = vld [vmem:[%s15972_s22 + $0x178] sm:$0xff] }
  0x21   : > { %14232 = vmatpush3.bf16.msra.mxu1 %v14229_v21  ;;  %v325_v8 = vld [vmem:[%s15972_s22 + $0x180] sm:$0xff]  ;;  %v326_v9 = vld [vmem:[%s15972_s22 + $0x188] sm:$0xff]  ;;  %v327_v10 = vld [vmem:[%s15972_s22 + $0x190] sm:$0xff] }
  0x22   : > { %14234 = vmatprep.subr.bf16.mxu1 %v14233_v24  ;;  %v328_v11 = vld [vmem:[%s15972_s22 + $0x198] sm:$0xff]  ;;  %v329_v12 = vld [vmem:[%s15972_s22 + $0x1a0] sm:$0xff]  ;;  %v330_v13 = vld [vmem:[%s15972_s22 + $0x1a8] sm:$0xff] }
  0x23   : > { %v331_v14 = vld [vmem:[%s15972_s22 + $0x1b0] sm:$0xff]  ;;  %v332_v15 = vld [vmem:[%s15972_s22 + $0x1b8] sm:$0xff]  ;;  %v333_v16 = vld [vmem:[%s15972_s22 + $0x1c0] sm:$0xff] }
  0x24   : > { %v334_v17 = vld [vmem:[%s15972_s22 + $0x1c8] sm:$0xff]  ;;  %v335_v18 = vld [vmem:[%s15972_s22 + $0x1d0] sm:$0xff]  ;;  %v336_v20 = vld [vmem:[%s15972_s22 + $0x1d8] sm:$0xff] }
  0x25   : > { %14236 = vmatpush3.bf16.msra.mxu1 %v14233_v24  ;;  %v337_v21 = vld [vmem:[%s15972_s22 + $0x1e0] sm:$0xff]  ;;  %v338_v22 = vld [vmem:[%s15972_s22 + $0x1e8] sm:$0xff]  ;;  %v339_v23 = vld [vmem:[%s15972_s22 + $0x1f0] sm:$0xff] }
  0x26   : > { %v340_v24 = vld [vmem:[%s15972_s22 + $0x1f8] sm:$0xff] }
  0x28   : > { %12206 = vmatmul.mubr.f32.vlgmr.msra.gmra.mrb[0].mxu1 %v278_v25  ;;  %v341_v25 = vld [vmem:[%s15972_s22 + $0x200] sm:$0xff] }
  0x29   : > { %12208 = vmatprep.mubr.f32.mxu1 %v279_v26  ;;  %v342_v26 = vld [vmem:[%s15972_s22 + $0x208] sm:$0xff] }
  0x2c   : > { %12209 = vmatmul.mubr.f32.gmra.mrb[2].mxu1 %v280_v27  ;;  %v343_v27 = vld [vmem:[%s15972_s22 + $0x210] sm:$0xff] }
  0x2d   : > { %12211 = vmatprep.mubr.f32.mxu1 %v281_v28  ;;  %v344_v28 = vld [vmem:[%s15972_s22 + $0x218] sm:$0xff] }
  0x30   : > { %12212 = vmatmul.mubr.f32.gmra.mrb[4].mxu1 %v282_v29  ;;  %v345_v29 = vld [vmem:[%s15972_s22 + $0x220] sm:$0xff] }
  0x31   : > { %12214 = vmatprep.mubr.f32.mxu1 %v283_v30  ;;  %v346_v30 = vld [vmem:[%s15972_s22 + $0x228] sm:$0xff] }
  0x34   : > { %12215 = vmatmul.mubr.f32.gmra.mrb[6].mxu1 %v284_v31  ;;  %v347_v31 = vld [vmem:[%s15972_s22 + $0x230] sm:$0xff] }
  0x35   : > { %12217 = vmatprep.mubr.f32.mxu1 %v285_v32  ;;  %v348_v32 = vld [vmem:[%s15972_s22 + $0x238] sm:$0xff] }
  0x38   : > { %12218 = vmatmul.mubr.f32.gmra.mrb[8].mxu1 %v286_v33  ;;  %v349_v33 = vld [vmem:[%s15972_s22 + $0x240] sm:$0xff] }
  0x39   : > { %12220 = vmatprep.mubr.f32.mxu1 %v287_v34  ;;  %v350_v34 = vld [vmem:[%s15972_s22 + $0x248] sm:$0xff] }
  0x3c   : > { %12221 = vmatmul.mubr.f32.gmra.mrb[10].mxu1 %v288_v35  ;;  %v351_v35 = vld [vmem:[%s15972_s22 + $0x250] sm:$0xff] }
  0x3d   : > { %12223 = vmatprep.mubr.f32.mxu1 %v289_v36  ;;  %v352_v36 = vld [vmem:[%s15972_s22 + $0x258] sm:$0xff] }
  0x40   : > { %12224 = vmatmul.mubr.f32.gmra.mrb[12].mxu1 %v290_v37  ;;  %v353_v37 = vld [vmem:[%s15972_s22 + $0x260] sm:$0xff] }
  0x41   : > { %12226 = vmatprep.mubr.f32.mxu1 %v291_v38  ;;  %v354_v38 = vld [vmem:[%s15972_s22 + $0x268] sm:$0xff] }
  0x44   : > { %12227 = vmatmul.mubr.f32.gmra.mrb[14].mxu1 %v292_v39  ;;  %v355_v39 = vld [vmem:[%s15972_s22 + $0x270] sm:$0xff] }
  0x45   : > { %12229 = vmatprep.mubr.f32.mxu1 %v293_v40  ;;  %v356_v40 = vld [vmem:[%s15972_s22 + $0x278] sm:$0xff] }
  0x48   : > { %12230 = vmatmul.mubr.f32.gmra.mrb[16].mxu1 %v294_v41  ;;  %v357_v41 = vld [vmem:[%s15972_s22 + $0x280] sm:$0xff] }
  0x49   : > { %12232 = vmatprep.mubr.f32.mxu1 %v295_v42  ;;  %v358_v42 = vld [vmem:[%s15972_s22 + $0x288] sm:$0xff] }
  0x4c   : > { %12233 = vmatmul.mubr.f32.gmra.mrb[18].mxu1 %v296_v43  ;;  %v359_v43 = vld [vmem:[%s15972_s22 + $0x290] sm:$0xff] }
  0x4d   : > { %12235 = vmatprep.mubr.f32.mxu1 %v297_v44  ;;  %v360_v44 = vld [vmem:[%s15972_s22 + $0x298] sm:$0xff] }
  0x50   : > { %12236 = vmatmul.mubr.f32.gmra.mrb[20].mxu1 %v298_v45  ;;  %v361_v45 = vld [vmem:[%s15972_s22 + $0x2a0] sm:$0xff] }
  0x51   : > { %12238 = vmatprep.mubr.f32.mxu1 %v299_v46  ;;  %v362_v46 = vld [vmem:[%s15972_s22 + $0x2a8] sm:$0xff] }
  0x54   : > { %12239 = vmatmul.mubr.f32.gmra.mrb[22].mxu1 %v300_v47  ;;  %v363_v47 = vld [vmem:[%s15972_s22 + $0x2b0] sm:$0xff] }
  0x55   : > { %12241 = vmatprep.mubr.f32.mxu1 %v301_v48  ;;  %v364_v48 = vld [vmem:[%s15972_s22 + $0x2b8] sm:$0xff] }
  0x58   : > { %12242 = vmatmul.mubr.f32.gmra.mrb[24].mxu1 %v302_v49  ;;  %v365_v49 = vld [vmem:[%s15972_s22 + $0x2c0] sm:$0xff] }
  0x59   : > { %12244 = vmatprep.mubr.f32.mxu1 %v303_v50  ;;  %v366_v50 = vld [vmem:[%s15972_s22 + $0x2c8] sm:$0xff] }
  0x5c   : > { %12245 = vmatmul.mubr.f32.gmra.mrb[26].mxu1 %v304_v51  ;;  %v367_v51 = vld [vmem:[%s15972_s22 + $0x2d0] sm:$0xff] }
  0x5d   : > { %12247 = vmatprep.mubr.f32.mxu1 %v305_v52  ;;  %v1044_v52 = vlaneseq }
  0x60   : > { %12248 = vmatmul.mubr.f32.gmra.mrb[28].mxu1 %v306_v53  ;;  %v368_v53 = vld [vmem:[%s15972_s22 + $0x2d8] sm:$0xff] }
  0x61   : > { %12250 = vmatprep.mubr.f32.mxu1 %v307_v54  ;;  %v369_v54 = vld [vmem:[%s15972_s22 + $0x2e0] sm:$0xff] }
  0x64   : > { %12251 = vmatmul.mubr.f32.gmra.mrb[30].mxu1 %v308_v55  ;;  %v16094_v55 = vshrl.u32 %v1044_v52, 7 }
  0x65   : > { %12253 = vmatprep.mubr.f32.mxu1 %v309_v56  ;;  %v370_v56 = vld [vmem:[%s15972_s22 + $0x2e8] sm:$0xff] }
  0x68   : > { %12254 = vmatmul.mubr.f32.gmra.mrb[32].mxu1 %v310_v57  ;;  %v371_v57 = vld [vmem:[%s15972_s22 + $0x2f0] sm:$0xff] }
  0x69   : > { %12256 = vmatprep.mubr.f32.mxu1 %v311_v58  ;;  %v16098_v58 = vand.u32 127, %v1044_v52 }
  0x6c   : > { %12257 = vmatmul.mubr.f32.gmra.mrb[34].mxu1 %v312_v59  ;;  %v1049_v59 = vmul.u32 2, %v16094_v55 }
  0x6d   : > { %12259 = vmatprep.mubr.f32.mxu1 %v313_v60  ;;  %v372_v60 = vld [vmem:[%s15972_s22 + $0x2f8] sm:$0xff] }
  0x6e   : > { %vm1051_vm0 = vcmp.eq.s32.totalorder %v16098_v58, %v1049_v59 }
  0x70   : > { %12260 = vmatmul.mubr.f32.gmra.mrb[36].mxu1 %v314_v61  ;;  %v373_v61 = vld [vmem:[%s15972_s22 + $0x300] sm:$0xff] }
  0x71   : > { %12262 = vmatprep.mubr.f32.mxu1 %v315_v62  ;;  %v374_v62 = vld [vmem:[%s15972_s22 + $0x308] sm:$0xff] }
  0x74   : > { %12263 = vmatmul.mubr.f32.gmra.mrb[38].mxu1 %v316_v63  ;;  %v16106_v63 = vsel %vm1051_vm0, 1.0, %v15890_v19 }
  0x75   : > { %12265 = vmatprep.mubr.f32.mxu1 %v317_v0 }
  0x78   : > { %12266 = vmatmul.mubr.f32.gmra.mrb[40].mxu1 %v318_v1 }
  0x79   : > { %12268 = vmatprep.mubr.f32.mxu1 %v319_v2 }
  0x7c   : > { %12269 = vmatmul.mubr.f32.gmra.mrb[42].mxu1 %v320_v3 }
  0x7d   : > { %12271 = vmatprep.mubr.f32.mxu1 %v321_v4 }
  0x80   : > { %12272 = vmatmul.mubr.f32.gmra.mrb[44].mxu1 %v322_v5 }
  0x81   : > { %12274 = vmatprep.mubr.f32.mxu1 %v323_v6 }
  0x84   : > { %12275 = vmatmul.mubr.f32.gmra.mrb[46].mxu1 %v324_v7 }
  0x85   : > { %12277 = vmatprep.mubr.f32.mxu1 %v325_v8 }
  0x88   : > { %12278 = vmatmul.mubr.f32.gmra.mrb[48].mxu1 %v326_v9  ;;  %v1046_v9 = vadd.s32 8, %v16094_v55 }
  0x89   : > { %12280 = vmatprep.mubr.f32.mxu1 %v327_v10 }
  0x8c   : > { %12281 = vmatmul.mubr.f32.gmra.mrb[50].mxu1 %v328_v11 }
  0x8d   : > { %12283 = vmatprep.mubr.f32.mxu1 %v329_v12 }
  0x90   : > { %12284 = vmatmul.mubr.f32.gmra.mrb[52].mxu1 %v330_v13 }
  0x91   : > { %12286 = vmatprep.mubr.f32.mxu1 %v331_v14 }
  0x94   : > { %12287 = vmatmul.mubr.f32.gmra.mrb[54].mxu1 %v332_v15 }
  0x95   : > { %12289 = vmatprep.mubr.f32.mxu1 %v333_v16 }
  0x98   : > { %12290 = vmatmul.mubr.f32.gmra.mrb[56].mxu1 %v334_v17  ;;  %v1050_v17 = vmul.u32 2, %v1046_v9 }
  0x99   : > { %12292 = vmatprep.mubr.f32.mxu1 %v335_v18  ;;  %v1057_v18 = vadd.s32 1, %v1049_v59 }
  0x9a   : > { %vm1052_vm5 = vcmp.eq.s32.totalorder %v16098_v58, %v1050_v17 }
  0x9b   : > { %vm1059_vm6 = vcmp.eq.s32.totalorder %v16098_v58, %v1057_v18 }
  0x9c   : > { %12293 = vmatmul.mubr.f32.gmra.mrb[58].mxu1 %v336_v20 }
  0x9d   : > { %12295 = vmatprep.mubr.f32.mxu1 %v337_v21 }
  0xa0   : > { %12296 = vmatmul.mubr.f32.gmra.mrb[60].mxu1 %v338_v22 }
  0xa1   : > { %12298 = vmatprep.mubr.f32.mxu1 %v339_v23 }
  0xa4   : > { %12299 = vmatmul.mubr.f32.gmra.mrb[62].mxu1 %v340_v24 }
  0xa5   : > { %12301 = vmatprep.mubr.f32.mxu1 %v341_v25 }
  0xa8   : > { %12302 = vmatmul.mubr.f32.gmra.mrb[64].mxu1 %v342_v26  ;;  %v16480_v26 = vld [vmem:[%s18220_s2] ss:$0 sm:$0xff] }
  0xa9   : > { %12304 = vmatprep.mubr.f32.mxu1 %v343_v27 }
  0xac   : > { %12305 = vmatmul.mubr.f32.gmra.mrb[66].mxu1 %v344_v28 }
  0xad   : > { %12307 = vmatprep.mubr.f32.mxu1 %v345_v29 }
  0xb0   : > { %12308 = vmatmul.mubr.f32.gmra.mrb[68].mxu1 %v346_v30  ;;  %v16126_v30 = vsel %vm1052_vm5, 1.0, %v15890_v19 }
  0xb1   : > { %12310 = vmatprep.mubr.f32.mxu1 %v347_v31 }
  0xb4   : > { %12311 = vmatmul.mubr.f32.gmra.mrb[70].mxu1 %v348_v32  ;;  %v16129_v32 = vsel %vm1059_vm6, 1.0, %v15890_v19 }
  0xb5   : > { %12313 = vmatprep.mubr.f32.mxu1 %v349_v33  ;;  %v1058_v33 = vadd.s32 1, %v1050_v17 }
  0xb7   : > { %vm1060_vm7 = vcmp.eq.s32.totalorder %v16098_v58, %v1058_v33 }
  0xb8   : > { %12314 = vmatmul.mubr.f32.gmra.mrb[72].mxu1 %v350_v34 }
  0xb9   : > { %12316 = vmatprep.mubr.f32.mxu1 %v351_v35 }
  0xbc   : > { %12317 = vmatmul.mubr.f32.gmra.mrb[74].mxu1 %v352_v36 }
  0xbd   : > { %12319 = vmatprep.mubr.f32.mxu1 %v353_v37 }
  0xc0   : > { %12320 = vmatmul.mubr.f32.gmra.mrb[76].mxu1 %v354_v38 }
  0xc1   : > { %12322 = vmatprep.mubr.f32.mxu1 %v355_v39 }
  0xc4   : > { %12323 = vmatmul.mubr.f32.gmra.mrb[78].mxu1 %v356_v40 }
  0xc5   : > { %12325 = vmatprep.mubr.f32.mxu1 %v357_v41 }
  0xc8   : > { %12326 = vmatmul.mubr.f32.gmra.mrb[80].mxu1 %v358_v42 }
  0xc9   : > { %12328 = vmatprep.mubr.f32.mxu1 %v359_v43 }
  0xcc   : > { %12329 = vmatmul.mubr.f32.gmra.mrb[82].mxu1 %v360_v44 }
  0xcd   : > { %12331 = vmatprep.mubr.f32.mxu1 %v361_v45 }
  0xd0   : > { %12332 = vmatmul.mubr.f32.gmra.mrb[84].mxu1 %v362_v46  ;;  %v16142_v46 = vsel %vm1060_vm7, 1.0, %v15890_v19 }
  0xd1   : > { %12334 = vmatprep.mubr.f32.mxu1 %v363_v47 }
  0xd4   : > { %12335 = vmatmul.mubr.f32.gmra.mrb[86].mxu1 %v364_v48 }
  0xd5   : > { %12337 = vmatprep.mubr.f32.mxu1 %v365_v49 }
  0xd8   : > { %12338 = vmatmul.mubr.f32.gmra.mrb[88].mxu1 %v366_v50 }
  0xd9   : > { %12340 = vmatprep.mubr.f32.mxu1 %v367_v51 }
  0xdc   : > { %12341 = vmatmul.mubr.f32.gmra.mrb[90].mxu1 %v368_v53 }
  0xdd   : > { %12343 = vmatprep.mubr.f32.mxu1 %v369_v54 }
  0xe0   : > { %12344 = vmatmul.mubr.f32.gmra.mrb[92].mxu1 %v370_v56 }
  0xe1   : > { %12346 = vmatprep.mubr.f32.mxu1 %v371_v57 }
  0xe4   : > { %12347 = vmatmul.mubr.f32.gmra.mrb[94].mxu1 %v372_v60 }
  0xe5   : > { %12349 = vmatprep.mubr.f32.mxu1 %v373_v61 }
  0xe8   : > { %12350 = vmatmul.mubr.f32.gmra.mrb[96].mxu1 %v374_v62 }
  0xe9   : > { %12360 = vmatprep.mubr.msk.f32.mxu1 %vm1082_vm1, %v16106_v63 }
  0xfb   : > { %v12207_v0 = vpop.f32.mrb[0].mxu1 }
  0xfc   : > { %v457_v1 = vpop.f32.mrb[1].mxu1 }
  0xff   : > { %v12210_v2 = vpop.f32.mrb[2].mxu1 }
 0x100   : > { %949 = vst [vmem:[#allocation2 + $0x18] sm:$0xff] %v12210_v2  ;;  %v467_v3 = vpop.f32.mrb[3].mxu1 }
 0x103   : > { %v12213_v4 = vpop.f32.mrb[4].mxu1 }
 0x104   : > { %951 = vst [vmem:[#allocation2 + $0x28] sm:$0xff] %v12213_v4  ;;  %v477_v5 = vpop.f32.mrb[5].mxu1 }
 0x105   : > { %950 = vst [vmem:[#allocation2 + $0x20] sm:$0xff] %v477_v5 }
 0x107   : > { %v12216_v6 = vpop.f32.mrb[6].mxu1  ;;  %v1073_v21 = vld [vmem:[#allocation2 + $0x18] sm:$0xf] }
 0x108   : > { %v487_v7 = vpop.f32.mrb[7].mxu1 }
 0x109   : > { %952 = vst [vmem:[#allocation2 + $0x30] sm:$0xff] %v487_v7 }
 0x10b   : > { %v16110_v8 = vpop.f32.mrb[8].mxu1 }
 0x10c   : > { %v497_v10 = vpop.f32.mrb[9].mxu1  ;;  %v1074_v11 = vld [vmem:[#allocation2 + $0x1c] sm:$0xff]  ;;  %v1075_v12 = vld [vmem:[#allocation2 + $0x24] sm:$0xff] }
 0x10d   : > { %v1078_v13 = vmax.f32 %v457_v1, %v1074_v11  ;;  %v1079_v14 = vmax.f32 %v12207_v0, %v1075_v12 }
 0x10f   : > { %v12222_v15 = vpop.f32.mrb[10].mxu1  ;;  %v14237_v16 = vpack.c.bf16 %v1079_v14, %v1078_v13 }
 0x110   : > { %957 = vst [vmem:[#allocation2 + $0x58] sm:$0xff] %v12222_v15  ;;  %v507_v20 = vpop.f32.mrb[11].mxu1  ;;  %v1076_v22 = vld [vmem:[#allocation2 + $0x2c] sm:$0xff]  ;;  %v1077_v23 = vld [vmem:[#allocation2 + $0x34] sm:$0xf] }
 0x111   : > { %14238 = vmatprep.subr.bf16.mxu1 %v14237_v16  ;;  %956 = vst [vmem:[#allocation2 + $0x50] sm:$0xff] %v507_v20  ;;  %v1080_v24 = vmax.f32 %v467_v3, %v1076_v22  ;;  %v1081_v25 = vmax.f32 %v1073_v21, %v1077_v23 }
 0x112   : > { %14240 = vmatpush3.bf16.msra.mxu1 %v14237_v16 }
 0x113   : > { %v12225_v27 = vpop.f32.mrb[12].mxu1  ;;  %v14241_v28 = vpack.c.bf16 %v1081_v25, %v1080_v24 }
 0x114   : > { %959 = vst [vmem:[#allocation2 + $0x68] sm:$0xff] %v12225_v27  ;;  %v517_v29 = vpop.f32.mrb[13].mxu1 }
 0x115   : > { %958 = vst [vmem:[#allocation2 + $0x60] sm:$0xff] %v517_v29  ;;  %14243 = vmatprep.subr.msk.bf16.mxu1 %vm16115_vm4, %v14241_v28 }
 0x116   : > { %14246 = vmatpush3.bf16.msk.msra.mxu1 %vm16115_vm4, %v14241_v28 }
 0x117   : > { %14248 = vmatprep.subr.bf16.mxu1 %v14237_v16  ;;  %v12228_v31 = vpop.f32.mrb[14].mxu1 }
 0x118   : > { %v527_v34 = vpop.f32.mrb[15].mxu1  ;;  %v1267_v35 = vld [vmem:[#allocation2 + $0x54] sm:$0xff]  ;;  %v1266_v40 = vld [vmem:[#allocation2 + $0x50] sm:$0xf] }
 0x119   : > { %12361 = vmatmul.mubr.msk.f32.vlgmr.msra.gmra.mrb[98].mxu1 %vm1082_vm1, %v16126_v30  ;;  %v1271_v42 = vmax.f32 %v12216_v6, %v1267_v35 }
 0x11a   : > { %14250 = vmatpush3.bf16.msra.mxu1 %v14237_v16  ;;  %12371 = vmatprep.mubr.msk.f32.mxu1 %vm1082_vm1, %v16129_v32 }
 0x11b   : > { %14253 = vmatprep.subr.msk.bf16.mxu1 %vm16115_vm4, %v14241_v28  ;;  %v12231_v36 = vpop.f32.mrb[16].mxu1  ;;  %v1270_v37 = vld [vmem:[#allocation2 + $0x6c] sm:$0xf] }
 0x11c   : > { %963 = vst [vmem:[#allocation2 + $0x88] sm:$0xff] %v12231_v36  ;;  %v1268_v38 = vld [vmem:[#allocation2 + $0x5c] sm:$0xff]  ;;  %v537_v39 = vpop.f32.mrb[17].mxu1  ;;  %v1269_v41 = vld [vmem:[#allocation2 + $0x64] sm:$0xff]  ;;  %v1274_v45 = vmax.f32 %v1266_v40, %v1270_v37 }
 0x11d   : > { %v1272_v43 = vmax.f32 %v497_v10, %v1268_v38  ;;  %v1273_v44 = vmax.f32 %v16110_v8, %v1269_v41 }
 0x11e   : > { %14256 = vmatpush3.bf16.msk.msra.mxu1 %vm16115_vm4, %v14241_v28 }
 0x11f   : > { %v14257_v47 = vpack.c.bf16 %v1272_v43, %v1271_v42  ;;  %v12234_v48 = vpop.f32.mrb[18].mxu1  ;;  %v14261_v50 = vpack.c.bf16 %v1274_v45, %v1273_v44 }
 0x120   : > { %965 = vst [vmem:[#allocation2 + $0x98] sm:$0xff] %v12234_v48  ;;  %v547_v49 = vpop.f32.mrb[19].mxu1 }
 0x121   : > { %14258 = vmatprep.subr.bf16.mxu1 %v14257_v47  ;;  %12372 = vmatmul.mubr.msk.f32.vlgmr.msra.gmra.mrb[100].mxu1 %vm1082_vm1, %v16142_v46  ;;  %964 = vst [vmem:[#allocation2 + $0x90] sm:$0xff] %v547_v49 }
 0x122   : > { %14260 = vmatpush3.bf16.msra.mxu1 %v14257_v47  ;;  %12382 = vmatprep.mubr.msk.f32.mxu1 %vm1082_vm1, %v16106_v63 }
 0x123   : > { %14263 = vmatprep.subr.msk.bf16.mxu1 %vm16115_vm4, %v14261_v50  ;;  %v12237_v51 = vpop.f32.mrb[20].mxu1  ;;  %v1439_v62 = vld [vmem:[#allocation2 + $0x88] sm:$0xf] }
 0x124   : > { %v557_v19 = vpop.f32.mrb[21].mxu1 }
 0x125   : > { %966 = vst [vmem:[#allocation2 + $0xa0] sm:$0xff] %v557_v19 }
 0x126   : > { %14266 = vmatpush3.bf16.msk.msra.mxu1 %vm16115_vm4, %v14261_v50 }
 0x127   : > { %14268 = vmatprep.subr.bf16.mxu1 %v14257_v47  ;;  %v12240_v52 = vpop.f32.mrb[22].mxu1 }
 0x128   : > { %v567_v53 = vpop.f32.mrb[23].mxu1  ;;  %v1440_v54 = vld [vmem:[#allocation2 + $0x8c] sm:$0xff]  ;;  %v1441_v56 = vld [vmem:[#allocation2 + $0x94] sm:$0xff] }
 0x129   : > { %12383 = vmatmul.mubr.msk.f32.vlgmr.msra.gmra.mrb[102].mxu1 %vm1082_vm1, %v16126_v30  ;;  %v1444_v57 = vmax.f32 %v527_v34, %v1440_v54  ;;  %v1445_v58 = vmax.f32 %v12228_v31, %v1441_v56 }
 0x12a   : > { %14270 = vmatpush3.bf16.msra.mxu1 %v14257_v47  ;;  %12393 = vmatprep.mubr.msk.f32.mxu1 %vm1082_vm1, %v16129_v32 }
 0x12b   : > { %14273 = vmatprep.subr.msk.bf16.mxu1 %vm16115_vm4, %v14261_v50  ;;  %v12243_v59 = vpop.f32.mrb[24].mxu1  ;;  %v14277_v60 = vpack.c.bf16 %v1445_v58, %v1444_v57 }
 0x12c   : > { %971 = vst [vmem:[#allocation2 + $0xc8] sm:$0xff] %v12243_v59  ;;  %v577_v61 = vpop.f32.mrb[25].mxu1  ;;  %v1442_v0 = vld [vmem:[#allocation2 + $0x9c] sm:$0xff]  ;;  %v1443_v1 = vld [vmem:[#allocation2 + $0xa4] sm:$0xf] }
 0x12d   : > { %970 = vst [vmem:[#allocation2 + $0xc0] sm:$0xff] %v577_v61  ;;  %v1446_v2 = vmax.f32 %v537_v39, %v1442_v0  ;;  %v1447_v3 = vmax.f32 %v1439_v62, %v1443_v1 }
 0x12e   : > { %14276 = vmatpush3.bf16.msk.msra.mxu1 %vm16115_vm4, %v14261_v50 }
 0x12f   : > { %14278 = vmatprep.subr.bf16.mxu1 %v14277_v60  ;;  %v12246_v4 = vpop.f32.mrb[26].mxu1  ;;  %v14281_v6 = vpack.c.bf16 %v1447_v3, %v1446_v2 }
 0x130   : > { %973 = vst [vmem:[#allocation2 + $0xd8] sm:$0xff] %v12246_v4  ;;  %v587_v5 = vpop.f32.mrb[27].mxu1 }
 0x131   : > { %12394 = vmatmul.mubr.msk.f32.vlgmr.msra.gmra.mrb[104].mxu1 %vm1082_vm1, %v16142_v46  ;;  %972 = vst [vmem:[#allocation2 + $0xd0] sm:$0xff] %v587_v5 }
 0x132   : > { %14280 = vmatpush3.bf16.msra.mxu1 %v14277_v60  ;;  %12404 = vmatprep.mubr.msk.f32.mxu1 %vm1082_vm1, %v16106_v63 }
 0x133   : > { %14283 = vmatprep.subr.msk.bf16.mxu1 %vm16115_vm4, %v14281_v6  ;;  %v12249_v7 = vpop.f32.mrb[28].mxu1 }
 0x134   : > { %v597_v8 = vpop.f32.mrb[29].mxu1  ;;  %v1613_v9 = vld [vmem:[#allocation2 + $0xc4] sm:$0xff]  ;;  %v1612_v15 = vld [vmem:[#allocation2 + $0xc0] sm:$0xf] }
 0x135   : > { %v1617_v13 = vmax.f32 %v12237_v51, %v1613_v9 }
 0x136   : > { %14286 = vmatpush3.bf16.msk.msra.mxu1 %vm16115_vm4, %v14281_v6 }
 0x137   : > { %14288 = vmatprep.subr.bf16.mxu1 %v14277_v60  ;;  %v12252_v10 = vpop.f32.mrb[30].mxu1  ;;  %v1616_v17 = vld [vmem:[#allocation2 + $0xdc] sm:$0xf] }
 0x138   : > { %977 = vst [vmem:[#allocation2 + $0xf8] sm:$0xff] %v12252_v10  ;;  %v1614_v11 = vld [vmem:[#allocation2 + $0xcc] sm:$0xff]  ;;  %v607_v12 = vpop.f32.mrb[31].mxu1  ;;  %v1615_v16 = vld [vmem:[#allocation2 + $0xd4] sm:$0xff]  ;;  %v1620_v23 = vmax.f32 %v1612_v15, %v1616_v17 }
 0x139   : > { %12405 = vmatmul.mubr.msk.f32.vlgmr.msra.gmra.mrb[106].mxu1 %vm1082_vm1, %v16126_v30  ;;  %v1618_v14 = vmax.f32 %v567_v53, %v1614_v11  ;;  %v1619_v22 = vmax.f32 %v12240_v52, %v1615_v16 }
 0x13a   : > { %14290 = vmatpush3.bf16.msra.mxu1 %v14277_v60  ;;  %12415 = vmatprep.mubr.msk.f32.mxu1 %vm1082_vm1, %v16129_v32 }
 0x13b   : > { %14293 = vmatprep.subr.msk.bf16.mxu1 %vm16115_vm4, %v14281_v6  ;;  %v14297_v18 = vpack.c.bf16 %v1618_v14, %v1617_v13  ;;  %v12255_v20 = vpop.f32.mrb[32].mxu1  ;;  %v14301_v27 = vpack.c.bf16 %v1620_v23, %v1619_v22 }
 0x13c   : > { %979 = vst [vmem:[#allocation2 + $0x108] sm:$0xff] %v12255_v20  ;;  %v617_v21 = vpop.f32.mrb[33].mxu1 }
 0x13d   : > { %978 = vst [vmem:[#allocation2 + $0x100] sm:$0xff] %v617_v21 }
 0x13e   : > { %14296 = vmatpush3.bf16.msk.msra.mxu1 %vm16115_vm4, %v14281_v6 }
 0x13f   : > { %14298 = vmatprep.subr.bf16.mxu1 %v14297_v18  ;;  %v12258_v24 = vpop.f32.mrb[34].mxu1  ;;  %v1785_v39 = vld [vmem:[#allocation2 + $0xf8] sm:$0xf] }
 0x140   : > { %v627_v25 = vpop.f32.mrb[35].mxu1 }
 0x141   : > { %12416 = vmatmul.mubr.msk.f32.vlgmr.msra.gmra.mrb[108].mxu1 %vm1082_vm1, %v16142_v46  ;;  %980 = vst [vmem:[#allocation2 + $0x110] sm:$0xff] %v627_v25 }
 0x142   : > { %14300 = vmatpush3.bf16.msra.mxu1 %v14297_v18  ;;  %12426 = vmatprep.mubr.msk.f32.mxu1 %vm1082_vm1, %v16106_v63 }
 0x143   : > { %14303 = vmatprep.subr.msk.bf16.mxu1 %vm16115_vm4, %v14301_v27  ;;  %v16182_v28 = vpop.f32.mrb[36].mxu1 }
 0x144   : > { %v637_v29 = vpop.f32.mrb[37].mxu1  ;;  %v1786_v31 = vld [vmem:[#allocation2 + $0xfc] sm:$0xff]  ;;  %v1787_v33 = vld [vmem:[#allocation2 + $0x104] sm:$0xff] }
 0x145   : > { %v1790_v34 = vmax.f32 %v597_v8, %v1786_v31  ;;  %v1791_v35 = vmax.f32 %v12249_v7, %v1787_v33 }
 0x146   : > { %14306 = vmatpush3.bf16.msk.msra.mxu1 %vm16115_vm4, %v14301_v27 }
 0x147   : > { %14308 = vmatprep.subr.bf16.mxu1 %v14297_v18  ;;  %v12264_v36 = vpop.f32.mrb[38].mxu1  ;;  %v14317_v37 = vpack.c.bf16 %v1791_v35, %v1790_v34 }
 0x148   : > { %985 = vst [vmem:[#allocation2 + $0x138] sm:$0xff] %v12264_v36  ;;  %v647_v38 = vpop.f32.mrb[39].mxu1  ;;  %v1788_v40 = vld [vmem:[#allocation2 + $0x10c] sm:$0xff]  ;;  %v1789_v41 = vld [vmem:[#allocation2 + $0x114] sm:$0xf] }
 0x149   : > { %12427 = vmatmul.mubr.msk.f32.vlgmr.msra.gmra.mrb[110].mxu1 %vm1082_vm1, %v16126_v30  ;;  %984 = vst [vmem:[#allocation2 + $0x130] sm:$0xff] %v647_v38  ;;  %v1792_v44 = vmax.f32 %v607_v12, %v1788_v40  ;;  %v1793_v45 = vmax.f32 %v1785_v39, %v1789_v41 }
 0x14a   : > { %14310 = vmatpush3.bf16.msra.mxu1 %v14297_v18  ;;  %12437 = vmatprep.mubr.msk.f32.mxu1 %vm1082_vm1, %v16129_v32 }
 0x14b   : > { %14313 = vmatprep.subr.msk.bf16.mxu1 %vm16115_vm4, %v14301_v27  ;;  %v12267_v42 = vpop.f32.mrb[40].mxu1  ;;  %v14321_v49 = vpack.c.bf16 %v1793_v45, %v1792_v44 }
 0x14c   : > { %987 = vst [vmem:[#allocation2 + $0x148] sm:$0xff] %v12267_v42  ;;  %v657_v43 = vpop.f32.mrb[41].mxu1 }
 0x14d   : > { %986 = vst [vmem:[#allocation2 + $0x140] sm:$0xff] %v657_v43 }
 0x14e   : > { %14316 = vmatpush3.bf16.msk.msra.mxu1 %vm16115_vm4, %v14301_v27 }
 0x14f   : > { %14318 = vmatprep.subr.bf16.mxu1 %v14317_v37  ;;  %v12270_v47 = vpop.f32.mrb[42].mxu1 }
 0x150   : > { %v667_v48 = vpop.f32.mrb[43].mxu1  ;;  %v1959_v50 = vld [vmem:[#allocation2 + $0x134] sm:$0xff]  ;;  %v1958_v59 = vld [vmem:[#allocation2 + $0x130] sm:$0xf] }
 0x151   : > { %12438 = vmatmul.mubr.msk.f32.vlgmr.msra.gmra.mrb[112].mxu1 %vm1082_vm1, %v16142_v46  ;;  %v1963_v53 = vmax.f32 %v12258_v24, %v1959_v50 }
 0x152   : > { %14320 = vmatpush3.bf16.msra.mxu1 %v14317_v37  ;;  %12448 = vmatprep.mubr.msk.f32.mxu1 %vm1082_vm1, %v16106_v63 }
 0x153   : > { %14323 = vmatprep.subr.msk.bf16.mxu1 %vm16115_vm4, %v14321_v49  ;;  %v12273_v51 = vpop.f32.mrb[44].mxu1  ;;  %v1962_v61 = vld [vmem:[#allocation2 + $0x14c] sm:$0xf] }
 0x154   : > { %991 = vst [vmem:[#allocation2 + $0x168] sm:$0xff] %v12273_v51  ;;  %v1960_v19 = vld [vmem:[#allocation2 + $0x13c] sm:$0xff]  ;;  %v16200_v52 = vpop.f32.mrb[45].mxu1  ;;  %v1961_v60 = vld [vmem:[#allocation2 + $0x144] sm:$0xff]  ;;  %v1966_v2 = vmax.f32 %v1958_v59, %v1962_v61  ;;  %v10669_v59 = vld [vmem:[%s18221_s3 + $0x290] sm:$0xff] }
 0x155   : > { %v1964_v54 = vmax.f32 %v637_v29, %v1960_v19  ;;  %v1965_v1 = vmax.f32 %v16182_v28, %v1961_v60  ;;  %v10670_v60 = vld [vmem:[%s18221_s3 + $0x298] sm:$0xff] }
 0x156   : > { %14326 = vmatpush3.bf16.msk.msra.mxu1 %vm16115_vm4, %v14321_v49 }
 0x157   : > { %14328 = vmatprep.subr.bf16.mxu1 %v14317_v37  ;;  %v14337_v56 = vpack.c.bf16 %v1964_v54, %v1963_v53  ;;  %v12276_v57 = vpop.f32.mrb[46].mxu1  ;;  %v14341_v7 = vpack.c.bf16 %v1966_v2, %v1965_v1  ;;  %v10667_v53 = vld [vmem:[%s18221_s3 + $0x280] sm:$0xff]  ;;  %v10668_v54 = vld [vmem:[%s18221_s3 + $0x288] sm:$0xff] }
 0x158   : > { %993 = vst [vmem:[#allocation2 + $0x178] sm:$0xff] %v12276_v57  ;;  %v687_v58 = vpop.f32.mrb[47].mxu1  ;;  %v14677_v57 = vpack.c.bf16 %v10668_v54, %v10667_v53  ;;  %v10682_v53 = vld [vmem:[%s18221_s3 + $0x2f8] sm:$0xff] }
 0x159   : > { %12449 = vmatmul.mubr.msk.f32.vlgmr.msra.gmra.mrb[114].mxu1 %vm1082_vm1, %v16126_v30  ;;  %992 = vst [vmem:[#allocation2 + $0x170] sm:$0xff] %v687_v58 }
 0x15a   : > { %14330 = vmatpush3.bf16.msra.mxu1 %v14317_v37  ;;  %12459 = vmatprep.mubr.msk.f32.mxu1 %vm1082_vm1, %v16129_v32 }
 0x15b   : > { %14333 = vmatprep.subr.msk.bf16.mxu1 %vm16115_vm4, %v14321_v49  ;;  %v12279_v62 = vpop.f32.mrb[48].mxu1  ;;  %v2131_v15 = vld [vmem:[#allocation2 + $0x168] sm:$0xf]  ;;  %14678 = vmatprep.subr.bf16.mxu0 %v14677_v57 }
 0x15c   : > { %v697_v0 = vpop.f32.mrb[49].mxu1  ;;  %14680 = vmatpush3.bf16.msra.mxu0 %v14677_v57 }
 0x15d   : > { %994 = vst [vmem:[#allocation2 + $0x180] sm:$0xff] %v697_v0 }
 0x15e   : > { %14336 = vmatpush3.bf16.msk.msra.mxu1 %vm16115_vm4, %v14321_v49 }
 0x15f   : > { %14338 = vmatprep.subr.bf16.mxu1 %v14337_v56  ;;  %v16213_v3 = vpop.f32.mrb[50].mxu1 }
 0x160   : > { %v707_v4 = vpop.f32.mrb[51].mxu1  ;;  %v2132_v5 = vld [vmem:[#allocation2 + $0x16c] sm:$0xff]  ;;  %v2133_v6 = vld [vmem:[#allocation2 + $0x174] sm:$0xff] }
 0x161   : > { %12460 = vmatmul.mubr.msk.f32.vlgmr.msra.gmra.mrb[116].mxu1 %vm1082_vm1, %v16142_v46  ;;  %v2136_v8 = vmax.f32 %v667_v48, %v2132_v5  ;;  %v2137_v9 = vmax.f32 %v12270_v47, %v2133_v6  ;;  %v10672_v6 = vld [vmem:[%s18221_s3 + $0x2a8] sm:$0xff] }
 0x162   : > { %14340 = vmatpush3.bf16.msra.mxu1 %v14337_v56  ;;  %12470 = vmatprep.mubr.msk.f32.mxu1 %vm1082_vm1, %v16106_v63 }
 0x163   : > { %14343 = vmatprep.subr.msk.bf16.mxu1 %vm16115_vm4, %v14341_v7  ;;  %v12285_v10 = vpop.f32.mrb[52].mxu1  ;;  %v14357_v11 = vpack.c.bf16 %v2137_v9, %v2136_v8 }
 0x164   : > { %999 = vst [vmem:[#allocation2 + $0x1a8] sm:$0xff] %v12285_v10  ;;  %v717_v12 = vpop.f32.mrb[53].mxu1  ;;  %v2134_v16 = vld [vmem:[#allocation2 + $0x17c] sm:$0xff]  ;;  %v2135_v17 = vld [vmem:[#allocation2 + $0x184] sm:$0xf] }
 0x165   : > { %998 = vst [vmem:[#allocation2 + $0x1a0] sm:$0xff] %v717_v12  ;;  %v2138_v21 = vmax.f32 %v16200_v52, %v2134_v16  ;;  %v2139_v22 = vmax.f32 %v2131_v15, %v2135_v17  ;;  %v10673_v15 = vld [vmem:[%s18221_s3 + $0x2b0] sm:$0xff]  ;;  %v10674_v16 = vld [vmem:[%s18221_s3 + $0x2b8] sm:$0xff] }
 0x166   : > { %14346 = vmatpush3.bf16.msk.msra.mxu1 %vm16115_vm4, %v14341_v7 }
 0x167   : > { %14348 = vmatprep.subr.bf16.mxu1 %v14337_v56  ;;  %v12288_v13 = vpop.f32.mrb[54].mxu1  ;;  %v14361_v28 = vpack.c.bf16 %v2139_v22, %v2138_v21 }
 0x168   : > { %1001 = vst [vmem:[#allocation2 + $0x1b8] sm:$0xff] %v12288_v13  ;;  %v727_v14 = vpop.f32.mrb[55].mxu1 }
 0x169   : > { %12471 = vmatmul.mubr.msk.f32.vlgmr.msra.gmra.mrb[118].mxu1 %vm1082_vm1, %v16126_v30  ;;  %1000 = vst [vmem:[#allocation2 + $0x1b0] sm:$0xff] %v727_v14 }
 0x16a   : > { %14350 = vmatpush3.bf16.msra.mxu1 %v14337_v56  ;;  %12481 = vmatprep.mubr.msk.f32.mxu1 %vm1082_vm1, %v16129_v32 }
 0x16b   : > { %14353 = vmatprep.subr.msk.bf16.mxu1 %vm16115_vm4, %v14341_v7  ;;  %v12291_v18 = vpop.f32.mrb[56].mxu1 }
 0x16c   : > { %v737_v20 = vpop.f32.mrb[57].mxu1  ;;  %v2305_v23 = vld [vmem:[#allocation2 + $0x1a4] sm:$0xff]  ;;  %v2304_v38 = vld [vmem:[#allocation2 + $0x1a0] sm:$0xf] }
 0x16d   : > { %v2309_v29 = vmax.f32 %v12279_v62, %v2305_v23  ;;  %v14681_v62 = vpack.c.bf16 %v10670_v60, %v10669_v59  ;;  %v10675_v23 = vld [vmem:[%s18221_s3 + $0x2c0] sm:$0xff] }
 0x16e   : > { %14356 = vmatpush3.bf16.msk.msra.mxu1 %vm16115_vm4, %v14341_v7 }
 0x16f   : > { %14358 = vmatprep.subr.bf16.mxu1 %v14357_v11  ;;  %v12294_v24 = vpop.f32.mrb[58].mxu1  ;;  %v2308_v40 = vld [vmem:[#allocation2 + $0x1bc] sm:$0xf]  ;;  %14682 = vmatprep.subr.bf16.mxu0 %v14681_v62 }
 0x170   : > { %1005 = vst [vmem:[#allocation2 + $0x1d8] sm:$0xff] %v12294_v24  ;;  %v2306_v25 = vld [vmem:[#allocation2 + $0x1ac] sm:$0xff]  ;;  %v16232_v27 = vpop.f32.mrb[59].mxu1  ;;  %v2307_v39 = vld [vmem:[#allocation2 + $0x1b4] sm:$0xff]  ;;  %v2312_v47 = vmax.f32 %v2304_v38, %v2308_v40  ;;  %14684 = vmatpush3.bf16.msra.mxu0 %v14681_v62  ;;  %v10679_v40 = vld [vmem:[%s18221_s3 + $0x2e0] sm:$0xff] }
 0x171   : > { %12482 = vmatmul.mubr.msk.f32.vlgmr.msra.gmra.mrb[120].mxu1 %vm1082_vm1, %v16142_v46  ;;  %v2310_v31 = vmax.f32 %v707_v4, %v2306_v25  ;;  %v2311_v45 = vmax.f32 %v16213_v3, %v2307_v39  ;;  %v10671_v3 = vld [vmem:[%s18221_s3 + $0x2a0] sm:$0xff]  ;;  %v10676_v24 = vld [vmem:[%s18221_s3 + $0x2c8] sm:$0xff] }
 0x172   : > { %14360 = vmatpush3.bf16.msra.mxu1 %v14357_v11  ;;  %12492 = vmatprep.mubr.msk.f32.mxu1 %vm1082_vm1, %v16106_v63  ;;  %v14685_v8 = vpack.c.bf16 %v10672_v6, %v10671_v3  ;;  %v14693_v25 = vpack.c.bf16 %v10676_v24, %v10675_v23 }
 0x173   : > { %14363 = vmatprep.subr.msk.bf16.mxu1 %vm16115_vm4, %v14361_v28  ;;  %v14377_v33 = vpack.c.bf16 %v2310_v31, %v2309_v29  ;;  %v12297_v34 = vpop.f32.mrb[60].mxu1  ;;  %v14381_v52 = vpack.c.bf16 %v2312_v47, %v2311_v45  ;;  %v10677_v29 = vld [vmem:[%s18221_s3 + $0x2d0] sm:$0xff]  ;;  %v10678_v31 = vld [vmem:[%s18221_s3 + $0x2d8] sm:$0xff] }
 0x174   : > { %1007 = vst [vmem:[#allocation2 + $0x1e8] sm:$0xff] %v12297_v34  ;;  %v757_v35 = vpop.f32.mrb[61].mxu1  ;;  %14686 = vmatprep.subr.bf16.mxu0 %v14685_v8 }
 0x175   : > { %1006 = vst [vmem:[#allocation2 + $0x1e0] sm:$0xff] %v757_v35  ;;  %14688 = vmatpush3.bf16.msra.mxu0 %v14685_v8 }
 0x176   : > { %14366 = vmatpush3.bf16.msk.msra.mxu1 %vm16115_vm4, %v14361_v28 }
 0x177   : > { %14368 = vmatprep.subr.bf16.mxu1 %v14357_v11  ;;  %v16242_v36 = vpop.f32.mrb[62].mxu1  ;;  %v2477_v1 = vld [vmem:[#allocation2 + $0x1d8] sm:$0xf] }
 0x178   : > { %v767_v37 = vpop.f32.mrb[63].mxu1 }
 0x179   : > { %12493 = vmatmul.mubr.msk.f32.vlgmr.msra.gmra.mrb[122].mxu1 %vm1082_vm1, %v16126_v30  ;;  %1008 = vst [vmem:[#allocation2 + $0x1f0] sm:$0xff] %v767_v37 }
 0x17a   : > { %14370 = vmatpush3.bf16.msra.mxu1 %v14357_v11  ;;  %12503 = vmatprep.mubr.msk.f32.mxu1 %vm1082_vm1, %v16129_v32 }
 0x17b   : > { %14373 = vmatprep.subr.msk.bf16.mxu1 %vm16115_vm4, %v14361_v28  ;;  %v16250_v41 = vpop.f32.mrb[64].mxu1 }
 0x17c   : > { %v777_v42 = vpop.f32.mrb[65].mxu1  ;;  %v2478_v43 = vld [vmem:[#allocation2 + $0x1dc] sm:$0xff]  ;;  %v2479_v44 = vld [vmem:[#allocation2 + $0x1e4] sm:$0xff] }
 0x17d   : > { %v2482_v48 = vmax.f32 %v737_v20, %v2478_v43  ;;  %v2483_v49 = vmax.f32 %v12291_v18, %v2479_v44  ;;  %v14689_v20 = vpack.c.bf16 %v10674_v16, %v10673_v15 }
 0x17e   : > { %14376 = vmatpush3.bf16.msk.msra.mxu1 %vm16115_vm4, %v14361_v28 }
 0x17f   : > { %14378 = vmatprep.subr.bf16.mxu1 %v14377_v33  ;;  %v12306_v50 = vpop.f32.mrb[66].mxu1  ;;  %v16255_v51 = vpack.c.bf16 %v2483_v49, %v2482_v48  ;;  %14690 = vmatprep.subr.bf16.mxu0 %v14689_v20 }
 0x180   : > { %1013 = vst [vmem:[#allocation2 + $0x218] sm:$0xff] %v12306_v50  ;;  %v787_v19 = vpop.f32.mrb[67].mxu1  ;;  %v2480_v2 = vld [vmem:[#allocation2 + $0x1ec] sm:$0xff]  ;;  %v2481_v4 = vld [vmem:[#allocation2 + $0x1f4] sm:$0xf]  ;;  %14692 = vmatpush3.bf16.msra.mxu0 %v14689_v20 }
 0x181   : > { %12504 = vmatmul.mubr.msk.f32.vlgmr.msra.gmra.mrb[124].mxu1 %vm1082_vm1, %v16142_v46  ;;  %1012 = vst [vmem:[#allocation2 + $0x210] sm:$0xff] %v787_v19  ;;  %v2484_v11 = vmax.f32 %v16232_v27, %v2480_v2  ;;  %v2485_v12 = vmax.f32 %v2477_v1, %v2481_v4  ;;  %14694 = vmatprep.subr.bf16.mxu0 %v14693_v25 }
 0x182   : > { %14380 = vmatpush3.bf16.msra.mxu1 %v14377_v33  ;;  %12514 = vmatprep.mubr.msk.f32.mxu1 %vm1082_vm1, %v16106_v63 }
 0x183   : > { %14383 = vmatprep.subr.msk.bf16.mxu1 %vm16115_vm4, %v14381_v52  ;;  %v12309_v56 = vpop.f32.mrb[68].mxu1  ;;  %v14401_v22 = vpack.c.bf16 %v2485_v12, %v2484_v11 }
 0x184   : > { %1015 = vst [vmem:[#allocation2 + $0x228] sm:$0xff] %v12309_v56  ;;  %v797_v58 = vpop.f32.mrb[69].mxu1  ;;  %14696 = vmatpush3.bf16.msra.mxu0 %v14693_v25 }
 0x185   : > { %1014 = vst [vmem:[#allocation2 + $0x220] sm:$0xff] %v797_v58 }
 0x186   : > { %14386 = vmatpush3.bf16.msk.msra.mxu1 %vm16115_vm4, %v14381_v52 }
 0x187   : > { %14388 = vmatprep.subr.bf16.mxu1 %v14377_v33  ;;  %v16277_v61 = vpop.f32.mrb[70].mxu1 }
 0x188   : > { %v16279_v0 = vpop.f32.mrb[71].mxu1  ;;  %v2651_v5 = vld [vmem:[#allocation2 + $0x214] sm:$0xff]  ;;  %v2650_v43 = vld [vmem:[#allocation2 + $0x210] sm:$0xf] }
 0x189   : > { %12515 = vmatmul.mubr.msk.f32.vlgmr.msra.gmra.mrb[126].mxu1 %vm1082_vm1, %v16126_v30  ;;  %v2655_v13 = vmax.f32 %v16242_v36, %v2651_v5 }
 0x18a   : > { %14390 = vmatpush3.bf16.msra.mxu1 %v14377_v33  ;;  %12525 = vmatprep.mubr.msk.f32.mxu1 %vm1082_vm1, %v16129_v32  ;;  %v14697_v33 = vpack.c.bf16 %v10678_v31, %v10677_v29 }
 0x18b   : > { %14393 = vmatprep.subr.msk.bf16.mxu1 %vm16115_vm4, %v14381_v52  ;;  %v12315_v7 = vpop.f32.mrb[72].mxu1  ;;  %v2654_v45 = vld [vmem:[#allocation2 + $0x22c] sm:$0xf] }
 0x18c   : > { %1019 = vst [vmem:[#allocation2 + $0x248] sm:$0xff] %v12315_v7  ;;  %v2652_v9 = vld [vmem:[#allocation2 + $0x21c] sm:$0xff]  ;;  %v16293_v10 = vpop.f32.mrb[73].mxu1  ;;  %14698 = vmatprep.subr.bf16.mxu0 %v14697_v33  ;;  %v2653_v44 = vld [vmem:[#allocation2 + $0x224] sm:$0xff] }
 0x18d   : > { %v2656_v14 = vmax.f32 %v777_v42, %v2652_v9  ;;  %v10680_v42 = vld [vmem:[%s18221_s3 + $0x2e8] sm:$0xff]  ;;  %14700 = vmatpush3.bf16.msra.mxu0 %v14697_v33  ;;  %v2657_v19 = vmax.f32 %v16250_v41, %v2653_v44 }
 0x18e   : > { %14396 = vmatpush3.bf16.msk.msra.mxu1 %vm16115_vm4, %v14381_v52  ;;  %v14701_v47 = vpack.c.bf16 %v10680_v42, %v10679_v40  ;;  %v10681_v52 = vld [vmem:[%s18221_s3 + $0x2f0] sm:$0xff] }
 0x18f   : > { %14398 = vmatprep.subr.bf16.mxu1 %v16255_v51  ;;  %v16306_v17 = vpack.c.bf16 %v2656_v14, %v2655_v13  ;;  %v12318_v18 = vpop.f32.mrb[74].mxu1  ;;  %v14705_v54 = vpack.c.bf16 %v10682_v53, %v10681_v52  ;;  %v3566_v53 = vld [vmem:[%s18221_s3] sm:$0xff] }
 0x190   : > { %1021 = vst [vmem:[#allocation2 + $0x258] sm:$0xff] %v12318_v18  ;;  %v827_v21 = vpop.f32.mrb[75].mxu1  ;;  %14702 = vmatprep.subr.bf16.mxu0 %v14701_v47 }
 0x191   : > { %12526 = vmatmul.mubr.msk.f32.vlgmr.msra.gmra.mrb[128].mxu1 %vm1082_vm1, %v16142_v46  ;;  %1020 = vst [vmem:[#allocation2 + $0x250] sm:$0xff] %v827_v21  ;;  %14704 = vmatpush3.bf16.msra.mxu0 %v14701_v47 }
 0x192   : > { %14400 = vmatpush3.bf16.msra.mxu1 %v16255_v51  ;;  %12536 = vmatprep.mubr.msk.f32.mxu1 %vm1082_vm1, %v16106_v63 }
 0x193   : > { %14403 = vmatprep.subr.msk.bf16.mxu1 %vm16115_vm4, %v14401_v22  ;;  %v16321_v27 = vpop.f32.mrb[76].mxu1  ;;  %14706 = vmatprep.subr.bf16.mxu0 %v14705_v54  ;;  %v2823_v3 = vld [vmem:[#allocation2 + $0x248] sm:$0xf] }
 0x194   : > { %v837_v28 = vpop.f32.mrb[77].mxu1 }
 0x195   : > { %1022 = vst [vmem:[#allocation2 + $0x260] sm:$0xff] %v837_v28  ;;  %14708 = vmatpush3.bf16.msra.mxu0 %v14705_v54  ;;  %v3567_v54 = vld [vmem:[%s18221_s3 + $0x8] sm:$0xff] }
 0x196   : > { %14406 = vmatpush3.bf16.msk.msra.mxu1 %vm16115_vm4, %v14401_v22 }
 0x197   : > { %14408 = vmatprep.subr.bf16.mxu1 %v16255_v51  ;;  %v16332_v34 = vpop.f32.mrb[78].mxu1 }
 0x198   : > { %v2824_v35 = vld [vmem:[#allocation2 + $0x24c] sm:$0xff]  ;;  %v2825_v36 = vld [vmem:[#allocation2 + $0x254] sm:$0xff]  ;;  %v847_v37 = vpop.f32.mrb[79].mxu1 }
 0x199   : > { %12537 = vmatmul.mubr.msk.f32.vlgmr.msra.gmra.mrb[130].mxu1 %vm1082_vm1, %v16126_v30  ;;  %v2828_v38 = vmax.f32 %v16279_v0, %v2824_v35  ;;  %v2829_v39 = vmax.f32 %v16277_v61, %v2825_v36 }
 0x19a   : > { %14410 = vmatpush3.bf16.msra.mxu1 %v16255_v51  ;;  %12547 = vmatprep.mubr.msk.f32.mxu1 %vm1082_vm1, %v16129_v32  ;;  %v2658_v51 = vmax.f32 %v2650_v43, %v2654_v45 }
 0x19b   : > { %14413 = vmatprep.subr.msk.bf16.mxu1 %vm16115_vm4, %v14401_v22  ;;  %v16349_v48 = vpack.c.bf16 %v2829_v39, %v2828_v38  ;;  %v12327_v49 = vpop.f32.mrb[80].mxu1 }
 0x19c   : > { %1027 = vst [vmem:[#allocation2 + $0x288] sm:$0xff] %v12327_v49  ;;  %v857_v50 = vpop.f32.mrb[81].mxu1  ;;  %v14421_v57 = vpack.c.bf16 %v2658_v51, %v2657_v19  ;;  %v2826_v4 = vld [vmem:[#allocation2 + $0x25c] sm:$0xff]  ;;  %v2827_v5 = vld [vmem:[#allocation2 + $0x264] sm:$0xf] }
 0x19d   : > { %1026 = vst [vmem:[#allocation2 + $0x280] sm:$0xff] %v857_v50  ;;  %v2830_v9 = vmax.f32 %v16293_v10, %v2826_v4  ;;  %v2831_v11 = vmax.f32 %v2823_v3, %v2827_v5 }
 0x19e   : > { %14416 = vmatpush3.bf16.msk.msra.mxu1 %vm16115_vm4, %v14401_v22 }
 0x19f   : > { %14418 = vmatprep.subr.bf16.mxu1 %v16306_v17  ;;  %v12330_v56 = vpop.f32.mrb[82].mxu1  ;;  %v14441_v14 = vpack.c.bf16 %v2831_v11, %v2830_v9  ;;  %v3575_v9 = vld [vmem:[%s18221_s3 + $0x48] sm:$0xff] }
 0x1a0   : > { %1029 = vst [vmem:[#allocation2 + $0x298] sm:$0xff] %v12330_v56  ;;  %v867_v41 = vpop.f32.mrb[83].mxu1  ;;  %v14517_v56 = vpack.c.bf16 %v3567_v54, %v3566_v53 }
 0x1a1   : > { %12548 = vmatmul.mubr.msk.f32.vlgmr.msra.gmra.mrb[132].mxu1 %vm1082_vm1, %v16142_v46  ;;  %1028 = vst [vmem:[#allocation2 + $0x290] sm:$0xff] %v867_v41  ;;  %v3568_v41 = vld [vmem:[%s18221_s3 + $0x10] sm:$0xff] }
 0x1a2   : > { %14420 = vmatpush3.bf16.msra.mxu1 %v16306_v17  ;;  %12558 = vmatprep.mubr.msk.f32.mxu1 %vm1082_vm1, %v16106_v63 }
 0x1a3   : > { %14423 = vmatprep.subr.msk.bf16.mxu1 %vm16115_vm4, %v14421_v57  ;;  %v12333_v58 = vpop.f32.mrb[84].mxu1 }
 0x1a4   : > { %v2997_v59 = vld [vmem:[#allocation2 + $0x284] sm:$0xff]  ;;  %v877_v60 = vpop.f32.mrb[85].mxu1  ;;  %v2996_v23 = vld [vmem:[#allocation2 + $0x280] sm:$0xf] }
 0x1a5   : > { %v3001_v61 = vmax.f32 %v16321_v27, %v2997_v59 }
 0x1a6   : > { %14426 = vmatpush3.bf16.msk.msra.mxu1 %vm16115_vm4, %v14421_v57 }
 0x1a7   : > { %14428 = vmatprep.subr.bf16.mxu1 %v16306_v17  ;;  %v12336_v62 = vpop.f32.mrb[86].mxu1  ;;  %v3000_v25 = vld [vmem:[#allocation2 + $0x29c] sm:$0xf] }
 0x1a8   : > { %v2998_v0 = vld [vmem:[#allocation2 + $0x28c] sm:$0xff]  ;;  %1033 = vst [vmem:[#allocation2 + $0x2b8] sm:$0xff] %v12336_v62  ;;  %v16372_v1 = vpop.f32.mrb[87].mxu1  ;;  %v2999_v24 = vld [vmem:[#allocation2 + $0x294] sm:$0xff]  ;;  %v3004_v29 = vmax.f32 %v2996_v23, %v3000_v25 }
 0x1a9   : > { %12559 = vmatmul.mubr.msk.f32.vlgmr.msra.gmra.mrb[134].mxu1 %vm1082_vm1, %v16126_v30  ;;  %v3002_v2 = vmax.f32 %v847_v37, %v2998_v0  ;;  %v3003_v28 = vmax.f32 %v16332_v34, %v2999_v24  ;;  %v3580_v23 = vld [vmem:[%s18221_s3 + $0x70] sm:$0xff]  ;;  %v3581_v24 = vld [vmem:[%s18221_s3 + $0x78] sm:$0xff] }
 0x1aa   : > { %14430 = vmatpush3.bf16.msra.mxu1 %v16306_v17  ;;  %12569 = vmatprep.mubr.msk.f32.mxu1 %vm1082_vm1, %v16129_v32 }
 0x1ab   : > { %14433 = vmatprep.subr.msk.bf16.mxu1 %vm16115_vm4, %v14421_v57  ;;  %v14457_v6 = vpack.c.bf16 %v3002_v2, %v3001_v61  ;;  %v12339_v7 = vpop.f32.mrb[88].mxu1  ;;  %v14461_v35 = vpack.c.bf16 %v3004_v29, %v3003_v28  ;;  %v3571_v61 = vld [vmem:[%s18221_s3 + $0x28] sm:$0xff]  ;;  %v3573_v2 = vld [vmem:[%s18221_s3 + $0x38] sm:$0xff] }
 0x1ac   : > { %1035 = vst [vmem:[#allocation2 + $0x2c8] sm:$0xff] %v12339_v7  ;;  %v897_v8 = vpop.f32.mrb[89].mxu1 }
 0x1ad   : > { %1034 = vst [vmem:[#allocation2 + $0x2c0] sm:$0xff] %v897_v8  ;;  %v3574_v8 = vld [vmem:[%s18221_s3 + $0x40] sm:$0xff] }
 0x1ae   : > { %14436 = vmatpush3.bf16.msk.msra.mxu1 %vm16115_vm4, %v14421_v57  ;;  %v3569_v57 = vld [vmem:[%s18221_s3 + $0x18] sm:$0xff] }
 0x1af   : > { %14438 = vmatprep.subr.bf16.mxu1 %v16349_v48  ;;  %v12342_v12 = vpop.f32.mrb[90].mxu1  ;;  %v3169_v40 = vld [vmem:[#allocation2 + $0x2b8] sm:$0xf] }
 0x1b0   : > { %v907_v13 = vpop.f32.mrb[91].mxu1 }
 0x1b1   : > { %12570 = vmatmul.mubr.msk.f32.vlgmr.msra.gmra.mrb[136].mxu1 %vm1082_vm1, %v16142_v46  ;;  %1036 = vst [vmem:[#allocation2 + $0x2d0] sm:$0xff] %v907_v13  ;;  %v14533_v13 = vpack.c.bf16 %v3575_v9, %v3574_v8  ;;  %v10615_v8 = vld [vmem:[%s18221_s3 + $0xe0] sm:$0xff]  ;;  %v10616_v9 = vld [vmem:[%s18221_s3 + $0xe8] sm:$0xff] }
 0x1b2   : > { %14440 = vmatpush3.bf16.msra.mxu1 %v16349_v48  ;;  %12580 = vmatprep.mubr.msk.f32.mxu1 %vm1082_vm1, %v16106_v63 }
 0x1b3   : > { %14443 = vmatprep.subr.msk.bf16.mxu1 %vm16115_vm4, %v14441_v14  ;;  %v16392_v10 = vpop.f32.mrb[92].mxu1 }
 0x1b4   : > { %v917_v15 = vpop.f32.mrb[93].mxu1  ;;  %v3170_v16 = vld [vmem:[#allocation2 + $0x2bc] sm:$0xff]  ;;  %v3171_v17 = vld [vmem:[#allocation2 + $0x2c4] sm:$0xff] }
 0x1b5   : > { %v3174_v18 = vmax.f32 %v877_v60, %v3170_v16  ;;  %v3175_v20 = vmax.f32 %v12333_v58, %v3171_v17  ;;  %v3570_v60 = vld [vmem:[%s18221_s3 + $0x20] sm:$0xff] }
 0x1b6   : > { %14446 = vmatpush3.bf16.msk.msra.mxu1 %vm16115_vm4, %v14441_v14  ;;  %v14525_v62 = vpack.c.bf16 %v3571_v61, %v3570_v60 }
 0x1b7   : > { %14448 = vmatprep.subr.bf16.mxu1 %v16349_v48  ;;  %v12348_v21 = vpop.f32.mrb[94].mxu1  ;;  %v14477_v22 = vpack.c.bf16 %v3175_v20, %v3174_v18  ;;  %v3578_v18 = vld [vmem:[%s18221_s3 + $0x60] sm:$0xff]  ;;  %v3579_v20 = vld [vmem:[%s18221_s3 + $0x68] sm:$0xff] }
 0x1b8   : > { %1041 = vst [vmem:[#allocation2 + $0x2f8] sm:$0xff] %v12348_v21  ;;  %v927_v27 = vpop.f32.mrb[95].mxu1  ;;  %v3172_v42 = vld [vmem:[#allocation2 + $0x2cc] sm:$0xff]  ;;  %v3173_v43 = vld [vmem:[#allocation2 + $0x2d4] sm:$0xf]  ;;  %v14541_v21 = vpack.c.bf16 %v3579_v20, %v3578_v18 }
 0x1b9   : > { %12581 = vmatmul.mubr.msk.f32.vlgmr.msra.gmra.mrb[138].mxu1 %vm1082_vm1, %v16126_v30  ;;  %1040 = vst [vmem:[#allocation2 + $0x2f0] sm:$0xff] %v927_v27  ;;  %v3176_v44 = vmax.f32 %v16372_v1, %v3172_v42  ;;  %v3177_v45 = vmax.f32 %v3169_v40, %v3173_v43  ;;  %v3572_v1 = vld [vmem:[%s18221_s3 + $0x30] sm:$0xff]  ;;  %v10684_v40 = vld [vmem:[%s18221_s3 + $0x308] sm:$0xff] }
 0x1ba   : > { %14450 = vmatpush3.bf16.msra.mxu1 %v16349_v48  ;;  %12591 = vmatprep.mubr.msk.f32.mxu1 %vm1082_vm1, %v16129_v32  ;;  %v10688_v18 = vld [vmem:[%s18221_s3 + $0x328] sm:$0xff] }
 0x1bb   : > { %14453 = vmatprep.subr.msk.bf16.mxu1 %vm16115_vm4, %v14441_v14  ;;  %v12351_v31 = vpop.f32.mrb[96].mxu1  ;;  %v14481_v47 = vpack.c.bf16 %v3177_v45, %v3176_v44  ;;  %v10605_v45 = vld [vmem:[%s18221_s3 + $0x90] sm:$0xff] }
 0x1bc   : > { %1043 = vst [vmem:[#allocation2 + $0x308] sm:$0xff] %v12351_v31  ;;  %v937_v33 = vpop.f32.mrb[97].mxu1  ;;  %v14545_v31 = vpack.c.bf16 %v3581_v24, %v3580_v23  ;;  %v14573_v24 = vpack.c.bf16 %v10616_v9, %v10615_v8 }
 0x1bd   : > { %1042 = vst [vmem:[#allocation2 + $0x300] sm:$0xff] %v937_v33 }
 0x1be   : > { %14456 = vmatpush3.bf16.msk.msra.mxu1 %vm16115_vm4, %v14441_v14 }
 0x1bf   : > { %14458 = vmatprep.subr.bf16.mxu1 %v14457_v6 }
 0x1c0   : > { %v3343_v36 = vld [vmem:[#allocation2 + $0x2f4] sm:$0xff]  ;;  %v3342_v48 = vld [vmem:[#allocation2 + $0x2f0] sm:$0xf] }
 0x1c1   : > { %12592 = vmatmul.mubr.msk.f32.vlgmr.msra.gmra.mrb[140].mxu1 %vm1082_vm1, %v16142_v46  ;;  %v3347_v34 = vmax.f32 %v12342_v12, %v3343_v36  ;;  %v10604_v36 = vld [vmem:[%s18221_s3 + $0x88] sm:$0xff] }
 0x1c2   : > { %14460 = vmatpush3.bf16.msra.mxu1 %v14457_v6  ;;  %12602 = vmatprep.mubr.msk.f32.mxu1 %vm1082_vm1, %v16106_v63 }
 0x1c3   : > { %14463 = vmatprep.subr.msk.bf16.mxu1 %vm16115_vm4, %v14461_v35  ;;  %v3346_v50 = vld [vmem:[#allocation2 + $0x30c] sm:$0xf] }
 0x1c4   : > { %v3344_v37 = vld [vmem:[#allocation2 + $0x2fc] sm:$0xff]  ;;  %v3345_v49 = vld [vmem:[#allocation2 + $0x304] sm:$0xff]  ;;  %v3350_v51 = vmax.f32 %v3342_v48, %v3346_v50 }
 0x1c5   : > { %v3348_v38 = vmax.f32 %v917_v15, %v3344_v37  ;;  %v3349_v19 = vmax.f32 %v16392_v10, %v3345_v49  ;;  %v3576_v10 = vld [vmem:[%s18221_s3 + $0x50] sm:$0xff]  ;;  %v3577_v15 = vld [vmem:[%s18221_s3 + $0x58] sm:$0xff]  ;;  %v10607_v49 = vld [vmem:[%s18221_s3 + $0xa0] sm:$0xff] }
 0x1c6   : > { %14466 = vmatpush3.bf16.msk.msra.mxu1 %vm16115_vm4, %v14461_v35  ;;  %v14537_v17 = vpack.c.bf16 %v3577_v15, %v3576_v10 }
 0x1c7   : > { %14468 = vmatprep.subr.bf16.mxu1 %v14457_v6  ;;  %v14497_v39 = vpack.c.bf16 %v3348_v38, %v3347_v34  ;;  %v14501_v52 = vpack.c.bf16 %v3350_v51, %v3349_v19  ;;  %v10683_v38 = vld [vmem:[%s18221_s3 + $0x300] sm:$0xff]  ;;  %v10608_v51 = vld [vmem:[%s18221_s3 + $0xa8] sm:$0xff] }
 0x1c8   : > { %v16528_v43 = vpack.c.bf16 %v10684_v40, %v10683_v38  ;;  %v10691_v38 = vld [vmem:[%s18221_s3 + $0x340] sm:$0xff]  ;;  %v10692_v40 = vld [vmem:[%s18221_s3 + $0x348] sm:$0xff] }
 0x1c9   : > { %12603 = vmatmul.mubr.msk.f32.vlgmr.msra.gmra.mrb[142].mxu1 %vm1082_vm1, %v16126_v30 }
 0x1ca   : > { %14470 = vmatpush3.bf16.msra.mxu1 %v14457_v6  ;;  %12613 = vmatprep.mubr.msk.f32.mxu1 %vm1082_vm1, %v16129_v32  ;;  %v14529_v6 = vpack.c.bf16 %v3573_v2, %v3572_v1  ;;  %v10612_v1 = vld [vmem:[%s18221_s3 + $0xc8] sm:$0xff] }
 0x1cb   : > { %14473 = vmatprep.subr.msk.bf16.mxu1 %vm16115_vm4, %v14461_v35  ;;  %14710 = vmatprep.subr.bf16.mxu0 %v16528_v43 }
 0x1ce   : > { %14476 = vmatpush3.bf16.msk.msra.mxu1 %vm16115_vm4, %v14461_v35  ;;  %v10603_v35 = vld [vmem:[%s18221_s3 + $0x80] sm:$0xff] }
 0x1cf   : > { %14478 = vmatprep.subr.bf16.mxu1 %v14477_v22 }
 0x1d1   : > { %12614 = vmatmul.mubr.msk.f32.vlgmr.msra.gmra.mrb[144].mxu1 %vm1082_vm1, %v16142_v46 }
 0x1d2   : > { %14480 = vmatpush3.bf16.msra.mxu1 %v14477_v22  ;;  %12624 = vmatprep.mubr.msk.f32.mxu1 %vm1082_vm1, %v16106_v63 }
 0x1d3   : > { %14483 = vmatprep.subr.msk.bf16.mxu1 %vm16115_vm4, %v14481_v47 }
 0x1d6   : > { %14486 = vmatpush3.bf16.msk.msra.mxu1 %vm16115_vm4, %v14481_v47 }
 0x1d7   : > { %14488 = vmatprep.subr.bf16.mxu1 %v14477_v22 }
 0x1d9   : > { %12625 = vmatmul.mubr.msk.f32.vlgmr.msra.gmra.mrb[146].mxu1 %vm1082_vm1, %v16126_v30 }
 0x1da   : > { %14490 = vmatpush3.bf16.msra.mxu1 %v14477_v22  ;;  %12635 = vmatprep.mubr.msk.f32.mxu1 %vm1082_vm1, %v16129_v32 }
 0x1db   : > { %14493 = vmatprep.subr.msk.bf16.mxu1 %vm16115_vm4, %v14481_v47 }
 0x1de   : > { %14496 = vmatpush3.bf16.msk.msra.mxu1 %vm16115_vm4, %v14481_v47  ;;  %v10606_v47 = vld [vmem:[%s18221_s3 + $0x98] sm:$0xff] }
 0x1df   : > { %14498 = vmatprep.subr.bf16.mxu1 %v14497_v39  ;;  %v14553_v48 = vpack.c.bf16 %v10606_v47, %v10605_v45  ;;  %v14725_v45 = vpack.c.bf16 %v10692_v40, %v10691_v38 }
 0x1e1   : > { %12636 = vmatmul.mubr.msk.f32.vlgmr.msra.gmra.mrb[148].mxu1 %vm1082_vm1, %v16142_v46 }
 0x1e2   : > { %14500 = vmatpush3.bf16.msra.mxu1 %v14497_v39  ;;  %12646 = vmatprep.mubr.msk.f32.mxu1 %vm1082_vm1, %v16106_v63 }
 0x1e3   : > { %14503 = vmatprep.subr.msk.bf16.mxu1 %vm16115_vm4, %v14501_v52 }
 0x1e6   : > { %14506 = vmatpush3.bf16.msk.msra.mxu1 %vm16115_vm4, %v14501_v52 }
 0x1e7   : > { %14508 = vmatprep.subr.bf16.mxu1 %v14497_v39 }
 0x1e9   : > { %12647 = vmatmul.mubr.msk.f32.vlgmr.msra.gmra.mrb[150].mxu1 %vm1082_vm1, %v16126_v30  ;;  %v14521_v30 = vpack.c.bf16 %v3569_v57, %v3568_v41  ;;  %v14557_v41 = vpack.c.bf16 %v10608_v51, %v10607_v49  ;;  %v10694_v49 = vld [vmem:[%s18221_s3 + $0x358] sm:$0xff] }
 0x1ea   : > { %14510 = vmatpush3.bf16.msra.mxu1 %v14497_v39  ;;  %12657 = vmatprep.mubr.msk.f32.mxu1 %vm1082_vm1, %v16129_v32  ;;  %v14549_v39 = vpack.c.bf16 %v10604_v36, %v10603_v35 }
 0x1eb   : > { %14513 = vmatprep.subr.msk.bf16.mxu1 %vm16115_vm4, %v14501_v52 }
 0x1ec   : > { %v12362_v58 = vpop.f32.mrb[98].mxu1 }
 0x1ed   : > { %v1159_v59 = vpop.f32.mrb[99].mxu1 }
 0x1ee   : > { %14516 = vmatpush3.bf16.msk.msra.mxu1 %vm16115_vm4, %v14501_v52 }
 0x1ef   : > { %14518 = vmatprep.subr.bf16.mxu1 %v14517_v56 }
 0x1f1   : > { %12658 = vmatmul.mubr.msk.f32.vlgmr.msra.gmra.mrb[152].mxu1 %vm1082_vm1, %v16142_v46 }
 0x1f2   : > { %14520 = vmatpush3.bf16.msra.mxu1 %v14517_v56 }
 0x1f3   : > { %14522 = vmatprep.subr.bf16.mxu1 %v14521_v30 }
 0x1f4   : > { %v12373_v0 = vpop.f32.mrb[100].mxu1 }
 0x1f5   : > { %v1250_v3 = vmax.f32 %v12362_v58, %v12373_v0  ;;  %v1240_v4 = vpop.f32.mrb[101].mxu1  ;;  %v10609_v58 = vld [vmem:[%s18221_s3 + $0xb0] sm:$0xff]  ;;  %v10611_v0 = vld [vmem:[%s18221_s3 + $0xc0] sm:$0xff] }
 0x1f6   : > { %14524 = vmatpush3.bf16.msra.mxu1 %v14521_v30  ;;  %v1249_v46 = vmax.f32 %v1159_v59, %v1240_v4  ;;  %v10610_v59 = vld [vmem:[%s18221_s3 + $0xb8] sm:$0xff]  ;;  %v14565_v4 = vpack.c.bf16 %v10612_v1, %v10611_v0  ;;  %v10697_v0 = vld [vmem:[%s18221_s3 + $0x370] sm:$0xff] }
 0x1f7   : > { %v1258_v5 = vadd.f32 %v16480_v26, %v1250_v3  ;;  %14526 = vmatprep.subr.bf16.mxu1 %v14525_v62  ;;  %v10698_v1 = vld [vmem:[%s18221_s3 + $0x378] sm:$0xff] }
 0x1f8   : > { %v1257_v7 = vadd.f32 %v16480_v26, %v1249_v46  ;;  %v10613_v46 = vld [vmem:[%s18221_s3 + $0xd0] sm:$0xff] }
 0x1f9   : > { %v1260_v11 = vmax.f32 %v1258_v5, 0.0  ;;  %v10614_v5 = vld [vmem:[%s18221_s3 + $0xd8] sm:$0xff] }
 0x1fa   : > { %v1259_v12 = vmax.f32 %v1257_v7, 0.0  ;;  %14528 = vmatpush3.bf16.msra.mxu1 %v14525_v62  ;;  %v14561_v62 = vpack.c.bf16 %v10610_v59, %v10609_v58  ;;  %v10686_v7 = vld [vmem:[%s18221_s3 + $0x318] sm:$0xff] }
 0x1fb   : > { %1262 = vst [vmem:[#allocation3 + $0x8] sm:$0x3f] %v1260_v11  ;;  %14530 = vmatprep.subr.bf16.mxu1 %v14529_v6 }
 0x1fc   : > { %1261 = vst [vmem:[#allocation3] sm:$0xff] %v1259_v12  ;;  %v12384_v14 = vpop.f32.mrb[102].mxu1  ;;  %12692 = vmatprep.mubr.f32.mxu1 %v1259_v12 }
 0x1fd   : > { %v1344_v16 = vpop.f32.mrb[103].mxu1 }
 0x1fe   : > { %14532 = vmatpush3.bf16.msra.mxu1 %v14529_v6  ;;  %v10685_v6 = vld [vmem:[%s18221_s3 + $0x310] sm:$0xff] }
 0x1ff   : > { %14534 = vmatprep.subr.bf16.mxu1 %v14533_v13  ;;  %v14713_v10 = vpack.c.bf16 %v10686_v7, %v10685_v6  ;;  %v10700_v6 = vld [vmem:[%s18221_s3 + $0x388] sm:$0xff] }
 0x202   : > { %14536 = vmatpush3.bf16.msra.mxu1 %v14533_v13 }
 0x203   : > { %14538 = vmatprep.subr.bf16.mxu1 %v14537_v17 }
 0x204   : > { %v12395_v22 = vpop.f32.mrb[104].mxu1 }
 0x205   : > { %v1429_v25 = vmax.f32 %v12384_v14, %v12395_v22  ;;  %v1419_v27 = vpop.f32.mrb[105].mxu1  ;;  %v14569_v14 = vpack.c.bf16 %v10614_v5, %v10613_v46  ;;  %v10699_v5 = vld [vmem:[%s18221_s3 + $0x380] sm:$0xff] }
 0x206   : > { %v1428_v28 = vmax.f32 %v1344_v16, %v1419_v27  ;;  %14540 = vmatpush3.bf16.msra.mxu1 %v14537_v17  ;;  %v10687_v17 = vld [vmem:[%s18221_s3 + $0x320] sm:$0xff]  ;;  %v10617_v27 = vld [vmem:[%s18221_s3 + $0xf0] sm:$0xff]  ;;  %v16661_v8 = vpack.c.bf16 %v10700_v6, %v10699_v5 }
 0x207   : > { %v1431_v29 = vadd.f32 %v16480_v26, %v1429_v25  ;;  %14542 = vmatprep.subr.bf16.mxu1 %v14541_v21  ;;  %v14717_v25 = vpack.c.bf16 %v10688_v18, %v10687_v17 }
 0x208   : > { %v1430_v33 = vadd.f32 %v16480_v26, %v1428_v28 }
 0x209   : > { %v1433_v34 = vmax.f32 %v1431_v29, 0.0  ;;  %v10618_v29 = vld [vmem:[%s18221_s3 + $0xf8] sm:$0xff] }
 0x20a   : > { %v1432_v37 = vmax.f32 %v1430_v33, 0.0  ;;  %14544 = vmatpush3.bf16.msra.mxu1 %v14541_v21  ;;  %v10690_v33 = vld [vmem:[%s18221_s3 + $0x338] sm:$0xff] }
 0x20b   : > { %1435 = vst [vmem:[#allocation3 + $0x16] sm:$0x3f] %v1433_v34  ;;  %14546 = vmatprep.subr.bf16.mxu1 %v14545_v31  ;;  %v14577_v34 = vpack.c.bf16 %v10618_v29, %v10617_v27 }
 0x20c   : > { %1434 = vst [vmem:[#allocation3 + $0xe] sm:$0xff] %v1432_v37  ;;  %v12406_v42 = vpop.f32.mrb[106].mxu1  ;;  %12987 = vmatprep.mubr.f32.mxu0 %v1432_v37 }
 0x20d   : > { %v1517_v44 = vpop.f32.mrb[107].mxu1 }
 0x20e   : > { %14548 = vmatpush3.bf16.msra.mxu1 %v14545_v31  ;;  %v10689_v31 = vld [vmem:[%s18221_s3 + $0x330] sm:$0xff] }
 0x20f   : > { %14550 = vmatprep.subr.bf16.mxu1 %v14549_v39  ;;  %v14721_v37 = vpack.c.bf16 %v10690_v33, %v10689_v31 }
 0x213   : > { %v3531_v50 = vld [vmem:[#allocation3 + $0x8] sm:$0xff]  ;;  %v16540_v19 = vld [vmem:[#allocation3 + $0x10] sm:$0xff] }
 0x214   : > { %v12417_v52 = vpop.f32.mrb[108].mxu1  ;;  %12693 = vmatmul.mubr.f32.vlgmr.msra.gmra.mrb[154].mxu1 %v3531_v50 }
 0x215   : > { %v1602_v53 = vmax.f32 %v12406_v42, %v12417_v52  ;;  %v1592_v54 = vpop.f32.mrb[109].mxu1  ;;  %12695 = vmatprep.mubr.f32.mxu1 %v16540_v19  ;;  %14552 = vmatpush3.bf16.msra.mxu1 %v14549_v39  ;;  %v10619_v42 = vld [vmem:[%s18221_s3 + $0x100] sm:$0xff] }
 0x216   : > { %v1601_v56 = vmax.f32 %v1517_v44, %v1592_v54  ;;  %14554 = vmatprep.subr.bf16.mxu1 %v14553_v48 }
 0x217   : > { %v1604_v57 = vadd.f32 %v16480_v26, %v1602_v53 }
 0x218   : > { %v1603_v30 = vadd.f32 %v16480_v26, %v1601_v56 }
 0x219   : > { %v1606_v60 = vmax.f32 %v1604_v57, 0.0  ;;  %14556 = vmatpush3.bf16.msra.mxu1 %v14553_v48  ;;  %v10693_v48 = vld [vmem:[%s18221_s3 + $0x350] sm:$0xff]  ;;  %v10696_v57 = vld [vmem:[%s18221_s3 + $0x368] sm:$0xff] }
 0x21a   : > { %v1605_v61 = vmax.f32 %v1603_v30, 0.0  ;;  %14558 = vmatprep.subr.bf16.mxu1 %v14557_v41  ;;  %v14729_v53 = vpack.c.bf16 %v10694_v49, %v10693_v48 }
 0x21b   : > { %1608 = vst [vmem:[#allocation3 + $0x24] sm:$0x3f] %v1606_v60 }
 0x21c   : > { %1607 = vst [vmem:[#allocation3 + $0x1c] sm:$0xff] %v1605_v61  ;;  %v12428_v2 = vpop.f32.mrb[110].mxu1 }
 0x21d   : > { %v1690_v3 = vpop.f32.mrb[111].mxu1  ;;  %14560 = vmatpush3.bf16.msra.mxu1 %v14557_v41  ;;  %v10695_v41 = vld [vmem:[%s18221_s3 + $0x360] sm:$0xff] }
 0x21e   : > { %14562 = vmatprep.subr.bf16.mxu1 %v14561_v62  ;;  %v14733_v61 = vpack.c.bf16 %v10696_v57, %v10695_v41 }
 0x221   : > { %14564 = vmatpush3.bf16.msra.mxu1 %v14561_v62 }
 0x222   : > { %14566 = vmatprep.subr.bf16.mxu1 %v14565_v4 }
 0x223   : > { %v16578_v11 = vld [vmem:[#allocation3 + $0x18] sm:$0xff]  ;;  %v16580_v12 = vld [vmem:[#allocation3 + $0x20] sm:$0xff] }
 0x224   : > { %v4750_v13 = vld [vmem:[#allocation3 + $0x16] sm:$0xff]  ;;  %v12439_v15 = vpop.f32.mrb[112].mxu1  ;;  %12696 = vmatmul.mubr.f32.gmra.mrb[156].mxu1 %v16578_v11  ;;  %v4751_v16 = vld [vmem:[#allocation3 + $0x1e] sm:$0xff] }
 0x225   : > { %12988 = vmatmul.mubr.f32.vlgmr.msra.gmra.mrb[0].mxu0 %v4750_v13  ;;  %v1775_v20 = vmax.f32 %v12428_v2, %v12439_v15  ;;  %v1765_v21 = vpop.f32.mrb[113].mxu1  ;;  %12698 = vmatprep.mubr.f32.mxu1 %v16580_v12 }
 0x226   : > { %12990 = vmatprep.mubr.f32.mxu0 %v4751_v16  ;;  %v1774_v22 = vmax.f32 %v1690_v3, %v1765_v21  ;;  %14568 = vmatpush3.bf16.msra.mxu1 %v14565_v4  ;;  %v14737_v4 = vpack.c.bf16 %v10698_v1, %v10697_v0 }
 0x227   : > { %14712 = vmatpush3.bf16.msra.mxu0 %v16528_v43  ;;  %v1777_v23 = vadd.f32 %v16480_v26, %v1775_v20  ;;  %14570 = vmatprep.subr.bf16.mxu1 %v14569_v14  ;;  %v10620_v43 = vld [vmem:[%s18221_s3 + $0x108] sm:$0xff] }
 0x228   : > { %14714 = vmatprep.subr.bf16.mxu0 %v14713_v10  ;;  %v16596_v28 = vadd.f32 %v16480_v26, %v1774_v22  ;;  %v16622_v47 = vpack.c.bf16 %v10620_v43, %v10619_v42 }
 0x229   : > { %v1779_v35 = vmax.f32 %v1777_v23, 0.0 }
 0x22a   : > { %v1778_v36 = vmax.f32 %v16596_v28, 0.0  ;;  %14572 = vmatpush3.bf16.msra.mxu1 %v14569_v14 }
 0x22b   : > { %14716 = vmatpush3.bf16.msra.mxu0 %v14713_v10  ;;  %1781 = vst [vmem:[#allocation3 + $0x32] sm:$0x3f] %v1779_v35  ;;  %14574 = vmatprep.subr.bf16.mxu1 %v14573_v24 }
 0x22c   : > { %14718 = vmatprep.subr.bf16.mxu0 %v14717_v25  ;;  %1780 = vst [vmem:[#allocation3 + $0x2a] sm:$0xff] %v1778_v36  ;;  %v12450_v39 = vpop.f32.mrb[114].mxu1 }
 0x22d   : > { %v1863_v44 = vpop.f32.mrb[115].mxu1 }
 0x22e   : > { %14576 = vmatpush3.bf16.msra.mxu1 %v14573_v24 }
 0x22f   : > { %14720 = vmatpush3.bf16.msra.mxu0 %v14717_v25  ;;  %14578 = vmatprep.subr.bf16.mxu1 %v14577_v34 }
 0x230   : > { %14722 = vmatprep.subr.bf16.mxu0 %v14721_v37 }
 0x232   : > { %14580 = vmatpush3.bf16.msra.mxu1 %v14577_v34 }
 0x233   : > { %14724 = vmatpush3.bf16.msra.mxu0 %v14721_v37  ;;  %v16630_v50 = vld [vmem:[#allocation3 + $0x28] sm:$0xff]  ;;  %v16632_v51 = vld [vmem:[#allocation3 + $0x30] sm:$0xff]  ;;  %14582 = vmatprep.subr.bf16.mxu1 %v16622_v47 }
 0x234   : > { %v4752_v52 = vld [vmem:[#allocation3 + $0x26] sm:$0xff]  ;;  %14726 = vmatprep.subr.bf16.mxu0 %v14725_v45  ;;  %v12461_v54 = vpop.f32.mrb[116].mxu1  ;;  %12699 = vmatmul.mubr.f32.gmra.mrb[158].mxu1 %v16630_v50  ;;  %v4753_v56 = vld [vmem:[#allocation3 + $0x2e] sm:$0xff] }
 0x235   : > { %12991 = vmatmul.mubr.f32.gmra.mrb[2].mxu0 %v4752_v52  ;;  %v1948_v58 = vmax.f32 %v12450_v39, %v12461_v54  ;;  %v1938_v59 = vpop.f32.mrb[117].mxu1  ;;  %12701 = vmatprep.mubr.f32.mxu1 %v16632_v51 }
 0x236   : > { %12993 = vmatprep.mubr.f32.mxu0 %v4753_v56  ;;  %v1947_v30 = vmax.f32 %v1863_v44, %v1938_v59 }
 0x237   : > { %14728 = vmatpush3.bf16.msra.mxu0 %v14725_v45  ;;  %v1950_v60 = vadd.f32 %v16480_v26, %v1948_v58 }
 0x238   : > { %14730 = vmatprep.subr.bf16.mxu0 %v14729_v53  ;;  %v1949_v62 = vadd.f32 %v16480_v26, %v1947_v30 }
 0x239   : > { %v1952_v2 = vmax.f32 %v1950_v60, 0.0 }
 0x23a   : > { %v16651_v3 = vmax.f32 %v1949_v62, 0.0 }
 0x23b   : > { %14732 = vmatpush3.bf16.msra.mxu0 %v14729_v53  ;;  %1954 = vst [vmem:[#allocation3 + $0x40] sm:$0x3f] %v1952_v2 }
 0x23c   : > { %14734 = vmatprep.subr.bf16.mxu0 %v14733_v61  ;;  %1953 = vst [vmem:[#allocation3 + $0x38] sm:$0xff] %v16651_v3  ;;  %v12472_v46 = vpop.f32.mrb[118].mxu1  ;;  %12702 = vmatmul.mubr.f32.gmra.mrb[160].mxu1 %v16651_v3 }
 0x23d   : > { %v2036_v7 = vpop.f32.mrb[119].mxu1 }
 0x23f   : > { %14736 = vmatpush3.bf16.msra.mxu0 %v14733_v61 }
 0x240   : > { %14738 = vmatprep.subr.bf16.mxu0 %v14737_v4 }
 0x243   : > { %14740 = vmatpush3.bf16.msra.mxu0 %v14737_v4  ;;  %v4754_v9 = vld [vmem:[#allocation3 + $0x36] sm:$0xff]  ;;  %v4755_v13 = vld [vmem:[#allocation3 + $0x3e] sm:$0xff] }
 0x244   : > { %14742 = vmatprep.subr.bf16.mxu0 %v16661_v8  ;;  %v12483_v14 = vpop.f32.mrb[120].mxu1  ;;  %12994 = vmatmul.mubr.f32.gmra.mrb[4].mxu0 %v4754_v9 }
 0x245   : > { %v2121_v10 = vmax.f32 %v12472_v46, %v12483_v14  ;;  %v2111_v15 = vpop.f32.mrb[121].mxu1  ;;  %12996 = vmatprep.mubr.f32.mxu0 %v4755_v13 }
 0x246   : > { %v2120_v16 = vmax.f32 %v2036_v7, %v2111_v15 }
 0x247   : > { %v2123_v17 = vadd.f32 %v16480_v26, %v2121_v10 }
 0x248   : > { %v2122_v18 = vadd.f32 %v16480_v26, %v2120_v16 }
 0x249   : > { %v2125_v20 = vmax.f32 %v2123_v17, 0.0 }
 0x24a   : > { %v2124_v21 = vmax.f32 %v2122_v18, 0.0 }
 0x24b   : > { %2127 = vst [vmem:[#allocation3 + $0x4e] sm:$0x3f] %v2125_v20 }
 0x24c   : > { %2126 = vst [vmem:[#allocation3 + $0x46] sm:$0xff] %v2124_v21  ;;  %v12494_v22 = vpop.f32.mrb[122].mxu1  ;;  %12997 = vmatmul.mubr.f32.gmra.mrb[6].mxu0 %v2124_v21 }
 0x24d   : > { %v2209_v23 = vpop.f32.mrb[123].mxu1 }
 0x253   : > { %v16666_v24 = vld [vmem:[#allocation3 + $0x40] sm:$0xff]  ;;  %v16668_v25 = vld [vmem:[#allocation3 + $0x48] sm:$0xff] }
 0x254   : > { %v12505_v27 = vpop.f32.mrb[124].mxu1  ;;  %12704 = vmatprep.mubr.f32.mxu1 %v16666_v24  ;;  %v16899_v28 = vld [vmem:[#allocation3 + $0x42] sm:$0xff] }
 0x255   : > { %v2294_v29 = vmax.f32 %v12494_v22, %v12505_v27  ;;  %v2284_v31 = vpop.f32.mrb[125].mxu1  ;;  %12705 = vmatmul.mubr.f32.gmra.mrb[162].mxu1 %v16668_v25 }
 0x256   : > { %v2293_v33 = vmax.f32 %v2209_v23, %v2284_v31 }
 0x257   : > { %v2296_v35 = vadd.f32 %v16480_v26, %v2294_v29 }
 0x258   : > { %v2295_v34 = vadd.f32 %v16480_v26, %v2293_v33 }
 0x259   : > { %v2298_v37 = vmax.f32 %v2296_v35, 0.0 }
 0x25a   : > { %v2297_v38 = vmax.f32 %v2295_v34, 0.0 }
 0x25b   : > { %2300 = vst [vmem:[#allocation3 + $0x5c] sm:$0x3f] %v2298_v37 }
 0x25c   : > { %2299 = vst [vmem:[#allocation3 + $0x54] sm:$0xff] %v2297_v38  ;;  %v12516_v39 = vpop.f32.mrb[126].mxu1 }
 0x25d   : > { %v2382_v40 = vpop.f32.mrb[127].mxu1 }
 0x263   : > { %v16674_v42 = vld [vmem:[#allocation3 + $0x50] sm:$0xff]  ;;  %v16676_v43 = vld [vmem:[#allocation3 + $0x58] sm:$0xff] }
 0x264   : > { %v4757_v44 = vld [vmem:[#allocation3 + $0x4e] sm:$0xff]  ;;  %v12527_v45 = vpop.f32.mrb[128].mxu1  ;;  %12707 = vmatprep.mubr.f32.mxu1 %v16674_v42  ;;  %v4758_v48 = vld [vmem:[#allocation3 + $0x56] sm:$0xff] }
 0x265   : > { %12999 = vmatprep.mubr.f32.mxu0 %v4757_v44  ;;  %v2467_v49 = vmax.f32 %v12516_v39, %v12527_v45  ;;  %v2457_v52 = vpop.f32.mrb[129].mxu1  ;;  %12708 = vmatmul.mubr.f32.gmra.mrb[164].mxu1 %v16676_v43  ;;  %v10621_v44 = vld [vmem:[%s18221_s3 + $0x110] sm:$0xff]  ;;  %v10622_v45 = vld [vmem:[%s18221_s3 + $0x118] sm:$0xff] }
 0x266   : > { %13000 = vmatmul.mubr.f32.gmra.mrb[8].mxu0 %v4758_v48  ;;  %v2466_v53 = vmax.f32 %v2382_v40, %v2457_v52 }
 0x267   : > { %v2469_v54 = vadd.f32 %v16480_v26, %v2467_v49  ;;  %v3773_v49 = vld [vmem:[#allocation3 + $0x1] sm:$0xff] }
 0x268   : > { %v16682_v56 = vadd.f32 %v16480_v26, %v2466_v53 }
 0x269   : > { %v2471_v41 = vmax.f32 %v2469_v54, 0.0  ;;  %v14585_v54 = vpack.c.bf16 %v10622_v45, %v10621_v44  ;;  %v4994_v45 = vld [vmem:[#allocation3 + $0x17] sm:$0xff] }
 0x26a   : > { %v2470_v57 = vmax.f32 %v16682_v56, 0.0  ;;  %v16968_v56 = vld [vmem:[%s18220_s2] ss:$0 sm:$0xff] }
 0x26b   : > { %2473 = vst [vmem:[#allocation3 + $0x6a] sm:$0x3f] %v2471_v41  ;;  %v3774_v41 = vld [vmem:[#allocation3 + $0x9] sm:$0xff] }
 0x26c   : > { %2472 = vst [vmem:[#allocation3 + $0x62] sm:$0xff] %v2470_v57  ;;  %v12538_v58 = vpop.f32.mrb[130].mxu1 }
 0x26d   : > { %v2555_v59 = vpop.f32.mrb[131].mxu1 }
 0x273   : > { %v16687_v30 = vld [vmem:[#allocation3 + $0x60] sm:$0xff]  ;;  %v16689_v60 = vld [vmem:[#allocation3 + $0x68] sm:$0xff] }
 0x274   : > { %v4759_v61 = vld [vmem:[#allocation3 + $0x5e] sm:$0xff]  ;;  %v12549_v62 = vpop.f32.mrb[132].mxu1  ;;  %12710 = vmatprep.mubr.f32.mxu1 %v16687_v30  ;;  %v4760_v0 = vld [vmem:[#allocation3 + $0x66] sm:$0xff] }
 0x275   : > { %13002 = vmatprep.mubr.f32.mxu0 %v4759_v61  ;;  %v2640_v1 = vmax.f32 %v12538_v58, %v12549_v62  ;;  %v2630_v2 = vpop.f32.mrb[133].mxu1  ;;  %12711 = vmatmul.mubr.f32.gmra.mrb[166].mxu1 %v16689_v60  ;;  %v10623_v58 = vld [vmem:[%s18221_s3 + $0x120] sm:$0xff] }
 0x276   : > { %13003 = vmatmul.mubr.f32.gmra.mrb[10].mxu0 %v4760_v0  ;;  %v2639_v4 = vmax.f32 %v2555_v59, %v2630_v2  ;;  %v10624_v59 = vld [vmem:[%s18221_s3 + $0x128] sm:$0xff] }
 0x277   : > { %v2642_v46 = vadd.f32 %v16480_v26, %v2640_v1  ;;  %v16721_v61 = vld [vmem:[#allocation3 + $0x11] sm:$0xff]  ;;  %v14589_v1 = vpack.c.bf16 %v10624_v59, %v10623_v58  ;;  %v16725_v2 = vld [vmem:[#allocation3 + $0x19] sm:$0xff] }
 0x278   : > { %v2641_v5 = vadd.f32 %v16480_v26, %v2639_v4  ;;  %v16728_v4 = vld [vmem:[#allocation3 + $0x21] sm:$0xff]  ;;  %v10632_v58 = vld [vmem:[%s18221_s3 + $0x168] sm:$0xff] }
 0x279   : > { %v2644_v6 = vmax.f32 %v2642_v46, 0.0  ;;  %v10625_v46 = vld [vmem:[%s18221_s3 + $0x130] sm:$0xff]  ;;  %v16778_v59 = vld [vmem:[#allocation3 + $0x51] sm:$0xff] }
 0x27a   : > { %v16695_v7 = vmax.f32 %v2641_v5, 0.0  ;;  %v10626_v5 = vld [vmem:[%s18221_s3 + $0x138] sm:$0xff] }
 0x27b   : > { %2646 = vst [vmem:[#allocation3 + $0x78] sm:$0x3f] %v2644_v6 }
 0x27c   : > { %2645 = vst [vmem:[#allocation3 + $0x70] sm:$0xff] %v16695_v7  ;;  %v12560_v9 = vpop.f32.mrb[134].mxu1  ;;  %12713 = vmatprep.mubr.f32.mxu1 %v16695_v7 }
 0x27d   : > { %v2728_v13 = vpop.f32.mrb[135].mxu1 }
 0x283   : > { %v4761_v14 = vld [vmem:[#allocation3 + $0x6e] sm:$0xff]  ;;  %v4762_v10 = vld [vmem:[#allocation3 + $0x76] sm:$0xff] }
 0x284   : > { %v12571_v15 = vpop.f32.mrb[136].mxu1  ;;  %13005 = vmatprep.mubr.f32.mxu0 %v4761_v14  ;;  %v16740_v14 = vld [vmem:[#allocation3 + $0x31] sm:$0xff] }
 0x285   : > { %v2813_v16 = vmax.f32 %v12560_v9, %v12571_v15  ;;  %v2803_v17 = vpop.f32.mrb[137].mxu1  ;;  %13006 = vmatmul.mubr.f32.gmra.mrb[12].mxu0 %v4762_v10  ;;  %v10627_v10 = vld [vmem:[%s18221_s3 + $0x140] sm:$0xff]  ;;  %v10628_v15 = vld [vmem:[%s18221_s3 + $0x148] sm:$0xff] }
 0x286   : > { %v2812_v18 = vmax.f32 %v2728_v13, %v2803_v17  ;;  %v14593_v13 = vpack.c.bf16 %v10626_v5, %v10625_v46  ;;  %v4996_v5 = vld [vmem:[#allocation3 + $0x27] sm:$0xff] }
 0x287   : > { %v2815_v20 = vadd.f32 %v16480_v26, %v2813_v16 }
 0x288   : > { %v2814_v21 = vadd.f32 %v16480_v26, %v2812_v18 }
 0x289   : > { %v2817_v22 = vmax.f32 %v2815_v20, 0.0  ;;  %v4993_v20 = vld [vmem:[#allocation3 + $0xf] sm:$0xff] }
 0x28a   : > { %v2816_v23 = vmax.f32 %v2814_v21, 0.0  ;;  %v10629_v21 = vld [vmem:[%s18221_s3 + $0x150] sm:$0xff] }
 0x28b   : > { %2819 = vst [vmem:[#allocation3 + $0x86] sm:$0x3f] %v2817_v22 }
 0x28c   : > { %2818 = vst [vmem:[#allocation3 + $0x7e] sm:$0xff] %v2816_v23  ;;  %v12582_v27 = vpop.f32.mrb[138].mxu1  ;;  %13008 = vmatprep.mubr.f32.mxu0 %v2816_v23  ;;  %v16752_v23 = vld [vmem:[#allocation3 + $0x39] sm:$0xff] }
 0x28d   : > { %v2901_v29 = vpop.f32.mrb[139].mxu1 }
 0x292   : > { %v3547_v40 = vld [vmem:[#allocation3 + $0x88] sm:$0xf] }
 0x293   : > { %v16701_v31 = vld [vmem:[#allocation3 + $0x78] sm:$0xff]  ;;  %v16703_v33 = vld [vmem:[#allocation3 + $0x80] sm:$0xff] }
 0x294   : > { %v12593_v35 = vpop.f32.mrb[140].mxu1  ;;  %12714 = vmatmul.mubr.f32.gmra.mrb[168].mxu1 %v16701_v31 }
 0x295   : > { %v2986_v34 = vmax.f32 %v12582_v27, %v12593_v35  ;;  %v2976_v37 = vpop.f32.mrb[141].mxu1  ;;  %12716 = vmatprep.mubr.f32.mxu1 %v16703_v33  ;;  %v10630_v35 = vld [vmem:[%s18221_s3 + $0x158] sm:$0xff] }
 0x296   : > { %v2985_v38 = vmax.f32 %v2901_v29, %v2976_v37  ;;  %v14597_v29 = vpack.c.bf16 %v10628_v15, %v10627_v10  ;;  %v16759_v37 = vld [vmem:[#allocation3 + $0x41] sm:$0xff] }
 0x297   : > { %v2988_v39 = vadd.f32 %v16480_v26, %v2986_v34  ;;  %v10633_v15 = vld [vmem:[%s18221_s3 + $0x170] sm:$0xff] }
 0x298   : > { %v2987_v48 = vadd.f32 %v16480_v26, %v2985_v38  ;;  %12717 = vmatmul.mubr.f32.gmra.mrb[170].mxu1 %v3547_v40  ;;  %v10701_v38 = vld [vmem:[%s18221_s3 + $0x390] sm:$0xff] }
 0x299   : > { %v2990_v52 = vmax.f32 %v2988_v39, 0.0  ;;  %12751 = vmatprep.mubr.f32.mxu1 %v3773_v49  ;;  %v10702_v39 = vld [vmem:[%s18221_s3 + $0x398] sm:$0xff] }
 0x29a   : > { %v2989_v53 = vmax.f32 %v2987_v48, 0.0  ;;  %v4995_v48 = vld [vmem:[#allocation3 + $0x1f] sm:$0xff] }
 0x29b   : > { %2992 = vst [vmem:[#allocation3 + $0x94] sm:$0x3f] %v2990_v52  ;;  %v16769_v52 = vld [vmem:[#allocation3 + $0x49] sm:$0xff] }
 0x29c   : > { %2991 = vst [vmem:[#allocation3 + $0x8c] sm:$0xff] %v2989_v53  ;;  %12752 = vmatmul.mubr.f32.vlgmr.msra.gmra.mrb[154].mxu1 %v3774_v41  ;;  %v12604_v62 = vpop.f32.mrb[142].mxu1  ;;  %v14601_v53 = vpack.c.bf16 %v10630_v35, %v10629_v21  ;;  %v10631_v41 = vld [vmem:[%s18221_s3 + $0x160] sm:$0xff]  ;;  %v10708_v21 = vld [vmem:[%s18221_s3 + $0x3c8] sm:$0xff] }
 0x29d   : > { %12754 = vmatprep.mubr.f32.mxu1 %v16721_v61  ;;  %14584 = vmatpush3.bf16.msra.mxu1 %v16622_v47  ;;  %v3074_v0 = vpop.f32.mrb[143].mxu1  ;;  %v16737_v47 = vld [vmem:[#allocation3 + $0x29] sm:$0xff] }
 0x29e   : > { %14586 = vmatprep.subr.bf16.mxu1 %v14585_v54 }
 0x2a0   : > { %12755 = vmatmul.mubr.f32.gmra.mrb[156].mxu1 %v16725_v2 }
 0x2a1   : > { %12757 = vmatprep.mubr.f32.mxu1 %v16728_v4  ;;  %14588 = vmatpush3.bf16.msra.mxu1 %v14585_v54  ;;  %v14745_v54 = vpack.c.bf16 %v10702_v39, %v10701_v38  ;;  %v16820_v38 = vld [vmem:[#allocation3 + $0x71] sm:$0xff]  ;;  %v4999_v39 = vld [vmem:[#allocation3 + $0x3f] sm:$0xff] }
 0x2a2   : > { %14590 = vmatprep.subr.bf16.mxu1 %v14589_v1  ;;  %v4766_v27 = vld [vmem:[#allocation3 + $0x96] sm:$0xf] }
 0x2a3   : > { %v4764_v6 = vld [vmem:[#allocation3 + $0x86] sm:$0xff]  ;;  %v4765_v9 = vld [vmem:[#allocation3 + $0x8e] sm:$0xff] }
 0x2a4   : > { %12758 = vmatmul.mubr.f32.gmra.mrb[158].mxu1 %v16737_v47  ;;  %13009 = vmatmul.mubr.f32.gmra.mrb[14].mxu0 %v4764_v6  ;;  %v12615_v16 = vpop.f32.mrb[144].mxu1  ;;  %v4997_v6 = vld [vmem:[#allocation3 + $0x2f] sm:$0xff] }
 0x2a5   : > { %12760 = vmatprep.mubr.f32.mxu1 %v16740_v14  ;;  %13011 = vmatprep.mubr.f32.mxu0 %v4765_v9  ;;  %v3159_v17 = vmax.f32 %v12604_v62, %v12615_v16  ;;  %v3149_v18 = vpop.f32.mrb[145].mxu1  ;;  %v10703_v62 = vld [vmem:[%s18221_s3 + $0x3a0] sm:$0xff]  ;;  %v16790_v9 = vld [vmem:[#allocation3 + $0x59] sm:$0xff]  ;;  %v10634_v16 = vld [vmem:[%s18221_s3 + $0x178] sm:$0xff] }
 0x2a6   : > { %14592 = vmatpush3.bf16.msra.mxu1 %v14589_v1  ;;  %v3158_v22 = vmax.f32 %v3074_v0, %v3149_v18  ;;  %v10704_v0 = vld [vmem:[%s18221_s3 + $0x3a8] sm:$0xff]  ;;  %v10706_v18 = vld [vmem:[%s18221_s3 + $0x3b8] sm:$0xff] }
 0x2a7   : > { %14594 = vmatprep.subr.bf16.mxu1 %v14593_v13  ;;  %v3161_v34 = vadd.f32 %v16480_v26, %v3159_v17  ;;  %v14749_v10 = vpack.c.bf16 %v10704_v0, %v10703_v62  ;;  %v16799_v17 = vld [vmem:[#allocation3 + $0x61] sm:$0xff]  ;;  %v5001_v0 = vld [vmem:[#allocation3 + $0x4f] sm:$0xff] }
 0x2a8   : > { %12761 = vmatmul.mubr.f32.gmra.mrb[160].mxu1 %v16752_v23  ;;  %13012 = vmatmul.mubr.f32.gmra.mrb[16].mxu0 %v4766_v27  ;;  %v3160_v40 = vadd.f32 %v16480_v26, %v3158_v22  ;;  %v16814_v22 = vld [vmem:[#allocation3 + $0x69] sm:$0xff]  ;;  %v4998_v27 = vld [vmem:[#allocation3 + $0x37] sm:$0xff]  ;;  %v16834_v62 = vld [vmem:[#allocation3 + $0x81] sm:$0xff] }
 0x2a9   : > { %12763 = vmatprep.mubr.f32.mxu1 %v16759_v37  ;;  %13046 = vmatprep.mubr.f32.mxu0 %v4993_v20  ;;  %v3163_v44 = vmax.f32 %v3161_v34, 0.0  ;;  %v10707_v20 = vld [vmem:[%s18221_s3 + $0x3c0] sm:$0xff] }
 0x2aa   : > { %14596 = vmatpush3.bf16.msra.mxu1 %v14593_v13  ;;  %v3162_v49 = vmax.f32 %v3160_v40, 0.0  ;;  %v14605_v13 = vpack.c.bf16 %v10632_v58, %v10631_v41  ;;  %v10635_v34 = vld [vmem:[%s18221_s3 + $0x180] sm:$0xff]  ;;  %v10636_v40 = vld [vmem:[%s18221_s3 + $0x188] sm:$0xff]  ;;  %v10709_v58 = vld [vmem:[%s18221_s3 + $0x3d0] sm:$0xff] }
 0x2ab   : > { %14598 = vmatprep.subr.bf16.mxu1 %v14597_v29  ;;  %3165 = vst [vmem:[#allocation3 + $0xa2] sm:$0x3f] %v3163_v44  ;;  %v14613_v41 = vpack.c.bf16 %v10636_v40, %v10635_v34  ;;  %v10639_v40 = vld [vmem:[%s18221_s3 + $0x1a0] sm:$0xff] }
 0x2ac   : > { %12764 = vmatmul.mubr.f32.gmra.mrb[162].mxu1 %v16769_v52  ;;  %13047 = vmatmul.mubr.f32.vlgmr.msra.gmra.mrb[0].mxu0 %v4994_v45  ;;  %3164 = vst [vmem:[#allocation3 + $0x9a] sm:$0xff] %v3162_v49  ;;  %v16786_v1 = vpop.f32.mrb[146].mxu1  ;;  %v16828_v49 = vld [vmem:[#allocation3 + $0x79] sm:$0xff] }
 0x2ad   : > { %12766 = vmatprep.mubr.f32.mxu1 %v16778_v59  ;;  %13049 = vmatprep.mubr.f32.mxu0 %v4995_v48  ;;  %v3247_v46 = vpop.f32.mrb[147].mxu1 }
 0x2ae   : > { %14600 = vmatpush3.bf16.msra.mxu1 %v14597_v29  ;;  %14744 = vmatpush3.bf16.msra.mxu0 %v16661_v8  ;;  %v10705_v8 = vld [vmem:[%s18221_s3 + $0x3b0] sm:$0xff]  ;;  %v14609_v29 = vpack.c.bf16 %v10634_v16, %v10633_v15  ;;  %v3790_v15 = vld [vmem:[#allocation3 + $0x89] sm:$0xf]  ;;  %v5002_v16 = vld [vmem:[#allocation3 + $0x57] sm:$0xff] }
 0x2af   : > { %14602 = vmatprep.subr.bf16.mxu1 %v14601_v53  ;;  %14746 = vmatprep.subr.bf16.mxu0 %v14745_v54  ;;  %v14753_v35 = vpack.c.bf16 %v10706_v18, %v10705_v8  ;;  %v5003_v18 = vld [vmem:[#allocation3 + $0x5f] sm:$0xff] }
 0x2b0   : > { %12767 = vmatmul.mubr.f32.gmra.mrb[164].mxu1 %v16790_v9  ;;  %13050 = vmatmul.mubr.f32.gmra.mrb[2].mxu0 %v4996_v5 }
 0x2b1   : > { %12769 = vmatprep.mubr.f32.mxu1 %v16799_v17  ;;  %13052 = vmatprep.mubr.f32.mxu0 %v4997_v6  ;;  %v4017_v6 = vld [vmem:[#allocation3 + $0x2] sm:$0xff] }
 0x2b2   : > { %14604 = vmatpush3.bf16.msra.mxu1 %v14601_v53  ;;  %14748 = vmatpush3.bf16.msra.mxu0 %v14745_v54  ;;  %v5000_v53 = vld [vmem:[#allocation3 + $0x47] sm:$0xff]  ;;  %v14757_v54 = vpack.c.bf16 %v10708_v21, %v10707_v20  ;;  %v10711_v20 = vld [vmem:[%s18221_s3 + $0x3e0] sm:$0xff]  ;;  %v10712_v21 = vld [vmem:[%s18221_s3 + $0x3e8] sm:$0xff] }
 0x2b3   : > { %14606 = vmatprep.subr.bf16.mxu1 %v14605_v13  ;;  %14750 = vmatprep.subr.bf16.mxu0 %v14749_v10 }
 0x2b4   : > { %12770 = vmatmul.mubr.f32.gmra.mrb[166].mxu1 %v16814_v22  ;;  %13053 = vmatmul.mubr.f32.gmra.mrb[4].mxu0 %v4998_v27  ;;  %v16825_v44 = vpop.f32.mrb[148].mxu1  ;;  %v4018_v27 = vld [vmem:[#allocation3 + $0xa] sm:$0xff] }
 0x2b5   : > { %12772 = vmatprep.mubr.f32.mxu1 %v16820_v38  ;;  %13055 = vmatprep.mubr.f32.mxu0 %v4999_v39  ;;  %v3322_v45 = vpop.f32.mrb[149].mxu1  ;;  %v14765_v39 = vpack.c.bf16 %v10712_v21, %v10711_v20  ;;  %v5009_v21 = vld [vmem:[#allocation3 + $0x8f] sm:$0xff] }
 0x2b6   : > { %14608 = vmatpush3.bf16.msra.mxu1 %v14605_v13  ;;  %14752 = vmatpush3.bf16.msra.mxu0 %v14749_v10  ;;  %v3331_v48 = vmax.f32 %v3247_v46, %v3322_v45  ;;  %v10710_v46 = vld [vmem:[%s18221_s3 + $0x3d8] sm:$0xff]  ;;  %v10637_v13 = vld [vmem:[%s18221_s3 + $0x190] sm:$0xff]  ;;  %v10640_v45 = vld [vmem:[%s18221_s3 + $0x1a8] sm:$0xff] }
 0x2b7   : > { %14610 = vmatprep.subr.bf16.mxu1 %v14609_v29  ;;  %14754 = vmatprep.subr.bf16.mxu0 %v14753_v35  ;;  %v14761_v8 = vpack.c.bf16 %v10710_v46, %v10709_v58  ;;  %v16868_v58 = vld [vmem:[#allocation3 + $0x1a] sm:$0xff] }
 0x2b8   : > { %12773 = vmatmul.mubr.f32.gmra.mrb[168].mxu1 %v16828_v49  ;;  %13056 = vmatmul.mubr.f32.gmra.mrb[6].mxu0 %v5000_v53  ;;  %v3333_v5 = vadd.f32 %v16480_v26, %v3331_v48  ;;  %v10638_v26 = vld [vmem:[%s18221_s3 + $0x198] sm:$0xff]  ;;  %v10713_v53 = vld [vmem:[%s18221_s3 + $0x3f0] sm:$0xff]  ;;  %v5006_v46 = vld [vmem:[#allocation3 + $0x77] sm:$0xff] }
 0x2b9   : > { %12775 = vmatprep.mubr.f32.mxu1 %v16834_v62  ;;  %13058 = vmatprep.mubr.f32.mxu0 %v5001_v0  ;;  %v14617_v34 = vpack.c.bf16 %v10638_v26, %v10637_v13  ;;  %v5005_v48 = vld [vmem:[#allocation3 + $0x6f] sm:$0xff]  ;;  %v16870_v0 = vld [vmem:[#allocation3 + $0x22] sm:$0xff] }
 0x2ba   : > { %14612 = vmatpush3.bf16.msra.mxu1 %v14609_v29  ;;  %14756 = vmatpush3.bf16.msra.mxu0 %v14753_v35  ;;  %v3335_v10 = vmax.f32 %v3333_v5, 0.0  ;;  %v16853_v29 = vld [vmem:[#allocation3 + $0x12] sm:$0xff]  ;;  %v5004_v35 = vld [vmem:[#allocation3 + $0x67] sm:$0xff]  ;;  %v14621_v5 = vpack.c.bf16 %v10640_v45, %v10639_v40 }
 0x2bb   : > { %14758 = vmatprep.subr.bf16.mxu0 %v14757_v54  ;;  %14614 = vmatprep.subr.bf16.mxu1 %v14613_v41  ;;  %v10641_v13 = vld [vmem:[%s18221_s3 + $0x1b0] sm:$0xff]  ;;  %v16886_v26 = vld [vmem:[#allocation3 + $0x32] sm:$0xff]  ;;  %v10646_v45 = vld [vmem:[%s18221_s3 + $0x1d8] sm:$0xff] }
 0x2bc   : > { %12776 = vmatmul.mubr.f32.gmra.mrb[172].mxu1 %v3790_v15  ;;  %13059 = vmatmul.mubr.f32.gmra.mrb[8].mxu0 %v5002_v16  ;;  %3337 = vst [vmem:[#allocation3 + $0xa8] sm:$0xff] %v3335_v10  ;;  %v10642_v10 = vld [vmem:[%s18221_s3 + $0x1b8] sm:$0xff]  ;;  %v5007_v15 = vld [vmem:[#allocation3 + $0x7f] sm:$0xff] }
 0x2bd   : > { %12810 = vmatprep.mubr.f32.mxu1 %v4017_v6  ;;  %13061 = vmatprep.mubr.f32.mxu0 %v5003_v18  ;;  %v10716_v16 = vld [vmem:[%s18221_s3 + $0x408] sm:$0xff]  ;;  %v14625_v18 = vpack.c.bf16 %v10642_v10, %v10641_v13  ;;  %v10645_v40 = vld [vmem:[%s18221_s3 + $0x1d0] sm:$0xff]  ;;  %v10719_v10 = vld [vmem:[%s18221_s3 + $0x420] sm:$0xff] }
 0x2be   : > { %14760 = vmatpush3.bf16.msra.mxu0 %v14757_v54  ;;  %v10714_v54 = vld [vmem:[%s18221_s3 + $0x3f8] sm:$0xff]  ;;  %v10648_v13 = vld [vmem:[%s18221_s3 + $0x1e8] sm:$0xff] }
 0x2bf   : > { %14762 = vmatprep.subr.bf16.mxu0 %v14761_v8  ;;  %v14769_v6 = vpack.c.bf16 %v10714_v54, %v10713_v53  ;;  %v10718_v53 = vld [vmem:[%s18221_s3 + $0x418] sm:$0xff] }
 0x2c0   : > { %12811 = vmatmul.mubr.f32.vlgmr.msra.gmra.mrb[154].mxu1 %v4018_v27  ;;  %13062 = vmatmul.mubr.f32.gmra.mrb[10].mxu0 %v5004_v35  ;;  %v10643_v27 = vld [vmem:[%s18221_s3 + $0x1c0] sm:$0xff]  ;;  %v10644_v35 = vld [vmem:[%s18221_s3 + $0x1c8] sm:$0xff] }
 0x2c1   : > { %12813 = vmatprep.mubr.f32.mxu1 %v16853_v29  ;;  %13064 = vmatprep.mubr.f32.mxu0 %v5005_v48  ;;  %v10717_v48 = vld [vmem:[%s18221_s3 + $0x410] sm:$0xff]  ;;  %v16916_v54 = vld [vmem:[#allocation3 + $0x4a] sm:$0xff] }
 0x2c2   : > { %14616 = vmatpush3.bf16.msra.mxu1 %v14613_v41  ;;  %14764 = vmatpush3.bf16.msra.mxu0 %v14761_v8  ;;  %v10715_v41 = vld [vmem:[%s18221_s3 + $0x400] sm:$0xff]  ;;  %v5008_v8 = vld [vmem:[#allocation3 + $0x87] sm:$0xff] }
 0x2c3   : > { %14618 = vmatprep.subr.bf16.mxu1 %v14617_v34  ;;  %14766 = vmatprep.subr.bf16.mxu0 %v14765_v39  ;;  %v14773_v20 = vpack.c.bf16 %v10716_v16, %v10715_v41  ;;  %v16936_v41 = vld [vmem:[#allocation3 + $0x5a] sm:$0xff] }
 0x2c4   : > { %12814 = vmatmul.mubr.f32.gmra.mrb[156].mxu1 %v16868_v58  ;;  %13065 = vmatmul.mubr.f32.gmra.mrb[12].mxu0 %v5006_v46  ;;  %v14633_v46 = vpack.c.bf16 %v10646_v45, %v10645_v40  ;;  %v16983_v45 = vld [vmem:[#allocation3 + $0x7a] sm:$0xff] }
 0x2c5   : > { %12816 = vmatprep.mubr.f32.mxu1 %v16870_v0  ;;  %13067 = vmatprep.mubr.f32.mxu0 %v5007_v15  ;;  %v10720_v15 = vld [vmem:[%s18221_s3 + $0x428] sm:$0xff] }
 0x2c6   : > { %14620 = vmatpush3.bf16.msra.mxu1 %v14617_v34  ;;  %14768 = vmatpush3.bf16.msra.mxu0 %v14765_v39  ;;  %v16897_v34 = vld [vmem:[#allocation3 + $0x3a] sm:$0xff]  ;;  %v14781_v16 = vpack.c.bf16 %v10720_v15, %v10719_v10  ;;  %v10654_v10 = vld [vmem:[%s18221_s3 + $0x218] sm:$0xff] }
 0x2c7   : > { %14622 = vmatprep.subr.bf16.mxu1 %v14621_v5  ;;  %14770 = vmatprep.subr.bf16.mxu0 %v14769_v6  ;;  %v5010_v39 = vld [vmem:[#allocation3 + $0x97] sm:$0xf] }
 0x2c8   : > { %12817 = vmatmul.mubr.f32.gmra.mrb[158].mxu1 %v1778_v36  ;;  %13068 = vmatmul.mubr.f32.gmra.mrb[14].mxu0 %v5008_v8  ;;  %v14629_v36 = vpack.c.bf16 %v10644_v35, %v10643_v27  ;;  %v10649_v8 = vld [vmem:[%s18221_s3 + $0x1f0] sm:$0xff]  ;;  %v10728_v15 = vld [vmem:[%s18221_s3 + $0x468] sm:$0xff] }
 0x2c9   : > { %12819 = vmatprep.mubr.f32.mxu1 %v16886_v26  ;;  %13070 = vmatprep.mubr.f32.mxu0 %v5009_v21  ;;  %v16957_v21 = vld [vmem:[#allocation3 + $0x6a] sm:$0xff] }
 0x2ca   : > { %14624 = vmatpush3.bf16.msra.mxu1 %v14621_v5  ;;  %14772 = vmatpush3.bf16.msra.mxu0 %v14769_v6  ;;  %v14777_v5 = vpack.c.bf16 %v10718_v53, %v10717_v48  ;;  %v10647_v6 = vld [vmem:[%s18221_s3 + $0x1e0] sm:$0xff]  ;;  %v16987_v53 = vld [vmem:[#allocation3 + $0x82] sm:$0xff] }
 0x2cb   : > { %14626 = vmatprep.subr.bf16.mxu1 %v14625_v18  ;;  %14774 = vmatprep.subr.bf16.mxu0 %v14773_v20 }
 0x2cc   : > { %12820 = vmatmul.mubr.f32.gmra.mrb[160].mxu1 %v16897_v34  ;;  %13071 = vmatmul.mubr.f32.gmra.mrb[18].mxu0 %v5010_v39  ;;  %v10723_v39 = vld [vmem:[%s18221_s3 + $0x440] sm:$0xff] }
 0x2cd   : > { %13105 = vmatprep.mubr.f32.mxu0 %v16540_v19  ;;  %12822 = vmatprep.mubr.f32.mxu1 %v16899_v28  ;;  %v16926_v19 = vld [vmem:[#allocation3 + $0x52] sm:$0xff] }
 0x2ce   : > { %14628 = vmatpush3.bf16.msra.mxu1 %v14625_v18  ;;  %v10721_v18 = vld [vmem:[%s18221_s3 + $0x430] sm:$0xff] }
 0x2cf   : > { %14630 = vmatprep.subr.bf16.mxu1 %v14629_v36 }
 0x2d0   : > { %12823 = vmatmul.mubr.f32.gmra.mrb[162].mxu1 %v16916_v54  ;;  %13106 = vmatmul.mubr.f32.vlgmr.msra.gmra.mrb[0].mxu0 %v16578_v11  ;;  %v14637_v11 = vpack.c.bf16 %v10648_v13, %v10647_v6  ;;  %v4261_v6 = vld [vmem:[#allocation3 + $0x3] sm:$0xff] }
 0x2d1   : > { %13108 = vmatprep.mubr.f32.mxu0 %v16580_v12  ;;  %12825 = vmatprep.mubr.f32.mxu1 %v16926_v19  ;;  %v10650_v12 = vld [vmem:[%s18221_s3 + $0x1f8] sm:$0xff]  ;;  %v10653_v13 = vld [vmem:[%s18221_s3 + $0x210] sm:$0xff] }
 0x2d2   : > { %14632 = vmatpush3.bf16.msra.mxu1 %v14629_v36  ;;  %14776 = vmatpush3.bf16.msra.mxu0 %v14773_v20  ;;  %v10722_v20 = vld [vmem:[%s18221_s3 + $0x438] sm:$0xff]  ;;  %v14641_v27 = vpack.c.bf16 %v10650_v12, %v10649_v8  ;;  %v10652_v36 = vld [vmem:[%s18221_s3 + $0x208] sm:$0xff]  ;;  %v10655_v12 = vld [vmem:[%s18221_s3 + $0x220] sm:$0xff] }
 0x2d3   : > { %14634 = vmatprep.subr.bf16.mxu1 %v14633_v46  ;;  %14778 = vmatprep.subr.bf16.mxu0 %v14777_v5  ;;  %v14785_v35 = vpack.c.bf16 %v10722_v20, %v10721_v18  ;;  %v10656_v18 = vld [vmem:[%s18221_s3 + $0x228] sm:$0xff]  ;;  %v10730_v20 = vld [vmem:[%s18221_s3 + $0x478] sm:$0xff] }
 0x2d4   : > { %12826 = vmatmul.mubr.f32.gmra.mrb[164].mxu1 %v16936_v41  ;;  %13109 = vmatmul.mubr.f32.gmra.mrb[2].mxu0 %v16630_v50  ;;  %v3332_v50 = vmax.f32 %v16786_v1, %v16825_v44  ;;  %v16973_v1 = vld [vmem:[#allocation3 + $0x72] sm:$0xff] }
 0x2d5   : > { %13111 = vmatprep.mubr.f32.mxu0 %v16632_v51  ;;  %12828 = vmatprep.mubr.f32.mxu1 %v2470_v57  ;;  %v10724_v51 = vld [vmem:[%s18221_s3 + $0x448] sm:$0xff]  ;;  %v10651_v44 = vld [vmem:[%s18221_s3 + $0x200] sm:$0xff] }
 0x2d6   : > { %14636 = vmatpush3.bf16.msra.mxu1 %v14633_v46  ;;  %14780 = vmatpush3.bf16.msra.mxu0 %v14777_v5  ;;  %v3334_v57 = vadd.f32 %v16968_v56, %v3332_v50  ;;  %v14645_v48 = vpack.c.bf16 %v10652_v36, %v10651_v44  ;;  %v10726_v46 = vld [vmem:[%s18221_s3 + $0x458] sm:$0xff]  ;;  %v4264_v50 = vld [vmem:[#allocation3 + $0x1b] sm:$0xff] }
 0x2d7   : > { %14638 = vmatprep.subr.bf16.mxu1 %v14637_v11  ;;  %14782 = vmatprep.subr.bf16.mxu0 %v14781_v16  ;;  %v4034_v5 = vld [vmem:[#allocation3 + $0x8a] sm:$0xf] }
 0x2d8   : > { %12829 = vmatmul.mubr.f32.gmra.mrb[166].mxu1 %v16957_v21  ;;  %13112 = vmatmul.mubr.f32.gmra.mrb[4].mxu0 %v16651_v3  ;;  %v3336_v40 = vmax.f32 %v3334_v57, 0.0  ;;  %v14789_v3 = vpack.c.bf16 %v10724_v51, %v10723_v39  ;;  %v10657_v39 = vld [vmem:[%s18221_s3 + $0x230] sm:$0xff]  ;;  %v10658_v51 = vld [vmem:[%s18221_s3 + $0x238] sm:$0xff]  ;;  %v10732_v57 = vld [vmem:[%s18221_s3 + $0x488] sm:$0xff] }
 0x2d9   : > { %12831 = vmatprep.mubr.f32.mxu1 %v16973_v1  ;;  %13114 = vmatprep.mubr.f32.mxu0 %v16666_v24  ;;  %v10725_v24 = vld [vmem:[%s18221_s3 + $0x450] sm:$0xff]  ;;  %v4266_v44 = vld [vmem:[#allocation3 + $0x2b] sm:$0xff] }
 0x2da   : > { %14640 = vmatpush3.bf16.msra.mxu1 %v14637_v11  ;;  %14784 = vmatpush3.bf16.msra.mxu0 %v14781_v16  ;;  %3338 = vst [vmem:[#allocation3 + $0xb0] sm:$0x3f] %v3336_v40  ;;  %v4262_v11 = vld [vmem:[#allocation3 + $0xb] sm:$0xff]  ;;  %v4263_v16 = vld [vmem:[#allocation3 + $0x13] sm:$0xff]  ;;  %v14657_v40 = vpack.c.bf16 %v10658_v51, %v10657_v39  ;;  %v4273_v51 = vld [vmem:[#allocation3 + $0x63] sm:$0xff] }
 0x2db   : > { %14642 = vmatprep.subr.bf16.mxu1 %v14641_v27  ;;  %14786 = vmatprep.subr.bf16.mxu0 %v14785_v35  ;;  %v5252_v36 = vld [vmem:[#allocation3 + $0x88] sm:$0xff] }
 0x2dc   : > { %12832 = vmatmul.mubr.f32.gmra.mrb[168].mxu1 %v16983_v45  ;;  %13115 = vmatmul.mubr.f32.gmra.mrb[6].mxu0 %v16668_v25  ;;  %v14793_v25 = vpack.c.bf16 %v10726_v46, %v10725_v24  ;;  %v10659_v24 = vld [vmem:[%s18221_s3 + $0x240] sm:$0xff]  ;;  %v4268_v46 = vld [vmem:[#allocation3 + $0x3b] sm:$0xff] }
 0x2dd   : > { %12834 = vmatprep.mubr.f32.mxu1 %v16987_v53  ;;  %13117 = vmatprep.mubr.f32.mxu0 %v16674_v42  ;;  %v10727_v42 = vld [vmem:[%s18221_s3 + $0x460] sm:$0xff] }
 0x2de   : > { %14644 = vmatpush3.bf16.msra.mxu1 %v14641_v27  ;;  %14788 = vmatpush3.bf16.msra.mxu0 %v14785_v35  ;;  %v14797_v8 = vpack.c.bf16 %v10728_v15, %v10727_v42  ;;  %v4265_v27 = vld [vmem:[#allocation3 + $0x23] sm:$0xff] }
 0x2df   : > { %14790 = vmatprep.subr.bf16.mxu0 %v14789_v3  ;;  %14646 = vmatprep.subr.bf16.mxu1 %v14645_v48  ;;  %v10662_v42 = vld [vmem:[%s18221_s3 + $0x258] sm:$0xff]  ;;  %v10733_v15 = vld [vmem:[%s18221_s3 + $0x490] sm:$0xff] }
 0x2e0   : > { %12835 = vmatmul.mubr.f32.gmra.mrb[174].mxu1 %v4034_v5  ;;  %13118 = vmatmul.mubr.f32.gmra.mrb[8].mxu0 %v16676_v43  ;;  %v14649_v43 = vpack.c.bf16 %v10654_v10, %v10653_v13  ;;  %v5254_v5 = vld [vmem:[#allocation3 + $0x98] sm:$0xf]  ;;  %v10661_v13 = vld [vmem:[%s18221_s3 + $0x250] sm:$0xff]  ;;  %v17048_v10 = vpop.f32.mrb[150].mxu1 }
 0x2e1   : > { %12869 = vmatprep.mubr.f32.mxu1 %v4261_v6  ;;  %13120 = vmatprep.mubr.f32.mxu0 %v16687_v30  ;;  %v10729_v30 = vld [vmem:[%s18221_s3 + $0x470] sm:$0xff] }
 0x2e2   : > { %14792 = vmatpush3.bf16.msra.mxu0 %v14789_v3  ;;  %v14801_v35 = vpack.c.bf16 %v10730_v20, %v10729_v30  ;;  %v4269_v6 = vld [vmem:[#allocation3 + $0x43] sm:$0xff]  ;;  %v14665_v30 = vpack.c.bf16 %v10662_v42, %v10661_v13 }
 0x2e3   : > { %14794 = vmatprep.subr.bf16.mxu0 %v14793_v25  ;;  %v4277_v13 = vld [vmem:[#allocation3 + $0x83] sm:$0xff] }
 0x2e4   : > { %12870 = vmatmul.mubr.f32.vlgmr.msra.gmra.mrb[154].mxu1 %v4262_v11  ;;  %13121 = vmatmul.mubr.f32.gmra.mrb[10].mxu0 %v16689_v60  ;;  %v14653_v60 = vpack.c.bf16 %v10656_v18, %v10655_v12  ;;  %v10734_v11 = vld [vmem:[%s18221_s3 + $0x498] sm:$0xff]  ;;  %v4271_v18 = vld [vmem:[#allocation3 + $0x53] sm:$0xff]  ;;  %v10741_v42 = vld [vmem:[%s18221_s3 + $0x4d0] sm:$0xff] }
 0x2e5   : > { %12872 = vmatprep.mubr.f32.mxu1 %v4263_v16  ;;  %13123 = vmatprep.mubr.f32.mxu0 %v16695_v7  ;;  %v10731_v7 = vld [vmem:[%s18221_s3 + $0x480] sm:$0xff]  ;;  %v3420_v16 = vpop.f32.mrb[151].mxu1  ;;  %v14809_v20 = vpack.c.bf16 %v10734_v11, %v10733_v15  ;;  %v4278_v15 = vld [vmem:[#allocation3 + $0x8b] sm:$0xf] }
 0x2e6   : > { %14648 = vmatpush3.bf16.msra.mxu1 %v14645_v48  ;;  %14796 = vmatpush3.bf16.msra.mxu0 %v14793_v25  ;;  %v14805_v3 = vpack.c.bf16 %v10732_v57, %v10731_v7  ;;  %v5253_v48 = vld [vmem:[#allocation3 + $0x90] sm:$0xff]  ;;  %v4505_v11 = vld [vmem:[#allocation3 + $0x4] sm:$0xff] }
 0x2e7   : > { %14650 = vmatprep.subr.bf16.mxu1 %v14649_v43  ;;  %14798 = vmatprep.subr.bf16.mxu0 %v14797_v8  ;;  %v4270_v12 = vld [vmem:[#allocation3 + $0x4b] sm:$0xff] }
 0x2e8   : > { %12873 = vmatmul.mubr.f32.gmra.mrb[156].mxu1 %v4264_v50  ;;  %13124 = vmatmul.mubr.f32.gmra.mrb[12].mxu0 %v16701_v31  ;;  %v4267_v31 = vld [vmem:[#allocation3 + $0x33] sm:$0xff] }
 0x2e9   : > { %12875 = vmatprep.mubr.f32.mxu1 %v4265_v27  ;;  %13126 = vmatprep.mubr.f32.mxu0 %v16703_v33  ;;  %v10660_v33 = vld [vmem:[%s18221_s3 + $0x248] sm:$0xff]  ;;  %v10663_v50 = vld [vmem:[%s18221_s3 + $0x260] sm:$0xff] }
 0x2ea   : > { %14652 = vmatpush3.bf16.msra.mxu1 %v14649_v43  ;;  %14800 = vmatpush3.bf16.msra.mxu0 %v14797_v8  ;;  %v14661_v25 = vpack.c.bf16 %v10660_v33, %v10659_v24  ;;  %v17060_v43 = vpop.f32.mrb[152].mxu1  ;;  %v10739_v33 = vld [vmem:[%s18221_s3 + $0x4c0] sm:$0xff] }
 0x2eb   : > { %14654 = vmatprep.subr.bf16.mxu1 %v14653_v60  ;;  %14802 = vmatprep.subr.bf16.mxu0 %v14801_v35  ;;  %v3495_v8 = vpop.f32.mrb[153].mxu1 }
 0x2ec   : > { %12876 = vmatmul.mubr.f32.gmra.mrb[158].mxu1 %v4266_v44  ;;  %13127 = vmatmul.mubr.f32.gmra.mrb[14].mxu0 %v5252_v36  ;;  %v3504_v27 = vmax.f32 %v3420_v16, %v3495_v8  ;;  %v10665_v44 = vld [vmem:[%s18221_s3 + $0x270] sm:$0xff] }
 0x2ed   : > { %12878 = vmatprep.mubr.f32.mxu1 %v4267_v31  ;;  %13129 = vmatprep.mubr.f32.mxu0 %v5253_v48  ;;  %v10737_v31 = vld [vmem:[%s18221_s3 + $0x4b0] sm:$0xff] }
 0x2ee   : > { %14656 = vmatpush3.bf16.msra.mxu1 %v14653_v60  ;;  %14804 = vmatpush3.bf16.msra.mxu0 %v14801_v35  ;;  %v10735_v60 = vld [vmem:[%s18221_s3 + $0x4a0] sm:$0xff]  ;;  %v10736_v35 = vld [vmem:[%s18221_s3 + $0x4a8] sm:$0xff]  ;;  %v3506_v39 = vadd.f32 %v16968_v56, %v3504_v27  ;;  %v10973_v8 = vld [vmem:[%s18221_s3 + $0xc10] sm:$0xff] }
 0x2ef   : > { %14658 = vmatprep.subr.bf16.mxu1 %v14657_v40  ;;  %14806 = vmatprep.subr.bf16.mxu0 %v14805_v3  ;;  %v14813_v57 = vpack.c.bf16 %v10736_v35, %v10735_v60  ;;  %v10746_v27 = vld [vmem:[%s18221_s3 + $0x4f8] sm:$0xff]  ;;  %v17147_v60 = vld [vmem:[#allocation3 + $0x1c] sm:$0xff] }
 0x2f0   : > { %12879 = vmatmul.mubr.f32.gmra.mrb[160].mxu1 %v4268_v46  ;;  %13130 = vmatmul.mubr.f32.gmra.mrb[20].mxu0 %v5254_v5  ;;  %v3508_v36 = vmax.f32 %v3506_v39, 0.0  ;;  %v10971_v46 = vld [vmem:[%s18221_s3 + $0xc00] sm:$0xff]  ;;  %v10972_v5 = vld [vmem:[%s18221_s3 + $0xc08] sm:$0xff] }
 0x2f1   : > { %12881 = vmatprep.mubr.f32.mxu1 %v4269_v6  ;;  %13164 = vmatprep.mubr.f32.mxu0 %v16721_v61  ;;  %v10664_v61 = vld [vmem:[%s18221_s3 + $0x268] sm:$0xff] }
 0x2f2   : > { %14660 = vmatpush3.bf16.msra.mxu1 %v14657_v40  ;;  %v14669_v7 = vpack.c.bf16 %v10664_v61, %v10663_v50  ;;  %v10738_v40 = vld [vmem:[%s18221_s3 + $0x4b8] sm:$0xff]  ;;  %3510 = vst [vmem:[#allocation3 + $0xb6] sm:$0xff] %v3508_v36  ;;  %v4276_v6 = vld [vmem:[#allocation3 + $0x7b] sm:$0xff] }
 0x2f3   : > { %14662 = vmatprep.subr.bf16.mxu1 %v14661_v25  ;;  %v14817_v24 = vpack.c.bf16 %v10738_v40, %v10737_v31  ;;  %v10745_v50 = vld [vmem:[%s18221_s3 + $0x4f0] sm:$0xff]  ;;  %v10976_v61 = vld [vmem:[%s18221_s3 + $0xc28] sm:$0xff] }
 0x2f4   : > { %12882 = vmatmul.mubr.f32.gmra.mrb[162].mxu1 %v4270_v12  ;;  %13165 = vmatmul.mubr.f32.vlgmr.msra.gmra.mrb[0].mxu0 %v16725_v2  ;;  %v4272_v2 = vld [vmem:[#allocation3 + $0x5b] sm:$0xff]  ;;  %v10974_v12 = vld [vmem:[%s18221_s3 + $0xc18] sm:$0xff]  ;;  %v14833_v35 = vpack.c.bf16 %v10746_v27, %v10745_v50  ;;  %v5497_v31 = vld [vmem:[#allocation3 + $0x91] sm:$0xff] }
 0x2f5   : > { %12884 = vmatprep.mubr.f32.mxu1 %v4271_v18  ;;  %13167 = vmatprep.mubr.f32.mxu0 %v16728_v4  ;;  %v10666_v4 = vld [vmem:[%s18221_s3 + $0x278] sm:$0xff]  ;;  %v10980_v40 = vld [vmem:[%s18221_s3 + $0xc48] sm:$0xff] }
 0x2f6   : > { %14664 = vmatpush3.bf16.msra.mxu1 %v14661_v25  ;;  %14808 = vmatpush3.bf16.msra.mxu0 %v14805_v3  ;;  %v4274_v3 = vld [vmem:[#allocation3 + $0x6b] sm:$0xff]  ;;  %v14673_v48 = vpack.c.bf16 %v10666_v4, %v10665_v44  ;;  %v17105_v25 = vpack.c.bf16 %v10972_v5, %v10971_v46  ;;  %v17173_v44 = vld [vmem:[#allocation3 + $0x34] sm:$0xff]  ;;  %v10981_v46 = vld [vmem:[%s18221_s3 + $0xc50] sm:$0xff] }
 0x2f7   : > { %14666 = vmatprep.subr.bf16.mxu1 %v14665_v30  ;;  %14810 = vmatprep.subr.bf16.mxu0 %v14809_v20  ;;  %v4506_v18 = vld [vmem:[#allocation3 + $0xc] sm:$0xff] }
 0x2f8   : > { %12885 = vmatmul.mubr.f32.gmra.mrb[164].mxu1 %v4272_v2  ;;  %13168 = vmatmul.mubr.f32.gmra.mrb[2].mxu0 %v16737_v47  ;;  %v4275_v47 = vld [vmem:[#allocation3 + $0x73] sm:$0xff]  ;;  %v10977_v2 = vld [vmem:[%s18221_s3 + $0xc30] sm:$0xff]  ;;  %v10982_v5 = vld [vmem:[%s18221_s3 + $0xc58] sm:$0xff] }
 0x2f9   : > { %13170 = vmatprep.mubr.f32.mxu0 %v16740_v14  ;;  %12887 = vmatprep.mubr.f32.mxu1 %v4273_v51  ;;  %v10740_v14 = vld [vmem:[%s18221_s3 + $0x4c8] sm:$0xff]  ;;  %v10747_v51 = vld [vmem:[%s18221_s3 + $0x500] sm:$0xff] }
 0x2fa   : > { %14668 = vmatpush3.bf16.msra.mxu1 %v14665_v30  ;;  %14812 = vmatpush3.bf16.msra.mxu0 %v14809_v20  ;;  %v4507_v30 = vld [vmem:[#allocation3 + $0x14] sm:$0xff]  ;;  %v17130_v20 = vpack.c.bf16 %v10974_v12, %v10973_v8  ;;  %v10753_v12 = vld [vmem:[%s18221_s3 + $0x530] sm:$0xff] }
 0x2fb   : > { %14670 = vmatprep.subr.bf16.mxu1 %v14669_v7  ;;  %14814 = vmatprep.subr.bf16.mxu0 %v14813_v57 }
 0x2fc   : > { %12888 = vmatmul.mubr.f32.gmra.mrb[166].mxu1 %v4274_v3  ;;  %13171 = vmatmul.mubr.f32.gmra.mrb[4].mxu0 %v16752_v23  ;;  %v14821_v23 = vpack.c.bf16 %v10740_v14, %v10739_v33  ;;  %v17186_v3 = vld [vmem:[#allocation3 + $0x3c] sm:$0xff]  ;;  %v10750_v14 = vld [vmem:[%s18221_s3 + $0x518] sm:$0xff] }
 0x2fd   : > { %13173 = vmatprep.mubr.f32.mxu0 %v16759_v37  ;;  %12890 = vmatprep.mubr.f32.mxu1 %v4275_v47  ;;  %v10742_v37 = vld [vmem:[%s18221_s3 + $0x4d8] sm:$0xff]  ;;  %v5498_v47 = vld [vmem:[#allocation3 + $0x99] sm:$0xf]  ;;  %v10749_v33 = vld [vmem:[%s18221_s3 + $0x510] sm:$0xff] }
 0x2fe   : > { %14672 = vmatpush3.bf16.msra.mxu1 %v14669_v7  ;;  %14816 = vmatpush3.bf16.msra.mxu0 %v14813_v57  ;;  %v14825_v16 = vpack.c.bf16 %v10742_v37, %v10741_v42  ;;  %v10748_v7 = vld [vmem:[%s18221_s3 + $0x508] sm:$0xff]  ;;  %v5496_v57 = vld [vmem:[#allocation3 + $0x89] sm:$0xff]  ;;  %v17215_v42 = vpack.c.bf16 %v10982_v5, %v10981_v46 }
 0x2ff   : > { %14674 = vmatprep.subr.bf16.mxu1 %v14673_v48  ;;  %14818 = vmatprep.subr.bf16.mxu0 %v14817_v24  ;;  %v14837_v4 = vpack.c.bf16 %v10748_v7, %v10747_v51  ;;  %v10751_v37 = vld [vmem:[%s18221_s3 + $0x520] sm:$0xff]  ;;  %v4522_v51 = vld [vmem:[#allocation3 + $0x8c] sm:$0xf]  ;;  %v5735_v7 = vld [vmem:[#allocation3 + $0x62] sm:$0xff] }
 0x300   : > { %12891 = vmatmul.mubr.f32.gmra.mrb[168].mxu1 %v4276_v6  ;;  %13174 = vmatmul.mubr.f32.gmra.mrb[6].mxu0 %v16769_v52  ;;  %v10743_v52 = vld [vmem:[%s18221_s3 + $0x4e0] sm:$0xff]  ;;  %v10766_v5 = vld [vmem:[%s18221_s3 + $0x598] sm:$0xff] }
 0x301   : > { %13176 = vmatprep.mubr.f32.mxu0 %v16778_v59  ;;  %12893 = vmatprep.mubr.f32.mxu1 %v4277_v13  ;;  %v10744_v59 = vld [vmem:[%s18221_s3 + $0x4e8] sm:$0xff]  ;;  %v17210_v6 = vld [vmem:[#allocation3 + $0x4c] sm:$0xff]  ;;  %v14841_v13 = vpack.c.bf16 %v10750_v14, %v10749_v33 }
 0x302   : > { %14676 = vmatpush3.bf16.msra.mxu1 %v14673_v48  ;;  %14820 = vmatpush3.bf16.msra.mxu0 %v14817_v24  ;;  %v17189_v48 = vld [vmem:[#allocation3 + $0x44] sm:$0xff]  ;;  %v17320_v33 = vld [vmem:[#allocation3 + $0x8c] sm:$0xff]  ;;  %v5742_v14 = vld [vmem:[#allocation3 + $0x9a] sm:$0xf] }
 0x303   : > { %14822 = vmatprep.subr.bf16.mxu0 %v14821_v23  ;;  %15357 = vmatprep.subr.bf16.mxu1 %v17105_v25  ;;  %v17323_v46 = vld [vmem:[#allocation3 + $0x94] sm:$0xff] }
 0x304   : > { %12894 = vmatmul.mubr.f32.gmra.mrb[176].mxu1 %v4278_v15  ;;  %13177 = vmatmul.mubr.f32.gmra.mrb[8].mxu0 %v16790_v9  ;;  %v14829_v9 = vpack.c.bf16 %v10744_v59, %v10743_v52  ;;  %v10983_v15 = vld [vmem:[%s18221_s3 + $0xc60] sm:$0xff]  ;;  %v17236_v52 = vld [vmem:[#allocation3 + $0x64] sm:$0xff] }
 0x305   : > { %12928 = vmatprep.mubr.f32.mxu1 %v4505_v11  ;;  %13179 = vmatprep.mubr.f32.mxu0 %v16799_v17  ;;  %v10975_v17 = vld [vmem:[%s18221_s3 + $0xc20] sm:$0xff]  ;;  %v10984_v11 = vld [vmem:[%s18221_s3 + $0xc68] sm:$0xff] }
 0x306   : > { %14824 = vmatpush3.bf16.msra.mxu0 %v14821_v23  ;;  %v17152_v39 = vpack.c.bf16 %v10976_v61, %v10975_v17  ;;  %v17212_v23 = vld [vmem:[#allocation3 + $0x54] sm:$0xff]  ;;  %v17239_v8 = vpack.c.bf16 %v10984_v11, %v10983_v15 }
 0x307   : > { %14826 = vmatprep.subr.bf16.mxu0 %v14825_v16  ;;  %v17264_v17 = vld [vmem:[#allocation3 + $0x74] sm:$0xff] }
 0x308   : > { %12929 = vmatmul.mubr.f32.vlgmr.msra.gmra.mrb[154].mxu1 %v4506_v18  ;;  %13180 = vmatmul.mubr.f32.gmra.mrb[10].mxu0 %v16814_v22  ;;  %v17149_v22 = vld [vmem:[#allocation3 + $0x24] sm:$0xff]  ;;  %v10756_v61 = vld [vmem:[%s18221_s3 + $0x548] sm:$0xff]  ;;  %v10767_v15 = vld [vmem:[%s18221_s3 + $0x5a0] sm:$0xff] }
 0x309   : > { %12931 = vmatprep.mubr.f32.mxu1 %v4507_v30  ;;  %13182 = vmatprep.mubr.f32.mxu0 %v16820_v38  ;;  %v10978_v38 = vld [vmem:[%s18221_s3 + $0xc38] sm:$0xff]  ;;  %v10985_v18 = vld [vmem:[%s18221_s3 + $0xc70] sm:$0xff]  ;;  %v10768_v11 = vld [vmem:[%s18221_s3 + $0x5a8] sm:$0xff] }
 0x30a   : > { %14828 = vmatpush3.bf16.msra.mxu0 %v14825_v16  ;;  %15365 = vmatpush3.bf16.msra.mxu1 %v17105_v25  ;;  %v17176_v36 = vpack.c.bf16 %v10978_v38, %v10977_v2  ;;  %v5728_v16 = vld [vmem:[#allocation3 + $0x2a] sm:$0xff]  ;;  %v10757_v38 = vld [vmem:[%s18221_s3 + $0x550] sm:$0xff] }
 0x30b   : > { %14830 = vmatprep.subr.bf16.mxu0 %v14829_v9  ;;  %15358 = vmatprep.subr.bf16.mxu1 %v17130_v20  ;;  %v10986_v30 = vld [vmem:[%s18221_s3 + $0xc78] sm:$0xff] }
 0x30c   : > { %12932 = vmatmul.mubr.f32.gmra.mrb[156].mxu1 %v17147_v60  ;;  %13183 = vmatmul.mubr.f32.gmra.mrb[12].mxu0 %v16828_v49  ;;  %v17171_v49 = vld [vmem:[#allocation3 + $0x2c] sm:$0xff]  ;;  %v17260_v27 = vpack.c.bf16 %v10986_v30, %v10985_v18  ;;  %v17280_v2 = vld [vmem:[#allocation3 + $0x84] sm:$0xff]  ;;  %v10772_v18 = vld [vmem:[%s18221_s3 + $0x5c8] sm:$0xff] }
 0x30d   : > { %12934 = vmatprep.mubr.f32.mxu1 %v17149_v22  ;;  %13185 = vmatprep.mubr.f32.mxu0 %v16834_v62  ;;  %v10979_v62 = vld [vmem:[%s18221_s3 + $0xc40] sm:$0xff]  ;;  %v10774_v30 = vld [vmem:[%s18221_s3 + $0x5d8] sm:$0xff] }
 0x30e   : > { %14832 = vmatpush3.bf16.msra.mxu0 %v14829_v9  ;;  %15366 = vmatpush3.bf16.msra.mxu1 %v17130_v20  ;;  %v17192_v24 = vpack.c.bf16 %v10980_v40, %v10979_v62  ;;  %v17257_v9 = vld [vmem:[#allocation3 + $0x6c] sm:$0xff]  ;;  %v10764_v40 = vld [vmem:[%s18221_s3 + $0x588] sm:$0xff] }
 0x30f   : > { %14834 = vmatprep.subr.bf16.mxu0 %v14833_v35  ;;  %15359 = vmatprep.subr.bf16.mxu1 %v17152_v39 }
 0x310   : > { %12935 = vmatmul.mubr.f32.gmra.mrb[158].mxu1 %v17171_v49  ;;  %13186 = vmatmul.mubr.f32.gmra.mrb[14].mxu0 %v5496_v57  ;;  %v10759_v57 = vld [vmem:[%s18221_s3 + $0x560] sm:$0xff] }
 0x311   : > { %12937 = vmatprep.mubr.f32.mxu1 %v17173_v44  ;;  %13188 = vmatprep.mubr.f32.mxu0 %v5497_v31  ;;  %v10762_v31 = vld [vmem:[%s18221_s3 + $0x578] sm:$0xff] }
 0x312   : > { %14836 = vmatpush3.bf16.msra.mxu0 %v14833_v35  ;;  %15367 = vmatpush3.bf16.msra.mxu1 %v17152_v39  ;;  %v17275_v35 = vld [vmem:[#allocation3 + $0x7c] sm:$0xff] }
 0x313   : > { %15360 = vmatprep.subr.bf16.mxu1 %v17176_v36  ;;  %14838 = vmatprep.subr.bf16.mxu0 %v14837_v4 }
 0x314   : > { %12938 = vmatmul.mubr.f32.gmra.mrb[160].mxu1 %v17186_v3  ;;  %13189 = vmatmul.mubr.f32.gmra.mrb[22].mxu0 %v5498_v47 }
 0x315   : > { %12940 = vmatprep.mubr.f32.mxu1 %v17189_v48  ;;  %13223 = vmatprep.mubr.f32.mxu0 %v16853_v29  ;;  %v10752_v29 = vld [vmem:[%s18221_s3 + $0x528] sm:$0xff] }
 0x316   : > { %15368 = vmatpush3.bf16.msra.mxu1 %v17176_v36  ;;  %v14845_v59 = vpack.c.bf16 %v10752_v29, %v10751_v37  ;;  %v9398_v29 = vld [vmem:[#allocation3 + $0xa4] sm:$0xff] }
 0x317   : > { %15361 = vmatprep.subr.bf16.mxu1 %v17192_v24 }
 0x318   : > { %12941 = vmatmul.mubr.f32.gmra.mrb[162].mxu1 %v17210_v6  ;;  %13224 = vmatmul.mubr.f32.vlgmr.msra.gmra.mrb[0].mxu0 %v16868_v58  ;;  %v17234_v58 = vld [vmem:[#allocation3 + $0x5c] sm:$0xff] }
 0x319   : > { %12943 = vmatprep.mubr.f32.mxu1 %v17212_v23  ;;  %13226 = vmatprep.mubr.f32.mxu0 %v16870_v0  ;;  %v10754_v0 = vld [vmem:[%s18221_s3 + $0x538] sm:$0xff] }
 0x31a   : > { %14840 = vmatpush3.bf16.msra.mxu0 %v14837_v4  ;;  %15369 = vmatpush3.bf16.msra.mxu1 %v17192_v24  ;;  %v14849_v50 = vpack.c.bf16 %v10754_v0, %v10753_v12  ;;  %v10769_v12 = vld [vmem:[%s18221_s3 + $0x5b0] sm:$0xff]  ;;  %v10770_v0 = vld [vmem:[%s18221_s3 + $0x5b8] sm:$0xff] }
 0x31b   : > { %14842 = vmatprep.subr.bf16.mxu0 %v14841_v13  ;;  %15362 = vmatprep.subr.bf16.mxu1 %v17215_v42 }
 0x31c   : > { %12944 = vmatmul.mubr.f32.gmra.mrb[164].mxu1 %v17234_v58  ;;  %13227 = vmatmul.mubr.f32.gmra.mrb[2].mxu0 %v5728_v16  ;;  %v9399_v16 = vld [vmem:[#allocation3 + $0xac] sm:$0xff] }
 0x31d   : > { %12946 = vmatprep.mubr.f32.mxu1 %v17236_v52  ;;  %13229 = vmatprep.mubr.f32.mxu0 %v16886_v26  ;;  %v10755_v26 = vld [vmem:[%s18221_s3 + $0x540] sm:$0xff] }
 0x31e   : > { %14844 = vmatpush3.bf16.msra.mxu0 %v14841_v13  ;;  %15370 = vmatpush3.bf16.msra.mxu1 %v17215_v42  ;;  %v17332_v13 = vld [vmem:[#allocation3 + $0x9c] sm:$0xff] }
 0x31f   : > { %14846 = vmatprep.subr.bf16.mxu0 %v14845_v59  ;;  %15363 = vmatprep.subr.bf16.mxu1 %v17239_v8 }
 0x320   : > { %12947 = vmatmul.mubr.f32.gmra.mrb[166].mxu1 %v17257_v9  ;;  %13230 = vmatmul.mubr.f32.gmra.mrb[4].mxu0 %v16897_v34  ;;  %v14853_v34 = vpack.c.bf16 %v10756_v61, %v10755_v26  ;;  %v10778_v26 = vld [vmem:[%s18221_s3 + $0x5f8] sm:$0xff]  ;;  %v3505_v61 = vmax.f32 %v17048_v10, %v17060_v43  ;;  %v10781_v43 = vld [vmem:[%s18221_s3 + $0x610] sm:$0xff] }
 0x321   : > { %12949 = vmatprep.mubr.f32.mxu1 %v17264_v17  ;;  %13232 = vmatprep.mubr.f32.mxu0 %v16899_v28  ;;  %v10758_v28 = vld [vmem:[%s18221_s3 + $0x558] sm:$0xff] }
 0x322   : > { %14848 = vmatpush3.bf16.msra.mxu0 %v14845_v59  ;;  %15371 = vmatpush3.bf16.msra.mxu1 %v17239_v8  ;;  %v14877_v59 = vpack.c.bf16 %v10768_v11, %v10767_v15 }
 0x323   : > { %14850 = vmatprep.subr.bf16.mxu0 %v14849_v50  ;;  %15364 = vmatprep.subr.bf16.mxu1 %v17260_v27 }
 0x324   : > { %12950 = vmatmul.mubr.f32.gmra.mrb[168].mxu1 %v17275_v35  ;;  %13233 = vmatmul.mubr.f32.gmra.mrb[6].mxu0 %v16916_v54  ;;  %v14857_v54 = vpack.c.bf16 %v10758_v28, %v10757_v38  ;;  %v10780_v38 = vld [vmem:[%s18221_s3 + $0x608] sm:$0xff] }
 0x325   : > { %13235 = vmatprep.mubr.f32.mxu0 %v16926_v19  ;;  %12952 = vmatprep.mubr.f32.mxu1 %v17280_v2  ;;  %v10760_v19 = vld [vmem:[%s18221_s3 + $0x568] sm:$0xff] }
 0x326   : > { %14852 = vmatpush3.bf16.msra.mxu0 %v14849_v50  ;;  %15372 = vmatpush3.bf16.msra.mxu1 %v17260_v27  ;;  %v14861_v4 = vpack.c.bf16 %v10760_v19, %v10759_v57  ;;  %v10776_v50 = vld [vmem:[%s18221_s3 + $0x5e8] sm:$0xff]  ;;  %v6215_v57 = vld [vmem:[#allocation3 + $0x2d] sm:$0xff] }
 0x327   : > { %14854 = vmatprep.subr.bf16.mxu0 %v14853_v34 }
 0x328   : > { %12953 = vmatmul.mubr.f32.gmra.mrb[178].mxu1 %v4522_v51  ;;  %13236 = vmatmul.mubr.f32.gmra.mrb[8].mxu0 %v16936_v41  ;;  %v10761_v41 = vld [vmem:[%s18221_s3 + $0x570] sm:$0xff] }
 0x329   : > { %13238 = vmatprep.mubr.f32.mxu0 %v5735_v7  ;;  %14114 = vmatprep.mubr.f32.mxu1 %v17234_v58  ;;  %v14865_v62 = vpack.c.bf16 %v10762_v31, %v10761_v41  ;;  %v6214_v51 = vld [vmem:[#allocation3 + $0x25] sm:$0xff]  ;;  %v10784_v7 = vld [vmem:[%s18221_s3 + $0x628] sm:$0xff] }
 0x32a   : > { %14856 = vmatpush3.bf16.msra.mxu0 %v14853_v34  ;;  %v10779_v34 = vld [vmem:[%s18221_s3 + $0x600] sm:$0xff]  ;;  %v10785_v41 = vld [vmem:[%s18221_s3 + $0x630] sm:$0xff]  ;;  %v10786_v31 = vld [vmem:[%s18221_s3 + $0x638] sm:$0xff] }
 0x32b   : > { %14858 = vmatprep.subr.bf16.mxu0 %v14857_v54  ;;  %v14901_v10 = vpack.c.bf16 %v10780_v38, %v10779_v34  ;;  %v10797_v34 = vld [vmem:[%s18221_s3 + $0x690] sm:$0xff]  ;;  %v10798_v38 = vld [vmem:[%s18221_s3 + $0x698] sm:$0xff] }
 0x32c   : > { %13239 = vmatmul.mubr.f32.gmra.mrb[10].mxu0 %v16957_v21  ;;  %14115 = vmatmul.mubr.f32.vlgmr.msra.gmra.mrb[180].mxu1 %v17236_v52  ;;  %v10763_v21 = vld [vmem:[%s18221_s3 + $0x580] sm:$0xff] }
 0x32d   : > { %13241 = vmatprep.mubr.f32.mxu0 %v16973_v1  ;;  %14117 = vmatprep.mubr.f32.mxu1 %v17257_v9  ;;  %v5740_v1 = vld [vmem:[#allocation3 + $0x8a] sm:$0xff]  ;;  %v14869_v47 = vpack.c.bf16 %v10764_v40, %v10763_v21  ;;  %v14913_v21 = vpack.c.bf16 %v10786_v31, %v10785_v41  ;;  %v10804_v31 = vld [vmem:[%s18221_s3 + $0x6c8] sm:$0xff] }
 0x32e   : > { %14860 = vmatpush3.bf16.msra.mxu0 %v14857_v54  ;;  %v10783_v54 = vld [vmem:[%s18221_s3 + $0x620] sm:$0xff]  ;;  %v6218_v40 = vld [vmem:[#allocation3 + $0x45] sm:$0xff] }
 0x32f   : > { %14862 = vmatprep.subr.bf16.mxu0 %v14861_v4  ;;  %v14909_v19 = vpack.c.bf16 %v10784_v7, %v10783_v54  ;;  %v10801_v54 = vld [vmem:[%s18221_s3 + $0x6b0] sm:$0xff]  ;;  %v10802_v7 = vld [vmem:[%s18221_s3 + $0x6b8] sm:$0xff]  ;;  %v10803_v41 = vld [vmem:[%s18221_s3 + $0x6c0] sm:$0xff] }
 0x330   : > { %13242 = vmatmul.mubr.f32.gmra.mrb[12].mxu0 %v16983_v45  ;;  %14118 = vmatmul.mubr.f32.gmra.mrb[182].mxu1 %v17264_v17  ;;  %v5741_v45 = vld [vmem:[#allocation3 + $0x92] sm:$0xff] }
 0x331   : > { %13244 = vmatprep.mubr.f32.mxu0 %v16987_v53  ;;  %14120 = vmatprep.mubr.f32.mxu1 %v17275_v35  ;;  %v10765_v53 = vld [vmem:[%s18221_s3 + $0x590] sm:$0xff] }
 0x332   : > { %14864 = vmatpush3.bf16.msra.mxu0 %v14861_v4  ;;  %v14873_v37 = vpack.c.bf16 %v10766_v5, %v10765_v53  ;;  %v6216_v4 = vld [vmem:[#allocation3 + $0x35] sm:$0xff]  ;;  %v10789_v53 = vld [vmem:[%s18221_s3 + $0x650] sm:$0xff]  ;;  %v10790_v5 = vld [vmem:[%s18221_s3 + $0x658] sm:$0xff] }
 0x333   : > { %14866 = vmatprep.subr.bf16.mxu0 %v14865_v62  ;;  %v14921_v11 = vpack.c.bf16 %v10790_v5, %v10789_v53  ;;  %v6465_v53 = vld [vmem:[#allocation3 + $0x5e] sm:$0xff] }
 0x334   : > { %13245 = vmatmul.mubr.f32.gmra.mrb[14].mxu0 %v5740_v1  ;;  %14121 = vmatmul.mubr.f32.gmra.mrb[184].mxu1 %v17280_v2  ;;  %v10787_v1 = vld [vmem:[%s18221_s3 + $0x640] sm:$0xff] }
 0x335   : > { %13247 = vmatprep.mubr.f32.mxu0 %v5741_v45  ;;  %14123 = vmatprep.mubr.f32.mxu1 %v17320_v33  ;;  %v6219_v45 = vld [vmem:[#allocation3 + $0x4d] sm:$0xff] }
 0x336   : > { %14868 = vmatpush3.bf16.msra.mxu0 %v14865_v62  ;;  %v6217_v62 = vld [vmem:[#allocation3 + $0x3d] sm:$0xff] }
 0x337   : > { %14870 = vmatprep.subr.bf16.mxu0 %v14869_v47 }
 0x338   : > { %13248 = vmatmul.mubr.f32.gmra.mrb[24].mxu0 %v5742_v14  ;;  %14124 = vmatmul.mubr.f32.gmra.mrb[186].mxu1 %v17323_v46 }
 0x339   : > { %13282 = vmatprep.mubr.f32.mxu0 %v17147_v60  ;;  %14126 = vmatprep.mubr.f32.mxu1 %v17332_v13  ;;  %v9400_v60 = vld [vmem:[#allocation3 + $0xb4] sm:$0xff] }
 0x33c   : > { %13283 = vmatmul.mubr.f32.vlgmr.msra.gmra.mrb[0].mxu0 %v17149_v22  ;;  %14127 = vmatmul.mubr.f32.gmra.mrb[188].mxu1 %v9398_v29  ;;  %v14881_v22 = vpack.c.bf16 %v10770_v0, %v10769_v12  ;;  %v6223_v12 = vld [vmem:[#allocation3 + $0x6d] sm:$0xff] }
 0x33d   : > { %13285 = vmatprep.mubr.f32.mxu0 %v17171_v49  ;;  %14872 = vmatpush3.bf16.msra.mxu0 %v14869_v47  ;;  %v10771_v49 = vld [vmem:[%s18221_s3 + $0x5c0] sm:$0xff]  ;;  %v10788_v47 = vld [vmem:[%s18221_s3 + $0x648] sm:$0xff] }
 0x33e   : > { %14874 = vmatprep.subr.bf16.mxu0 %v14873_v37  ;;  %14129 = vmatprep.mubr.f32.mxu1 %v9399_v16  ;;  %v14917_v14 = vpack.c.bf16 %v10788_v47, %v10787_v1  ;;  %v6222_v16 = vld [vmem:[#allocation3 + $0x65] sm:$0xff] }
 0x33f   : > { %v10805_v1 = vld [vmem:[%s18221_s3 + $0x6d0] sm:$0xff]  ;;  %v10806_v47 = vld [vmem:[%s18221_s3 + $0x6d8] sm:$0xff] }
 0x340   : > { %13286 = vmatmul.mubr.f32.gmra.mrb[2].mxu0 %v17173_v44  ;;  %14130 = vmatmul.mubr.f32.gmra.mrb[190].mxu1 %v9400_v60  ;;  %v14885_v44 = vpack.c.bf16 %v10772_v18, %v10771_v49  ;;  %v10791_v60 = vld [vmem:[%s18221_s3 + $0x660] sm:$0xff]  ;;  %v10793_v49 = vld [vmem:[%s18221_s3 + $0x670] sm:$0xff]  ;;  %v10794_v18 = vld [vmem:[%s18221_s3 + $0x678] sm:$0xff] }
 0x341   : > { %13288 = vmatprep.mubr.f32.mxu0 %v17186_v3  ;;  %14876 = vmatpush3.bf16.msra.mxu0 %v14873_v37  ;;  %v10773_v3 = vld [vmem:[%s18221_s3 + $0x5d0] sm:$0xff] }
 0x342   : > { %14878 = vmatprep.subr.bf16.mxu0 %v14877_v59  ;;  %v6221_v37 = vld [vmem:[#allocation3 + $0x5d] sm:$0xff] }
 0x344   : > { %13289 = vmatmul.mubr.f32.gmra.mrb[4].mxu0 %v17189_v48  ;;  %v14889_v48 = vpack.c.bf16 %v10774_v30, %v10773_v3  ;;  %v14929_v3 = vpack.c.bf16 %v10794_v18, %v10793_v49  ;;  %v6226_v30 = vld [vmem:[#allocation3 + $0x85] sm:$0xff] }
 0x345   : > { %13291 = vmatprep.mubr.f32.mxu0 %v17210_v6  ;;  %14880 = vmatpush3.bf16.msra.mxu0 %v14877_v59  ;;  %v10775_v6 = vld [vmem:[%s18221_s3 + $0x5e0] sm:$0xff]  ;;  %v10792_v59 = vld [vmem:[%s18221_s3 + $0x668] sm:$0xff] }
 0x346   : > { %14882 = vmatprep.subr.bf16.mxu0 %v14881_v22  ;;  %v14925_v0 = vpack.c.bf16 %v10792_v59, %v10791_v60  ;;  %v6467_v60 = vld [vmem:[#allocation3 + $0x6e] sm:$0xff]  ;;  %v6469_v49 = vld [vmem:[#allocation3 + $0x7e] sm:$0xff] }
 0x348   : > { %13292 = vmatmul.mubr.f32.gmra.mrb[6].mxu0 %v17212_v23  ;;  %v14893_v23 = vpack.c.bf16 %v10776_v50, %v10775_v6  ;;  %v10796_v6 = vld [vmem:[%s18221_s3 + $0x688] sm:$0xff]  ;;  %v6227_v50 = vld [vmem:[#allocation3 + $0x8d] sm:$0xff] }
 0x349   : > { %13294 = vmatprep.mubr.f32.mxu0 %v17234_v58  ;;  %14884 = vmatpush3.bf16.msra.mxu0 %v14881_v22  ;;  %v10777_v58 = vld [vmem:[%s18221_s3 + $0x5f0] sm:$0xff]  ;;  %v6224_v22 = vld [vmem:[#allocation3 + $0x75] sm:$0xff] }
 0x34a   : > { %14886 = vmatprep.subr.bf16.mxu0 %v14885_v44 }
 0x34c   : > { %13295 = vmatmul.mubr.f32.gmra.mrb[8].mxu0 %v17236_v52  ;;  %v14897_v52 = vpack.c.bf16 %v10778_v26, %v10777_v58  ;;  %v6228_v58 = vld [vmem:[#allocation3 + $0x95] sm:$0xff] }
 0x34d   : > { %13297 = vmatprep.mubr.f32.mxu0 %v17257_v9  ;;  %14888 = vmatpush3.bf16.msra.mxu0 %v14885_v44  ;;  %v3507_v9 = vadd.f32 %v16968_v56, %v3505_v61  ;;  %v5986_v56 = vld [vmem:[#allocation3 + $0xa4] sm:$0xf] }
 0x34e   : > { %14890 = vmatprep.subr.bf16.mxu0 %v14889_v48  ;;  %v6225_v44 = vld [vmem:[#allocation3 + $0x7d] sm:$0xff] }
 0x34f   : > { %v6229_v61 = vld [vmem:[#allocation3 + $0x9d] sm:$0xff] }
 0x350   : > { %13298 = vmatmul.mubr.f32.gmra.mrb[10].mxu0 %v17264_v17  ;;  %v3509_v17 = vmax.f32 %v3507_v9, 0.0  ;;  %v6230_v9 = vld [vmem:[#allocation3 + $0xa5] sm:$0xf] }
 0x351   : > { %13300 = vmatprep.mubr.f32.mxu0 %v17275_v35  ;;  %14892 = vmatpush3.bf16.msra.mxu0 %v14889_v48  ;;  %v10782_v35 = vld [vmem:[%s18221_s3 + $0x618] sm:$0xff]  ;;  %v10795_v48 = vld [vmem:[%s18221_s3 + $0x680] sm:$0xff] }
 0x352   : > { %14894 = vmatprep.subr.bf16.mxu0 %v14893_v23  ;;  %3511 = vst [vmem:[#allocation3 + $0xbe] sm:$0x3f] %v3509_v17  ;;  %v14905_v28 = vpack.c.bf16 %v10782_v35, %v10781_v43  ;;  %v6457_v17 = vld [vmem:[#allocation3 + $0x1e] sm:$0xff]  ;;  %v10799_v43 = vld [vmem:[%s18221_s3 + $0x6a0] sm:$0xff] }
 0x353   : > { %v10800_v35 = vld [vmem:[%s18221_s3 + $0x6a8] sm:$0xff] }
 0x354   : > { %13301 = vmatmul.mubr.f32.gmra.mrb[12].mxu0 %v17280_v2  ;;  %v6213_v2 = vld [vmem:[#allocation3 + $0x1d] sm:$0xff] }
 0x355   : > { %13303 = vmatprep.mubr.f32.mxu0 %v17320_v33  ;;  %14896 = vmatpush3.bf16.msra.mxu0 %v14893_v23  ;;  %v3565_v33 = vld [vmem:[#allocation4 + $0x88] sm:$0xf]  ;;  %v14933_v23 = vpack.c.bf16 %v10796_v6, %v10795_v48  ;;  %v6471_v48 = vld [vmem:[#allocation3 + $0x8e] sm:$0xff] }
 0x356   : > { %14898 = vmatprep.subr.bf16.mxu0 %v14897_v52 }
 0x358   : > { %13304 = vmatmul.mubr.f32.gmra.mrb[14].mxu0 %v17323_v46  ;;  %v6220_v46 = vld [vmem:[#allocation3 + $0x55] sm:$0xff] }
 0x359   : > { %13306 = vmatprep.mubr.f32.mxu0 %v17332_v13  ;;  %14900 = vmatpush3.bf16.msra.mxu0 %v14897_v52 }
 0x35a   : > { %14902 = vmatprep.subr.bf16.mxu0 %v14901_v10 }
 0x35c   : > { %13307 = vmatmul.mubr.f32.gmra.mrb[26].mxu0 %v5986_v56  ;;  %v6458_v56 = vld [vmem:[#allocation3 + $0x26] sm:$0xff] }
 0x35d   : > { %13341 = vmatprep.mubr.f32.mxu0 %v6213_v2  ;;  %v6459_v2 = vld [vmem:[#allocation3 + $0x2e] sm:$0xff] }
 0x360   : > { %13342 = vmatmul.mubr.f32.vlgmr.msra.gmra.mrb[0].mxu0 %v6214_v51  ;;  %v6460_v51 = vld [vmem:[#allocation3 + $0x36] sm:$0xff] }
 0x361   : > { %13344 = vmatprep.mubr.f32.mxu0 %v6215_v57  ;;  %14904 = vmatpush3.bf16.msra.mxu0 %v14901_v10  ;;  %v14937_v10 = vpack.c.bf16 %v10798_v38, %v10797_v34  ;;  %v6461_v57 = vld [vmem:[#allocation3 + $0x3e] sm:$0xff]  ;;  %v10814_v38 = vld [vmem:[%s18221_s3 + $0x718] sm:$0xff] }
 0x362   : > { %14906 = vmatprep.subr.bf16.mxu0 %v14905_v28  ;;  %v10813_v34 = vld [vmem:[%s18221_s3 + $0x710] sm:$0xff] }
 0x364   : > { %13345 = vmatmul.mubr.f32.gmra.mrb[2].mxu0 %v6216_v4  ;;  %v6462_v4 = vld [vmem:[#allocation3 + $0x46] sm:$0xff] }
 0x365   : > { %13347 = vmatprep.mubr.f32.mxu0 %v6217_v62  ;;  %14908 = vmatpush3.bf16.msra.mxu0 %v14905_v28  ;;  %v14941_v28 = vpack.c.bf16 %v10800_v35, %v10799_v43  ;;  %v6463_v62 = vld [vmem:[#allocation3 + $0x4e] sm:$0xff]  ;;  %v10816_v35 = vld [vmem:[%s18221_s3 + $0x728] sm:$0xff] }
 0x366   : > { %14910 = vmatprep.subr.bf16.mxu0 %v14909_v19  ;;  %v10815_v43 = vld [vmem:[%s18221_s3 + $0x720] sm:$0xff] }
 0x368   : > { %13348 = vmatmul.mubr.f32.gmra.mrb[4].mxu0 %v6218_v40  ;;  %v14949_v40 = vpack.c.bf16 %v10804_v31, %v10803_v41  ;;  %v10819_v41 = vld [vmem:[%s18221_s3 + $0x740] sm:$0xff]  ;;  %v10820_v31 = vld [vmem:[%s18221_s3 + $0x748] sm:$0xff] }
 0x369   : > { %13350 = vmatprep.mubr.f32.mxu0 %v6219_v45  ;;  %14912 = vmatpush3.bf16.msra.mxu0 %v14909_v19  ;;  %v14945_v19 = vpack.c.bf16 %v10802_v7, %v10801_v54  ;;  %v10817_v54 = vld [vmem:[%s18221_s3 + $0x730] sm:$0xff]  ;;  %v10818_v7 = vld [vmem:[%s18221_s3 + $0x738] sm:$0xff] }
 0x36a   : > { %14914 = vmatprep.subr.bf16.mxu0 %v14913_v21 }
 0x36b   : > { %v12718_v13 = vpop.f32.mrb[170].mxu1 }
 0x36c   : > { %13351 = vmatmul.mubr.f32.gmra.mrb[6].mxu0 %v6220_v46  ;;  %v3754_v29 = vadd.f32 %v12718_v13, %v3565_v33  ;;  %v17427_v15 = vpop.f32.mrb[171].mxu1  ;;  %v17481_v33 = vld [vmem:[#allocation3 + $0xcc] sm:$0xff] }
 0x36d   : > { %13353 = vmatprep.mubr.f32.mxu0 %v6221_v37  ;;  %14916 = vmatpush3.bf16.msra.mxu0 %v14913_v21  ;;  %v6464_v21 = vld [vmem:[#allocation3 + $0x56] sm:$0xff] }
 0x36e   : > { %14918 = vmatprep.subr.bf16.mxu0 %v14917_v14  ;;  %3772 = vst [vmem:[#allocation4 + $0x88] sm:$0xf] %v3754_v29  ;;  %v14953_v29 = vpack.c.bf16 %v10806_v47, %v10805_v1  ;;  %v10821_v1 = vld [vmem:[%s18221_s3 + $0x750] sm:$0xff]  ;;  %v10822_v47 = vld [vmem:[%s18221_s3 + $0x758] sm:$0xff] }
 0x370   : > { %13354 = vmatmul.mubr.f32.gmra.mrb[8].mxu0 %v6222_v16  ;;  %v10807_v16 = vld [vmem:[%s18221_s3 + $0x6e0] sm:$0xff] }
 0x371   : > { %13356 = vmatprep.mubr.f32.mxu0 %v6223_v12  ;;  %14920 = vmatpush3.bf16.msra.mxu0 %v14917_v14  ;;  %v3753_v14 = vadd.f32 %v17481_v33, %v17427_v15  ;;  %v10808_v15 = vld [vmem:[%s18221_s3 + $0x6e8] sm:$0xff] }
 0x372   : > { %14922 = vmatprep.subr.bf16.mxu0 %v14921_v11  ;;  %v14957_v59 = vpack.c.bf16 %v10808_v15, %v10807_v16  ;;  %v6468_v12 = vld [vmem:[#allocation3 + $0x76] sm:$0xff] }
 0x373   : > { %v10823_v16 = vld [vmem:[%s18221_s3 + $0x760] sm:$0xff]  ;;  %v10824_v15 = vld [vmem:[%s18221_s3 + $0x768] sm:$0xff] }
 0x374   : > { %13357 = vmatmul.mubr.f32.gmra.mrb[10].mxu0 %v6224_v22  ;;  %v10810_v22 = vld [vmem:[%s18221_s3 + $0x6f8] sm:$0xff] }
 0x375   : > { %13359 = vmatprep.mubr.f32.mxu0 %v6225_v44  ;;  %14924 = vmatpush3.bf16.msra.mxu0 %v14921_v11  ;;  %v3808_v45 = vld [vmem:[#allocation4 + $0x88] sm:$0xf] }
 0x376   : > { %14926 = vmatprep.subr.bf16.mxu0 %v14925_v0  ;;  %v6466_v11 = vld [vmem:[#allocation3 + $0x66] sm:$0xff] }
 0x377   : > { %v6470_v44 = vld [vmem:[#allocation3 + $0x86] sm:$0xff] }
 0x378   : > { %13360 = vmatmul.mubr.f32.gmra.mrb[12].mxu0 %v6226_v30  ;;  %v10812_v30 = vld [vmem:[%s18221_s3 + $0x708] sm:$0xff] }
 0x379   : > { %13362 = vmatprep.mubr.f32.mxu0 %v6227_v50  ;;  %14928 = vmatpush3.bf16.msra.mxu0 %v14925_v0  ;;  %v10809_v0 = vld [vmem:[%s18221_s3 + $0x6f0] sm:$0xff]  ;;  %v6472_v50 = vld [vmem:[#allocation3 + $0x96] sm:$0xff] }
 0x37a   : > { %14930 = vmatprep.subr.bf16.mxu0 %v14929_v3  ;;  %v14961_v18 = vpack.c.bf16 %v10810_v22, %v10809_v0  ;;  %v10825_v0 = vld [vmem:[%s18221_s3 + $0x770] sm:$0xff]  ;;  %v10826_v22 = vld [vmem:[%s18221_s3 + $0x778] sm:$0xff] }
 0x37b   : > { %v17447_v26 = vpop.f32.mrb[16].mxu0 }
 0x37c   : > { %13363 = vmatmul.mubr.f32.gmra.mrb[14].mxu0 %v6228_v58  ;;  %v17449_v52 = vpop.f32.mrb[17].mxu0  ;;  %v6473_v58 = vld [vmem:[#allocation3 + $0x9e] sm:$0xff] }
 0x37d   : > { %13365 = vmatprep.mubr.f32.mxu0 %v6229_v61  ;;  %14932 = vmatpush3.bf16.msra.mxu0 %v14929_v3  ;;  %v10811_v3 = vld [vmem:[%s18221_s3 + $0x700] sm:$0xff] }
 0x37e   : > { %14934 = vmatprep.subr.bf16.mxu0 %v14933_v23  ;;  %v14965_v6 = vpack.c.bf16 %v10812_v30, %v10811_v3  ;;  %v10827_v3 = vld [vmem:[%s18221_s3 + $0x780] sm:$0xff]  ;;  %v10828_v30 = vld [vmem:[%s18221_s3 + $0x788] sm:$0xff] }
 0x380   : > { %13366 = vmatmul.mubr.f32.gmra.mrb[28].mxu0 %v6230_v9  ;;  %v6474_v9 = vld [vmem:[#allocation3 + $0xa6] sm:$0xf] }
 0x381   : > { %13400 = vmatprep.mubr.f32.mxu0 %v6457_v17  ;;  %v6701_v17 = vld [vmem:[#allocation3 + $0x1f] sm:$0xff] }
 0x384   : > { %13401 = vmatmul.mubr.f32.vlgmr.msra.gmra.mrb[0].mxu0 %v6458_v56  ;;  %v6702_v56 = vld [vmem:[#allocation3 + $0x27] sm:$0xff] }
 0x385   : > { %13403 = vmatprep.mubr.f32.mxu0 %v6459_v2  ;;  %14936 = vmatpush3.bf16.msra.mxu0 %v14933_v23  ;;  %v6703_v2 = vld [vmem:[#allocation3 + $0x2f] sm:$0xff] }
 0x386   : > { %14938 = vmatprep.subr.bf16.mxu0 %v14937_v10 }
 0x388   : > { %13404 = vmatmul.mubr.f32.gmra.mrb[2].mxu0 %v6460_v51  ;;  %v6704_v51 = vld [vmem:[#allocation3 + $0x37] sm:$0xff] }
 0x389   : > { %13406 = vmatprep.mubr.f32.mxu0 %v6461_v57  ;;  %14940 = vmatpush3.bf16.msra.mxu0 %v14937_v10  ;;  %v14969_v10 = vpack.c.bf16 %v10814_v38, %v10813_v34  ;;  %v6705_v57 = vld [vmem:[#allocation3 + $0x3f] sm:$0xff]  ;;  %v6718_v38 = vld [vmem:[#allocation3 + $0xa7] sm:$0xf] }
 0x38a   : > { %14942 = vmatprep.subr.bf16.mxu0 %v14941_v28 }
 0x38c   : > { %13407 = vmatmul.mubr.f32.gmra.mrb[4].mxu0 %v6462_v4  ;;  %v6706_v4 = vld [vmem:[#allocation3 + $0x47] sm:$0xff] }
 0x38d   : > { %13409 = vmatprep.mubr.f32.mxu0 %v6463_v62  ;;  %14944 = vmatpush3.bf16.msra.mxu0 %v14941_v28  ;;  %v14973_v28 = vpack.c.bf16 %v10816_v35, %v10815_v43  ;;  %v6707_v62 = vld [vmem:[#allocation3 + $0x4f] sm:$0xff] }
 0x38e   : > { %14946 = vmatprep.subr.bf16.mxu0 %v14945_v19  ;;  %v6946_v35 = vld [vmem:[#allocation3 + $0x28] sm:$0xff] }
 0x38f   : > { %v12777_v46 = vpop.f32.mrb[172].mxu1 }
 0x390   : > { %13410 = vmatmul.mubr.f32.gmra.mrb[6].mxu0 %v6464_v21  ;;  %v3998_v5 = vadd.f32 %v12777_v46, %v3808_v45  ;;  %v3972_v13 = vpop.f32.mrb[173].mxu1  ;;  %v6708_v21 = vld [vmem:[#allocation3 + $0x57] sm:$0xff]  ;;  %v6709_v46 = vld [vmem:[#allocation3 + $0x5f] sm:$0xff] }
 0x391   : > { %13412 = vmatprep.mubr.f32.mxu0 %v6465_v53  ;;  %14948 = vmatpush3.bf16.msra.mxu0 %v14945_v19  ;;  %v17485_v37 = vadd.f32 %v3972_v13, %v3753_v14  ;;  %v14977_v19 = vpack.c.bf16 %v10818_v7, %v10817_v54  ;;  %v6948_v7 = vld [vmem:[#allocation3 + $0x38] sm:$0xff] }
 0x392   : > { %14950 = vmatprep.subr.bf16.mxu0 %v14949_v40  ;;  %4016 = vst [vmem:[#allocation4 + $0x88] sm:$0xf] %v3998_v5 }
 0x394   : > { %13413 = vmatmul.mubr.f32.gmra.mrb[8].mxu0 %v6466_v11  ;;  %v6710_v11 = vld [vmem:[#allocation3 + $0x67] sm:$0xff] }
 0x395   : > { %13415 = vmatprep.mubr.f32.mxu0 %v6467_v60  ;;  %14952 = vmatpush3.bf16.msra.mxu0 %v14949_v40  ;;  %v14981_v40 = vpack.c.bf16 %v10820_v31, %v10819_v41  ;;  %v6711_v60 = vld [vmem:[#allocation3 + $0x6f] sm:$0xff] }
 0x396   : > { %14954 = vmatprep.subr.bf16.mxu0 %v14953_v29  ;;  %v6950_v31 = vld [vmem:[#allocation3 + $0x48] sm:$0xff] }
 0x398   : > { %13416 = vmatmul.mubr.f32.gmra.mrb[10].mxu0 %v6468_v12  ;;  %v6712_v12 = vld [vmem:[#allocation3 + $0x77] sm:$0xff] }
 0x399   : > { %13418 = vmatprep.mubr.f32.mxu0 %v6469_v49  ;;  %14956 = vmatpush3.bf16.msra.mxu0 %v14953_v29  ;;  %v4052_v45 = vld [vmem:[#allocation4 + $0x88] sm:$0xf]  ;;  %v14985_v29 = vpack.c.bf16 %v10822_v47, %v10821_v1  ;;  %v6713_v49 = vld [vmem:[#allocation3 + $0x7f] sm:$0xff] }
 0x39a   : > { %14958 = vmatprep.subr.bf16.mxu0 %v14957_v59  ;;  %v6952_v1 = vld [vmem:[#allocation3 + $0x58] sm:$0xff] }
 0x39c   : > { %13419 = vmatmul.mubr.f32.gmra.mrb[12].mxu0 %v6470_v44  ;;  %v6714_v44 = vld [vmem:[#allocation3 + $0x87] sm:$0xff] }
 0x39d   : > { %13421 = vmatprep.mubr.f32.mxu0 %v6471_v48  ;;  %14960 = vmatpush3.bf16.msra.mxu0 %v14957_v59  ;;  %v14989_v59 = vpack.c.bf16 %v10824_v15, %v10823_v16  ;;  %v6715_v48 = vld [vmem:[#allocation3 + $0x8f] sm:$0xff] }
 0x39e   : > { %14962 = vmatprep.subr.bf16.mxu0 %v14961_v18 }
 0x39f   : > { %v17505_v23 = vpop.f32.mrb[18].mxu0 }
 0x3a0   : > { %13422 = vmatmul.mubr.f32.gmra.mrb[14].mxu0 %v6472_v50  ;;  %v17507_v61 = vpop.f32.mrb[19].mxu0  ;;  %v6716_v50 = vld [vmem:[#allocation3 + $0x97] sm:$0xff] }
 0x3a1   : > { %13424 = vmatprep.mubr.f32.mxu0 %v6473_v58  ;;  %14964 = vmatpush3.bf16.msra.mxu0 %v14961_v18  ;;  %v14993_v18 = vpack.c.bf16 %v10826_v22, %v10825_v0 }
 0x3a2   : > { %14966 = vmatprep.subr.bf16.mxu0 %v14965_v6 }
 0x3a4   : > { %13425 = vmatmul.mubr.f32.gmra.mrb[30].mxu0 %v6474_v9  ;;  %v6717_v9 = vld [vmem:[#allocation3 + $0x9f] sm:$0xff] }
 0x3a5   : > { %13459 = vmatprep.mubr.f32.mxu0 %v6701_v17  ;;  %v10829_v17 = vld [vmem:[%s18221_s3 + $0x790] sm:$0xff] }
 0x3a8   : > { %13460 = vmatmul.mubr.f32.vlgmr.msra.gmra.mrb[0].mxu0 %v6702_v56  ;;  %v6945_v56 = vld [vmem:[#allocation3 + $0x20] sm:$0xff] }
 0x3a9   : > { %13462 = vmatprep.mubr.f32.mxu0 %v6703_v2  ;;  %14968 = vmatpush3.bf16.msra.mxu0 %v14965_v6  ;;  %v14997_v6 = vpack.c.bf16 %v10828_v30, %v10827_v3  ;;  %v10831_v2 = vld [vmem:[%s18221_s3 + $0x7a0] sm:$0xff]  ;;  %v6956_v3 = vld [vmem:[#allocation3 + $0x78] sm:$0xff]  ;;  %v10841_v30 = vld [vmem:[%s18221_s3 + $0x7f0] sm:$0xff] }
 0x3aa   : > { %14970 = vmatprep.subr.bf16.mxu0 %v14969_v10 }
 0x3ac   : > { %13463 = vmatmul.mubr.f32.gmra.mrb[2].mxu0 %v6704_v51  ;;  %v6947_v51 = vld [vmem:[#allocation3 + $0x30] sm:$0xff] }
 0x3ad   : > { %13465 = vmatprep.mubr.f32.mxu0 %v6705_v57  ;;  %14972 = vmatpush3.bf16.msra.mxu0 %v14969_v10  ;;  %v10830_v10 = vld [vmem:[%s18221_s3 + $0x798] sm:$0xff]  ;;  %v10833_v57 = vld [vmem:[%s18221_s3 + $0x7b0] sm:$0xff] }
 0x3ae   : > { %14974 = vmatprep.subr.bf16.mxu0 %v14973_v28  ;;  %v15001_v43 = vpack.c.bf16 %v10830_v10, %v10829_v17 }
 0x3b0   : > { %13466 = vmatmul.mubr.f32.gmra.mrb[4].mxu0 %v6706_v4  ;;  %v6949_v4 = vld [vmem:[#allocation3 + $0x40] sm:$0xff] }
 0x3b1   : > { %13468 = vmatprep.mubr.f32.mxu0 %v6707_v62  ;;  %14976 = vmatpush3.bf16.msra.mxu0 %v14973_v28  ;;  %v10832_v28 = vld [vmem:[%s18221_s3 + $0x7a8] sm:$0xff]  ;;  %v10835_v62 = vld [vmem:[%s18221_s3 + $0x7c0] sm:$0xff] }
 0x3b2   : > { %14978 = vmatprep.subr.bf16.mxu0 %v14977_v19  ;;  %v15005_v54 = vpack.c.bf16 %v10832_v28, %v10831_v2 }
 0x3b3   : > { %v12836_v14 = vpop.f32.mrb[174].mxu1 }
 0x3b4   : > { %13469 = vmatmul.mubr.f32.gmra.mrb[6].mxu0 %v6708_v21  ;;  %v4242_v53 = vadd.f32 %v12836_v14, %v4052_v45  ;;  %v4216_v5 = vpop.f32.mrb[175].mxu1  ;;  %v10836_v21 = vld [vmem:[%s18221_s3 + $0x7c8] sm:$0xff] }
 0x3b5   : > { %13471 = vmatprep.mubr.f32.mxu0 %v6709_v46  ;;  %14980 = vmatpush3.bf16.msra.mxu0 %v14977_v19  ;;  %v17540_v13 = vadd.f32 %v4216_v5, %v17485_v37  ;;  %v9401_v37 = vld [vmem:[#allocation3 + $0xbc] sm:$0xff]  ;;  %v10834_v19 = vld [vmem:[%s18221_s3 + $0x7b8] sm:$0xff]  ;;  %v15013_v47 = vpack.c.bf16 %v10836_v21, %v10835_v62 }
 0x3b6   : > { %14982 = vmatprep.subr.bf16.mxu0 %v14981_v40  ;;  %4260 = vst [vmem:[#allocation4 + $0x88] sm:$0xf] %v4242_v53  ;;  %14132 = vmatprep.mubr.f32.mxu1 %v9401_v37  ;;  %v15009_v41 = vpack.c.bf16 %v10834_v19, %v10833_v57  ;;  %v10837_v46 = vld [vmem:[%s18221_s3 + $0x7d0] sm:$0xff]  ;;  %v10838_v53 = vld [vmem:[%s18221_s3 + $0x7d8] sm:$0xff]  ;;  %v10839_v37 = vld [vmem:[%s18221_s3 + $0x7e0] sm:$0xff] }
 0x3b7   : > { %v15017_v15 = vpack.c.bf16 %v10838_v53, %v10837_v46  ;;  %v6960_v19 = vld [vmem:[#allocation3 + $0x98] sm:$0xff]  ;;  %v6961_v62 = vld [vmem:[#allocation3 + $0xa0] sm:$0xff] }
 0x3b8   : > { %13472 = vmatmul.mubr.f32.gmra.mrb[8].mxu0 %v6710_v11 }
 0x3b9   : > { %13474 = vmatprep.mubr.f32.mxu0 %v6711_v60  ;;  %14984 = vmatpush3.bf16.msra.mxu0 %v14981_v40  ;;  %v6951_v40 = vld [vmem:[#allocation3 + $0x50] sm:$0xff] }
 0x3ba   : > { %14986 = vmatprep.subr.bf16.mxu0 %v14985_v29 }
 0x3bc   : > { %13475 = vmatmul.mubr.f32.gmra.mrb[10].mxu0 %v6712_v12  ;;  %v10840_v12 = vld [vmem:[%s18221_s3 + $0x7e8] sm:$0xff] }
 0x3bd   : > { %13477 = vmatprep.mubr.f32.mxu0 %v6713_v49  ;;  %14988 = vmatpush3.bf16.msra.mxu0 %v14985_v29  ;;  %v4296_v45 = vld [vmem:[#allocation4 + $0x88] sm:$0xf]  ;;  %v6953_v29 = vld [vmem:[#allocation3 + $0x60] sm:$0xff] }
 0x3be   : > { %14990 = vmatprep.subr.bf16.mxu0 %v14989_v59 }
 0x3c0   : > { %13478 = vmatmul.mubr.f32.gmra.mrb[12].mxu0 %v6714_v44 }
 0x3c1   : > { %13480 = vmatprep.mubr.f32.mxu0 %v6715_v48  ;;  %14992 = vmatpush3.bf16.msra.mxu0 %v14989_v59  ;;  %v6954_v59 = vld [vmem:[#allocation3 + $0x68] sm:$0xff] }
 0x3c2   : > { %14994 = vmatprep.subr.bf16.mxu0 %v14993_v18  ;;  %v10842_v48 = vld [vmem:[%s18221_s3 + $0x7f8] sm:$0xff] }
 0x3c3   : > { %v17560_v58 = vpop.f32.mrb[20].mxu0  ;;  %v15025_v17 = vpack.c.bf16 %v10842_v48, %v10841_v30  ;;  %v10850_v30 = vld [vmem:[%s18221_s3 + $0x838] sm:$0xff] }
 0x3c4   : > { %13481 = vmatmul.mubr.f32.gmra.mrb[14].mxu0 %v6716_v50  ;;  %v17562_v34 = vpop.f32.mrb[21].mxu0 }
 0x3c5   : > { %13483 = vmatprep.mubr.f32.mxu0 %v6717_v9  ;;  %14996 = vmatpush3.bf16.msra.mxu0 %v14993_v18  ;;  %v15021_v18 = vpack.c.bf16 %v10840_v12, %v10839_v37  ;;  %v6957_v9 = vld [vmem:[#allocation3 + $0x80] sm:$0xff]  ;;  %v10848_v37 = vld [vmem:[%s18221_s3 + $0x828] sm:$0xff] }
 0x3c6   : > { %14998 = vmatprep.subr.bf16.mxu0 %v14997_v6 }
 0x3c8   : > { %13484 = vmatmul.mubr.f32.gmra.mrb[32].mxu0 %v6718_v38 }
 0x3c9   : > { %13518 = vmatprep.mubr.f32.mxu0 %v6945_v56  ;;  %v6958_v56 = vld [vmem:[#allocation3 + $0x88] sm:$0xff] }
 0x3cc   : > { %13519 = vmatmul.mubr.f32.vlgmr.msra.gmra.mrb[0].mxu0 %v6946_v35  ;;  %v10844_v35 = vld [vmem:[%s18221_s3 + $0x808] sm:$0xff] }
 0x3cd   : > { %13521 = vmatprep.mubr.f32.mxu0 %v6947_v51  ;;  %15000 = vmatpush3.bf16.msra.mxu0 %v14997_v6  ;;  %v6959_v51 = vld [vmem:[#allocation3 + $0x90] sm:$0xff] }
 0x3ce   : > { %15002 = vmatprep.subr.bf16.mxu0 %v15001_v43 }
 0x3d0   : > { %13522 = vmatmul.mubr.f32.gmra.mrb[2].mxu0 %v6948_v7 }
 0x3d1   : > { %13524 = vmatprep.mubr.f32.mxu0 %v6949_v4  ;;  %15004 = vmatpush3.bf16.msra.mxu0 %v15001_v43  ;;  %v10843_v43 = vld [vmem:[%s18221_s3 + $0x800] sm:$0xff] }
 0x3d2   : > { %15006 = vmatprep.subr.bf16.mxu0 %v15005_v54  ;;  %v15029_v7 = vpack.c.bf16 %v10844_v35, %v10843_v43  ;;  %v10852_v43 = vld [vmem:[%s18221_s3 + $0x848] sm:$0xff] }
 0x3d4   : > { %13525 = vmatmul.mubr.f32.gmra.mrb[4].mxu0 %v6950_v31 }
 0x3d5   : > { %13527 = vmatprep.mubr.f32.mxu0 %v6951_v40  ;;  %15008 = vmatpush3.bf16.msra.mxu0 %v15005_v54 }
 0x3d6   : > { %15010 = vmatprep.subr.bf16.mxu0 %v15009_v41 }
 0x3d7   : > { %v12895_v14 = vpop.f32.mrb[176].mxu1 }
 0x3d8   : > { %13528 = vmatmul.mubr.f32.gmra.mrb[6].mxu0 %v6952_v1  ;;  %v4486_v5 = vadd.f32 %v12895_v14, %v4296_v45  ;;  %v4460_v11 = vpop.f32.mrb[177].mxu1  ;;  %v10845_v45 = vld [vmem:[%s18221_s3 + $0x810] sm:$0xff]  ;;  %v10846_v14 = vld [vmem:[%s18221_s3 + $0x818] sm:$0xff] }
 0x3d9   : > { %13530 = vmatprep.mubr.f32.mxu0 %v6953_v29  ;;  %v17595_v16 = vadd.f32 %v4460_v11, %v17540_v13  ;;  %15012 = vmatpush3.bf16.msra.mxu0 %v15009_v41  ;;  %v6955_v13 = vld [vmem:[#allocation3 + $0x70] sm:$0xff]  ;;  %v15033_v11 = vpack.c.bf16 %v10846_v14, %v10845_v45 }
 0x3da   : > { %4504 = vst [vmem:[#allocation4 + $0x88] sm:$0xf] %v4486_v5  ;;  %15014 = vmatprep.subr.bf16.mxu0 %v15013_v47  ;;  %v7189_v5 = vld [vmem:[#allocation3 + $0x2a] sm:$0xff]  ;;  %v7198_v14 = vld [vmem:[#allocation3 + $0x72] sm:$0xff] }
 0x3db   : > { %v12930_v60 = vpop.f32.mrb[154].mxu1 }
 0x3dc   : > { %v15375_v0 = vadd.f32 %v17481_v33, %v12930_v60  ;;  %v4624_v22 = vpop.f32.mrb[155].mxu1  ;;  %13531 = vmatmul.mubr.f32.gmra.mrb[8].mxu0 %v6954_v59  ;;  %v7190_v60 = vld [vmem:[#allocation3 + $0x32] sm:$0xff] }
 0x3dd   : > { %v15381_v49 = vadd.f32 %v17481_v33, %v4624_v22  ;;  %13533 = vmatprep.mubr.f32.mxu0 %v6955_v13  ;;  %15016 = vmatpush3.bf16.msra.mxu0 %v15013_v47  ;;  %v6962_v47 = vld [vmem:[#allocation3 + $0xa8] sm:$0xf]  ;;  %v10847_v59 = vld [vmem:[%s18221_s3 + $0x820] sm:$0xff]  ;;  %v7191_v22 = vld [vmem:[#allocation3 + $0x3a] sm:$0xff] }
 0x3de   : > { %15376 = vst [vmem:[#allocation4 + $0x8] sm:$0xff] %v15375_v0  ;;  %15018 = vmatprep.subr.bf16.mxu0 %v15017_v15 }
 0x3df   : > { %15382 = vst [vmem:[#allocation4] sm:$0xff] %v15381_v49  ;;  %v12933_v44 = vpop.f32.mrb[156].mxu1  ;;  %v15037_v49 = vpack.c.bf16 %v10848_v37, %v10847_v59  ;;  %v10857_v37 = vld [vmem:[%s18221_s3 + $0x870] sm:$0xff] }
 0x3e0   : > { %v15387_v6 = vadd.f32 %v17481_v33, %v12933_v44  ;;  %v4634_v50 = vpop.f32.mrb[157].mxu1  ;;  %13534 = vmatmul.mubr.f32.gmra.mrb[10].mxu0 %v6956_v3  ;;  %v7192_v44 = vld [vmem:[#allocation3 + $0x42] sm:$0xff] }
 0x3e1   : > { %v15393_v38 = vadd.f32 %v17481_v33, %v4634_v50  ;;  %13536 = vmatprep.mubr.f32.mxu0 %v6957_v9  ;;  %15020 = vmatpush3.bf16.msra.mxu0 %v15017_v15  ;;  %v10849_v3 = vld [vmem:[%s18221_s3 + $0x830] sm:$0xff]  ;;  %v7193_v50 = vld [vmem:[#allocation3 + $0x4a] sm:$0xff] }
 0x3e2   : > { %15388 = vst [vmem:[#allocation4 + $0x18] sm:$0xff] %v15387_v6  ;;  %15022 = vmatprep.subr.bf16.mxu0 %v15021_v18 }
 0x3e3   : > { %15394 = vst [vmem:[#allocation4 + $0x10] sm:$0xff] %v15393_v38  ;;  %v12936_v10 = vpop.f32.mrb[158].mxu1  ;;  %v15041_v38 = vpack.c.bf16 %v10850_v30, %v10849_v3  ;;  %v10859_v3 = vld [vmem:[%s18221_s3 + $0x880] sm:$0xff]  ;;  %v10860_v30 = vld [vmem:[%s18221_s3 + $0x888] sm:$0xff] }
 0x3e4   : > { %v15399_v2 = vadd.f32 %v17481_v33, %v12936_v10  ;;  %v4644_v28 = vpop.f32.mrb[159].mxu1  ;;  %13537 = vmatmul.mubr.f32.gmra.mrb[12].mxu0 %v6958_v56  ;;  %v7194_v10 = vld [vmem:[#allocation3 + $0x52] sm:$0xff] }
 0x3e5   : > { %v15408_v54 = vadd.f32 %v17481_v33, %v4644_v28  ;;  %13539 = vmatprep.mubr.f32.mxu0 %v6959_v51  ;;  %15024 = vmatpush3.bf16.msra.mxu0 %v15021_v18  ;;  %v10851_v56 = vld [vmem:[%s18221_s3 + $0x840] sm:$0xff]  ;;  %v7195_v28 = vld [vmem:[#allocation3 + $0x5a] sm:$0xff] }
 0x3e6   : > { %15400 = vst [vmem:[#allocation4 + $0x28] sm:$0xff] %v15399_v2  ;;  %15026 = vmatprep.subr.bf16.mxu0 %v15025_v17 }
 0x3e7   : > { %15409 = vst [vmem:[#allocation4 + $0x20] sm:$0xff] %v15408_v54  ;;  %v12939_v57 = vpop.f32.mrb[160].mxu1  ;;  %v17621_v4 = vpop.f32.mrb[22].mxu0  ;;  %v7196_v54 = vld [vmem:[#allocation3 + $0x62] sm:$0xff] }
 0x3e8   : > { %v15417_v41 = vadd.f32 %v17481_v33, %v12939_v57  ;;  %v4654_v31 = vpop.f32.mrb[161].mxu1  ;;  %13540 = vmatmul.mubr.f32.gmra.mrb[14].mxu0 %v6960_v19  ;;  %v17624_v21 = vpop.f32.mrb[23].mxu0  ;;  %v4540_v57 = vld [vmem:[#allocation4 + $0x88] sm:$0xf] }
 0x3e9   : > { %v15426_v40 = vadd.f32 %v17481_v33, %v4654_v31  ;;  %13542 = vmatprep.mubr.f32.mxu0 %v6961_v62  ;;  %15028 = vmatpush3.bf16.msra.mxu0 %v15025_v17  ;;  %v10854_v31 = vld [vmem:[%s18221_s3 + $0x858] sm:$0xff] }
 0x3ea   : > { %15418 = vst [vmem:[#allocation4 + $0x38] sm:$0xff] %v15417_v41  ;;  %15030 = vmatprep.subr.bf16.mxu0 %v15029_v7  ;;  %v10853_v41 = vld [vmem:[%s18221_s3 + $0x850] sm:$0xff] }
 0x3eb   : > { %15427 = vst [vmem:[#allocation4 + $0x30] sm:$0xff] %v15426_v40  ;;  %v12942_v1 = vpop.f32.mrb[162].mxu1 }
 0x3ec   : > { %v15435_v46 = vadd.f32 %v17481_v33, %v12942_v1  ;;  %v4664_v53 = vpop.f32.mrb[163].mxu1  ;;  %13543 = vmatmul.mubr.f32.gmra.mrb[34].mxu0 %v6962_v47  ;;  %v15049_v47 = vpack.c.bf16 %v10854_v31, %v10853_v41  ;;  %v7434_v41 = vld [vmem:[#allocation3 + $0x33] sm:$0xff] }
 0x3ed   : > { %v15444_v29 = vadd.f32 %v17481_v33, %v4664_v53  ;;  %13577 = vmatprep.mubr.f32.mxu0 %v7189_v5  ;;  %v10855_v53 = vld [vmem:[%s18221_s3 + $0x860] sm:$0xff]  ;;  %v10856_v5 = vld [vmem:[%s18221_s3 + $0x868] sm:$0xff] }
 0x3ee   : > { %15436 = vst [vmem:[#allocation4 + $0x48] sm:$0xff] %v15435_v46  ;;  %v10863_v31 = vld [vmem:[%s18221_s3 + $0x8a0] sm:$0xff] }
 0x3ef   : > { %15445 = vst [vmem:[#allocation4 + $0x40] sm:$0xff] %v15444_v29  ;;  %v12945_v15 = vpop.f32.mrb[164].mxu1  ;;  %v7199_v29 = vld [vmem:[#allocation3 + $0x7a] sm:$0xff] }
 0x3f0   : > { %v15453_v12 = vadd.f32 %v17481_v33, %v12945_v15  ;;  %v4674_v0 = vpop.f32.mrb[165].mxu1  ;;  %13578 = vmatmul.mubr.f32.vlgmr.msra.gmra.mrb[0].mxu0 %v7190_v60  ;;  %v15053_v15 = vpack.c.bf16 %v10856_v5, %v10855_v53  ;;  %v7437_v53 = vld [vmem:[#allocation3 + $0x4b] sm:$0xff] }
 0x3f1   : > { %v15462_v13 = vadd.f32 %v17481_v33, %v4674_v0  ;;  %13580 = vmatprep.mubr.f32.mxu0 %v7191_v22  ;;  %15032 = vmatpush3.bf16.msra.mxu0 %v15029_v7  ;;  %v15045_v7 = vpack.c.bf16 %v10852_v43, %v10851_v56  ;;  %v7201_v22 = vld [vmem:[#allocation3 + $0x8a] sm:$0xff]  ;;  %v7206_v43 = vld [vmem:[#allocation3 + $0xb2] sm:$0xf] }
 0x3f2   : > { %15454 = vst [vmem:[#allocation4 + $0x58] sm:$0xff] %v15453_v12  ;;  %15034 = vmatprep.subr.bf16.mxu0 %v15033_v11  ;;  %v10858_v12 = vld [vmem:[%s18221_s3 + $0x878] sm:$0xff] }
 0x3f3   : > { %15463 = vst [vmem:[#allocation4 + $0x50] sm:$0xff] %v15462_v13  ;;  %v12948_v18 = vpop.f32.mrb[166].mxu1 }
 0x3f4   : > { %v15471_v48 = vadd.f32 %v17481_v33, %v12948_v18  ;;  %v4684_v6 = vpop.f32.mrb[167].mxu1  ;;  %13581 = vmatmul.mubr.f32.gmra.mrb[2].mxu0 %v7192_v44  ;;  %v7202_v44 = vld [vmem:[#allocation3 + $0x92] sm:$0xff] }
 0x3f5   : > { %v15480_v9 = vadd.f32 %v17481_v33, %v4684_v6  ;;  %13583 = vmatprep.mubr.f32.mxu0 %v7193_v50  ;;  %15036 = vmatpush3.bf16.msra.mxu0 %v15033_v11  ;;  %v7204_v6 = vld [vmem:[#allocation3 + $0xa2] sm:$0xff] }
 0x3f6   : > { %15472 = vst [vmem:[#allocation4 + $0x68] sm:$0xff] %v15471_v48  ;;  %15038 = vmatprep.subr.bf16.mxu0 %v15037_v49 }
 0x3f7   : > { %15481 = vst [vmem:[#allocation4 + $0x60] sm:$0xff] %v15480_v9  ;;  %v12951_v17 = vpop.f32.mrb[168].mxu1 }
 0x3f8   : > { %v15489_v35 = vadd.f32 %v17481_v33, %v12951_v17  ;;  %v4694_v2 = vpop.f32.mrb[169].mxu1  ;;  %13584 = vmatmul.mubr.f32.gmra.mrb[4].mxu0 %v7194_v10 }
 0x3f9   : > { %v15498_v51 = vadd.f32 %v17481_v33, %v4694_v2  ;;  %13586 = vmatprep.mubr.f32.mxu0 %v7195_v28  ;;  %15040 = vmatpush3.bf16.msra.mxu0 %v15037_v49  ;;  %v7197_v33 = vld [vmem:[#allocation3 + $0x6a] sm:$0xff]  ;;  %v10861_v2 = vld [vmem:[%s18221_s3 + $0x890] sm:$0xff] }
 0x3fa   : > { %15490 = vst [vmem:[#allocation4 + $0x78] sm:$0xff] %v15489_v35  ;;  %15042 = vmatprep.subr.bf16.mxu0 %v15041_v38  ;;  %v10862_v28 = vld [vmem:[%s18221_s3 + $0x898] sm:$0xff] }
 0x3fb   : > { %15499 = vst [vmem:[#allocation4 + $0x70] sm:$0xff] %v15498_v51  ;;  %v12954_v19 = vpop.f32.mrb[178].mxu1 }
 0x3fc   : > { %v4730_v62 = vadd.f32 %v12954_v19, %v4540_v57  ;;  %v4704_v40 = vpop.f32.mrb[179].mxu1  ;;  %13587 = vmatmul.mubr.f32.gmra.mrb[6].mxu0 %v7196_v54  ;;  %v15065_v19 = vpack.c.bf16 %v10862_v28, %v10861_v2  ;;  %v7446_v2 = vld [vmem:[#allocation3 + $0x93] sm:$0xff] }
 0x3fd   : > { %v4729_v1 = vadd.f32 %v4704_v40, %v17595_v16  ;;  %13589 = vmatprep.mubr.f32.mxu0 %v7197_v33  ;;  %15044 = vmatpush3.bf16.msra.mxu0 %v15041_v38  ;;  %v7205_v38 = vld [vmem:[#allocation3 + $0xaa] sm:$0xff] }
 0x3fe   : > { %4748 = vst [vmem:[#allocation4 + $0x88] sm:$0xf] %v4730_v62  ;;  %15046 = vmatprep.subr.bf16.mxu0 %v15045_v7  ;;  %v10864_v62 = vld [vmem:[%s18221_s3 + $0x8a8] sm:$0xff]  ;;  %v10875_v28 = vld [vmem:[%s18221_s3 + $0x900] sm:$0xff] }
 0x3ff   : > { %v17666_v45 = vpop.f32.mrb[180].mxu1  ;;  %v4973_v46 = vadd.f32 %v17449_v52, %v4729_v1  ;;  %v7200_v52 = vld [vmem:[#allocation3 + $0x82] sm:$0xff]  ;;  %v15069_v1 = vpack.c.bf16 %v10864_v62, %v10863_v31 }
 0x400   : > { %13590 = vmatmul.mubr.f32.gmra.mrb[8].mxu0 %v7198_v14  ;;  %v17675_v16 = vpop.f32.mrb[181].mxu1  ;;  %v10865_v14 = vld [vmem:[%s18221_s3 + $0x8b0] sm:$0xff] }
 0x401   : > { %13592 = vmatprep.mubr.f32.mxu0 %v7199_v29  ;;  %15048 = vmatpush3.bf16.msra.mxu0 %v15045_v7  ;;  %v5217_v11 = vadd.f32 %v17507_v61, %v4973_v46  ;;  %v7433_v7 = vld [vmem:[#allocation3 + $0x2b] sm:$0xff]  ;;  %v7448_v62 = vld [vmem:[#allocation3 + $0xa3] sm:$0xff] }
 0x402   : > { %15050 = vmatprep.subr.bf16.mxu0 %v15049_v47  ;;  %v10866_v46 = vld [vmem:[%s18221_s3 + $0x8b8] sm:$0xff] }
 0x403   : > { %v17678_v60 = vpop.f32.mrb[182].mxu1  ;;  %v5461_v59 = vadd.f32 %v17562_v34, %v5217_v11  ;;  %v15057_v34 = vpack.c.bf16 %v10858_v12, %v10857_v37  ;;  %v15073_v11 = vpack.c.bf16 %v10866_v46, %v10865_v14  ;;  %v7439_v37 = vld [vmem:[#allocation3 + $0x5b] sm:$0xff]  ;;  %v7450_v46 = vld [vmem:[#allocation3 + $0xb3] sm:$0xf] }
 0x404   : > { %13593 = vmatmul.mubr.f32.gmra.mrb[10].mxu0 %v7200_v52  ;;  %v17687_v0 = vpop.f32.mrb[183].mxu1  ;;  %v10867_v52 = vld [vmem:[%s18221_s3 + $0x8c0] sm:$0xff] }
 0x405   : > { %v4784_v61 = vld [vmem:[#allocation4 + $0x88] sm:$0xf]  ;;  %13595 = vmatprep.mubr.f32.mxu0 %v7201_v22  ;;  %15052 = vmatpush3.bf16.msra.mxu0 %v15049_v47  ;;  %v5705_v13 = vadd.f32 %v17624_v21, %v5461_v59  ;;  %v7203_v21 = vld [vmem:[#allocation3 + $0x9a] sm:$0xff] }
 0x406   : > { %v4974_v49 = vadd.f32 %v17447_v26, %v4784_v61  ;;  %15054 = vmatprep.subr.bf16.mxu0 %v15053_v15  ;;  %v15061_v26 = vpack.c.bf16 %v10860_v30, %v10859_v3  ;;  %v7436_v47 = vld [vmem:[#allocation3 + $0x43] sm:$0xff]  ;;  %v10868_v59 = vld [vmem:[%s18221_s3 + $0x8c8] sm:$0xff]  ;;  %v10871_v3 = vld [vmem:[%s18221_s3 + $0x8e0] sm:$0xff] }
 0x407   : > { %v17691_v18 = vpop.f32.mrb[184].mxu1  ;;  %v15077_v12 = vpack.c.bf16 %v10868_v59, %v10867_v52  ;;  %v7440_v22 = vld [vmem:[#allocation3 + $0x63] sm:$0xff]  ;;  %v10872_v30 = vld [vmem:[%s18221_s3 + $0x8e8] sm:$0xff] }
 0x408   : > { %4992 = vst [vmem:[#allocation4 + $0x88] sm:$0xf] %v4974_v49  ;;  %13596 = vmatmul.mubr.f32.gmra.mrb[12].mxu0 %v7202_v44  ;;  %v17699_v48 = vpop.f32.mrb[185].mxu1  ;;  %v10870_v61 = vld [vmem:[%s18221_s3 + $0x8d8] sm:$0xff]  ;;  %v7442_v49 = vld [vmem:[#allocation3 + $0x73] sm:$0xff] }
 0x409   : > { %13598 = vmatprep.mubr.f32.mxu0 %v7203_v21  ;;  %15056 = vmatpush3.bf16.msra.mxu0 %v15053_v15  ;;  %v7438_v15 = vld [vmem:[#allocation3 + $0x53] sm:$0xff] }
 0x40a   : > { %15058 = vmatprep.subr.bf16.mxu0 %v15057_v34  ;;  %v10880_v52 = vld [vmem:[%s18221_s3 + $0x928] sm:$0xff] }
 0x40b   : > { %v17701_v50 = vpop.f32.mrb[186].mxu1  ;;  %v17703_v9 = vpop.f32.mrb[24].mxu0 }
 0x40c   : > { %13599 = vmatmul.mubr.f32.gmra.mrb[14].mxu0 %v7204_v6  ;;  %v17705_v17 = vpop.f32.mrb[187].mxu1  ;;  %v5924_v10 = vpop.f32.mrb[25].mxu0  ;;  %v15085_v6 = vpack.c.bf16 %v10872_v30, %v10871_v3  ;;  %v10884_v3 = vld [vmem:[%s18221_s3 + $0x948] sm:$0xff] }
 0x40d   : > { %13601 = vmatprep.mubr.f32.mxu0 %v7205_v38  ;;  %15060 = vmatpush3.bf16.msra.mxu0 %v15057_v34  ;;  %v17707_v56 = vadd.f32 %v5924_v10, %v5705_v13  ;;  %v7441_v13 = vld [vmem:[#allocation3 + $0x6b] sm:$0xff]  ;;  %v7444_v38 = vld [vmem:[#allocation3 + $0x83] sm:$0xff] }
 0x40e   : > { %15062 = vmatprep.subr.bf16.mxu0 %v15061_v26  ;;  %v10873_v10 = vld [vmem:[%s18221_s3 + $0x8f0] sm:$0xff] }
 0x40f   : > { %v5028_v35 = vld [vmem:[#allocation4 + $0x88] sm:$0xf]  ;;  %v17715_v51 = vpop.f32.mrb[188].mxu1  ;;  %v7683_v30 = vld [vmem:[#allocation3 + $0x5c] sm:$0xff] }
 0x410   : > { %v5218_v54 = vadd.f32 %v17505_v23, %v5028_v35  ;;  %13602 = vmatmul.mubr.f32.gmra.mrb[36].mxu0 %v7206_v43  ;;  %v17718_v57 = vpop.f32.mrb[189].mxu1  ;;  %v7435_v23 = vld [vmem:[#allocation3 + $0x3b] sm:$0xff]  ;;  %v10874_v43 = vld [vmem:[%s18221_s3 + $0x8f8] sm:$0xff] }
 0x411   : > { %13636 = vmatprep.mubr.f32.mxu0 %v7433_v7  ;;  %v7445_v35 = vld [vmem:[#allocation3 + $0x8b] sm:$0xff]  ;;  %v7447_v7 = vld [vmem:[#allocation3 + $0x9b] sm:$0xff] }
 0x412   : > { %5236 = vst [vmem:[#allocation4 + $0x88] sm:$0xf] %v5218_v54  ;;  %v10876_v54 = vld [vmem:[%s18221_s3 + $0x908] sm:$0xff] }
 0x413   : > { %v17726_v40 = vpop.f32.mrb[190].mxu1  ;;  %v15093_v31 = vpack.c.bf16 %v10876_v54, %v10875_v28  ;;  %v7687_v28 = vld [vmem:[#allocation3 + $0x7c] sm:$0xff] }
 0x414   : > { %13637 = vmatmul.mubr.f32.vlgmr.msra.gmra.mrb[0].mxu0 %v7434_v41  ;;  %v17728_v33 = vpop.f32.mrb[191].mxu1 }
 0x415   : > { %13639 = vmatprep.mubr.f32.mxu0 %v7435_v23  ;;  %15064 = vmatpush3.bf16.msra.mxu0 %v15061_v26  ;;  %v7443_v26 = vld [vmem:[#allocation3 + $0x7b] sm:$0xff] }
 0x416   : > { %15066 = vmatprep.subr.bf16.mxu0 %v15065_v19 }
 0x418   : > { %13640 = vmatmul.mubr.f32.gmra.mrb[2].mxu0 %v7436_v47 }
 0x419   : > { %v5272_v5 = vld [vmem:[#allocation4 + $0x88] sm:$0xf]  ;;  %13642 = vmatprep.mubr.f32.mxu0 %v7437_v53  ;;  %15068 = vmatpush3.bf16.msra.mxu0 %v15065_v19  ;;  %v10877_v53 = vld [vmem:[%s18221_s3 + $0x910] sm:$0xff] }
 0x41a   : > { %v5462_v29 = vadd.f32 %v17560_v58, %v5272_v5  ;;  %15070 = vmatprep.subr.bf16.mxu0 %v15069_v1  ;;  %v10869_v58 = vld [vmem:[%s18221_s3 + $0x8d0] sm:$0xff]  ;;  %v7677_v5 = vld [vmem:[#allocation3 + $0x2c] sm:$0xff] }
 0x41b   : > { %v15081_v34 = vpack.c.bf16 %v10870_v61, %v10869_v58  ;;  %v10881_v58 = vld [vmem:[%s18221_s3 + $0x930] sm:$0xff]  ;;  %v10882_v61 = vld [vmem:[%s18221_s3 + $0x938] sm:$0xff] }
 0x41c   : > { %5480 = vst [vmem:[#allocation4 + $0x88] sm:$0xf] %v5462_v29  ;;  %13643 = vmatmul.mubr.f32.gmra.mrb[4].mxu0 %v7438_v15  ;;  %v7678_v29 = vld [vmem:[#allocation3 + $0x34] sm:$0xff] }
 0x41d   : > { %13645 = vmatprep.mubr.f32.mxu0 %v7439_v37  ;;  %15072 = vmatpush3.bf16.msra.mxu0 %v15069_v1  ;;  %v7449_v1 = vld [vmem:[#allocation3 + $0xab] sm:$0xff]  ;;  %v7679_v37 = vld [vmem:[#allocation3 + $0x3c] sm:$0xff] }
 0x41e   : > { %15074 = vmatprep.subr.bf16.mxu0 %v15073_v11 }
 0x420   : > { %13646 = vmatmul.mubr.f32.gmra.mrb[6].mxu0 %v7440_v22  ;;  %v7680_v22 = vld [vmem:[#allocation3 + $0x44] sm:$0xff] }
 0x421   : > { %13648 = vmatprep.mubr.f32.mxu0 %v7441_v13  ;;  %15076 = vmatpush3.bf16.msra.mxu0 %v15073_v11  ;;  %v7681_v13 = vld [vmem:[#allocation3 + $0x4c] sm:$0xff] }
 0x422   : > { %15078 = vmatprep.subr.bf16.mxu0 %v15077_v12 }
 0x423   : > { %v5516_v44 = vld [vmem:[#allocation4 + $0x88] sm:$0xf] }
 0x424   : > { %v5706_v21 = vadd.f32 %v17621_v4, %v5516_v44  ;;  %13649 = vmatmul.mubr.f32.gmra.mrb[8].mxu0 %v7442_v49  ;;  %v15089_v4 = vpack.c.bf16 %v10874_v43, %v10873_v10  ;;  %v15105_v49 = vpack.c.bf16 %v10882_v61, %v10881_v58  ;;  %v10883_v44 = vld [vmem:[%s18221_s3 + $0x940] sm:$0xff] }
 0x425   : > { %13651 = vmatprep.mubr.f32.mxu0 %v7443_v26  ;;  %15080 = vmatpush3.bf16.msra.mxu0 %v15077_v12  ;;  %v7684_v26 = vld [vmem:[#allocation3 + $0x64] sm:$0xff]  ;;  %v7685_v10 = vld [vmem:[#allocation3 + $0x6c] sm:$0xff] }
 0x426   : > { %5724 = vst [vmem:[#allocation4 + $0x88] sm:$0xf] %v5706_v21  ;;  %15082 = vmatprep.subr.bf16.mxu0 %v15081_v34  ;;  %v15109_v21 = vpack.c.bf16 %v10884_v3, %v10883_v44  ;;  %v10895_v61 = vld [vmem:[%s18221_s3 + $0x9a0] sm:$0xff]  ;;  %v7924_v44 = vld [vmem:[#allocation3 + $0x45] sm:$0xff] }
 0x427   : > { %v10897_v3 = vld [vmem:[%s18221_s3 + $0x9b0] sm:$0xff] }
 0x428   : > { %13652 = vmatmul.mubr.f32.gmra.mrb[10].mxu0 %v7444_v38  ;;  %v10886_v38 = vld [vmem:[%s18221_s3 + $0x958] sm:$0xff] }
 0x429   : > { %13654 = vmatprep.mubr.f32.mxu0 %v7445_v35  ;;  %15084 = vmatpush3.bf16.msra.mxu0 %v15081_v34  ;;  %v7682_v34 = vld [vmem:[#allocation3 + $0x54] sm:$0xff] }
 0x42a   : > { %15086 = vmatprep.subr.bf16.mxu0 %v15085_v6  ;;  %v7686_v35 = vld [vmem:[#allocation3 + $0x74] sm:$0xff] }
 0x42c   : > { %13655 = vmatmul.mubr.f32.gmra.mrb[12].mxu0 %v7446_v2  ;;  %v10888_v2 = vld [vmem:[%s18221_s3 + $0x968] sm:$0xff] }
 0x42d   : > { %v5760_v19 = vld [vmem:[#allocation4 + $0x88] sm:$0xf]  ;;  %13657 = vmatprep.mubr.f32.mxu0 %v7447_v7  ;;  %15088 = vmatpush3.bf16.msra.mxu0 %v15085_v6  ;;  %v10885_v6 = vld [vmem:[%s18221_s3 + $0x950] sm:$0xff] }
 0x42e   : > { %v5950_v41 = vadd.f32 %v17703_v9, %v5760_v19  ;;  %15090 = vmatprep.subr.bf16.mxu0 %v15089_v4  ;;  %v10878_v9 = vld [vmem:[%s18221_s3 + $0x918] sm:$0xff]  ;;  %v15113_v43 = vpack.c.bf16 %v10886_v38, %v10885_v6  ;;  %v10889_v19 = vld [vmem:[%s18221_s3 + $0x970] sm:$0xff]  ;;  %v7926_v6 = vld [vmem:[#allocation3 + $0x55] sm:$0xff] }
 0x42f   : > { %v13308_v23 = vpop.f32.mrb[26].mxu0  ;;  %v15097_v11 = vpack.c.bf16 %v10878_v9, %v10877_v53  ;;  %v7688_v7 = vld [vmem:[#allocation3 + $0x84] sm:$0xff]  ;;  %v10899_v38 = vld [vmem:[%s18221_s3 + $0x9c0] sm:$0xff] }
 0x430   : > { %5968 = vst [vmem:[#allocation4 + $0x88] sm:$0xf] %v5950_v41  ;;  %13658 = vmatmul.mubr.f32.gmra.mrb[14].mxu0 %v7448_v62  ;;  %v6168_v47 = vpop.f32.mrb[27].mxu0  ;;  %v10890_v41 = vld [vmem:[%s18221_s3 + $0x978] sm:$0xff] }
 0x431   : > { %13660 = vmatprep.mubr.f32.mxu0 %v7449_v1  ;;  %15092 = vmatpush3.bf16.msra.mxu0 %v15089_v4  ;;  %v17770_v14 = vadd.f32 %v6168_v47, %v17707_v56  ;;  %v10879_v56 = vld [vmem:[%s18221_s3 + $0x920] sm:$0xff]  ;;  %v15121_v62 = vpack.c.bf16 %v10890_v41, %v10889_v19  ;;  %v10892_v47 = vld [vmem:[%s18221_s3 + $0x988] sm:$0xff] }
 0x432   : > { %15094 = vmatprep.subr.bf16.mxu0 %v15093_v31  ;;  %v15101_v12 = vpack.c.bf16 %v10880_v52, %v10879_v56  ;;  %v10887_v4 = vld [vmem:[%s18221_s3 + $0x960] sm:$0xff] }
 0x433   : > { %v15117_v54 = vpack.c.bf16 %v10888_v2, %v10887_v4  ;;  %v10891_v1 = vld [vmem:[%s18221_s3 + $0x980] sm:$0xff]  ;;  %v7928_v4 = vld [vmem:[#allocation3 + $0x65] sm:$0xff] }
 0x434   : > { %13661 = vmatmul.mubr.f32.gmra.mrb[38].mxu0 %v7450_v46  ;;  %v7691_v46 = vld [vmem:[#allocation3 + $0x9c] sm:$0xff]  ;;  %v15125_v53 = vpack.c.bf16 %v10892_v47, %v10891_v1  ;;  %v15880_v52 = vld [vmem:[#allocation3 + $0xac] sm:$0xff] }
 0x435   : > { %13695 = vmatprep.mubr.f32.mxu0 %v7677_v5  ;;  %v10901_v2 = vld [vmem:[%s18221_s3 + $0x9d0] sm:$0xff]  ;;  %v7930_v19 = vld [vmem:[#allocation3 + $0x75] sm:$0xff] }
 0x436   : > { %v10903_v41 = vld [vmem:[%s18221_s3 + $0x9e0] sm:$0xff]  ;;  %v7932_v1 = vld [vmem:[#allocation3 + $0x85] sm:$0xff] }
 0x437   : > { %v6004_v15 = vld [vmem:[#allocation4 + $0x88] sm:$0xf]  ;;  %v10905_v47 = vld [vmem:[%s18221_s3 + $0x9f0] sm:$0xff] }
 0x438   : > { %v6194_v59 = vadd.f32 %v13308_v23, %v6004_v15  ;;  %13696 = vmatmul.mubr.f32.vlgmr.msra.gmra.mrb[0].mxu0 %v7678_v29  ;;  %v7690_v23 = vld [vmem:[#allocation3 + $0x94] sm:$0xff]  ;;  %v7692_v29 = vld [vmem:[#allocation3 + $0xa4] sm:$0xff] }
 0x439   : > { %13698 = vmatprep.mubr.f32.mxu0 %v7679_v37  ;;  %15096 = vmatpush3.bf16.msra.mxu0 %v15093_v31  ;;  %v7689_v31 = vld [vmem:[#allocation3 + $0x8c] sm:$0xff]  ;;  %v10893_v37 = vld [vmem:[%s18221_s3 + $0x990] sm:$0xff] }
 0x43a   : > { %6212 = vst [vmem:[#allocation4 + $0x88] sm:$0xf] %v6194_v59  ;;  %15098 = vmatprep.subr.bf16.mxu0 %v15097_v11  ;;  %v7694_v59 = vld [vmem:[#allocation3 + $0xb4] sm:$0xf] }
 0x43c   : > { %13699 = vmatmul.mubr.f32.gmra.mrb[2].mxu0 %v7680_v22  ;;  %v7921_v22 = vld [vmem:[#allocation3 + $0x2d] sm:$0xff] }
 0x43d   : > { %13701 = vmatprep.mubr.f32.mxu0 %v7681_v13  ;;  %15100 = vmatpush3.bf16.msra.mxu0 %v15097_v11  ;;  %v10896_v13 = vld [vmem:[%s18221_s3 + $0x9a8] sm:$0xff] }
 0x43e   : > { %15102 = vmatprep.subr.bf16.mxu0 %v15101_v12 }
 0x440   : > { %13702 = vmatmul.mubr.f32.gmra.mrb[4].mxu0 %v7682_v34  ;;  %v15133_v34 = vpack.c.bf16 %v10896_v13, %v10895_v61  ;;  %v7938_v13 = vld [vmem:[#allocation3 + $0xb5] sm:$0xf] }
 0x441   : > { %13704 = vmatprep.mubr.f32.mxu0 %v7683_v30  ;;  %15104 = vmatpush3.bf16.msra.mxu0 %v15101_v12  ;;  %v6248_v9 = vld [vmem:[#allocation4 + $0x88] sm:$0xf] }
 0x442   : > { %15106 = vmatprep.subr.bf16.mxu0 %v15105_v49  ;;  %v10894_v12 = vld [vmem:[%s18221_s3 + $0x998] sm:$0xff] }
 0x443   : > { %v15129_v58 = vpack.c.bf16 %v10894_v12, %v10893_v37  ;;  %v10898_v30 = vld [vmem:[%s18221_s3 + $0x9b8] sm:$0xff] }
 0x444   : > { %13705 = vmatmul.mubr.f32.gmra.mrb[6].mxu0 %v7684_v26  ;;  %v15137_v26 = vpack.c.bf16 %v10898_v30, %v10897_v3  ;;  %v7936_v12 = vld [vmem:[#allocation3 + $0xa5] sm:$0xff]  ;;  %v8166_v30 = vld [vmem:[#allocation3 + $0x36] sm:$0xff] }
 0x445   : > { %13707 = vmatprep.mubr.f32.mxu0 %v7685_v10  ;;  %15108 = vmatpush3.bf16.msra.mxu0 %v15105_v49  ;;  %v7923_v49 = vld [vmem:[#allocation3 + $0x3d] sm:$0xff] }
 0x446   : > { %15110 = vmatprep.subr.bf16.mxu0 %v15109_v21  ;;  %v10900_v10 = vld [vmem:[%s18221_s3 + $0x9c8] sm:$0xff] }
 0x448   : > { %13708 = vmatmul.mubr.f32.gmra.mrb[8].mxu0 %v7686_v35  ;;  %v15141_v35 = vpack.c.bf16 %v10900_v10, %v10899_v38  ;;  %v8168_v38 = vld [vmem:[#allocation3 + $0x46] sm:$0xff] }
 0x449   : > { %13710 = vmatprep.mubr.f32.mxu0 %v7687_v28  ;;  %15112 = vmatpush3.bf16.msra.mxu0 %v15109_v21  ;;  %v7925_v21 = vld [vmem:[#allocation3 + $0x4d] sm:$0xff]  ;;  %v10913_v10 = vld [vmem:[%s18221_s3 + $0xa30] sm:$0xff] }
 0x44a   : > { %15114 = vmatprep.subr.bf16.mxu0 %v15113_v43  ;;  %v10902_v28 = vld [vmem:[%s18221_s3 + $0x9d8] sm:$0xff] }
 0x44c   : > { %13711 = vmatmul.mubr.f32.gmra.mrb[10].mxu0 %v7688_v7  ;;  %v15145_v7 = vpack.c.bf16 %v10902_v28, %v10901_v2  ;;  %v8170_v2 = vld [vmem:[#allocation3 + $0x56] sm:$0xff] }
 0x44d   : > { %13713 = vmatprep.mubr.f32.mxu0 %v7689_v31  ;;  %15116 = vmatpush3.bf16.msra.mxu0 %v15113_v43  ;;  %v7927_v43 = vld [vmem:[#allocation3 + $0x5d] sm:$0xff]  ;;  %v10915_v28 = vld [vmem:[%s18221_s3 + $0xa40] sm:$0xff] }
 0x44e   : > { %15118 = vmatprep.subr.bf16.mxu0 %v15117_v54  ;;  %v10904_v31 = vld [vmem:[%s18221_s3 + $0x9e8] sm:$0xff] }
 0x450   : > { %13714 = vmatmul.mubr.f32.gmra.mrb[12].mxu0 %v7690_v23  ;;  %v15149_v23 = vpack.c.bf16 %v10904_v31, %v10903_v41  ;;  %v8172_v41 = vld [vmem:[#allocation3 + $0x66] sm:$0xff] }
 0x451   : > { %13716 = vmatprep.mubr.f32.mxu0 %v7691_v46  ;;  %15120 = vmatpush3.bf16.msra.mxu0 %v15117_v54  ;;  %v7929_v54 = vld [vmem:[#allocation3 + $0x6d] sm:$0xff]  ;;  %v10917_v31 = vld [vmem:[%s18221_s3 + $0xa50] sm:$0xff] }
 0x452   : > { %15122 = vmatprep.subr.bf16.mxu0 %v15121_v62  ;;  %v10906_v46 = vld [vmem:[%s18221_s3 + $0x9f8] sm:$0xff] }
 0x453   : > { %v13367_v5 = vpop.f32.mrb[28].mxu0 }
 0x454   : > { %v6438_v11 = vadd.f32 %v13367_v5, %v6248_v9  ;;  %v6412_v15 = vpop.f32.mrb[29].mxu0  ;;  %13717 = vmatmul.mubr.f32.gmra.mrb[14].mxu0 %v7692_v29  ;;  %v15153_v9 = vpack.c.bf16 %v10906_v46, %v10905_v47  ;;  %v7934_v5 = vld [vmem:[#allocation3 + $0x95] sm:$0xff] }
 0x455   : > { %v17821_v56 = vadd.f32 %v6412_v15, %v17770_v14  ;;  %13719 = vmatprep.mubr.f32.mxu0 %v15880_v52  ;;  %15124 = vmatpush3.bf16.msra.mxu0 %v15121_v62  ;;  %v7922_v14 = vld [vmem:[#allocation3 + $0x35] sm:$0xff]  ;;  %v7931_v62 = vld [vmem:[#allocation3 + $0x7d] sm:$0xff] }
 0x456   : > { %6456 = vst [vmem:[#allocation4 + $0x88] sm:$0xf] %v6438_v11  ;;  %15126 = vmatprep.subr.bf16.mxu0 %v15125_v53  ;;  %v10907_v29 = vld [vmem:[%s18221_s3 + $0xa00] sm:$0xff]  ;;  %v10908_v11 = vld [vmem:[%s18221_s3 + $0xa08] sm:$0xff] }
 0x457   : > { %v7935_v15 = vld [vmem:[#allocation3 + $0x9d] sm:$0xff]  ;;  %v15157_v52 = vpack.c.bf16 %v10908_v11, %v10907_v29  ;;  %v10919_v46 = vld [vmem:[%s18221_s3 + $0xa60] sm:$0xff]  ;;  %v8176_v29 = vld [vmem:[#allocation3 + $0x86] sm:$0xff] }
 0x458   : > { %13720 = vmatmul.mubr.f32.gmra.mrb[40].mxu0 %v7694_v59  ;;  %v8174_v47 = vld [vmem:[#allocation3 + $0x76] sm:$0xff]  ;;  %v10921_v11 = vld [vmem:[%s18221_s3 + $0xa70] sm:$0xff] }
 0x459   : > { %13754 = vmatprep.mubr.f32.mxu0 %v7921_v22 }
 0x45c   : > { %13755 = vmatmul.mubr.f32.vlgmr.msra.gmra.mrb[0].mxu0 %v7922_v14  ;;  %v7937_v14 = vld [vmem:[#allocation3 + $0xad] sm:$0xff] }
 0x45d   : > { %13757 = vmatprep.mubr.f32.mxu0 %v7923_v49  ;;  %15128 = vmatpush3.bf16.msra.mxu0 %v15125_v53  ;;  %v7933_v53 = vld [vmem:[#allocation3 + $0x8d] sm:$0xff]  ;;  %v6492_v59 = vld [vmem:[#allocation4 + $0x88] sm:$0xf]  ;;  %v10909_v49 = vld [vmem:[%s18221_s3 + $0xa10] sm:$0xff] }
 0x45e   : > { %15130 = vmatprep.subr.bf16.mxu0 %v15129_v58 }
 0x460   : > { %13758 = vmatmul.mubr.f32.gmra.mrb[2].mxu0 %v7924_v44  ;;  %v8165_v44 = vld [vmem:[#allocation3 + $0x2e] sm:$0xff] }
 0x461   : > { %13760 = vmatprep.mubr.f32.mxu0 %v7925_v21  ;;  %15132 = vmatpush3.bf16.msra.mxu0 %v15129_v58  ;;  %v10912_v21 = vld [vmem:[%s18221_s3 + $0xa28] sm:$0xff] }
 0x462   : > { %15134 = vmatprep.subr.bf16.mxu0 %v15133_v34 }
 0x464   : > { %13761 = vmatmul.mubr.f32.gmra.mrb[4].mxu0 %v7926_v6 }
 0x465   : > { %13763 = vmatprep.mubr.f32.mxu0 %v7927_v43  ;;  %15136 = vmatpush3.bf16.msra.mxu0 %v15133_v34  ;;  %v10910_v34 = vld [vmem:[%s18221_s3 + $0xa18] sm:$0xff] }
 0x466   : > { %15138 = vmatprep.subr.bf16.mxu0 %v15137_v26  ;;  %v15161_v3 = vpack.c.bf16 %v10910_v34, %v10909_v49  ;;  %v10914_v43 = vld [vmem:[%s18221_s3 + $0xa38] sm:$0xff] }
 0x467   : > { %v8180_v34 = vld [vmem:[#allocation3 + $0xa6] sm:$0xff] }
 0x468   : > { %13764 = vmatmul.mubr.f32.gmra.mrb[6].mxu0 %v7928_v4  ;;  %v15169_v4 = vpack.c.bf16 %v10914_v43, %v10913_v10  ;;  %v8410_v43 = vld [vmem:[#allocation3 + $0x40] sm:$0xff] }
 0x469   : > { %13766 = vmatprep.mubr.f32.mxu0 %v7929_v54  ;;  %15140 = vmatpush3.bf16.msra.mxu0 %v15137_v26  ;;  %v8167_v26 = vld [vmem:[#allocation3 + $0x3e] sm:$0xff] }
 0x46a   : > { %15142 = vmatprep.subr.bf16.mxu0 %v15141_v35  ;;  %v10916_v54 = vld [vmem:[%s18221_s3 + $0xa48] sm:$0xff] }
 0x46c   : > { %13767 = vmatmul.mubr.f32.gmra.mrb[8].mxu0 %v7930_v19  ;;  %v15173_v19 = vpack.c.bf16 %v10916_v54, %v10915_v28  ;;  %v8412_v28 = vld [vmem:[#allocation3 + $0x50] sm:$0xff]  ;;  %v10929_v54 = vld [vmem:[%s18221_s3 + $0xab0] sm:$0xff] }
 0x46d   : > { %13769 = vmatprep.mubr.f32.mxu0 %v7931_v62  ;;  %15144 = vmatpush3.bf16.msra.mxu0 %v15141_v35  ;;  %v8169_v35 = vld [vmem:[#allocation3 + $0x4e] sm:$0xff] }
 0x46e   : > { %15146 = vmatprep.subr.bf16.mxu0 %v15145_v7  ;;  %v10918_v62 = vld [vmem:[%s18221_s3 + $0xa58] sm:$0xff] }
 0x470   : > { %13770 = vmatmul.mubr.f32.gmra.mrb[10].mxu0 %v7932_v1  ;;  %v15177_v1 = vpack.c.bf16 %v10918_v62, %v10917_v31  ;;  %v8414_v31 = vld [vmem:[#allocation3 + $0x60] sm:$0xff]  ;;  %v10931_v62 = vld [vmem:[%s18221_s3 + $0xac0] sm:$0xff] }
 0x471   : > { %13772 = vmatprep.mubr.f32.mxu0 %v7933_v53  ;;  %15148 = vmatpush3.bf16.msra.mxu0 %v15145_v7  ;;  %v8171_v7 = vld [vmem:[#allocation3 + $0x5e] sm:$0xff] }
 0x472   : > { %15150 = vmatprep.subr.bf16.mxu0 %v15149_v23  ;;  %v10920_v53 = vld [vmem:[%s18221_s3 + $0xa68] sm:$0xff] }
 0x474   : > { %13773 = vmatmul.mubr.f32.gmra.mrb[12].mxu0 %v7934_v5  ;;  %v15181_v5 = vpack.c.bf16 %v10920_v53, %v10919_v46  ;;  %v8416_v46 = vld [vmem:[#allocation3 + $0x70] sm:$0xff]  ;;  %v10933_v53 = vld [vmem:[%s18221_s3 + $0xad0] sm:$0xff] }
 0x475   : > { %13775 = vmatprep.mubr.f32.mxu0 %v7935_v15  ;;  %15152 = vmatpush3.bf16.msra.mxu0 %v15149_v23  ;;  %v8173_v23 = vld [vmem:[#allocation3 + $0x6e] sm:$0xff] }
 0x476   : > { %15154 = vmatprep.subr.bf16.mxu0 %v15153_v9  ;;  %v10922_v15 = vld [vmem:[%s18221_s3 + $0xa78] sm:$0xff] }
 0x477   : > { %v13426_v37 = vpop.f32.mrb[30].mxu0 }
 0x478   : > { %v6682_v22 = vadd.f32 %v13426_v37, %v6492_v59  ;;  %v6656_v58 = vpop.f32.mrb[31].mxu0  ;;  %13776 = vmatmul.mubr.f32.gmra.mrb[14].mxu0 %v7936_v12  ;;  %v15185_v59 = vpack.c.bf16 %v10922_v15, %v10921_v11  ;;  %v8178_v37 = vld [vmem:[#allocation3 + $0x96] sm:$0xff]  ;;  %v8418_v11 = vld [vmem:[#allocation3 + $0x80] sm:$0xff] }
 0x479   : > { %v17872_v61 = vadd.f32 %v6656_v58, %v17821_v56  ;;  %13778 = vmatprep.mubr.f32.mxu0 %v7937_v14  ;;  %15156 = vmatpush3.bf16.msra.mxu0 %v15153_v9  ;;  %v10911_v56 = vld [vmem:[%s18221_s3 + $0xa20] sm:$0xff]  ;;  %v8175_v9 = vld [vmem:[#allocation3 + $0x7e] sm:$0xff] }
 0x47a   : > { %6700 = vst [vmem:[#allocation4 + $0x88] sm:$0xf] %v6682_v22  ;;  %15158 = vmatprep.subr.bf16.mxu0 %v15157_v52  ;;  %v15165_v6 = vpack.c.bf16 %v10912_v21, %v10911_v56  ;;  %v10923_v12 = vld [vmem:[%s18221_s3 + $0xa80] sm:$0xff]  ;;  %v10924_v22 = vld [vmem:[%s18221_s3 + $0xa88] sm:$0xff] }
 0x47b   : > { %v8179_v58 = vld [vmem:[#allocation3 + $0x9e] sm:$0xff]  ;;  %v15189_v14 = vpack.c.bf16 %v10924_v22, %v10923_v12  ;;  %v8182_v21 = vld [vmem:[#allocation3 + $0xb6] sm:$0xf] }
 0x47c   : > { %13779 = vmatmul.mubr.f32.gmra.mrb[42].mxu0 %v7938_v13  ;;  %v10935_v15 = vld [vmem:[%s18221_s3 + $0xae0] sm:$0xff]  ;;  %v10937_v22 = vld [vmem:[%s18221_s3 + $0xaf0] sm:$0xff] }
 0x47d   : > { %13813 = vmatprep.mubr.f32.mxu0 %v8165_v44  ;;  %v8420_v12 = vld [vmem:[#allocation3 + $0x90] sm:$0xff] }
 0x480   : > { %13814 = vmatmul.mubr.f32.vlgmr.msra.gmra.mrb[0].mxu0 %v8166_v30  ;;  %v8181_v30 = vld [vmem:[#allocation3 + $0xae] sm:$0xff] }
 0x481   : > { %13816 = vmatprep.mubr.f32.mxu0 %v8167_v26  ;;  %15160 = vmatpush3.bf16.msra.mxu0 %v15157_v52  ;;  %v8177_v52 = vld [vmem:[#allocation3 + $0x8e] sm:$0xff]  ;;  %v6736_v13 = vld [vmem:[#allocation4 + $0x88] sm:$0xf]  ;;  %v10925_v26 = vld [vmem:[%s18221_s3 + $0xa90] sm:$0xff] }
 0x482   : > { %15162 = vmatprep.subr.bf16.mxu0 %v15161_v3 }
 0x484   : > { %13817 = vmatmul.mubr.f32.gmra.mrb[2].mxu0 %v8168_v38  ;;  %v8409_v38 = vld [vmem:[#allocation3 + $0x38] sm:$0xff] }
 0x485   : > { %13819 = vmatprep.mubr.f32.mxu0 %v8169_v35  ;;  %15164 = vmatpush3.bf16.msra.mxu0 %v15161_v3  ;;  %v10928_v35 = vld [vmem:[%s18221_s3 + $0xaa8] sm:$0xff] }
 0x486   : > { %15166 = vmatprep.subr.bf16.mxu0 %v15165_v6 }
 0x488   : > { %13820 = vmatmul.mubr.f32.gmra.mrb[4].mxu0 %v8170_v2 }
 0x489   : > { %13822 = vmatprep.mubr.f32.mxu0 %v8171_v7  ;;  %15168 = vmatpush3.bf16.msra.mxu0 %v15165_v6  ;;  %v10926_v6 = vld [vmem:[%s18221_s3 + $0xa98] sm:$0xff] }
 0x48a   : > { %15170 = vmatprep.subr.bf16.mxu0 %v15169_v4  ;;  %v15193_v10 = vpack.c.bf16 %v10926_v6, %v10925_v26  ;;  %v10930_v7 = vld [vmem:[%s18221_s3 + $0xab8] sm:$0xff] }
 0x48c   : > { %13823 = vmatmul.mubr.f32.gmra.mrb[6].mxu0 %v8172_v41  ;;  %v15201_v41 = vpack.c.bf16 %v10930_v7, %v10929_v54  ;;  %v8653_v54 = vld [vmem:[#allocation3 + $0x39] sm:$0xff] }
 0x48d   : > { %13825 = vmatprep.mubr.f32.mxu0 %v8173_v23  ;;  %15172 = vmatpush3.bf16.msra.mxu0 %v15169_v4  ;;  %v8411_v4 = vld [vmem:[#allocation3 + $0x48] sm:$0xff]  ;;  %v10932_v23 = vld [vmem:[%s18221_s3 + $0xac8] sm:$0xff] }
 0x48e   : > { %15174 = vmatprep.subr.bf16.mxu0 %v15173_v19 }
 0x490   : > { %13826 = vmatmul.mubr.f32.gmra.mrb[8].mxu0 %v8174_v47  ;;  %v15205_v47 = vpack.c.bf16 %v10932_v23, %v10931_v62  ;;  %v8656_v23 = vld [vmem:[#allocation3 + $0x51] sm:$0xff] }
 0x491   : > { %13828 = vmatprep.mubr.f32.mxu0 %v8175_v9  ;;  %15176 = vmatpush3.bf16.msra.mxu0 %v15173_v19  ;;  %v8413_v19 = vld [vmem:[#allocation3 + $0x58] sm:$0xff]  ;;  %v10934_v9 = vld [vmem:[%s18221_s3 + $0xad8] sm:$0xff] }
 0x492   : > { %15178 = vmatprep.subr.bf16.mxu0 %v15177_v1 }
 0x494   : > { %13829 = vmatmul.mubr.f32.gmra.mrb[10].mxu0 %v8176_v29  ;;  %v15209_v29 = vpack.c.bf16 %v10934_v9, %v10933_v53  ;;  %v8658_v9 = vld [vmem:[#allocation3 + $0x61] sm:$0xff] }
 0x495   : > { %13831 = vmatprep.mubr.f32.mxu0 %v8177_v52  ;;  %15180 = vmatpush3.bf16.msra.mxu0 %v15177_v1  ;;  %v8415_v1 = vld [vmem:[#allocation3 + $0x68] sm:$0xff]  ;;  %v10936_v52 = vld [vmem:[%s18221_s3 + $0xae8] sm:$0xff] }
 0x496   : > { %15182 = vmatprep.subr.bf16.mxu0 %v15181_v5 }
 0x498   : > { %13832 = vmatmul.mubr.f32.gmra.mrb[12].mxu0 %v8178_v37  ;;  %v15213_v37 = vpack.c.bf16 %v10936_v52, %v10935_v15  ;;  %v8660_v52 = vld [vmem:[#allocation3 + $0x71] sm:$0xff] }
 0x499   : > { %13834 = vmatprep.mubr.f32.mxu0 %v8179_v58  ;;  %15184 = vmatpush3.bf16.msra.mxu0 %v15181_v5  ;;  %v8417_v5 = vld [vmem:[#allocation3 + $0x78] sm:$0xff]  ;;  %v10938_v58 = vld [vmem:[%s18221_s3 + $0xaf8] sm:$0xff] }
 0x49a   : > { %15186 = vmatprep.subr.bf16.mxu0 %v15185_v59 }
 0x49b   : > { %v13485_v49 = vpop.f32.mrb[32].mxu0 }
 0x49c   : > { %v6926_v44 = vadd.f32 %v13485_v49, %v6736_v13  ;;  %v6900_v3 = vpop.f32.mrb[33].mxu0  ;;  %13835 = vmatmul.mubr.f32.gmra.mrb[14].mxu0 %v8180_v34  ;;  %v9402_v13 = vld [vmem:[#allocation3 + $0xc4] sm:$0xf]  ;;  %v15217_v49 = vpack.c.bf16 %v10938_v58, %v10937_v22 }
 0x49d   : > { %v17923_v56 = vadd.f32 %v6900_v3, %v17872_v61  ;;  %13837 = vmatprep.mubr.f32.mxu0 %v8181_v30  ;;  %15188 = vmatpush3.bf16.msra.mxu0 %v15185_v59  ;;  %v10927_v61 = vld [vmem:[%s18221_s3 + $0xaa0] sm:$0xff]  ;;  %v8419_v59 = vld [vmem:[#allocation3 + $0x88] sm:$0xff]  ;;  %v8422_v34 = vld [vmem:[#allocation3 + $0xa0] sm:$0xff] }
 0x49e   : > { %6944 = vst [vmem:[#allocation4 + $0x88] sm:$0xf] %v6926_v44  ;;  %15190 = vmatprep.subr.bf16.mxu0 %v15189_v14  ;;  %v15197_v2 = vpack.c.bf16 %v10928_v35, %v10927_v61  ;;  %14133 = vmatmul.mubr.f32.gmra.mrb[192].mxu1 %v9402_v13  ;;  %v10939_v44 = vld [vmem:[%s18221_s3 + $0xb00] sm:$0xff]  ;;  %v10940_v3 = vld [vmem:[%s18221_s3 + $0xb08] sm:$0xff]  ;;  %v8423_v30 = vld [vmem:[#allocation3 + $0xa8] sm:$0xff] }
 0x49f   : > { %v8425_v61 = vld [vmem:[#allocation3 + $0xb8] sm:$0xff]  ;;  %v8662_v58 = vld [vmem:[#allocation3 + $0x81] sm:$0xff] }
 0x4a0   : > { %13838 = vmatmul.mubr.f32.gmra.mrb[44].mxu0 %v8182_v21  ;;  %v15221_v21 = vpack.c.bf16 %v10940_v3, %v10939_v44  ;;  %v10952_v13 = vld [vmem:[%s18221_s3 + $0xb68] sm:$0xff]  ;;  %v10953_v3 = vld [vmem:[%s18221_s3 + $0xb70] sm:$0xff] }
 0x4a1   : > { %13872 = vmatprep.mubr.f32.mxu0 %v8409_v38  ;;  %v8424_v38 = vld [vmem:[#allocation3 + $0xb0] sm:$0xff] }
 0x4a2   : > { %v8664_v44 = vld [vmem:[#allocation3 + $0x91] sm:$0xff] }
 0x4a4   : > { %13873 = vmatmul.mubr.f32.vlgmr.msra.gmra.mrb[0].mxu0 %v8410_v43 }
 0x4a5   : > { %13875 = vmatprep.mubr.f32.mxu0 %v8411_v4  ;;  %15192 = vmatpush3.bf16.msra.mxu0 %v15189_v14  ;;  %v8421_v14 = vld [vmem:[#allocation3 + $0x98] sm:$0xff]  ;;  %v6980_v26 = vld [vmem:[#allocation4 + $0x88] sm:$0xf]  ;;  %v8426_v4 = vld [vmem:[#allocation3 + $0xc0] sm:$0xf] }
 0x4a6   : > { %15194 = vmatprep.subr.bf16.mxu0 %v15193_v10 }
 0x4a8   : > { %13876 = vmatmul.mubr.f32.gmra.mrb[2].mxu0 %v8412_v28  ;;  %v10942_v28 = vld [vmem:[%s18221_s3 + $0xb18] sm:$0xff] }
 0x4a9   : > { %13878 = vmatprep.mubr.f32.mxu0 %v8413_v19  ;;  %15196 = vmatpush3.bf16.msra.mxu0 %v15193_v10  ;;  %v8654_v19 = vld [vmem:[#allocation3 + $0x41] sm:$0xff] }
 0x4aa   : > { %15198 = vmatprep.subr.bf16.mxu0 %v15197_v2 }
 0x4ac   : > { %13879 = vmatmul.mubr.f32.gmra.mrb[4].mxu0 %v8414_v31  ;;  %v8655_v31 = vld [vmem:[#allocation3 + $0x49] sm:$0xff] }
 0x4ad   : > { %13881 = vmatprep.mubr.f32.mxu0 %v8415_v1  ;;  %15200 = vmatpush3.bf16.msra.mxu0 %v15197_v2  ;;  %v10941_v2 = vld [vmem:[%s18221_s3 + $0xb10] sm:$0xff] }
 0x4ae   : > { %15202 = vmatprep.subr.bf16.mxu0 %v15201_v41  ;;  %v15225_v7 = vpack.c.bf16 %v10942_v28, %v10941_v2  ;;  %v10945_v1 = vld [vmem:[%s18221_s3 + $0xb30] sm:$0xff]  ;;  %v8668_v28 = vld [vmem:[#allocation3 + $0xb1] sm:$0xff] }
 0x4b0   : > { %13882 = vmatmul.mubr.f32.gmra.mrb[6].mxu0 %v8416_v46  ;;  %v8657_v46 = vld [vmem:[#allocation3 + $0x59] sm:$0xff] }
 0x4b1   : > { %13884 = vmatprep.mubr.f32.mxu0 %v8417_v5  ;;  %15204 = vmatpush3.bf16.msra.mxu0 %v15201_v41  ;;  %v10944_v41 = vld [vmem:[%s18221_s3 + $0xb28] sm:$0xff]  ;;  %v10947_v5 = vld [vmem:[%s18221_s3 + $0xb40] sm:$0xff] }
 0x4b2   : > { %15206 = vmatprep.subr.bf16.mxu0 %v15205_v47 }
 0x4b4   : > { %13885 = vmatmul.mubr.f32.gmra.mrb[8].mxu0 %v8418_v11  ;;  %v8659_v11 = vld [vmem:[#allocation3 + $0x69] sm:$0xff] }
 0x4b5   : > { %13887 = vmatprep.mubr.f32.mxu0 %v8419_v59  ;;  %15208 = vmatpush3.bf16.msra.mxu0 %v15205_v47  ;;  %v10946_v47 = vld [vmem:[%s18221_s3 + $0xb38] sm:$0xff]  ;;  %v10949_v59 = vld [vmem:[%s18221_s3 + $0xb50] sm:$0xff] }
 0x4b6   : > { %15210 = vmatprep.subr.bf16.mxu0 %v15209_v29  ;;  %v15233_v53 = vpack.c.bf16 %v10946_v47, %v10945_v1  ;;  %v8898_v47 = vld [vmem:[#allocation3 + $0x42] sm:$0xff] }
 0x4b8   : > { %13888 = vmatmul.mubr.f32.gmra.mrb[10].mxu0 %v8420_v12  ;;  %v8661_v12 = vld [vmem:[#allocation3 + $0x79] sm:$0xff] }
 0x4b9   : > { %13890 = vmatprep.mubr.f32.mxu0 %v8421_v14  ;;  %15212 = vmatpush3.bf16.msra.mxu0 %v15209_v29  ;;  %v10948_v29 = vld [vmem:[%s18221_s3 + $0xb48] sm:$0xff]  ;;  %v10951_v14 = vld [vmem:[%s18221_s3 + $0xb60] sm:$0xff] }
 0x4ba   : > { %15214 = vmatprep.subr.bf16.mxu0 %v15213_v37  ;;  %v15237_v15 = vpack.c.bf16 %v10948_v29, %v10947_v5  ;;  %v8900_v5 = vld [vmem:[#allocation3 + $0x52] sm:$0xff]  ;;  %v10961_v29 = vld [vmem:[%s18221_s3 + $0xbb0] sm:$0xff] }
 0x4bc   : > { %13891 = vmatmul.mubr.f32.gmra.mrb[12].mxu0 %v8422_v34  ;;  %v15245_v34 = vpack.c.bf16 %v10952_v13, %v10951_v14  ;;  %v8904_v14 = vld [vmem:[#allocation3 + $0x72] sm:$0xff]  ;;  %v10965_v13 = vld [vmem:[%s18221_s3 + $0xbd0] sm:$0xff] }
 0x4bd   : > { %13893 = vmatprep.mubr.f32.mxu0 %v8423_v30  ;;  %15216 = vmatpush3.bf16.msra.mxu0 %v15213_v37  ;;  %v10950_v37 = vld [vmem:[%s18221_s3 + $0xb58] sm:$0xff] }
 0x4be   : > { %15218 = vmatprep.subr.bf16.mxu0 %v15217_v49  ;;  %v15241_v22 = vpack.c.bf16 %v10950_v37, %v10949_v59  ;;  %v10954_v30 = vld [vmem:[%s18221_s3 + $0xb78] sm:$0xff]  ;;  %v10963_v37 = vld [vmem:[%s18221_s3 + $0xbc0] sm:$0xff] }
 0x4bf   : > { %v13544_v6 = vpop.f32.mrb[34].mxu0  ;;  %v8902_v59 = vld [vmem:[#allocation3 + $0x62] sm:$0xff] }
 0x4c0   : > { %v7170_v10 = vadd.f32 %v13544_v6, %v6980_v26  ;;  %v7144_v43 = vpop.f32.mrb[35].mxu0  ;;  %13894 = vmatmul.mubr.f32.gmra.mrb[14].mxu0 %v8424_v38  ;;  %v15249_v26 = vpack.c.bf16 %v10954_v30, %v10953_v3  ;;  %v8666_v6 = vld [vmem:[#allocation3 + $0xa1] sm:$0xff]  ;;  %v10955_v38 = vld [vmem:[%s18221_s3 + $0xb80] sm:$0xff] }
 0x4c1   : > { %v17974_v35 = vadd.f32 %v7144_v43, %v17923_v56  ;;  %13896 = vmatprep.mubr.f32.mxu0 %v8425_v61  ;;  %15220 = vmatpush3.bf16.msra.mxu0 %v15217_v49  ;;  %v10943_v56 = vld [vmem:[%s18221_s3 + $0xb20] sm:$0xff]  ;;  %v8906_v3 = vld [vmem:[#allocation3 + $0x82] sm:$0xff] }
 0x4c2   : > { %7188 = vst [vmem:[#allocation4 + $0x88] sm:$0xf] %v7170_v10  ;;  %15222 = vmatprep.subr.bf16.mxu0 %v15221_v21  ;;  %v15229_v62 = vpack.c.bf16 %v10944_v41, %v10943_v56  ;;  %v8663_v49 = vld [vmem:[#allocation3 + $0x89] sm:$0xff]  ;;  %v10956_v10 = vld [vmem:[%s18221_s3 + $0xb88] sm:$0xff]  ;;  %v8670_v41 = vld [vmem:[#allocation3 + $0xc1] sm:$0xf] }
 0x4c3   : > { %v8667_v43 = vld [vmem:[#allocation3 + $0xa9] sm:$0xff]  ;;  %v15253_v61 = vpack.c.bf16 %v10956_v10, %v10955_v38  ;;  %v8908_v38 = vld [vmem:[#allocation3 + $0x92] sm:$0xff]  ;;  %v10969_v10 = vld [vmem:[%s18221_s3 + $0xbf0] sm:$0xff] }
 0x4c4   : > { %13897 = vmatmul.mubr.f32.gmra.mrb[46].mxu0 %v8426_v4  ;;  %v10967_v30 = vld [vmem:[%s18221_s3 + $0xbe0] sm:$0xff] }
 0x4c5   : > { %13931 = vmatprep.mubr.f32.mxu0 %v8653_v54 }
 0x4c8   : > { %13932 = vmatmul.mubr.f32.vlgmr.msra.gmra.mrb[0].mxu0 %v8654_v19  ;;  %v8669_v19 = vld [vmem:[#allocation3 + $0xb9] sm:$0xff] }
 0x4c9   : > { %13934 = vmatprep.mubr.f32.mxu0 %v8655_v31  ;;  %15224 = vmatpush3.bf16.msra.mxu0 %v15221_v21  ;;  %v8665_v21 = vld [vmem:[#allocation3 + $0x99] sm:$0xff]  ;;  %v7224_v4 = vld [vmem:[#allocation4 + $0x88] sm:$0xf] }
 0x4ca   : > { %15226 = vmatprep.subr.bf16.mxu0 %v15225_v7  ;;  %v10957_v31 = vld [vmem:[%s18221_s3 + $0xb90] sm:$0xff] }
 0x4cc   : > { %13935 = vmatmul.mubr.f32.gmra.mrb[2].mxu0 %v8656_v23  ;;  %v8897_v23 = vld [vmem:[#allocation3 + $0x3a] sm:$0xff] }
 0x4cd   : > { %13937 = vmatprep.mubr.f32.mxu0 %v8657_v46  ;;  %15228 = vmatpush3.bf16.msra.mxu0 %v15225_v7  ;;  %v10960_v46 = vld [vmem:[%s18221_s3 + $0xba8] sm:$0xff] }
 0x4ce   : > { %15230 = vmatprep.subr.bf16.mxu0 %v15229_v62 }
 0x4d0   : > { %13938 = vmatmul.mubr.f32.gmra.mrb[4].mxu0 %v8658_v9 }
 0x4d1   : > { %13940 = vmatprep.mubr.f32.mxu0 %v8659_v11  ;;  %15232 = vmatpush3.bf16.msra.mxu0 %v15229_v62  ;;  %v10958_v62 = vld [vmem:[%s18221_s3 + $0xb98] sm:$0xff] }
 0x4d2   : > { %15234 = vmatprep.subr.bf16.mxu0 %v15233_v53  ;;  %v15257_v1 = vpack.c.bf16 %v10958_v62, %v10957_v31  ;;  %v10962_v11 = vld [vmem:[%s18221_s3 + $0xbb8] sm:$0xff]  ;;  %v8913_v62 = vld [vmem:[#allocation3 + $0xba] sm:$0xff] }
 0x4d4   : > { %13941 = vmatmul.mubr.f32.gmra.mrb[6].mxu0 %v8660_v52  ;;  %v15265_v52 = vpack.c.bf16 %v10962_v11, %v10961_v29  ;;  %v9148_v29 = vld [vmem:[#allocation3 + $0x73] sm:$0xff]  ;;  %v9150_v11 = vld [vmem:[#allocation3 + $0x83] sm:$0xff] }
 0x4d5   : > { %13943 = vmatprep.mubr.f32.mxu0 %v8661_v12  ;;  %15236 = vmatpush3.bf16.msra.mxu0 %v15233_v53  ;;  %v8899_v53 = vld [vmem:[#allocation3 + $0x4a] sm:$0xff]  ;;  %v10964_v12 = vld [vmem:[%s18221_s3 + $0xbc8] sm:$0xff] }
 0x4d6   : > { %15238 = vmatprep.subr.bf16.mxu0 %v15237_v15 }
 0x4d8   : > { %13944 = vmatmul.mubr.f32.gmra.mrb[8].mxu0 %v8662_v58  ;;  %v15269_v58 = vpack.c.bf16 %v10964_v12, %v10963_v37  ;;  %v9156_v37 = vld [vmem:[#allocation3 + $0xb3] sm:$0xff] }
 0x4d9   : > { %13946 = vmatprep.mubr.f32.mxu0 %v8663_v49  ;;  %15240 = vmatpush3.bf16.msra.mxu0 %v15237_v15  ;;  %v8901_v15 = vld [vmem:[#allocation3 + $0x5a] sm:$0xff]  ;;  %v10966_v49 = vld [vmem:[%s18221_s3 + $0xbd8] sm:$0xff] }
 0x4da   : > { %15242 = vmatprep.subr.bf16.mxu0 %v15241_v22 }
 0x4dc   : > { %13947 = vmatmul.mubr.f32.gmra.mrb[10].mxu0 %v8664_v44  ;;  %v15273_v44 = vpack.c.bf16 %v10966_v49, %v10965_v13  ;;  %v9385_v13 = vld [vmem:[#allocation3 + $0x3c] sm:$0xff]  ;;  %v9386_v49 = vld [vmem:[#allocation3 + $0x44] sm:$0xff] }
 0x4dd   : > { %13949 = vmatprep.mubr.f32.mxu0 %v8665_v21  ;;  %15244 = vmatpush3.bf16.msra.mxu0 %v15241_v22  ;;  %v8903_v22 = vld [vmem:[#allocation3 + $0x6a] sm:$0xff]  ;;  %v10968_v21 = vld [vmem:[%s18221_s3 + $0xbe8] sm:$0xff] }
 0x4de   : > { %15246 = vmatprep.subr.bf16.mxu0 %v15245_v34 }
 0x4e0   : > { %13950 = vmatmul.mubr.f32.gmra.mrb[12].mxu0 %v8666_v6  ;;  %v15277_v6 = vpack.c.bf16 %v10968_v21, %v10967_v30 }
 0x4e1   : > { %13952 = vmatprep.mubr.f32.mxu0 %v8667_v43  ;;  %15248 = vmatpush3.bf16.msra.mxu0 %v15245_v34  ;;  %v8905_v34 = vld [vmem:[#allocation3 + $0x7a] sm:$0xff]  ;;  %v10970_v43 = vld [vmem:[%s18221_s3 + $0xbf8] sm:$0xff] }
 0x4e2   : > { %15250 = vmatprep.subr.bf16.mxu0 %v15249_v26 }
 0x4e3   : > { %v13603_v2 = vpop.f32.mrb[36].mxu0 }
 0x4e4   : > { %v7414_v54 = vadd.f32 %v13603_v2, %v7224_v4  ;;  %v7388_v7 = vpop.f32.mrb[37].mxu0  ;;  %13953 = vmatmul.mubr.f32.gmra.mrb[14].mxu0 %v8668_v28  ;;  %v15281_v4 = vpack.c.bf16 %v10970_v43, %v10969_v10  ;;  %v8910_v2 = vld [vmem:[#allocation3 + $0xa2] sm:$0xff]  ;;  %v8911_v28 = vld [vmem:[#allocation3 + $0xaa] sm:$0xff] }
 0x4e5   : > { %v18025_v56 = vadd.f32 %v7388_v7, %v17974_v35  ;;  %13955 = vmatprep.mubr.f32.mxu0 %v8669_v19  ;;  %15252 = vmatpush3.bf16.msra.mxu0 %v15249_v26  ;;  %v10959_v35 = vld [vmem:[%s18221_s3 + $0xba0] sm:$0xff] }
 0x4e6   : > { %7432 = vst [vmem:[#allocation4 + $0x88] sm:$0xf] %v7414_v54  ;;  %15254 = vmatprep.subr.bf16.mxu0 %v15253_v61  ;;  %v15261_v9 = vpack.c.bf16 %v10960_v46, %v10959_v35  ;;  %v8907_v26 = vld [vmem:[#allocation3 + $0x8a] sm:$0xff]  ;;  %v8912_v19 = vld [vmem:[#allocation3 + $0xb2] sm:$0xff] }
 0x4e7   : > { %v9142_v35 = vld [vmem:[#allocation3 + $0x43] sm:$0xff]  ;;  %v9143_v46 = vld [vmem:[#allocation3 + $0x4b] sm:$0xff] }
 0x4e8   : > { %13956 = vmatmul.mubr.f32.gmra.mrb[48].mxu0 %v8670_v41 }
 0x4e9   : > { %13990 = vmatprep.mubr.f32.mxu0 %v8897_v23 }
 0x4ec   : > { %13991 = vmatmul.mubr.f32.vlgmr.msra.gmra.mrb[0].mxu0 %v8898_v47  ;;  %v9141_v47 = vld [vmem:[#allocation3 + $0x3b] sm:$0xff] }
 0x4ed   : > { %13993 = vmatprep.mubr.f32.mxu0 %v8899_v53  ;;  %15256 = vmatpush3.bf16.msra.mxu0 %v15253_v61  ;;  %v8909_v61 = vld [vmem:[#allocation3 + $0x9a] sm:$0xff]  ;;  %v7468_v54 = vld [vmem:[#allocation4 + $0x88] sm:$0xf] }
 0x4ee   : > { %15258 = vmatprep.subr.bf16.mxu0 %v15257_v1  ;;  %v9144_v53 = vld [vmem:[#allocation3 + $0x53] sm:$0xff] }
 0x4f0   : > { %13994 = vmatmul.mubr.f32.gmra.mrb[2].mxu0 %v8900_v5  ;;  %v9147_v5 = vld [vmem:[#allocation3 + $0x6b] sm:$0xff] }
 0x4f1   : > { %13996 = vmatprep.mubr.f32.mxu0 %v8901_v15  ;;  %15260 = vmatpush3.bf16.msra.mxu0 %v15257_v1  ;;  %v8914_v1 = vld [vmem:[#allocation3 + $0xc2] sm:$0xf]  ;;  %v9152_v15 = vld [vmem:[#allocation3 + $0x93] sm:$0xff] }
 0x4f2   : > { %15262 = vmatprep.subr.bf16.mxu0 %v15261_v9 }
 0x4f4   : > { %13997 = vmatmul.mubr.f32.gmra.mrb[4].mxu0 %v8902_v59 }
 0x4f5   : > { %13999 = vmatprep.mubr.f32.mxu0 %v8903_v22  ;;  %15264 = vmatpush3.bf16.msra.mxu0 %v15261_v9  ;;  %v9146_v9 = vld [vmem:[#allocation3 + $0x63] sm:$0xff] }
 0x4f6   : > { %15266 = vmatprep.subr.bf16.mxu0 %v15265_v52 }
 0x4f8   : > { %14000 = vmatmul.mubr.f32.gmra.mrb[6].mxu0 %v8904_v14 }
 0x4f9   : > { %14002 = vmatprep.mubr.f32.mxu0 %v8905_v34  ;;  %15268 = vmatpush3.bf16.msra.mxu0 %v15265_v52  ;;  %v9154_v52 = vld [vmem:[#allocation3 + $0xa3] sm:$0xff]  ;;  %v9388_v34 = vld [vmem:[#allocation3 + $0x54] sm:$0xff] }
 0x4fa   : > { %15270 = vmatprep.subr.bf16.mxu0 %v15269_v58 }
 0x4fc   : > { %14003 = vmatmul.mubr.f32.gmra.mrb[8].mxu0 %v8906_v3 }
 0x4fd   : > { %14005 = vmatprep.mubr.f32.mxu0 %v8907_v26  ;;  %15272 = vmatpush3.bf16.msra.mxu0 %v15269_v58  ;;  %v9157_v58 = vld [vmem:[#allocation3 + $0xbb] sm:$0xff] }
 0x4fe   : > { %15274 = vmatprep.subr.bf16.mxu0 %v15273_v44 }
 0x500   : > { %14006 = vmatmul.mubr.f32.gmra.mrb[10].mxu0 %v8908_v38 }
 0x501   : > { %14008 = vmatprep.mubr.f32.mxu0 %v8909_v61  ;;  %15276 = vmatpush3.bf16.msra.mxu0 %v15273_v44 }
 0x502   : > { %15278 = vmatprep.subr.bf16.mxu0 %v15277_v6 }
 0x504   : > { %14009 = vmatmul.mubr.f32.gmra.mrb[12].mxu0 %v8910_v2  ;;  %v15892_v2 = vmov 0.0|0.0  }
 0x505   : > { %14011 = vmatprep.mubr.f32.mxu0 %v8911_v28  ;;  %15280 = vmatpush3.bf16.msra.mxu0 %v15277_v6 }
 0x506   : > { %15282 = vmatprep.subr.bf16.mxu0 %v15281_v4  ;;  %15317 = vmatprep.subr.bf16.mxu1 %v15892_v2 }
 0x507   : > { %v13662_v7 = vpop.f32.mrb[38].mxu0 }
 0x508   : > { %v7658_v41 = vadd.f32 %v13662_v7, %v7468_v54  ;;  %v7632_v31 = vpop.f32.mrb[39].mxu0  ;;  %14012 = vmatmul.mubr.f32.gmra.mrb[14].mxu0 %v8912_v19 }
 0x509   : > { %v7657_v23 = vadd.f32 %v7632_v31, %v18025_v56  ;;  %14014 = vmatprep.mubr.f32.mxu0 %v8913_v62  ;;  %15284 = vmatpush3.bf16.msra.mxu0 %v15281_v4  ;;  %v9145_v56 = vld [vmem:[#allocation3 + $0x5b] sm:$0xff]  ;;  %v18091_v31 = vld [vmem:[#allocation3 + $0xcc] sm:$0xff] }
 0x50a   : > { %7676 = vst [vmem:[#allocation4 + $0x88] sm:$0xf] %v7658_v41  ;;  %15286 = vmatprep.subr.bf16.mxu0 %v17105_v25  ;;  %14139 = vmatprep.mubr.msk.f32.mxu1 %vm15893_vm8, %v18091_v31 }
 0x50c   : > { %14015 = vmatmul.mubr.f32.gmra.mrb[50].mxu0 %v8914_v1 }
 0x50d   : > { %14049 = vmatprep.mubr.f32.mxu0 %v9141_v47 }
 0x510   : > { %14050 = vmatmul.mubr.f32.vlgmr.msra.gmra.mrb[0].mxu0 %v9142_v35 }
 0x511   : > { %14052 = vmatprep.mubr.f32.mxu0 %v9143_v46  ;;  %15288 = vmatpush3.bf16.msra.mxu0 %v17105_v25  ;;  %v9149_v25 = vld [vmem:[#allocation3 + $0x7b] sm:$0xff]  ;;  %v7712_v59 = vld [vmem:[#allocation4 + $0x88] sm:$0xf] }
 0x512   : > { %15290 = vmatprep.subr.bf16.mxu0 %v17130_v20 }
 0x514   : > { %14053 = vmatmul.mubr.f32.gmra.mrb[2].mxu0 %v9144_v53 }
 0x515   : > { %14055 = vmatprep.mubr.f32.mxu0 %v9145_v56  ;;  %15292 = vmatpush3.bf16.msra.mxu0 %v17130_v20  ;;  %v9151_v20 = vld [vmem:[#allocation3 + $0x8b] sm:$0xff] }
 0x516   : > { %15294 = vmatprep.subr.bf16.mxu0 %v17152_v39 }
 0x518   : > { %14056 = vmatmul.mubr.f32.gmra.mrb[4].mxu0 %v9146_v9 }
 0x519   : > { %14058 = vmatprep.mubr.f32.mxu0 %v9147_v5  ;;  %15296 = vmatpush3.bf16.msra.mxu0 %v17152_v39  ;;  %v9153_v39 = vld [vmem:[#allocation3 + $0x9b] sm:$0xff] }
 0x51a   : > { %15298 = vmatprep.subr.bf16.mxu0 %v17176_v36 }
 0x51c   : > { %14059 = vmatmul.mubr.f32.gmra.mrb[6].mxu0 %v9148_v29 }
 0x51d   : > { %14061 = vmatprep.mubr.f32.mxu0 %v9149_v25  ;;  %15300 = vmatpush3.bf16.msra.mxu0 %v17176_v36  ;;  %v9155_v36 = vld [vmem:[#allocation3 + $0xab] sm:$0xff] }
 0x51e   : > { %15302 = vmatprep.subr.bf16.mxu0 %v17192_v24  ;;  %v15401_v25 = vld [vmem:[#allocation4 + $0x28] sm:$0xff] }
 0x520   : > { %14062 = vmatmul.mubr.f32.gmra.mrb[8].mxu0 %v9150_v11 }
 0x521   : > { %14064 = vmatprep.mubr.f32.mxu0 %v9151_v20  ;;  %15304 = vmatpush3.bf16.msra.mxu0 %v17192_v24 }
 0x522   : > { %15306 = vmatprep.subr.bf16.mxu0 %v17215_v42 }
 0x524   : > { %14065 = vmatmul.mubr.f32.gmra.mrb[10].mxu0 %v9152_v15  ;;  %v15410_v15 = vld [vmem:[#allocation4 + $0x20] sm:$0xff] }
 0x525   : > { %14067 = vmatprep.mubr.f32.mxu0 %v9153_v39  ;;  %15308 = vmatpush3.bf16.msra.mxu0 %v17215_v42  ;;  %v9158_v42 = vld [vmem:[#allocation3 + $0xc3] sm:$0xf] }
 0x526   : > { %15310 = vmatprep.subr.bf16.mxu0 %v17239_v8 }
 0x528   : > { %14068 = vmatmul.mubr.f32.gmra.mrb[12].mxu0 %v9154_v52 }
 0x529   : > { %14070 = vmatprep.mubr.f32.mxu0 %v9155_v36  ;;  %15312 = vmatpush3.bf16.msra.mxu0 %v17239_v8  ;;  %v9387_v8 = vld [vmem:[#allocation3 + $0x4c] sm:$0xff] }
 0x52a   : > { %15314 = vmatprep.subr.bf16.mxu0 %v17260_v27 }
 0x52b   : > { %v13721_v24 = vpop.f32.mrb[40].mxu0 }
 0x52c   : > { %v7902_v12 = vadd.f32 %v13721_v24, %v7712_v59  ;;  %v7876_v22 = vpop.f32.mrb[41].mxu0  ;;  %14071 = vmatmul.mubr.f32.gmra.mrb[14].mxu0 %v9156_v37  ;;  %v15419_v24 = vld [vmem:[#allocation4 + $0x38] sm:$0xff] }
 0x52d   : > { %v7901_v14 = vadd.f32 %v7876_v22, %v7657_v23  ;;  %14073 = vmatprep.mubr.f32.mxu0 %v9157_v58  ;;  %15316 = vmatpush3.bf16.msra.mxu0 %v17260_v27  ;;  %v15428_v22 = vld [vmem:[#allocation4 + $0x30] sm:$0xff] }
 0x52e   : > { %7920 = vst [vmem:[#allocation4 + $0x88] sm:$0xf] %v7902_v12 }
 0x530   : > { %14074 = vmatmul.mubr.f32.gmra.mrb[52].mxu0 %v9158_v42 }
 0x531   : > { %14108 = vmatprep.mubr.f32.mxu0 %v9385_v13 }
 0x534   : > { %14109 = vmatmul.mubr.f32.vlgmr.msra.gmra.mrb[0].mxu0 %v9386_v49  ;;  %v15437_v49 = vld [vmem:[#allocation4 + $0x48] sm:$0xff] }
 0x535   : > { %14111 = vmatprep.mubr.f32.mxu0 %v9387_v8  ;;  %v7956_v44 = vld [vmem:[#allocation4 + $0x88] sm:$0xf] }
 0x538   : > { %14112 = vmatmul.mubr.f32.gmra.mrb[2].mxu0 %v9388_v34 }
 0x54f   : > { %v13780_v3 = vpop.f32.mrb[42].mxu0 }
 0x550   : > { %v8146_v30 = vadd.f32 %v13780_v3, %v7956_v44  ;;  %v8120_v21 = vpop.f32.mrb[43].mxu0 }
 0x551   : > { %v8145_v26 = vadd.f32 %v8120_v21, %v7901_v14  ;;  %v15455_v21 = vld [vmem:[#allocation4 + $0x58] sm:$0xff] }
 0x552   : > { %8164 = vst [vmem:[#allocation4 + $0x88] sm:$0xf] %v8146_v30 }
 0x559   : > { %v8200_v6 = vld [vmem:[#allocation4 + $0x88] sm:$0xf] }
 0x571   : > { %v18086_v61 = vpop.f32.mrb[192].mxu1 }
 0x572   : > { %v18088_v4 = vpop.f32.mrb[193].mxu1 }
 0x573   : > { %v13839_v38 = vpop.f32.mrb[44].mxu0 }
 0x574   : > { %v8390_v27 = vadd.f32 %v13839_v38, %v8200_v6  ;;  %v8364_v10 = vpop.f32.mrb[45].mxu0  ;;  %v15464_v6 = vld [vmem:[#allocation4 + $0x50] sm:$0xff] }
 0x575   : > { %v8389_v43 = vadd.f32 %v8364_v10, %v8145_v26 }
 0x576   : > { %8408 = vst [vmem:[#allocation4 + $0x88] sm:$0xf] %v8390_v27 }
 0x57d   : > { %v8444_v28 = vld [vmem:[#allocation4 + $0x88] sm:$0xf] }
 0x597   : > { %v13898_v54 = vpop.f32.mrb[46].mxu0 }
 0x598   : > { %v8634_v7 = vadd.f32 %v13898_v54, %v8444_v28  ;;  %v8608_v19 = vpop.f32.mrb[47].mxu0 }
 0x599   : > { %v8633_v41 = vadd.f32 %v8608_v19, %v8389_v43  ;;  %v15473_v43 = vld [vmem:[#allocation4 + $0x68] sm:$0xff] }
 0x59a   : > { %8652 = vst [vmem:[#allocation4 + $0x88] sm:$0xf] %v8634_v7 }
 0x5a1   : > { %v8688_v62 = vld [vmem:[#allocation4 + $0x88] sm:$0xf] }
 0x5bb   : > { %v13957_v23 = vpop.f32.mrb[48].mxu0 }
 0x5bc   : > { %v8878_v1 = vadd.f32 %v13957_v23, %v8688_v62  ;;  %v8852_v47 = vpop.f32.mrb[49].mxu0  ;;  %v15491_v62 = vld [vmem:[#allocation4 + $0x78] sm:$0xff] }
 0x5bd   : > { %v8877_v35 = vadd.f32 %v8852_v47, %v8633_v41 }
 0x5be   : > { %8896 = vst [vmem:[#allocation4 + $0x88] sm:$0xf] %v8878_v1 }
 0x5c5   : > { %v8932_v46 = vld [vmem:[#allocation4 + $0x88] sm:$0xf] }
 0x5df   : > { %v14016_v53 = vpop.f32.mrb[50].mxu0 }
 0x5e0   : > { %v9122_v56 = vadd.f32 %v14016_v53, %v8932_v46  ;;  %v9096_v9 = vpop.f32.mrb[51].mxu0 }
 0x5e1   : > { %v18095_v5 = vadd.f32 %v9096_v9, %v8877_v35 }
 0x5e2   : > { %9140 = vst [vmem:[#allocation4 + $0x88] sm:$0xf] %v9122_v56 }
 0x5e9   : > { %v9176_v46 = vld [vmem:[#allocation4 + $0x88] sm:$0xf] }
 0x5eb   : > { %v14057_v29 = vpop.f32.mrb[4].mxu0 }
 0x5ec   : > { %v15402_v11 = vadd.f32 %v15401_v25, %v14057_v29  ;;  %v9280_v20 = vpop.f32.mrb[5].mxu0  ;;  %v15377_v29 = vld [vmem:[#allocation4 + $0x8] sm:$0xff] }
 0x5ed   : > { %v15411_v39 = vadd.f32 %v15410_v15, %v9280_v20 }
 0x5ee   : > { %v15405_v52 = vadd.f32 %v15402_v11, %v17666_v45 }
 0x5ef   : > { %v15414_v36 = vadd.f32 %v15411_v39, %v17675_v16  ;;  %v14060_v59 = vpop.f32.mrb[6].mxu0  ;;  %v15446_v16 = vld [vmem:[#allocation4 + $0x40] sm:$0xff]  ;;  %v15389_v39 = vld [vmem:[#allocation4 + $0x18] sm:$0xff] }
 0x5f0   : > { %9616 = vst [vmem:[#allocation4 + $0x28] sm:$0xff] %v15405_v52  ;;  %v15420_v37 = vadd.f32 %v15419_v24, %v14060_v59  ;;  %v9290_v12 = vpop.f32.mrb[7].mxu0  ;;  %v15395_v59 = vld [vmem:[#allocation4 + $0x10] sm:$0xff] }
 0x5f1   : > { %9615 = vst [vmem:[#allocation4 + $0x20] sm:$0xff] %v15414_v36  ;;  %v15429_v58 = vadd.f32 %v15428_v22, %v9290_v12 }
 0x5f2   : > { %v18100_v14 = vadd.f32 %v15420_v37, %v17678_v60 }
 0x5f3   : > { %v15432_v42 = vadd.f32 %v15429_v58, %v17687_v0  ;;  %v14063_v13 = vpop.f32.mrb[8].mxu0 }
 0x5f4   : > { %9618 = vst [vmem:[#allocation4 + $0x38] sm:$0xff] %v18100_v14  ;;  %v15438_v45 = vadd.f32 %v15437_v49, %v14063_v13  ;;  %v9300_v8 = vpop.f32.mrb[9].mxu0 }
 0x5f5   : > { %9617 = vst [vmem:[#allocation4 + $0x30] sm:$0xff] %v15432_v42  ;;  %v15447_v34 = vadd.f32 %v15446_v16, %v9300_v8 }
 0x5f6   : > { %v15441_v44 = vadd.f32 %v15438_v45, %v17691_v18  ;;  %v15482_v18 = vld [vmem:[#allocation4 + $0x60] sm:$0xff] }
 0x5f7   : > { %v15450_v3 = vadd.f32 %v15447_v34, %v17699_v48  ;;  %v14066_v30 = vpop.f32.mrb[10].mxu0 }
 0x5f8   : > { %9620 = vst [vmem:[#allocation4 + $0x48] sm:$0xff] %v15441_v44  ;;  %v15456_v60 = vadd.f32 %v15455_v21, %v14066_v30  ;;  %v9310_v26 = vpop.f32.mrb[11].mxu0  ;;  %v9796_v34 = vld [vmem:[#allocation4 + $0x24] sm:$0x3f] }
 0x5f9   : > { %9619 = vst [vmem:[#allocation4 + $0x40] sm:$0xff] %v15450_v3  ;;  %v15465_v0 = vadd.f32 %v15464_v6, %v9310_v26 }
 0x5fa   : > { %v15459_v38 = vadd.f32 %v15456_v60, %v17701_v50  ;;  %v15500_v50 = vld [vmem:[#allocation4 + $0x70] sm:$0xff] }
 0x5fb   : > { %v15468_v27 = vadd.f32 %v15465_v0, %v17705_v17  ;;  %v14069_v10 = vpop.f32.mrb[12].mxu0 }
 0x5fc   : > { %9622 = vst [vmem:[#allocation4 + $0x58] sm:$0xff] %v15459_v38  ;;  %v15474_v28 = vadd.f32 %v15473_v43, %v14069_v10  ;;  %v9320_v54 = vpop.f32.mrb[13].mxu0  ;;  %v9798_v8 = vld [vmem:[#allocation4 + $0x32] sm:$0x3f] }
 0x5fd   : > { %9621 = vst [vmem:[#allocation4 + $0x50] sm:$0xff] %v15468_v27  ;;  %v15483_v48 = vadd.f32 %v15482_v18, %v9320_v54  ;;  %v9800_v44 = vmax.f32 %v9796_v34, %v9798_v8 }
 0x5fe   : > { %v15477_v7 = vadd.f32 %v15474_v28, %v17715_v51 }
 0x5ff   : > { %v15486_v19 = vadd.f32 %v15483_v48, %v17718_v57  ;;  %v14072_v41 = vpop.f32.mrb[14].mxu0 }
 0x600   : > { %9624 = vst [vmem:[#allocation4 + $0x68] sm:$0xff] %v15477_v7  ;;  %v15492_v23 = vadd.f32 %v15491_v62, %v14072_v41  ;;  %v9330_v1 = vpop.f32.mrb[15].mxu0  ;;  %v9949_v21 = vld [vmem:[#allocation4 + $0x40] sm:$0x3f]  ;;  %v9950_v60 = vld [vmem:[#allocation4 + $0x46] sm:$0xff] }
 0x601   : > { %9623 = vst [vmem:[#allocation4 + $0x60] sm:$0xff] %v15486_v19  ;;  %v15501_v17 = vadd.f32 %v15500_v50, %v9330_v1  ;;  %v9952_v6 = vmax.f32 %v18100_v14, %v9950_v60  ;;  %v10991_v50 = vld [vmem:[%s18222_s4] ss:$0 sm:$0xff] }
 0x602   : > { %v15495_v47 = vadd.f32 %v15492_v23, %v17726_v40  ;;  %v15383_v40 = vld [vmem:[#allocation4] sm:$0xff] }
 0x603   : > { %v18112_v35 = vadd.f32 %v15501_v17, %v17728_v33  ;;  %v14075_v53 = vpop.f32.mrb[52].mxu0 }
 0x604   : > { %9626 = vst [vmem:[#allocation4 + $0x78] sm:$0xff] %v15495_v47  ;;  %v9366_v56 = vadd.f32 %v14075_v53, %v9176_v46  ;;  %v9340_v51 = vpop.f32.mrb[53].mxu0  ;;  %v9951_v30 = vld [vmem:[#allocation4 + $0x4e] sm:$0x3f]  ;;  %v10101_v43 = vld [vmem:[#allocation4 + $0x54] sm:$0xff] }
 0x605   : > { %9625 = vst [vmem:[#allocation4 + $0x70] sm:$0xff] %v18112_v35  ;;  %v9365_v57 = vadd.f32 %v9340_v51, %v18095_v5  ;;  %v9953_v26 = vmax.f32 %v9949_v21, %v9951_v30 }
 0x606   : > { %9384 = vst [vmem:[#allocation4 + $0x88] sm:$0xf] %v9366_v56 }
 0x607   : > { %v14110_v9 = vpop.f32.mrb[0].mxu0  ;;  %v9609_v25 = vadd.f32 %v18088_v4, %v9365_v57  ;;  %v15334_v0 = vpack.c.bf16 %v9953_v26, %v9952_v6  ;;  %v10104_v10 = vld [vmem:[#allocation4 + $0x6a] sm:$0x3f] }
 0x608   : > { %v15378_v11 = vadd.f32 %v15377_v29, %v14110_v9  ;;  %v9504_v20 = vpop.f32.mrb[1].mxu0  ;;  %v10102_v38 = vld [vmem:[#allocation4 + $0x5c] sm:$0x3f]  ;;  %v10103_v27 = vld [vmem:[#allocation4 + $0x62] sm:$0xff] }
 0x609   : > { %v15384_v15 = vadd.f32 %v15383_v40, %v9504_v20  ;;  %9627 = vst [vmem:[#allocation4 + $0x80] sm:$0xff] %v9609_v25  ;;  %v10105_v28 = vmax.f32 %v10101_v43, %v10103_v27  ;;  %v10106_v14 = vmax.f32 %v10102_v38, %v10104_v10 }
 0x60a   : > { %9612 = vst [vmem:[#allocation4 + $0x8] sm:$0xff] %v15378_v11 }
 0x60b   : > { %9611 = vst [vmem:[#allocation4] sm:$0xff] %v15384_v15  ;;  %v14113_v33 = vpop.f32.mrb[2].mxu0  ;;  %v15342_v54 = vpack.c.bf16 %v10106_v14, %v10105_v28  ;;  %v10255_v48 = vld [vmem:[#allocation4 + $0x78] sm:$0x3f] }
 0x60c   : > { %v15390_v52 = vadd.f32 %v15389_v39, %v14113_v33  ;;  %v9514_v36 = vpop.f32.mrb[3].mxu0  ;;  %v10411_v33 = vld [vmem:[%s18223_s5] sm:$0xff] }
 0x60d   : > { %v15396_v24 = vadd.f32 %v15395_v59, %v9514_v36  ;;  %v9420_v37 = vld [vmem:[#allocation4 + $0x88] sm:$0xf] }
 0x60e   : > { %9614 = vst [vmem:[#allocation4 + $0x18] sm:$0xff] %v15390_v52  ;;  %v9610_v5 = vadd.f32 %v18086_v61, %v9420_v37  ;;  %v9797_v61 = vld [vmem:[#allocation4 + $0x2a] sm:$0xff] }
 0x60f   : > { %9613 = vst [vmem:[#allocation4 + $0x10] sm:$0xff] %v15396_v24 }
 0x610   : > { %9628 = vst [vmem:[#allocation4 + $0x88] sm:$0xf] %v9610_v5  ;;  %v10256_v7 = vld [vmem:[#allocation4 + $0x7e] sm:$0xff] }
 0x611   : > { %v9631_v4 = vld [vmem:[#allocation4 + $0x8] sm:$0x3f]  ;;  %v10258_v41 = vmax.f32 %v18112_v35, %v10256_v7 }
 0x615   : > { %v9795_v45 = vld [vmem:[#allocation4 + $0x1c] sm:$0xff] }
 0x616   : > { %v9632_v12 = vld [vmem:[#allocation4 + $0xe] sm:$0xff]  ;;  %v9633_v22 = vld [vmem:[#allocation4 + $0x16] sm:$0x3f]  ;;  %v9799_v16 = vmax.f32 %v9795_v45, %v9797_v61 }
 0x617   : > { %v9634_v58 = vmax.f32 %v15384_v15, %v9632_v12  ;;  %v9635_v42 = vmax.f32 %v9631_v4, %v9633_v22  ;;  %v10257_v18 = vld [vmem:[#allocation4 + $0x86] sm:$0x3f]  ;;  %v10412_v61 = vld [vmem:[%s18223_s5 + $0x8] sm:$0xff] }
 0x618   : > { %v15326_v3 = vpack.c.bf16 %v9800_v44, %v9799_v16  ;;  %v10259_v19 = vmax.f32 %v10255_v48, %v10257_v18  ;;  %v10413_v44 = vld [vmem:[%s18223_s5 + $0x10] sm:$0xff] }
 0x619   : > { %v15318_v49 = vpack.c.bf16 %v9635_v42, %v9634_v58 }
 0x61a   : > { %v15350_v62 = vpack.c.bf16 %v10259_v19, %v10258_v41 }
 0x61b   : > { %15320 = vmatpush3.bf16.msk.msra.mxu1 %vm18119_vm10, %v15318_v49 }
 0x61c   : > { %15321 = vmatprep.subr.bf16.mxu1 %v15892_v2 }
 0x61e   : > { %14140 = vmatmul.mubr.msk.f32.vlgmr.msra.gmra.mrb[194].mxu1 %vm9636_vm11, %v16106_v63 }
 0x61f   : > { %15324 = vmatpush3.bf16.msk.msra.mxu1 %vm18119_vm10, %v15318_v49  ;;  %14146 = vmatprep.mubr.msk.f32.mxu1 %vm15893_vm8, %v18091_v31 }
 0x620   : > { %15325 = vmatprep.subr.bf16.mxu1 %v15892_v2 }
 0x622   : > { %14147 = vmatmul.mubr.msk.f32.vlgmr.msra.gmra.mrb[196].mxu1 %vm9636_vm11, %v16129_v32 }
 0x623   : > { %15328 = vmatpush3.bf16.msk.msra.mxu1 %vm18119_vm10, %v15326_v3  ;;  %14153 = vmatprep.mubr.msk.f32.mxu1 %vm15893_vm8, %v18091_v31 }
 0x624   : > { %15329 = vmatprep.subr.bf16.mxu1 %v15892_v2 }
 0x626   : > { %14154 = vmatmul.mubr.msk.f32.vlgmr.msra.gmra.mrb[198].mxu1 %vm9636_vm11, %v16106_v63 }
 0x627   : > { %15332 = vmatpush3.bf16.msk.msra.mxu1 %vm18119_vm10, %v15326_v3  ;;  %14160 = vmatprep.mubr.msk.f32.mxu1 %vm15893_vm8, %v18091_v31  ;;  %v10414_v3 = vld [vmem:[%s18223_s5 + $0x18] sm:$0x1] }
 0x628   : > { %15333 = vmatprep.subr.bf16.mxu1 %v15892_v2 }
 0x62a   : > { %14161 = vmatmul.mubr.msk.f32.vlgmr.msra.gmra.mrb[200].mxu1 %vm9636_vm11, %v16129_v32 }
 0x62b   : > { %15336 = vmatpush3.bf16.msk.msra.mxu1 %vm18119_vm10, %v15334_v0  ;;  %14167 = vmatprep.mubr.msk.f32.mxu1 %vm15893_vm8, %v18091_v31 }
 0x62c   : > { %15337 = vmatprep.subr.bf16.mxu1 %v15892_v2 }
 0x62e   : > { %14168 = vmatmul.mubr.msk.f32.vlgmr.msra.gmra.mrb[202].mxu1 %vm9636_vm11, %v16106_v63 }
 0x62f   : > { %15340 = vmatpush3.bf16.msk.msra.mxu1 %vm18119_vm10, %v15334_v0  ;;  %14174 = vmatprep.mubr.msk.f32.mxu1 %vm15893_vm8, %v18091_v31 }
 0x630   : > { %15341 = vmatprep.subr.bf16.mxu1 %v15892_v2 }
 0x632   : > { %14175 = vmatmul.mubr.msk.f32.vlgmr.msra.gmra.mrb[204].mxu1 %vm9636_vm11, %v16129_v32 }
 0x633   : > { %15344 = vmatpush3.bf16.msk.msra.mxu1 %vm18119_vm10, %v15342_v54  ;;  %14181 = vmatprep.mubr.msk.f32.mxu1 %vm15893_vm8, %v18091_v31 }
 0x634   : > { %15345 = vmatprep.subr.bf16.mxu1 %v15892_v2 }
 0x636   : > { %14182 = vmatmul.mubr.msk.f32.vlgmr.msra.gmra.mrb[206].mxu1 %vm9636_vm11, %v16106_v63 }
 0x637   : > { %15348 = vmatpush3.bf16.msk.msra.mxu1 %vm18119_vm10, %v15342_v54  ;;  %14188 = vmatprep.mubr.msk.f32.mxu1 %vm15893_vm8, %v18091_v31 }
 0x638   : > { %15349 = vmatprep.subr.bf16.mxu1 %v15892_v2 }
 0x63a   : > { %14189 = vmatmul.mubr.msk.f32.vlgmr.msra.gmra.mrb[208].mxu1 %vm9636_vm11, %v16129_v32 }
 0x63b   : > { %15352 = vmatpush3.bf16.msk.msra.mxu1 %vm18119_vm10, %v15350_v62  ;;  %14195 = vmatprep.mubr.msk.f32.mxu1 %vm15893_vm8, %v18091_v31 }
 0x63c   : > { %15353 = vmatprep.subr.bf16.mxu1 %v15892_v2 }
 0x63e   : > { %14196 = vmatmul.mubr.msk.f32.vlgmr.msra.gmra.mrb[210].mxu1 %vm9636_vm11, %v16106_v63 }
 0x63f   : > { %15356 = vmatpush3.bf16.msk.msra.mxu1 %vm18119_vm10, %v15350_v62  ;;  %14202 = vmatprep.mubr.msk.f32.mxu1 %vm15893_vm8, %v18091_v31  ;;  %v10439_v62 = vld [vmem:[%s18224_s6] sm:$0x1] }
 0x642   : > { %14203 = vmatmul.mubr.msk.f32.vlgmr.msra.gmra.mrb[212].mxu1 %vm9636_vm11, %v16129_v32 }
 0x6f1   : > { %v9709_v23 = vpop.f32.mrb[194].mxu1 }
 0x6f2   : > { %v14141_v1 = vpop.f32.mrb[195].mxu1 }
 0x6f5   : > { %v9781_v17 = vpop.f32.mrb[196].mxu1 }
 0x6f6   : > { %v9785_v2 = vmax.f32 %v9709_v23, %v9781_v17  ;;  %v14148_v47 = vpop.f32.mrb[197].mxu1 }
 0x6f7   : > { %v10450_v47 = vsub.s32 0, %v16094_v55 }
 0x6f8   : > { %v9792_v35 = vadd.f32 %v10991_v50, %v9785_v2 }
 0x6f9   : > { %v9870_v63 = vpop.f32.mrb[198].mxu1 }
 0x6fa   : > { %v9793_v46 = vmax.f32 %v9792_v35, 0.0  ;;  %v14155_v53 = vpop.f32.mrb[199].mxu1 }
 0x6fc   : > { %9794 = vst [vmem:[#allocation5] sm:$0x1f] %v9793_v46 }
 0x6fd   : > { %v9940_v56 = vpop.f32.mrb[200].mxu1 }
 0x6fe   : > { %v9944_v51 = vmax.f32 %v9870_v63, %v9940_v56  ;;  %v14162_v31 = vpop.f32.mrb[201].mxu1 }
 0x700   : > { %v9945_v57 = vadd.f32 %v10991_v50, %v9944_v51 }
 0x701   : > { %v10023_v9 = vpop.f32.mrb[202].mxu1 }
 0x702   : > { %v9946_v32 = vmax.f32 %v9945_v57, 0.0  ;;  %v14169_v29 = vpop.f32.mrb[203].mxu1 }
 0x704   : > { %9947 = vst [vmem:[#allocation5 + $0x5] sm:$0x1f] %v9946_v32 }
 0x705   : > { %v10093_v25 = vpop.f32.mrb[204].mxu1 }
 0x706   : > { %v10097_v11 = vmax.f32 %v10023_v9, %v10093_v25  ;;  %v14176_v20 = vpop.f32.mrb[205].mxu1 }
 0x708   : > { %v10098_v40 = vadd.f32 %v10991_v50, %v10097_v11 }
 0x709   : > { %v10176_v15 = vpop.f32.mrb[206].mxu1 }
 0x70a   : > { %v10099_v39 = vmax.f32 %v10098_v40, 0.0  ;;  %v14183_v52 = vpop.f32.mrb[207].mxu1 }
 0x70b   : > { %v10407_v36 = vld [vmem:[#allocation5] sm:$0xff] }
 0x70c   : > { %10100 = vst [vmem:[#allocation5 + $0xa] sm:$0x1f] %v10099_v39  ;;  %v10415_v59 = vmul.f32 %v10411_v33, %v10407_v36 }
 0x70d   : > { %v10246_v24 = vpop.f32.mrb[208].mxu1 }
 0x70e   : > { %v10250_v37 = vmax.f32 %v10176_v15, %v10246_v24  ;;  %v14190_v5 = vpop.f32.mrb[209].mxu1  ;;  %10419 = vadd.xlane.f32.xlu0 %v10415_v59 }
 0x710   : > { %v10251_v4 = vadd.f32 %v10991_v50, %v10250_v37 }
 0x711   : > { %v10329_v12 = vpop.f32.mrb[210].mxu1 }
 0x712   : > { %v10252_v22 = vmax.f32 %v10251_v4, 0.0  ;;  %v14197_v58 = vpop.f32.mrb[211].mxu1 }
 0x714   : > { %10253 = vst [vmem:[#allocation5 + $0xf] sm:$0x1f] %v10252_v22 }
 0x715   : > { %v10399_v42 = vpop.f32.mrb[212].mxu1 }
 0x716   : > { %v10403_v13 = vmax.f32 %v10329_v12, %v10399_v42  ;;  %v14204_v49 = vpop.f32.mrb[213].mxu1 }
 0x718   : > { %v10404_v45 = vadd.f32 %v10991_v50, %v10403_v13 }
 0x71a   : > { %v10405_v8 = vmax.f32 %v10404_v45, 0.0 }
 0x71b   : > { %v10408_v16 = vld [vmem:[#allocation5 + $0x8] sm:$0xff] }
 0x71c   : > { %10406 = vst [vmem:[#allocation5 + $0x14] sm:$0x1f] %v10405_v8  ;;  %v10416_v34 = vmul.f32 %v10412_v61, %v10408_v16 }
 0x71e   : > { %10421 = vadd.xlane.f32.xlu0 %v10416_v34 }
 0x723   : > { %v10409_v30 = vld [vmem:[#allocation5 + $0x10] sm:$0xff]  ;;  %v10410_v21 = vld [vmem:[#allocation5 + $0x18] sm:$0x1] }
 0x724   : > { %v10417_v60 = vmul.f32 %v10413_v44, %v10409_v30  ;;  %v10418_v26 = vmul.f32 %v10414_v3, %v10410_v21 }
 0x726   : > { %10423 = vadd.xlane.f32.xlu1 %v10417_v60  ;;  %v10426_v6 = vsel %vm10425_vm12, %v10418_v26, 0.0 }
 0x72a   : > { %10427 = vadd.xlane.f32.xlu1 %v10426_v6 }
 0x79b   : > { %v10420_v0 = vpop.xlane.xlu0 %10419 }
 0x7ab   : > { %v10422_v38 = vpop.xlane.xlu0 %10421 }
 0x7ac   : > { %v10429_v10 = vadd.f32 %v10422_v38, %v10420_v0 }
 0x7b3   : > { %v10424_v27 = vpop.xlane.xlu1 %10423 }
 0x7b4   : > { %v10430_v43 = vadd.f32 %v10429_v10, %v10424_v27 }
 0x7b7   : > { %v10428_v28 = vpop.xlane.xlu1 %10427 }
 0x7b8   : > { %v10431_v14 = vsel %vm10425_vm12, %v10428_v28, 0.0 }
 0x7b9   : > { %v10432_v54 = vadd.f32 %v10431_v14, %v10430_v43 }
 0x7bb   : > { %v10433_v18 = vrot.slane %v10432_v54, 4 }
 0x7bd   : > { %v10434_v48 = vadd.f32 %v10433_v18, %v10432_v54 }
 0x7bf   : > { %v10435_v7 = vrot.slane %v10434_v48, 2 }
 0x7c1   : > { %v10436_v19 = vadd.f32 %v10435_v7, %v10434_v48 }
 0x7c3   : > { %v10437_v41 = vrot.slane %v10436_v19, 1 }
 0x7c5   : > { %v10438_v23 = vadd.f32 %v10437_v41, %v10436_v19 }
 0x7c7   : > { %v10440_v1 = vadd.f32 %v10439_v62, %v10438_v23 }
 0x7c9   : > { %v11008_v50 = vmul.f32 -1.442695, %v10440_v1 }
 0x7cb   : > { %15874 = vpow2.f32 %v11008_v50 }
 0x7d5   : > { %v15875_v17 = vpop.eup %15874 }
 0x7d6   : > { %v10444_v2 = vadd.f32 1.0, %v15875_v17 }
 0x7d8   : > { %15876 = vrcp.f32 %v10444_v2 }
 0x7e2   : > { %v15877_v35 = vpop.eup %15876 }
 0x7e3   : > { %v10451_v63 = vrot.slane %v15877_v35, %v10450_v47 }
 0x7e5   : > { %10453 = vst [vmem:[%s276_s18] sm:$0xff] %v10451_v63 }
 0x7e6 PF: > { %s17_s24 = sadd.s32 1, %s15888_s24  }
 0x7e7   : > { %p14_p4 = scmp.ge.s32.totalorder %s17_s24, 4  }
 0x7e9   :  { %16 = sbr.rel (!%p14_p4) target bundleno = 1 (0x1), region = 102 }

</bundles_post_ra>
